<compile_context>
chip_gen: v5e
topology: v5e:2x2
jax: 0.10.0
libtpu: 0.0.40
codegen_flags: <defaults>
</compile_context>

<pallas_src>
import jax
import jax.numpy as jnp
from jax.experimental import pallas as pl
from jax.experimental.pallas import tpu as pltpu

K = 5          # conv kernel size
PAD = 2        # 'same' padding
EPS = 1e-5     # BatchNorm eps
CHANNELS = (1, 16, 32, 64, 128, 256)
FC_OUT = 64


# --------------------------------------------------------------------------
# Fused kernel: whole SharedCNN forward for Bt batch elements per grid step
# --------------------------------------------------------------------------
def shared_cnn_kernel(x_ref,
                      w1_ref, s1_ref, w2_ref, s2_ref, w3_ref, s3_ref,
                      w4_ref, s4_ref, w5_ref, s5_ref, wfct_ref, bfc_ref,
                      out_ref, slab_ref):
    Bt, _, L = x_ref.shape
    Lp = L + 2 * PAD          # per-element segment width (activation + pads)
    W = Bt * Lp               # staging slab width
    Wo = W - 2 * PAD          # conv-output width (all elements + gap columns)

    # Zero ONLY the outermost pad columns once per step; interior
    # inter-element gap columns are re-zeroed by every masked store below.
    zcol = jnp.zeros((slab_ref.shape[0], PAD), slab_ref.dtype)
    slab_ref[:, 0:PAD] = zcol
    slab_ref[:, W - PAD:W] = zcol

    # Validity mask over conv-output columns (False on inter-element gaps).
    col = jax.lax.broadcasted_iota(jnp.int32, (1, Wo), 1)
    valid = (col % Lp) < L

    # ---- Layer 1 (Cin=1): padded input row built in registers, one small
    #      MXU matmul (16,5)@(5,Wo).  No slab staging for the raw input.
    zpad = jnp.zeros((1, PAD), jnp.float32)
    zgap = jnp.zeros((1, 2 * PAD), jnp.float32)
    parts = [zpad]
    for b in range(Bt):
        parts.append(x_ref[b])                                  # (1, L) f32
        if b + 1 < Bt:
            parts.append(zgap)
    parts.append(zpad)
    xrow = jnp.concatenate(parts, axis=-1)                      # (1, W) f32
    stack = jnp.concatenate([xrow[:, k:k + Wo] for k in range(K)],
                            axis=0).astype(jnp.bfloat16)        # (K, Wo)
    a = jnp.maximum(jnp.dot(w1_ref[...], stack,
                            preferred_element_type=jnp.float32)
                    + s1_ref[...], 0.0)                         # (16, Wo) f32

    # ---- Layers 2..5: bf16 slab staging + one MXU matmul per layer ---------
    for w_ref, s_ref in ((w2_ref, s2_ref), (w3_ref, s3_ref),
                         (w4_ref, s4_ref), (w5_ref, s5_ref)):
        cin = a.shape[0]
        # Masked bf16 store: zeros land on the inter-element gap columns so
        # they double as the next layer's 'same' padding.
        slab_ref[0:cin, PAD:PAD + Wo] = (
            jnp.where(valid, a, 0.0).astype(slab_ref.dtype))
        xw = slab_ref[0:cin, :]                                 # (cin, W) bf16
        stack = jnp.concatenate([xw[:, k:k + Wo] for k in range(K)], axis=0)
        a = jnp.maximum(jnp.dot(w_ref[...], stack,              # (cout, K*cin)
                                preferred_element_type=jnp.float32)
                        + s_ref[...], 0.0)                      # (cout, Wo)

    # ---- AdaptiveAvgPool1d(1) per element + Linear(256->64); Dropout=id ----
    pooled = jnp.concatenate(
        [jnp.mean(a[:, b * Lp:b * Lp + L], axis=1, keepdims=True)
         for b in range(Bt)], axis=1)                           # (256, Bt) f32
    out = jnp.dot(jnp.transpose(pooled), wfct_ref[...],
                  preferred_element_type=jnp.float32) + bfc_ref[...]
    out_ref[0] = out.astype(out_ref.dtype)                      # (Bt, 64)


# --------------------------------------------------------------------------
# Host-side one-time parameter prep: BN fold + tap-major weight layout + bf16
# --------------------------------------------------------------------------
def _fold_bn(w, b, gamma, beta, rmean, rvar):
    scale = gamma / jnp.sqrt(rvar + EPS)                # (Cout,)
    shift = beta + (b - rmean) * scale                  # (Cout,)
    return w * scale[:, None, None], shift


def prepare_params(conv_params, fc_params):
    prepped = []
    for p in conv_params:
        wf, s = _fold_bn(*p)
        cout, cin, _ = wf.shape
        # w_mat[co, k*cin + c] == w[co, c, k] * scale[co]  (matches tap stack)
        w_mat = jnp.transpose(wf, (0, 2, 1)).reshape(cout, K * cin)
        prepped += [w_mat.astype(jnp.bfloat16), s[:, None].astype(jnp.float32)]
    w_fc, b_fc = fc_params
    prepped += [jnp.transpose(w_fc).astype(jnp.float32),        # (256, 64)
                b_fc[None, :].astype(jnp.float32)]              # (1, 64)
    return tuple(prepped)


# --------------------------------------------------------------------------
# Wrapper: single pallas_call for the whole forward pass
# --------------------------------------------------------------------------
def shared_cnn_forward(x, prepped, block_batch=2):
    """x: (B, 1, L) f32, prepped = prepare_params(...) -> (B, 64) f32."""
    B, cin0, L = x.shape
    assert cin0 == 1
    Bt = block_batch if B % block_batch == 0 else 1
    G = B // Bt

    macs = (sum(K * CHANNELS[i] * CHANNELS[i + 1] for i in range(5)) * L
            + CHANNELS[-1] * FC_OUT)
    cost = pl.CostEstimate(
        flops=2 * macs * B,
        transcendentals=0,
        bytes_accessed=(int(x.size) * x.dtype.itemsize
                        + sum(int(p.size) * p.dtype.itemsize for p in prepped)
                        + B * FC_OUT * 4))

    in_specs = [pl.BlockSpec((Bt, 1, L), lambda g: (g, 0, 0))]
    in_specs += [pl.BlockSpec(p.shape, lambda g: (0, 0)) for p in prepped]
    out = pl.pallas_call(
        shared_cnn_kernel,
        out_shape=jax.ShapeDtypeStruct((G, Bt, FC_OUT), jnp.float32),
        grid=(G,),
        in_specs=in_specs,
        out_specs=pl.BlockSpec((1, Bt, FC_OUT), lambda g: (g, 0, 0)),
        scratch_shapes=[pltpu.VMEM((CHANNELS[-2], Bt * (L + 2 * PAD)),
                                   jnp.bfloat16)],
        compiler_params=pltpu.CompilerParams(
            dimension_semantics=("parallel",)),
        cost_estimate=cost,
    )(x, *prepped)
    return out.reshape(B, FC_OUT)


# --------------------------------------------------------------------------
# Deterministic synthetic parameters + pure-JAX reference
# --------------------------------------------------------------------------
def make_params(key):
    conv_params = []
    for i in range(5):
        cin, cout = CHANNELS[i], CHANNELS[i + 1]
        key, k1, k2, k3, k4, k5, k6 = jax.random.split(key, 7)
        w = jax.random.normal(k1, (cout, cin, K), jnp.float32) / jnp.sqrt(cin * K)
        b = 0.01 * jax.random.normal(k2, (cout,), jnp.float32)
        gamma = 1.0 + 0.1 * jax.random.normal(k3, (cout,), jnp.float32)
        beta = 0.1 * jax.random.normal(k4, (cout,), jnp.float32)
        rmean = 0.1 * jax.random.normal(k5, (cout,), jnp.float32)
        rvar = jnp.abs(jax.random.normal(k6, (cout,), jnp.float32)) + 0.5
        conv_params.append((w, b, gamma, beta, rmean, rvar))
    key, kf1, kf2 = jax.random.split(key, 3)
    w_fc = jax.random.normal(kf1, (FC_OUT, 256), jnp.float32) / 16.0
    b_fc = 0.01 * jax.random.normal(kf2, (FC_OUT,), jnp.float32)
    return conv_params, (w_fc, b_fc)


def reference_forward(x, conv_params, fc_params):
    a = x
    for (w, b, gamma, beta, rmean, rvar) in conv_params:
        y = jax.lax.conv_general_dilated(
            a, w, window_strides=(1,), padding=[(PAD, PAD)],
            dimension_numbers=("NCH", "OIH", "NCH"))
        y = y + b[None, :, None]
        y = (y - rmean[None, :, None]) * (
            gamma[None, :, None] / jnp.sqrt(rvar[None, :, None] + EPS)
        ) + beta[None, :, None]
        a = jnp.maximum(y, 0.0)
    pooled = jnp.mean(a, axis=-1)                      # (B, 256)
    w_fc, b_fc = fc_params
    return pooled @ w_fc.T + b_fc[None, :]


if __name__ == "__main__":
    key = jax.random.PRNGKey(0)
    key, kx, kp = jax.random.split(key, 3)
    B, L = 4, 128                                       # 2 elems/step, grid=(2,)
    x = jax.random.normal(kx, (B, 1, L), jnp.float32)   # (N, C=1, length)
    conv_params, fc_params = make_params(kp)

    prepped = prepare_params(conv_params, fc_params)    # one-time prep
    fwd = jax.jit(shared_cnn_forward)
    out = jax.block_until_ready(fwd(x, prepped))
    assert out.shape == (B, FC_OUT), out.shape

    # Validate against a pure-JAX f32 reference (bf16 MXU operands -> loose tol).
    ref = reference_forward(x, conv_params, fc_params)
    err = float(jnp.max(jnp.abs(out - ref)))
    scale = float(jnp.max(jnp.abs(ref))) + 1e-6
    assert err < 3e-2 * scale + 1e-3, f"error {err} vs scale {scale}"
    print("KERNEL_OK")
</pallas_src>

<mosaic_0001>
module attributes {stable_mosaic.version = 11 : i64} {
  func.func @shared_cnn_kernel(%arg0: i32, %arg1: memref<2x1x128xf32, #tpu.memory_space<vmem>>, %arg2: memref<16x5xbf16, #tpu.memory_space<vmem>>, %arg3: memref<16x1xf32, #tpu.memory_space<vmem>>, %arg4: memref<32x80xbf16, #tpu.memory_space<vmem>>, %arg5: memref<32x1xf32, #tpu.memory_space<vmem>>, %arg6: memref<64x160xbf16, #tpu.memory_space<vmem>>, %arg7: memref<64x1xf32, #tpu.memory_space<vmem>>, %arg8: memref<128x320xbf16, #tpu.memory_space<vmem>>, %arg9: memref<128x1xf32, #tpu.memory_space<vmem>>, %arg10: memref<256x640xbf16, #tpu.memory_space<vmem>>, %arg11: memref<256x1xf32, #tpu.memory_space<vmem>>, %arg12: memref<256x64xf32, #tpu.memory_space<vmem>>, %arg13: memref<1x64xf32, #tpu.memory_space<vmem>>, %arg14: memref<1x2x64xf32, #tpu.memory_space<vmem>>, %arg15: memref<128x264xbf16, #tpu.memory_space<vmem>>) attributes {dimension_semantics = [#tpu.dimension_semantics<parallel>], iteration_bounds = array<i64: 2>, scalar_prefetch = 0 : i64, scratch_operands = 1 : i64, tpu.core_type = #tpu.core_type<tc>, window_params = [{transform_indices = @transform_0, window_bounds = array<i64: 2, 1, 128>}, {pipeline_mode = #tpu.pipeline_mode<synchronous>, transform_indices = @transform_1, window_bounds = array<i64: 16, 5>}, {pipeline_mode = #tpu.pipeline_mode<synchronous>, transform_indices = @transform_2, window_bounds = array<i64: 16, 1>}, {pipeline_mode = #tpu.pipeline_mode<synchronous>, transform_indices = @transform_3, window_bounds = array<i64: 32, 80>}, {pipeline_mode = #tpu.pipeline_mode<synchronous>, transform_indices = @transform_4, window_bounds = array<i64: 32, 1>}, {pipeline_mode = #tpu.pipeline_mode<synchronous>, transform_indices = @transform_5, window_bounds = array<i64: 64, 160>}, {pipeline_mode = #tpu.pipeline_mode<synchronous>, transform_indices = @transform_6, window_bounds = array<i64: 64, 1>}, {pipeline_mode = #tpu.pipeline_mode<synchronous>, transform_indices = @transform_7, window_bounds = array<i64: 128, 320>}, {pipeline_mode = #tpu.pipeline_mode<synchronous>, transform_indices = @transform_8, window_bounds = array<i64: 128, 1>}, {pipeline_mode = #tpu.pipeline_mode<synchronous>, transform_indices = @transform_9, window_bounds = array<i64: 256, 640>}, {pipeline_mode = #tpu.pipeline_mode<synchronous>, transform_indices = @transform_10, window_bounds = array<i64: 256, 1>}, {pipeline_mode = #tpu.pipeline_mode<synchronous>, transform_indices = @transform_11, window_bounds = array<i64: 256, 64>}, {pipeline_mode = #tpu.pipeline_mode<synchronous>, transform_indices = @transform_12, window_bounds = array<i64: 1, 64>}, {transform_indices = @transform_13, window_bounds = array<i64: 1, 2, 64>}]} {
    %cst = arith.constant 0.000000e+00 : bf16
    %0 = vector.broadcast %cst : bf16 to vector<128x2xbf16>
    %c0 = arith.constant 0 : index
    %c0_0 = arith.constant 0 : index
    %1 = vector.load %arg15[%c0, %c0_0] : memref<128x264xbf16, #tpu.memory_space<vmem>>, vector<128x2xbf16>
    tpu.vector_store %arg15[%c0, %c0_0], %0 {strides = array<i32>} : memref<128x264xbf16, #tpu.memory_space<vmem>>, vector<128x2xbf16>,
    %c0_1 = arith.constant 0 : index
    %c262 = arith.constant 262 : index
    %2 = vector.load %arg15[%c0_1, %c262] : memref<128x264xbf16, #tpu.memory_space<vmem>>, vector<128x2xbf16>
    tpu.vector_store %arg15[%c0_1, %c262], %0 {strides = array<i32>} : memref<128x264xbf16, #tpu.memory_space<vmem>>, vector<128x2xbf16>,
    %3 = tpu.iota {dimensions = array<i32: 1>} : vector<1x260xi32>
    %c132_i32 = arith.constant 132 : i32
    %c0_i32 = arith.constant 0 : i32
    %4 = arith.cmpi eq, %c132_i32, %c0_i32 : i32
    %c1_i32 = arith.constant 1 : i32
    %5 = arith.select %4, %c1_i32, %c132_i32 : i32
    %6 = vector.broadcast %5 : i32 to vector<1x260xi32>
    %7 = arith.remsi %3, %6 : vector<1x260xi32>
    %c0_i32_2 = arith.constant 0 : i32
    %8 = vector.broadcast %c0_i32_2 : i32 to vector<1x260xi32>
    %9 = arith.cmpi ne, %7, %8 : vector<1x260xi32>
    %c0_i32_3 = arith.constant 0 : i32
    %10 = vector.broadcast %c0_i32_3 : i32 to vector<1x260xi32>
    %11 = arith.cmpi slt, %7, %10 : vector<1x260xi32>
    %c0_i32_4 = arith.constant 0 : i32
    %12 = arith.cmpi slt, %5, %c0_i32_4 : i32
    %13 = vector.broadcast %12 : i1 to vector<1x260xi1>
    %14 = vector.broadcast %13 : vector<1x260xi1> to vector<1x260xi1>
    %15 = arith.xori %11, %14 : vector<1x260xi1>
    %16 = arith.andi %15, %9 : vector<1x260xi1>
    %17 = vector.broadcast %5 : i32 to vector<1x260xi32>
    %18 = arith.addi %7, %17 : vector<1x260xi32>
    %19 = arith.select %16, %18, %7 : vector<1x260xi1>, vector<1x260xi32>
    %c128_i32 = arith.constant 128 : i32
    %20 = vector.broadcast %c128_i32 : i32 to vector<1x260xi32>
    %21 = arith.cmpi slt, %19, %20 : vector<1x260xi32>
    %cst_5 = arith.constant 0.000000e+00 : f32
    %22 = vector.broadcast %cst_5 : f32 to vector<1x2xf32>
    %cst_6 = arith.constant 0.000000e+00 : f32
    %23 = vector.broadcast %cst_6 : f32 to vector<1x4xf32>
    %c0_7 = arith.constant 0 : index
    %c0_8 = arith.constant 0 : index
    %c0_9 = arith.constant 0 : index
    %24 = vector.load %arg1[%c0_7, %c0_8, %c0_9] : memref<2x1x128xf32, #tpu.memory_space<vmem>>, vector<1x1x128xf32>
    %25 = vector.shape_cast %24 : vector<1x1x128xf32> to vector<1x128xf32>
    %c1 = arith.constant 1 : index
    %c0_10 = arith.constant 0 : index
    %c0_11 = arith.constant 0 : index
    %26 = vector.load %arg1[%c1, %c0_10, %c0_11] : memref<2x1x128xf32, #tpu.memory_space<vmem>>, vector<1x1x128xf32>
    %27 = vector.shape_cast %26 : vector<1x1x128xf32> to vector<1x128xf32>
    %28 = tpu.concatenate %22, %25, %23, %27, %22 in 1 : vector<1x2xf32>, vector<1x128xf32>, vector<1x4xf32>, vector<1x128xf32>, vector<1x2xf32> -> vector<1x264xf32>
    %29 = vector.extract_strided_slice %28 {offsets = [0, 0], sizes = [1, 260], strides = [1, 1]} : vector<1x264xf32> to vector<1x260xf32>
    %30 = vector.extract_strided_slice %28 {offsets = [0, 1], sizes = [1, 260], strides = [1, 1]} : vector<1x264xf32> to vector<1x260xf32>
    %31 = vector.extract_strided_slice %28 {offsets = [0, 2], sizes = [1, 260], strides = [1, 1]} : vector<1x264xf32> to vector<1x260xf32>
    %32 = vector.extract_strided_slice %28 {offsets = [0, 3], sizes = [1, 260], strides = [1, 1]} : vector<1x264xf32> to vector<1x260xf32>
    %33 = vector.extract_strided_slice %28 {offsets = [0, 4], sizes = [1, 260], strides = [1, 1]} : vector<1x264xf32> to vector<1x260xf32>
    %34 = tpu.concatenate %29, %30, %31, %32, %33 in 0 : vector<1x260xf32>, vector<1x260xf32>, vector<1x260xf32>, vector<1x260xf32>, vector<1x260xf32> -> vector<5x260xf32>
    %35 = arith.truncf %34 : vector<5x260xf32> to vector<5x260xbf16>
    %c0_12 = arith.constant 0 : index
    %c0_13 = arith.constant 0 : index
    %36 = vector.load %arg2[%c0_12, %c0_13] : memref<16x5xbf16, #tpu.memory_space<vmem>>, vector<16x5xbf16>
    %cst_14 = arith.constant dense<0.000000e+00> : vector<16x260xf32>
    %37 = tpu.matmul %36, %35, %cst_14 {dimension_numbers = #tpu.dot_dimension_numbers<[1], [0], [0], [1], [0, 0, 1, 1], [], []>} : vector<16x5xbf16>, vector<5x260xbf16>, vector<16x260xf32> -> vector<16x260xf32>
    %c0_15 = arith.constant 0 : index
    %c0_16 = arith.constant 0 : index
    %38 = vector.load %arg3[%c0_15, %c0_16] : memref<16x1xf32, #tpu.memory_space<vmem>>, vector<16x1xf32>
    %39 = vector.broadcast %38 : vector<16x1xf32> to vector<16x260xf32>
    %40 = arith.addf %37, %39 : vector<16x260xf32>
    %cst_17 = arith.constant 0.000000e+00 : f32
    %41 = vector.broadcast %cst_17 : f32 to vector<16x260xf32>
    %42 = arith.maximumf %40, %41 : vector<16x260xf32>
    %cst_18 = arith.constant 0.000000e+00 : f32
    %43 = vector.shape_cast %21 : vector<1x260xi1> to vector<1x260xi1>
    %44 = vector.broadcast %43 : vector<1x260xi1> to vector<16x260xi1>
    %45 = vector.broadcast %cst_18 : f32 to vector<16x260xf32>
    %46 = arith.select %44, %42, %45 : vector<16x260xi1>, vector<16x260xf32>
    %47 = arith.truncf %46 : vector<16x260xf32> to vector<16x260xbf16>
    %c0_19 = arith.constant 0 : index
    %c2 = arith.constant 2 : index
    %48 = vector.load %arg15[%c0_19, %c2] : memref<128x264xbf16, #tpu.memory_space<vmem>>, vector<16x260xbf16>
    tpu.vector_store %arg15[%c0_19, %c2], %47 {strides = array<i32>} : memref<128x264xbf16, #tpu.memory_space<vmem>>, vector<16x260xbf16>,
    %c0_20 = arith.constant 0 : index
    %c0_21 = arith.constant 0 : index
    %49 = vector.load %arg15[%c0_20, %c0_21] : memref<128x264xbf16, #tpu.memory_space<vmem>>, vector<16x264xbf16>
    %50 = vector.extract_strided_slice %49 {offsets = [0, 0], sizes = [16, 260], strides = [1, 1]} : vector<16x264xbf16> to vector<16x260xbf16>
    %51 = vector.extract_strided_slice %49 {offsets = [0, 1], sizes = [16, 260], strides = [1, 1]} : vector<16x264xbf16> to vector<16x260xbf16>
    %52 = vector.extract_strided_slice %49 {offsets = [0, 2], sizes = [16, 260], strides = [1, 1]} : vector<16x264xbf16> to vector<16x260xbf16>
    %53 = vector.extract_strided_slice %49 {offsets = [0, 3], sizes = [16, 260], strides = [1, 1]} : vector<16x264xbf16> to vector<16x260xbf16>
    %54 = vector.extract_strided_slice %49 {offsets = [0, 4], sizes = [16, 260], strides = [1, 1]} : vector<16x264xbf16> to vector<16x260xbf16>
    %55 = tpu.concatenate %50, %51, %52, %53, %54 in 0 : vector<16x260xbf16>, vector<16x260xbf16>, vector<16x260xbf16>, vector<16x260xbf16>, vector<16x260xbf16> -> vector<80x260xbf16>
    %c0_22 = arith.constant 0 : index
    %c0_23 = arith.constant 0 : index
    %56 = vector.load %arg4[%c0_22, %c0_23] : memref<32x80xbf16, #tpu.memory_space<vmem>>, vector<32x80xbf16>
    %cst_24 = arith.constant dense<0.000000e+00> : vector<32x260xf32>
    %57 = tpu.matmul %56, %55, %cst_24 {dimension_numbers = #tpu.dot_dimension_numbers<[1], [0], [0], [1], [0, 0, 1, 1], [], []>} : vector<32x80xbf16>, vector<80x260xbf16>, vector<32x260xf32> -> vector<32x260xf32>
    %c0_25 = arith.constant 0 : index
    %c0_26 = arith.constant 0 : index
    %58 = vector.load %arg5[%c0_25, %c0_26] : memref<32x1xf32, #tpu.memory_space<vmem>>, vector<32x1xf32>
    %59 = vector.broadcast %58 : vector<32x1xf32> to vector<32x260xf32>
    %60 = arith.addf %57, %59 : vector<32x260xf32>
    %cst_27 = arith.constant 0.000000e+00 : f32
    %61 = vector.broadcast %cst_27 : f32 to vector<32x260xf32>
    %62 = arith.maximumf %60, %61 : vector<32x260xf32>
    %cst_28 = arith.constant 0.000000e+00 : f32
    %63 = vector.shape_cast %21 : vector<1x260xi1> to vector<1x260xi1>
    %64 = vector.broadcast %63 : vector<1x260xi1> to vector<32x260xi1>
    %65 = vector.broadcast %cst_28 : f32 to vector<32x260xf32>
    %66 = arith.select %64, %62, %65 : vector<32x260xi1>, vector<32x260xf32>
    %67 = arith.truncf %66 : vector<32x260xf32> to vector<32x260xbf16>
    %c0_29 = arith.constant 0 : index
    %c2_30 = arith.constant 2 : index
    %68 = vector.load %arg15[%c0_29, %c2_30] : memref<128x264xbf16, #tpu.memory_space<vmem>>, vector<32x260xbf16>
    tpu.vector_store %arg15[%c0_29, %c2_30], %67 {strides = array<i32>} : memref<128x264xbf16, #tpu.memory_space<vmem>>, vector<32x260xbf16>,
    %c0_31 = arith.constant 0 : index
    %c0_32 = arith.constant 0 : index
    %69 = vector.load %arg15[%c0_31, %c0_32] : memref<128x264xbf16, #tpu.memory_space<vmem>>, vector<32x264xbf16>
    %70 = vector.extract_strided_slice %69 {offsets = [0, 0], sizes = [32, 260], strides = [1, 1]} : vector<32x264xbf16> to vector<32x260xbf16>
    %71 = vector.extract_strided_slice %69 {offsets = [0, 1], sizes = [32, 260], strides = [1, 1]} : vector<32x264xbf16> to vector<32x260xbf16>
    %72 = vector.extract_strided_slice %69 {offsets = [0, 2], sizes = [32, 260], strides = [1, 1]} : vector<32x264xbf16> to vector<32x260xbf16>
    %73 = vector.extract_strided_slice %69 {offsets = [0, 3], sizes = [32, 260], strides = [1, 1]} : vector<32x264xbf16> to vector<32x260xbf16>
    %74 = vector.extract_strided_slice %69 {offsets = [0, 4], sizes = [32, 260], strides = [1, 1]} : vector<32x264xbf16> to vector<32x260xbf16>
    %75 = tpu.concatenate %70, %71, %72, %73, %74 in 0 : vector<32x260xbf16>, vector<32x260xbf16>, vector<32x260xbf16>, vector<32x260xbf16>, vector<32x260xbf16> -> vector<160x260xbf16>
    %c0_33 = arith.constant 0 : index
    %c0_34 = arith.constant 0 : index
    %76 = vector.load %arg6[%c0_33, %c0_34] : memref<64x160xbf16, #tpu.memory_space<vmem>>, vector<64x160xbf16>
    %cst_35 = arith.constant dense<0.000000e+00> : vector<64x260xf32>
    %77 = tpu.matmul %76, %75, %cst_35 {dimension_numbers = #tpu.dot_dimension_numbers<[1], [0], [0], [1], [0, 0, 1, 1], [], []>} : vector<64x160xbf16>, vector<160x260xbf16>, vector<64x260xf32> -> vector<64x260xf32>
    %c0_36 = arith.constant 0 : index
    %c0_37 = arith.constant 0 : index
    %78 = vector.load %arg7[%c0_36, %c0_37] : memref<64x1xf32, #tpu.memory_space<vmem>>, vector<64x1xf32>
    %79 = vector.broadcast %78 : vector<64x1xf32> to vector<64x260xf32>
    %80 = arith.addf %77, %79 : vector<64x260xf32>
    %cst_38 = arith.constant 0.000000e+00 : f32
    %81 = vector.broadcast %cst_38 : f32 to vector<64x260xf32>
    %82 = arith.maximumf %80, %81 : vector<64x260xf32>
    %cst_39 = arith.constant 0.000000e+00 : f32
    %83 = vector.shape_cast %21 : vector<1x260xi1> to vector<1x260xi1>
    %84 = vector.broadcast %83 : vector<1x260xi1> to vector<64x260xi1>
    %85 = vector.broadcast %cst_39 : f32 to vector<64x260xf32>
    %86 = arith.select %84, %82, %85 : vector<64x260xi1>, vector<64x260xf32>
    %87 = arith.truncf %86 : vector<64x260xf32> to vector<64x260xbf16>
    %c0_40 = arith.constant 0 : index
    %c2_41 = arith.constant 2 : index
    %88 = vector.load %arg15[%c0_40, %c2_41] : memref<128x264xbf16, #tpu.memory_space<vmem>>, vector<64x260xbf16>
    tpu.vector_store %arg15[%c0_40, %c2_41], %87 {strides = array<i32>} : memref<128x264xbf16, #tpu.memory_space<vmem>>, vector<64x260xbf16>,
    %c0_42 = arith.constant 0 : index
    %c0_43 = arith.constant 0 : index
    %89 = vector.load %arg15[%c0_42, %c0_43] : memref<128x264xbf16, #tpu.memory_space<vmem>>, vector<64x264xbf16>
    %90 = vector.extract_strided_slice %89 {offsets = [0, 0], sizes = [64, 260], strides = [1, 1]} : vector<64x264xbf16> to vector<64x260xbf16>
    %91 = vector.extract_strided_slice %89 {offsets = [0, 1], sizes = [64, 260], strides = [1, 1]} : vector<64x264xbf16> to vector<64x260xbf16>
    %92 = vector.extract_strided_slice %89 {offsets = [0, 2], sizes = [64, 260], strides = [1, 1]} : vector<64x264xbf16> to vector<64x260xbf16>
    %93 = vector.extract_strided_slice %89 {offsets = [0, 3], sizes = [64, 260], strides = [1, 1]} : vector<64x264xbf16> to vector<64x260xbf16>
    %94 = vector.extract_strided_slice %89 {offsets = [0, 4], sizes = [64, 260], strides = [1, 1]} : vector<64x264xbf16> to vector<64x260xbf16>
    %95 = tpu.concatenate %90, %91, %92, %93, %94 in 0 : vector<64x260xbf16>, vector<64x260xbf16>, vector<64x260xbf16>, vector<64x260xbf16>, vector<64x260xbf16> -> vector<320x260xbf16>
    %c0_44 = arith.constant 0 : index
    %c0_45 = arith.constant 0 : index
    %96 = vector.load %arg8[%c0_44, %c0_45] : memref<128x320xbf16, #tpu.memory_space<vmem>>, vector<128x320xbf16>
    %cst_46 = arith.constant dense<0.000000e+00> : vector<128x260xf32>
    %97 = tpu.matmul %96, %95, %cst_46 {dimension_numbers = #tpu.dot_dimension_numbers<[1], [0], [0], [1], [0, 0, 1, 1], [], []>} : vector<128x320xbf16>, vector<320x260xbf16>, vector<128x260xf32> -> vector<128x260xf32>
    %c0_47 = arith.constant 0 : index
    %c0_48 = arith.constant 0 : index
    %98 = vector.load %arg9[%c0_47, %c0_48] : memref<128x1xf32, #tpu.memory_space<vmem>>, vector<128x1xf32>
    %99 = vector.broadcast %98 : vector<128x1xf32> to vector<128x260xf32>
    %100 = arith.addf %97, %99 : vector<128x260xf32>
    %cst_49 = arith.constant 0.000000e+00 : f32
    %101 = vector.broadcast %cst_49 : f32 to vector<128x260xf32>
    %102 = arith.maximumf %100, %101 : vector<128x260xf32>
    %cst_50 = arith.constant 0.000000e+00 : f32
    %103 = vector.shape_cast %21 : vector<1x260xi1> to vector<1x260xi1>
    %104 = vector.broadcast %103 : vector<1x260xi1> to vector<128x260xi1>
    %105 = vector.broadcast %cst_50 : f32 to vector<128x260xf32>
    %106 = arith.select %104, %102, %105 : vector<128x260xi1>, vector<128x260xf32>
    %107 = arith.truncf %106 : vector<128x260xf32> to vector<128x260xbf16>
    %c0_51 = arith.constant 0 : index
    %c2_52 = arith.constant 2 : index
    %108 = vector.load %arg15[%c0_51, %c2_52] : memref<128x264xbf16, #tpu.memory_space<vmem>>, vector<128x260xbf16>
    tpu.vector_store %arg15[%c0_51, %c2_52], %107 {strides = array<i32>} : memref<128x264xbf16, #tpu.memory_space<vmem>>, vector<128x260xbf16>,
    %c0_53 = arith.constant 0 : index
    %c0_54 = arith.constant 0 : index
    %109 = vector.load %arg15[%c0_53, %c0_54] : memref<128x264xbf16, #tpu.memory_space<vmem>>, vector<128x264xbf16>
    %110 = vector.extract_strided_slice %109 {offsets = [0, 0], sizes = [128, 260], strides = [1, 1]} : vector<128x264xbf16> to vector<128x260xbf16>
    %111 = vector.extract_strided_slice %109 {offsets = [0, 1], sizes = [128, 260], strides = [1, 1]} : vector<128x264xbf16> to vector<128x260xbf16>
    %112 = vector.extract_strided_slice %109 {offsets = [0, 2], sizes = [128, 260], strides = [1, 1]} : vector<128x264xbf16> to vector<128x260xbf16>
    %113 = vector.extract_strided_slice %109 {offsets = [0, 3], sizes = [128, 260], strides = [1, 1]} : vector<128x264xbf16> to vector<128x260xbf16>
    %114 = vector.extract_strided_slice %109 {offsets = [0, 4], sizes = [128, 260], strides = [1, 1]} : vector<128x264xbf16> to vector<128x260xbf16>
    %115 = tpu.concatenate %110, %111, %112, %113, %114 in 0 : vector<128x260xbf16>, vector<128x260xbf16>, vector<128x260xbf16>, vector<128x260xbf16>, vector<128x260xbf16> -> vector<640x260xbf16>
    %c0_55 = arith.constant 0 : index
    %c0_56 = arith.constant 0 : index
    %116 = vector.load %arg10[%c0_55, %c0_56] : memref<256x640xbf16, #tpu.memory_space<vmem>>, vector<256x640xbf16>
    %cst_57 = arith.constant dense<0.000000e+00> : vector<256x260xf32>
    %117 = tpu.matmul %116, %115, %cst_57 {dimension_numbers = #tpu.dot_dimension_numbers<[1], [0], [0], [1], [0, 0, 1, 1], [], []>} : vector<256x640xbf16>, vector<640x260xbf16>, vector<256x260xf32> -> vector<256x260xf32>
    %c0_58 = arith.constant 0 : index
    %c0_59 = arith.constant 0 : index
    %118 = vector.load %arg11[%c0_58, %c0_59] : memref<256x1xf32, #tpu.memory_space<vmem>>, vector<256x1xf32>
    %119 = vector.broadcast %118 : vector<256x1xf32> to vector<256x260xf32>
    %120 = arith.addf %117, %119 : vector<256x260xf32>
    %cst_60 = arith.constant 0.000000e+00 : f32
    %121 = vector.broadcast %cst_60 : f32 to vector<256x260xf32>
    %122 = arith.maximumf %120, %121 : vector<256x260xf32>
    %123 = vector.extract_strided_slice %122 {offsets = [0, 0], sizes = [256, 128], strides = [1, 1]} : vector<256x260xf32> to vector<256x128xf32>
    %cst_61 = arith.constant dense<0.000000e+00> : vector<256xf32>
    %124 = vector.multi_reduction <add>, %123, %cst_61 [1] : vector<256x128xf32> to vector<256xf32>
    %125 = vector.shape_cast %124 : vector<256xf32> to vector<256x1xf32>
    %cst_62 = arith.constant 1.280000e+02 : f32
    %126 = vector.broadcast %cst_62 : f32 to vector<256x1xf32>
    %127 = arith.divf %125, %126 : vector<256x1xf32>
    %128 = vector.extract_strided_slice %122 {offsets = [0, 132], sizes = [256, 128], strides = [1, 1]} : vector<256x260xf32> to vector<256x128xf32>
    %cst_63 = arith.constant dense<0.000000e+00> : vector<256xf32>
    %129 = vector.multi_reduction <add>, %128, %cst_63 [1] : vector<256x128xf32> to vector<256xf32>
    %130 = vector.shape_cast %129 : vector<256xf32> to vector<256x1xf32>
    %cst_64 = arith.constant 1.280000e+02 : f32
    %131 = vector.broadcast %cst_64 : f32 to vector<256x1xf32>
    %132 = arith.divf %130, %131 : vector<256x1xf32>
    %133 = tpu.concatenate %127, %132 in 1 : vector<256x1xf32>, vector<256x1xf32> -> vector<256x2xf32>
    %134 = tpu.transpose %133, [1, 0] : vector<256x2xf32> -> vector<2x256xf32>
    %c0_65 = arith.constant 0 : index
    %c0_66 = arith.constant 0 : index
    %135 = vector.load %arg12[%c0_65, %c0_66] : memref<256x64xf32, #tpu.memory_space<vmem>>, vector<256x64xf32>
    %cst_67 = arith.constant dense<0.000000e+00> : vector<2x64xf32>
    %136 = tpu.matmul %134, %135, %cst_67 {dimension_numbers = #tpu.dot_dimension_numbers<[1], [0], [0], [1], [0, 0, 1, 1], [], []>} : vector<2x256xf32>, vector<256x64xf32>, vector<2x64xf32> -> vector<2x64xf32>
    %c0_68 = arith.constant 0 : index
    %c0_69 = arith.constant 0 : index
    %137 = vector.load %arg13[%c0_68, %c0_69] : memref<1x64xf32, #tpu.memory_space<vmem>>, vector<1x64xf32>
    %138 = vector.broadcast %137 : vector<1x64xf32> to vector<2x64xf32>
    %139 = arith.addf %136, %138 : vector<2x64xf32>
    %c0_70 = arith.constant 0 : index
    %c0_71 = arith.constant 0 : index
    %c0_72 = arith.constant 0 : index
    %140 = vector.load %arg14[%c0_70, %c0_71, %c0_72] : memref<1x2x64xf32, #tpu.memory_space<vmem>>, vector<1x2x64xf32>
    %141 = vector.shape_cast %140 : vector<1x2x64xf32> to vector<2x64xf32>
    %142 = vector.shape_cast %139 : vector<2x64xf32> to vector<1x2x64xf32>
    tpu.vector_store %arg14[%c0_70, %c0_71, %c0_72], %142 {strides = array<i32>} : memref<1x2x64xf32, #tpu.memory_space<vmem>>, vector<1x2x64xf32>,
    return
  }
  func.func @transform_0(%arg0: i32) -> (i32, i32, i32) {
    %c0_i32 = arith.constant 0 : i32
    %c0_i32_0 = arith.constant 0 : i32
    %c0_i32_1 = arith.constant 0 : i32
    return %arg0, %c0_i32, %c0_i32_0 : i32, i32, i32
  }
  func.func @transform_1(%arg0: i32) -> (i32, i32) {
    %c0_i32 = arith.constant 0 : i32
    %c0_i32_0 = arith.constant 0 : i32
    %c0_i32_1 = arith.constant 0 : i32
    return %c0_i32, %c0_i32_0 : i32, i32
  }
  func.func @transform_2(%arg0: i32) -> (i32, i32) {
    %c0_i32 = arith.constant 0 : i32
    %c0_i32_0 = arith.constant 0 : i32
    %c0_i32_1 = arith.constant 0 : i32
    return %c0_i32, %c0_i32_0 : i32, i32
  }
  func.func @transform_3(%arg0: i32) -> (i32, i32) {
    %c0_i32 = arith.constant 0 : i32
    %c0_i32_0 = arith.constant 0 : i32
    %c0_i32_1 = arith.constant 0 : i32
    return %c0_i32, %c0_i32_0 : i32, i32
  }
  func.func @transform_4(%arg0: i32) -> (i32, i32) {
    %c0_i32 = arith.constant 0 : i32
    %c0_i32_0 = arith.constant 0 : i32
    %c0_i32_1 = arith.constant 0 : i32
    return %c0_i32, %c0_i32_0 : i32, i32
  }
  func.func @transform_5(%arg0: i32) -> (i32, i32) {
    %c0_i32 = arith.constant 0 : i32
    %c0_i32_0 = arith.constant 0 : i32
    %c0_i32_1 = arith.constant 0 : i32
    return %c0_i32, %c0_i32_0 : i32, i32
  }
  func.func @transform_6(%arg0: i32) -> (i32, i32) {
    %c0_i32 = arith.constant 0 : i32
    %c0_i32_0 = arith.constant 0 : i32
    %c0_i32_1 = arith.constant 0 : i32
    return %c0_i32, %c0_i32_0 : i32, i32
  }
  func.func @transform_7(%arg0: i32) -> (i32, i32) {
    %c0_i32 = arith.constant 0 : i32
    %c0_i32_0 = arith.constant 0 : i32
    %c0_i32_1 = arith.constant 0 : i32
    return %c0_i32, %c0_i32_0 : i32, i32
  }
  func.func @transform_8(%arg0: i32) -> (i32, i32) {
    %c0_i32 = arith.constant 0 : i32
    %c0_i32_0 = arith.constant 0 : i32
    %c0_i32_1 = arith.constant 0 : i32
    return %c0_i32, %c0_i32_0 : i32, i32
  }
  func.func @transform_9(%arg0: i32) -> (i32, i32) {
    %c0_i32 = arith.constant 0 : i32
    %c0_i32_0 = arith.constant 0 : i32
    %c0_i32_1 = arith.constant 0 : i32
    return %c0_i32, %c0_i32_0 : i32, i32
  }
  func.func @transform_10(%arg0: i32) -> (i32, i32) {
    %c0_i32 = arith.constant 0 : i32
    %c0_i32_0 = arith.constant 0 : i32
    %c0_i32_1 = arith.constant 0 : i32
    return %c0_i32, %c0_i32_0 : i32, i32
  }
  func.func @transform_11(%arg0: i32) -> (i32, i32) {
    %c0_i32 = arith.constant 0 : i32
    %c0_i32_0 = arith.constant 0 : i32
    %c0_i32_1 = arith.constant 0 : i32
    return %c0_i32, %c0_i32_0 : i32, i32
  }
  func.func @transform_12(%arg0: i32) -> (i32, i32) {
    %c0_i32 = arith.constant 0 : i32
    %c0_i32_0 = arith.constant 0 : i32
    %c0_i32_1 = arith.constant 0 : i32
    return %c0_i32, %c0_i32_0 : i32, i32
  }
  func.func @transform_13(%arg0: i32) -> (i32, i32, i32) {
    %c0_i32 = arith.constant 0 : i32
    %c0_i32_0 = arith.constant 0 : i32
    %c0_i32_1 = arith.constant 0 : i32
    return %arg0, %c0_i32, %c0_i32_0 : i32, i32, i32
  }
}

</mosaic_0001>

<bundles_post_ra>
// kernel: shared_cnn_forward.1
= control target key start
LH: loop header
LB: loop body
LE: loop exit
PB: predicated region body
PF: predicated region fallthrough
CT: control target
= control target key end

     0   :  { %s12172_s0 = inlined_call_operand.vmem [shape: f32[4,1,128], index: 0, kind: input, shape index: {}]   ;;  %s12173_s1 = inlined_call_operand.vmem [shape: bf16[16,5], index: 1, kind: input, shape index: {}]   ;;  %s12174_s2 = inlined_call_operand.vmem [shape: f32[16,1], index: 2, kind: input, shape index: {}]   ;;  %s12175_s3 = inlined_call_operand.vmem [shape: bf16[32,80], index: 3, kind: input, shape index: {}]   ;;  %s12176_s4 = inlined_call_operand.vmem [shape: f32[32,1], index: 4, kind: input, shape index: {}]   ;;  %s12177_s5 = inlined_call_operand.vmem [shape: bf16[64,160], index: 5, kind: input, shape index: {}]   ;;  %s12178_s6 = inlined_call_operand.vmem [shape: f32[64,1], index: 6, kind: input, shape index: {}]   ;;  %s12179_s7 = inlined_call_operand.vmem [shape: bf16[128,320], index: 7, kind: input, shape index: {}]   ;;  %s12180_s8 = inlined_call_operand.vmem [shape: f32[128,1], index: 8, kind: input, shape index: {}]   ;;  %s12181_s9 = inlined_call_operand.hbm [shape: bf16[256,640], index: 9, kind: input, shape index: {}]   ;;  %s12182_s10 = inlined_call_operand.vmem [shape: f32[256,1], index: 10, kind: input, shape index: {}]   ;;  %s12183_s11 = inlined_call_operand.vmem [shape: f32[256,64], index: 11, kind: input, shape index: {}]   ;;  %s12184_s12 = inlined_call_operand.vmem [shape: f32[1,64], index: 12, kind: input, shape index: {}]   ;;  %s12185_s13 = inlined_call_operand.hbm [shape: f32[2,2,64], index: 13, kind: output, shape index: {}]  }
   0x1   :  { %12467 = sst [smem:[#allocation152_spill]] %s12172_s0 }
   0x2   :  { %12468 = sst [smem:[#allocation153_spill]] %s12173_s1 }
   0x3   :  { %12469 = sst [smem:[#allocation154_spill]] %s12174_s2 }
   0x4   :  { %12470 = sst [smem:[#allocation155_spill]] %s12175_s3 }
   0x5   :  { %12471 = sst [smem:[#allocation156_spill]] %s12176_s4 }
   0x6   :  { %12472 = sst [smem:[#allocation157_spill]] %s12181_s9 }
   0x7   :  { %18 = vsyncpa [#allocation4], 0 }
   0x8   :  { %19 = vsyncpa [#allocation5], 0 }
   0x9   :  { %21 = vsyncpa [#allocation5 + $0x1], 0  ;;  %s7485_s25 = smov 0   ;;  %s7487_s26 = smov 0  }
   0xa   :  { %s7489_s27 = smov 0   ;;  %s7491_s28 = smov 0  }
   0xb LB: > { %s7506_s29 = sadd.s32 4294967295, %s7400_s28   ;;  %s6325_s30 = sadd.s32 4294967294, %s7400_s28   ;;  %s7400_s28 = sphi %s7491_s28, %s13101_s28   ;;  %s7396_s27 = sphi %s7489_s27, %s13100_s27   ;;  %s7392_s26 = sphi %s7487_s26, %s13099_s26   ;;  %s7388_s25 = sphi %s7485_s25, %s13098_s25  }
   0xc   : > { %s7510_s14 = sadd.s32 1, %s7400_s28   ;;  %s312_s15 = sadd.s32 1, %s7396_s27 }
   0xd   : > { %s309_s16 = ssub.s32 %s7400_s28, %s7510_s14  ;;  %p322_p0 = scmp.ne.s32.totalorder %s7396_s27, %s7392_s26 }
   0xe   : > { %p310_p1 = scmp.eq.s32.totalorder %s309_s16, 0  ;;  %p323_p2 = scmp.eq.s32.totalorder %s7506_s29, 1 }
   0xf   : > { %p328_p3 = scmp.ne.s32.totalorder %s7392_s26, %s7388_s25  ;;  %p329_p4 = scmp.eq.s32.totalorder %s6325_s30, 1 }
  0x10   : > { %s7521_s17 = scalar_select %p310_p1, %s7396_s27, %s312_s15  }
  0x11   : > { %p7523_p5 = por %p323_p2, %p322_p0  ;;  %p7527_p6 = por %p329_p4, %p328_p3 }
  0x12   : > { %12473 = sst [smem:[#allocation9_spill]] %s7521_s17  ;;  %p6326_p7 = scmp.ge.s32.totalorder %s7400_s28, 1 }
  0x13   : > { %p336_p8 = scmp.lt.s32.totalorder %s7400_s28, 3  ;;  %p7229_p9 = scmp.eq.s32.totalorder %s7506_s29, 0 }
  0x14   : > { %s12476_s9 = sld [smem:[#allocation157_spill]]  ;;  %s7402_s23 = smov [#allocation3]  }
  0x15   : > { %p337_p10 = pnand %p6326_p7, %p336_p8  ;;  %s373_s24 = sshll.u32 %s7402_s23, 4  ;;  %s374_s24 = int_to_ptr.vmem [resolvable:$true] %s373_s24 }
  0x16   : > { %s7403_s30 = smov 320   ;;  %s7404_s15 = smov 20  }
  0x17   : > { %p7221_p11 = pneg %p337_p10  ;;  %406 = sbr.rel (%p337_p10) target bundleno = 4334 (0x10ee), region = 72 }
  0x19   : > { %p7222_p12 = pnand %p7229_p9, %p7221_p11 }
  0x1a   : > { %s371_s22 = sshll.u32 %s12476_s9, 4  ;;  %s372_s22 = int_to_ptr.hbm [resolvable:$true] %s371_s22 }
  0x1b   : > { %7224 = dma.hbm_to_vmem [thread:$0]  (!%p7222_p12), %s372_s22, 10240, %s374_s24, [#allocation4], %s7403_s30, %s7403_s30, %s7404_s15  }
  0x1c   : > { %7379 = dma.done.wait (%p7229_p9), [#allocation4], 10240  }
  0x1d   : > { %7381 = vsyncadd (%p7229_p9), [#allocation4], 4294957056  ;;  %s7544_s16 = sshll.u32 %s7506_s29, 1  ;;  %s12477_s0 = sld [smem:[#allocation152_spill]]  ;;  %vm612_vm0 = vcmask 15360   ;;  %vm615_vm1 = vcmask 48128  }
  0x1e   : > { %p451_p13 = scmp.lt.s32.totalorder %s7544_s16, 3  ;;  %s12188_s22 = smov 2   ;;  %v7411_v27 = vmov 0   ;;  %vm645_vm2 = vcmask 1031168   ;;  %vm681_vm3 = vcmask 1040384   ;;  %vm630_vm4 = vcmask 1039360  }
  0x1f   : > { %s7406_s24 = smov 6   ;;  %s12190_s29 = smov 127   ;;  %7296 = vset.pattern.permute.xlu1 %v7411_v27  ;;  %7297 = vset.pattern.permute.xlu2 %v7411_v27  ;;  %vm675_vm5 = vcmask 1014784   ;;  %vm660_vm6 = vcmask 1022976   ;;  %vm685_vm7 = vcmask 1041408   ;;  %vm689_vm8 = vcmask 1042432  }
  0x20   : > { %s452_s20 = scalar_select %p451_p13, %s7544_s16, 3  ;;  %7298 = vset.pattern.permute.xlu0 %v7411_v27  ;;  %vm693_vm9 = vcmask 1043456   ;;  %v7412_v45 = vmov 65535   ;;  %vm719_vm10 = vcmask 39936  }
  0x21   : > { %s12192_s30 = smov 125   ;;  %s12186_s15 = smov 124   ;;  %v723_v46 = vsel %vm685_vm7, 4294967295, %v7412_v45 }
  0x22   : > { %s12478_s2 = sld [smem:[#allocation154_spill]]  ;;  %v724_v55 = vsel %vm689_vm8, %v723_v46, 0  ;;  %s7354_s17 = scalar_lea.hbm %s12185_s13, 4 }
  0x23   : > { %s453_s9 = scalar_lea.vmem %s12477_s0, %s452_s20  ;;  %s12479_s1 = sld [smem:[#allocation153_spill]] }
  0x24   : > { %v7299_v0 = vld [vmem:[%s453_s9] ss:$0 sm:$0xff]  ;;  %v7300_v1 = vld [vmem:[%s453_s9 + $0x1] ss:$0 sm:$0xff]  ;;  %s12194_s9 = smov 126   ;;  %s12490_s4 = sld [smem:[#allocation156_spill]] }
  0x25   : > { %604 = vrot.lane.b32.xlu0 %v7299_v0, %s12188_s22  ;;  %s12491_s3 = sld [smem:[#allocation155_spill]]  ;;  %s12494_s0 = smov 126  }
  0x28   : > { %v702_v25 = vld [vmem:[%s12478_s2] sm:$0xff]  ;;  %v703_v26 = vld [vmem:[%s12478_s2 + $0x8] sm:$0xff] }
  0x2d   : > { %609 = vrot.lane.b32.xlu0 %v7300_v1, %s7406_s24 }
  0x97   : > { %v605_v2 = vpop.permute.xlu0 %604 }
  0x98   : > { %v7553_v3 = vsel %vm612_vm0, 0.0, %v605_v2  ;;  %v614_v4 = vsel %vm612_vm0, %v605_v2, 0.0 }
  0x99   : > { %v651_v10 = vrot.slane %v7553_v3, 5  ;;  %v636_v15 = vrot.slane %v7553_v3, 6  ;;  %v621_v16 = vrot.slane %v7553_v3, 7  ;;  %v666_v21 = vrot.slane %v7553_v3, 4 }
  0x9f   : > { %v610_v5 = vpop.permute.xlu0 %609 }
  0xa0   : > { %v7556_v6 = vsel %vm615_vm1, %v614_v4, %v610_v5  ;;  %v7558_v7 = vsel %vm615_vm1, %v610_v5, 0.0 }
  0xa1   : > { %v638_v8 = vrot.slane %v7558_v7, 6  ;;  %v623_v9 = vrot.slane %v7558_v7, 7  ;;  %v652_v11 = vrot.slane %v7556_v6, 5  ;;  %v637_v13 = vrot.slane %v7556_v6, 6 }
  0xa2   : > { %v622_v14 = vrot.slane %v7556_v6, 7  ;;  %v668_v19 = vrot.slane %v7558_v7, 4  ;;  %v667_v20 = vrot.slane %v7556_v6, 4  ;;  %v653_v23 = vrot.slane %v7558_v7, 5 }
  0xa3   : > { %643 = vrot.lane.b32.xlu2 %v638_v8, %s12194_s9  ;;  %628 = vrot.lane.b32.xlu1 %v623_v9, %s12190_s29  ;;  %v7286_v12 = vpack.i.bf16 %v652_v11, %v651_v10  ;;  %v7281_v17 = vpack.i.bf16 %v637_v13, %v636_v15  ;;  %v490_v9 = vlaneseq }
  0xa4   : > { %v7276_v18 = vpack.i.bf16 %v622_v14, %v621_v16  ;;  %v7291_v22 = vpack.i.bf16 %v667_v20, %v666_v21 }
  0xa5   : > { %7287 = vrot.lane.b32.xlu0 %v7286_v12, %s12192_s30  ;;  %v7617_v10 = vand.u32 127, %v490_v9 }
  0xa7   : > { %v7620_v11 = vadd.s32 128, %v7617_v10  ;;  %v497_v13 = vand.u32 65535, %v7617_v10  ;;  %v498_v16 = vshrl.u32 %v7617_v10, 16 }
  0xa9   : > { %v526_v12 = vand.u32 65535, %v7620_v11  ;;  %v527_v14 = vshrl.u32 %v7620_v11, 16 }
  0xab   : > { %7282 = vrot.lane.b32.xlu2 %v7281_v17, %s12194_s9  ;;  %7277 = vrot.lane.b32.xlu1 %v7276_v18, %s12190_s29  ;;  %v530_v15 = vmul.u32 63550, %v526_v12  ;;  %v501_v17 = vmul.u32 63550, %v497_v13  ;;  %v500_v18 = vmul.u32 3972, %v497_v13  ;;  %v529_v21 = vmul.u32 3972, %v526_v12 }
  0xad   : > { %673 = vrot.lane.b32.xlu0 %v668_v19, %s12186_s15  ;;  %v502_v19 = vmul.u32 3972, %v498_v16  ;;  %v504_v20 = vshll.u32 %v501_v17, 16 }
  0xaf   : > { %vm508_vm11 = vc.u32 %v500_v18, %v504_v20 }
  0xb3   : > { %7292 = vrot.lane.b32.xlu2 %v7291_v22, %s12186_s15  ;;  %658 = vrot.lane.b32.xlu1 %v653_v23, %s12192_s30  ;;  %v531_v22 = vmul.u32 3972, %v527_v14  ;;  %v533_v23 = vshll.u32 %v530_v15, 16 }
  0xb5   : > { %vm537_vm12 = vc.u32 %v529_v21, %v533_v23 }
  0xbb   : > { %706 = vperm.xlu1 %7296, %v702_v25   ;;  %711 = vperm.xlu2 %7297, %v703_v26   ;;  %v510_v25 = vadd.s32 %v504_v20, %v500_v18  ;;  %v493_v26 = vadd.s32 256, %v7617_v10 }
  0xfd   : > { %v644_v24 = vpop.permute.xlu2 %643 }
 0x105   : > { %v7283_v28 = vpop.permute.xlu2 %7282 }
 0x106   : > { %v7285_v32 = vunpack.i.h.bf16 %v7283_v28  ;;  %v7284_v33 = vunpack.i.l.bf16 %v7283_v28  ;;  %v535_v28 = vshll.u32 %v531_v22, 16 }
 0x108   : > { %v646_v43 = vsel %vm645_vm2, %v7284_v33, %v7285_v32  ;;  %v647_v56 = vsel %vm645_vm2, %v7285_v32, %v644_v24  ;;  %v556_v32 = vshrl.u32 %v493_v26, 16  ;;  %v532_v33 = vmul.u32 63550, %v527_v14 }
 0x10a   : > { %v561_v46 = vmul.u32 63550, %v556_v32 }
 0x10d   : > { %v7293_v31 = vpop.permute.xlu2 %7292 }
 0x10e   : > { %v7295_v39 = vunpack.i.h.bf16 %v7293_v31  ;;  %v7294_v40 = vunpack.i.l.bf16 %v7293_v31  ;;  %v555_v31 = vand.u32 65535, %v493_v26 }
 0x110   : > { %v676_v50 = vsel %vm675_vm5, %v7294_v40, %v7295_v39 }
 0x115   : > { %v629_v29 = vpop.permute.xlu1 %628 }
 0x116   : > { %v684_v47 = vsel %vm681_vm3, %v7558_v7, %v629_v29 }
 0x117   : > { %v7288_v30 = vpop.permute.xlu0 %7287  ;;  %v688_v57 = vsel %vm685_vm7, %v684_v47, %v644_v24  ;;  %v506_v24 = vshll.u32 %v502_v19, 16  ;;  %v505_v47 = vshrl.u32 %v501_v17, 16 }
 0x118   : > { %v7290_v35 = vunpack.i.h.bf16 %v7288_v30  ;;  %v7289_v36 = vunpack.i.l.bf16 %v7288_v30  ;;  %v503_v30 = vmul.u32 63550, %v498_v16 }
 0x119   : > { %vm512_vm13 = vc.u32 %v510_v25, %v506_v24 }
 0x11a   : > { %v661_v48 = vsel %vm660_vm6, %v7289_v36, %v7290_v35  ;;  %v559_v36 = vmul.u32 63550, %v555_v31 }
 0x11c   : > { %v562_v40 = vshll.u32 %v559_v36, 16 }
 0x11d   : > { %v7278_v34 = vpop.permute.xlu1 %7277 }
 0x11e   : > { %v7280_v37 = vunpack.i.h.bf16 %v7278_v34  ;;  %v7279_v38 = vunpack.i.l.bf16 %v7278_v34  ;;  %v509_v34 = vsel %vm508_vm11, 1, %v7411_v27 }
 0x11f   : > { %v674_v53 = vpop.permute.xlu0 %673 }
 0x120   : > { %v632_v41 = vsel %vm630_vm4, %v7280_v37, %v629_v29  ;;  %v631_v42 = vsel %vm630_vm4, %v7279_v38, %v7280_v37  ;;  %v677_v63 = vsel %vm675_vm5, %v7295_v39, %v674_v53  ;;  %v539_v29 = vadd.s32 %v533_v23, %v529_v21  ;;  %v712_v23 = vpop.permute.xlu2 %711 }
 0x121   : > { %v682_v44 = vsel %vm681_vm3, %v7553_v3, %v631_v42  ;;  %v683_v52 = vsel %vm681_vm3, %v7556_v6, %v632_v41  ;;  %v7023_v3 = vld [vmem:[%s12479_s1] sm:$0xff]  ;;  %v560_v37 = vmul.u32 3972, %v556_v32  ;;  %v538_v38 = vsel %vm537_vm12, 1, %v7411_v27  ;;  %s447_s1 = sand.u32 1, %s7392_s26  }
 0x122   : > { %v686_v49 = vsel %vm685_vm7, %v682_v44, %v646_v43  ;;  %v687_v62 = vsel %vm685_vm7, %v683_v52, %v647_v56  ;;  %vm541_vm14 = vc.u32 %v539_v29, %v535_v28  ;;  %v511_v39 = vadd.s32 %v509_v34, %v503_v30 }
 0x123   : > { %v690_v51 = vsel %vm689_vm8, %v686_v49, %v661_v48  ;;  %v513_v41 = vsel %vm512_vm13, 1, %v7411_v27  ;;  %v564_v42 = vshll.u32 %v560_v37, 16  ;;  %v540_v43 = vadd.s32 %v538_v38, %v532_v33 }
 0x124   : > { %v694_v54 = vsel %vm693_vm9, %v690_v51, %v676_v50  ;;  %v542_v45 = vsel %vm541_vm14, 1, %v7411_v27  ;;  %v515_v48 = vadd.s32 %v513_v41, %v511_v39  ;;  %v534_v50 = vshrl.u32 %v530_v15, 16 }
 0x125   : > { %v659_v58 = vpop.permute.xlu1 %658  ;;  %v697_v59 = vpack.c.bf16 %v694_v54, %v694_v54  ;;  %v544_v51 = vadd.s32 %v542_v45, %v540_v43  ;;  %v536_v56 = vshrl.u32 %v531_v22, 16  ;;  %v12484_v34 = vmov 0 }
 0x126   : > { %v662_v60 = vsel %vm660_vm6, %v7290_v35, %v659_v58  ;;  %v692_v61 = vsel %vm689_vm8, %v688_v57, %v659_v58  ;;  %v558_v35 = vmul.u32 3972, %v555_v31  ;;  %v516_v54 = vadd.s32 %v515_v48, %v505_v47 }
 0x127   : > { %v726_v0 = vand.u32 %v724_v55, %v697_v59  ;;  %v696_v1 = vsel %vm693_vm9, %v692_v61, %v674_v53  ;;  %v691_v2 = vsel %vm689_vm8, %v687_v62, %v662_v60  ;;  %v507_v53 = vshrl.u32 %v502_v19, 16 }
 0x128   : > { %v699_v4 = vpack.c.bf16 %v696_v1, %v696_v1  ;;  %v695_v5 = vsel %vm693_vm9, %v691_v2, %v677_v63  ;;  %vm566_vm15 = vc.u32 %v558_v35, %v562_v40  ;;  %v568_v44 = vadd.s32 %v562_v40, %v558_v35 }
 0x129   : > { %741 = vmatpush.bf16.msra.mxu0 %v726_v0  ;;  %v698_v6 = vpack.c.bf16 %v695_v5, %v695_v5  ;;  %v567_v49 = vsel %vm566_vm15, 1, %v7411_v27  ;;  %v545_v57 = vadd.s32 %v544_v51, %v534_v50  ;;  %v563_v58 = vshrl.u32 %v559_v36, 16 }
 0x12a   : > { %v732_v7 = vand.u32 %v724_v55, %v699_v4  ;;  %vm570_vm1 = vc.u32 %v568_v44, %v564_v42  ;;  %v569_v52 = vadd.s32 %v567_v49, %v561_v46  ;;  %v517_v60 = vadd.s32 %v516_v54, %v507_v53 }
 0x12b   : > { %v729_v8 = vand.u32 %v724_v55, %v698_v6  ;;  %v571_v55 = vsel %vm570_vm1, 1, %v7411_v27  ;;  %v546_v61 = vadd.s32 %v545_v57, %v536_v56  ;;  %v565_v62 = vshrl.u32 %v560_v37, 16 }
 0x12c   : > { %6338 = vmatmul.msk.bf16.vlgmr.msra.gmra.mxu0 %vm719_vm10, %v7023_v3  ;;  %769 = vmatpush.bf16.msra.mxu3 %v732_v7  ;;  %v573_v59 = vadd.s32 %v571_v55, %v569_v52  ;;  %v518_v0 = vshrl.u32 %v517_v60, 7  ;;  %v12487_v51 = vmov 0 }
 0x12d   : > { %755 = vmatpush.bf16.msra.mxu1 %v729_v8  ;;  %v547_v1 = vshrl.u32 %v546_v61, 7  ;;  %v707_v12 = vpop.permute.xlu1 %706 }
 0x12e   : > { %v574_v63 = vadd.s32 %v573_v59, %v563_v58 }
 0x12f   : > { %6340 = vmatmul.msk.bf16.vlgmr.msra.gmra.mxu3 %vm719_vm10, %v7023_v3  ;;  %v548_v4 = vmul.u32 132, %v547_v1 }
 0x130   : > { %6339 = vmatmul.msk.bf16.vlgmr.msra.gmra.mxu1 %vm719_vm10, %v7023_v3  ;;  %v575_v2 = vadd.s32 %v574_v63, %v565_v62  ;;  %v519_v3 = vmul.u32 132, %v518_v0 }
 0x131   : > { %v549_v7 = vsub.s32 %v7620_v11, %v548_v4 }
 0x132   : > { %v576_v5 = vshrl.u32 %v575_v2, 7  ;;  %v520_v6 = vsub.s32 %v7617_v10, %v519_v3 }
 0x133   : > { %vm582_vm8 = vcmp.ne.s32.totalorder %v549_v7, 0  ;;  %vm585_vm9 = vcmp.lt.s32.totalorder %v549_v7, 0  ;;  %v591_v14 = vadd.s32 132, %v549_v7 }
 0x134   : > { %v577_v8 = vmul.u32 132, %v576_v5  ;;  %vm581_vm3 = vcmp.ne.s32.totalorder %v520_v6, 0  ;;  %vm584_vm7 = vcmp.lt.s32.totalorder %v520_v6, 0  ;;  %v590_v9 = vadd.s32 132, %v520_v6  ;;  %vm588_vm11 = vmand %vm585_vm9, %vm582_vm8  ;;  %v903_v5 = vld [vmem:[%s12490_s4 + $0x10] sm:$0xff] }
 0x135   : > { %vm587_vm10 = vmand %vm584_vm7, %vm581_vm3  ;;  %v594_v10 = vsel %vm588_vm11, %v591_v14, %v549_v7  ;;  %vm456_vm7 = vcmask 11264   ;;  %vm473_vm8 = vcmask 60464   ;;  %vm821_vm9 = vcmask 1043472   ;;  %v902_v7 = vld [vmem:[%s12490_s4 + $0x8] sm:$0xff] }
 0x136   : > { %v578_v13 = vsub.s32 %v493_v26, %v577_v8  ;;  %v593_v17 = vsel %vm587_vm10, %v590_v9, %v520_v6  ;;  %vm7639_vm1 = vcmp.lt.s32.totalorder %v594_v10, 128  ;;  %457 = vst.msk [vmem:[#allocation2] sm:$0xf] %vm456_vm7, %v7411_v27  ;;  %vm822_vm10 = vcmask 1047556   ;;  %v904_v6 = vld [vmem:[%s12490_s4 + $0x18] sm:$0xff] }
 0x137   : > { %vm7635_vm14 = vcmp.lt.s32.totalorder %v593_v17, 128  ;;  %474 = vst.msk [vmem:[#allocation2 + $0x8] sm:$0xf] %vm473_vm8, %v7411_v27  ;;  %vm7727_vm11 = vmor %vm822_vm10, %vm821_vm9 }
 0x138   : > { %vm583_vm12 = vcmp.ne.s32.totalorder %v578_v13, 0  ;;  %vm586_vm13 = vcmp.lt.s32.totalorder %v578_v13, 0  ;;  %v592_v20 = vadd.s32 132, %v578_v13  ;;  %458 = vst.msk [vmem:[#allocation2 + $0xc] sm:$0xf] %vm456_vm7, %v7411_v27  ;;  %v12488_v51 = vsel %vm7727_vm11, 4294967295, %v12487_v51 }
 0x139   : > { %vm589_vm15 = vmand %vm586_vm13, %vm583_vm12  ;;  %459 = vst.msk [vmem:[#allocation2 + $0x18] sm:$0xf] %vm456_vm7, %v7411_v27  ;;  %vm825_vm12 = vcmask 44032   ;;  %vm935_vm13 = vcmask 654336  }
 0x13a   : > { %v595_v28 = vsel %vm589_vm15, %v592_v20, %v578_v13  ;;  %460 = vst.msk [vmem:[#allocation2 + $0x24] sm:$0xf] %vm456_vm7, %v7411_v27  ;;  %vm1303_vm15 = vcmask 261120  }
 0x13b   : > { %vm7647_vm3 = vcmp.lt.s32.totalorder %v595_v28, 128  ;;  %461 = vst.msk [vmem:[#allocation2 + $0x30] sm:$0xf] %vm456_vm7, %v7411_v27 }
 0x13c   : > { %v12485_v34 = vsel %vm7647_vm3, 4294967295, %v12484_v34  ;;  %462 = vst.msk [vmem:[#allocation2 + $0x3c] sm:$0xf] %vm456_vm7, %v7411_v27 }
 0x13d   : > { %12486 = vst [vmem:[#allocation10_spill] sm:$0xff] %v12485_v34 }
 0x13e   : > { %463 = vst.msk [vmem:[#allocation2 + $0x48] sm:$0xf] %vm456_vm7, %v7411_v27 }
 0x13f   : > { %464 = vst.msk [vmem:[#allocation2 + $0x54] sm:$0xf] %vm456_vm7, %v7411_v27 }
 0x140   : > { %465 = vst.msk [vmem:[#allocation2 + $0x60] sm:$0xf] %vm456_vm7, %v7411_v27 }
 0x141   : > { %466 = vst.msk [vmem:[#allocation2 + $0x6c] sm:$0xf] %vm456_vm7, %v7411_v27 }
 0x142   : > { %467 = vst.msk [vmem:[#allocation2 + $0x78] sm:$0xf] %vm456_vm7, %v7411_v27 }
 0x143   : > { %468 = vst.msk [vmem:[#allocation2 + $0x84] sm:$0xf] %vm456_vm7, %v7411_v27 }
 0x144   : > { %469 = vst.msk [vmem:[#allocation2 + $0x90] sm:$0xf] %vm456_vm7, %v7411_v27 }
 0x145   : > { %470 = vst.msk [vmem:[#allocation2 + $0x9c] sm:$0xf] %vm456_vm7, %v7411_v27 }
 0x146   : > { %471 = vst.msk [vmem:[#allocation2 + $0xa8] sm:$0xf] %vm456_vm7, %v7411_v27 }
 0x147   : > { %472 = vst.msk [vmem:[#allocation2 + $0xb4] sm:$0xf] %vm456_vm7, %v7411_v27  ;;  %vm2162_vm7 = vcmask 523264  }
 0x148   : > { %475 = vst.msk [vmem:[#allocation2 + $0x14] sm:$0xf] %vm473_vm8, %v7411_v27 }
 0x149   : > { %476 = vst.msk [vmem:[#allocation2 + $0x20] sm:$0xf] %vm473_vm8, %v7411_v27 }
 0x14a   : > { %477 = vst.msk [vmem:[#allocation2 + $0x2c] sm:$0xf] %vm473_vm8, %v7411_v27 }
 0x14b   : > { %478 = vst.msk [vmem:[#allocation2 + $0x38] sm:$0xf] %vm473_vm8, %v7411_v27 }
 0x14c   : > { %479 = vst.msk [vmem:[#allocation2 + $0x44] sm:$0xf] %vm473_vm8, %v7411_v27 }
 0x14d   : > { %480 = vst.msk [vmem:[#allocation2 + $0x50] sm:$0xf] %vm473_vm8, %v7411_v27 }
 0x14e   : > { %481 = vst.msk [vmem:[#allocation2 + $0x5c] sm:$0xf] %vm473_vm8, %v7411_v27 }
 0x14f   : > { %482 = vst.msk [vmem:[#allocation2 + $0x68] sm:$0xf] %vm473_vm8, %v7411_v27 }
 0x150   : > { %483 = vst.msk [vmem:[#allocation2 + $0x74] sm:$0xf] %vm473_vm8, %v7411_v27 }
 0x151   : > { %484 = vst.msk [vmem:[#allocation2 + $0x80] sm:$0xf] %vm473_vm8, %v7411_v27 }
 0x152   : > { %485 = vst.msk [vmem:[#allocation2 + $0x8c] sm:$0xf] %vm473_vm8, %v7411_v27 }
 0x153   : > { %486 = vst.msk [vmem:[#allocation2 + $0x98] sm:$0xf] %vm473_vm8, %v7411_v27 }
 0x154   : > { %487 = vst.msk [vmem:[#allocation2 + $0xa4] sm:$0xf] %vm473_vm8, %v7411_v27 }
 0x155   : > { %488 = vst.msk [vmem:[#allocation2 + $0xb0] sm:$0xf] %vm473_vm8, %v7411_v27 }
 0x156   : > { %489 = vst.msk [vmem:[#allocation2 + $0xbc] sm:$0xf] %vm473_vm8, %v7411_v27 }
 0x157   : > { %12489 = vst [vmem:[#allocation11_spill] sm:$0xff] %v12488_v51 }
 0x1a9   : > { %v743_v15 = vpop.f32.mrf.mxu0 }
 0x1aa   : > { %v744_v16 = vadd.f32 %v743_v15, %v707_v12 }
 0x1ac   : > { %v776_v18 = vmax.f32 %v744_v16, 0.0 }
 0x1ad   : > { %v757_v19 = vpop.f32.mrf.mxu1 }
 0x1ae   : > { %v758_v21 = vadd.f32 %v757_v19, %v707_v12  ;;  %v788_v25 = vsel %vm7635_vm14, %v776_v18, 0.0 }
 0x1b0   : > { %v777_v24 = vmax.f32 %v758_v21, 0.0 }
 0x1b1   : > { %v745_v26 = vpop.f32.mrf.mxu0 }
 0x1b2   : > { %v789_v29 = vsel %vm7639_vm1, %v777_v24, 0.0  ;;  %v746_v30 = vadd.f32 %v745_v26, %v712_v23  ;;  %v771_v31 = vpop.f32.mrf.mxu3  ;;  %v901_v26 = vld [vmem:[%s12490_s4] sm:$0xff] }
 0x1b3   : > { %v772_v32 = vadd.f32 %v771_v31, %v707_v12  ;;  %v794_v33 = vpack.c.bf16 %v789_v29, %v788_v25 }
 0x1b4   : > { %v779_v37 = vmax.f32 %v746_v30, 0.0 }
 0x1b5   : > { %v778_v35 = vmax.f32 %v772_v32, 0.0  ;;  %v759_v36 = vpop.f32.mrf.mxu1  ;;  %802 = vrot.lane.b32.xlu0 %v794_v33, %s12188_s22  ;;  %v7027_v32 = vld [vmem:[%s12491_s3] sm:$0xff]  ;;  %v7028_v33 = vld [vmem:[%s12491_s3 + $0x8] sm:$0xff] }
 0x1b6   : > { %v760_v38 = vadd.f32 %v759_v36, %v712_v23  ;;  %v791_v42 = vsel %vm7635_vm14, %v779_v37, 0.0 }
 0x1b7   : > { %v790_v39 = vsel %vm7647_vm3, %v778_v35, 0.0 }
 0x1b8   : > { %v795_v40 = vpack.c.bf16 %v790_v39, %v790_v39  ;;  %v780_v41 = vmax.f32 %v760_v38, 0.0 }
 0x1ba   : > { %v792_v43 = vsel %vm7639_vm1, %v780_v41, 0.0  ;;  %v773_v44 = vpop.f32.mrf.mxu3  ;;  %804 = vrot.lane.b32.xlu2 %v795_v40, %s12188_s22 }
 0x1bb   : > { %v774_v45 = vadd.f32 %v773_v44, %v712_v23  ;;  %v796_v46 = vpack.c.bf16 %v792_v43, %v791_v42 }
 0x1bd   : > { %v781_v47 = vmax.f32 %v774_v45, 0.0  ;;  %806 = vrot.lane.b32.xlu1 %v796_v46, %s12188_s22 }
 0x1bf   : > { %v793_v48 = vsel %vm7647_vm3, %v781_v47, 0.0 }
 0x1c0   : > { %v797_v49 = vpack.c.bf16 %v793_v48, %v793_v48 }
 0x1c2   : > { %808 = vrot.lane.b32.xlu0 %v797_v49, %s12188_s22  ;;  %s12492_s22 = smov 2  }
 0x214   : > { %v805_v53 = vpop.permute.xlu2 %804 }
 0x227   : > { %v803_v50 = vpop.permute.xlu0 %802 }
 0x228   : > { %v810_v52 = vrot.slane %v803_v50, 4 }
 0x22a   : > { %v813_v54 = vsel %vm612_vm0, %v810_v52, %v803_v50  ;;  %v814_v55 = vsel %vm612_vm0, %v810_v52, %v805_v53 }
 0x22b   : > { %824 = vst.msk [vmem:[#allocation2] sm:$0xff] %vm7727_vm11, %v813_v54 }
 0x22c   : > { %826 = vst.msk [vmem:[#allocation2 + $0x8] sm:$0xf] %vm825_vm12, %v814_v55 }
 0x22f   : > { %v807_v27 = vpop.permute.xlu1 %806 }
 0x230   : > { %v811_v56 = vrot.slane %v807_v27, 4 }
 0x232   : > { %v815_v57 = vsel %vm612_vm0, %v811_v56, %v807_v27  ;;  %v6343_v60 = vld [vmem:[#allocation2] sm:$0xf]  ;;  %v7024_v62 = vld [vmem:[#allocation2 + $0x4] sm:$0xf] }
 0x233   : > { %827 = vst.msk [vmem:[#allocation2 + $0xc] sm:$0xff] %vm7727_vm11, %v815_v57  ;;  %v6351_v3 = vld [vmem:[#allocation2 + $0x8] sm:$0xf] }
 0x234   : > { %v809_v58 = vpop.permute.xlu0 %808 }
 0x235   : > { %v816_v59 = vsel %vm612_vm0, %v811_v56, %v809_v58 }
 0x236   : > { %828 = vst.msk [vmem:[#allocation2 + $0x14] sm:$0xf] %vm825_vm12, %v816_v59 }
 0x23a   : > { %v7025_v61 = vld [vmem:[#allocation2 + $0x8] sm:$0xf0]  ;;  %v6345_v63 = vld [vmem:[#allocation2 + $0xc] sm:$0xf0] }
 0x23b   : > { %v6344_v0 = vor.u32 %v7025_v61, %v6343_v60  ;;  %v6348_v1 = vor.u32 %v7024_v62, %v6345_v63 }
 0x23d   : > { %873 = vrot.lane.b32.xlu0 %v6344_v0, %s12192_s30  ;;  %885 = vrot.lane.b32.xlu1 %v6344_v0, %s12186_s15  ;;  %v7026_v2 = vld [vmem:[#allocation2 + $0x10] sm:$0xf0] }
 0x23e   : > { %887 = vrot.lane.b32.xlu2 %v6348_v1, %s12186_s15  ;;  %v6352_v4 = vor.u32 %v7026_v2, %v6351_v3 }
 0x245   : > { %861 = vrot.lane.b32.xlu0 %v6344_v0, %s12194_s9  ;;  %875 = vrot.lane.b32.xlu1 %v6348_v1, %s12192_s30 }
 0x246   : > { %889 = vrot.lane.b32.xlu2 %v6352_v4, %s12186_s15  ;;  %s12493_s15 = smov 124  }
 0x24d   : > { %849 = vrot.lane.b32.xlu0 %v6344_v0, %s12190_s29  ;;  %863 = vrot.lane.b32.xlu1 %v6348_v1, %s12194_s9 }
 0x24e   : > { %877 = vrot.lane.b32.xlu2 %v6352_v4, %s12192_s30 }
 0x255   : > { %853 = vrot.lane.b32.xlu0 %v6352_v4, %s12190_s29  ;;  %851 = vrot.lane.b32.xlu1 %v6348_v1, %s12190_s29 }
 0x256   : > { %865 = vrot.lane.b32.xlu2 %v6352_v4, %s12194_s9 }
 0x25d   : > { %917 = vperm.xlu1 %7296, %v903_v5   ;;  %907 = vperm.xlu0 %7298, %v901_v26  }
 0x25e   : > { %922 = vperm.xlu2 %7297, %v904_v6  }
 0x265   : > { %912 = vperm.xlu1 %7296, %v902_v7  }
 0x298   : > { %v888_v8 = vpop.permute.xlu2 %887 }
 0x2a0   : > { %v890_v9 = vpop.permute.xlu2 %889 }
 0x2a1   : > { %983 = vmatpush.bf16.msrb.mxu1 %v890_v9  ;;  %v893_v12 = vsel %vm675_vm5, %v888_v8, %v890_v9 }
 0x2a2   : > { %964 = vmatpush.bf16.msra.mxu0 %v893_v12 }
 0x2a8   : > { %v878_v13 = vpop.permute.xlu2 %877 }
 0x2a9   : > { %984 = vmatpush.bf16.msrb.mxu1 %v878_v13 }
 0x2af   : > { %v874_v14 = vpop.permute.xlu0 %873  ;;  %v886_v15 = vpop.permute.xlu1 %885 }
 0x2b0   : > { %v866_v16 = vpop.permute.xlu2 %865  ;;  %v892_v17 = vsel %vm675_vm5, %v886_v15, %v888_v8 }
 0x2b1   : > { %985 = vmatpush.bf16.msrb.mxu1 %v866_v16  ;;  %945 = vmatpush.bf16.msrb.mxu3 %v892_v17 }
 0x2b7   : > { %v862_v18 = vpop.permute.xlu0 %861  ;;  %v876_v10 = vpop.permute.xlu1 %875 }
 0x2b8   : > { %v880_v19 = vsel %vm660_vm6, %v874_v14, %v876_v10  ;;  %v881_v20 = vsel %vm660_vm6, %v876_v10, %v878_v13  ;;  %v7796_v58 = vpop.permute.xlu2 %922 }
 0x2b9   : > { %946 = vmatpush.bf16.msrb.mxu3 %v880_v19  ;;  %965 = vmatpush.bf16.msra.mxu0 %v881_v20 }
 0x2bf   : > { %v850_v21 = vpop.permute.xlu0 %849  ;;  %v864_v23 = vpop.permute.xlu1 %863 }
 0x2c0   : > { %v868_v24 = vsel %vm645_vm2, %v862_v18, %v864_v23  ;;  %v869_v25 = vsel %vm645_vm2, %v864_v23, %v866_v16 }
 0x2c1   : > { %947 = vmatpush.bf16.msrb.mxu3 %v868_v24  ;;  %966 = vmatpush.bf16.msra.mxu0 %v869_v25 }
 0x2c7   : > { %v854_v28 = vpop.permute.xlu0 %853  ;;  %v852_v29 = vpop.permute.xlu1 %851 }
 0x2c8   : > { %986 = vmatpush.bf16.msrb.mxu1 %v854_v28  ;;  %v856_v30 = vsel %vm630_vm4, %v850_v21, %v852_v29  ;;  %v857_v31 = vsel %vm630_vm4, %v852_v29, %v854_v28 }
 0x2c9   : > { %948 = vmatpush.bf16.msrb.mxu3 %v856_v30  ;;  %967 = vmatpush.bf16.msra.mxu0 %v857_v31 }
 0x2cc   : > { %987 = vmatpush.bf16.msrb.mxu1 %v6352_v4 }
 0x2cd   : > { %949 = vmatpush.bf16.msrb.mxu3 %v6344_v0  ;;  %968 = vmatpush.bf16.msra.mxu0 %v6348_v1 }
 0x2cf   : > { %6365 = vmatmul.msk.bf16.vlgmr.msrb.gmra.mxu1 %vm935_vm13, %v7027_v32  ;;  %v7779_v35 = vpop.permute.xlu1 %917  ;;  %v7790_v50 = vpop.permute.xlu0 %907 }
 0x2d0   : > { %6361 = vmatmul.msk.bf16.vlgmr.msrb.gmra.mxu3 %vm935_vm13, %v7027_v32  ;;  %6363 = vmatmul.msk.bf16.vlgmr.msra.gmra.mxu0 %vm935_vm13, %v7027_v32 }
 0x2d7   : > { %v7781_v39 = vpop.permute.xlu1 %912 }
 0x2df   : > { %6366 = vmatmul.msk.bf16.gmra.mxu1 %vm935_vm13, %v7028_v33 }
 0x2e0   : > { %6362 = vmatmul.msk.bf16.gmra.mxu3 %vm935_vm13, %v7028_v33  ;;  %6364 = vmatmul.msk.bf16.gmra.mxu0 %vm935_vm13, %v7028_v33 }
 0x34c   : > { %v989_v29 = vpop.f32.mrf.mxu1 }
 0x34d   : > { %v970_v36 = vpop.f32.mrf.mxu0 }
 0x34e   : > { %v971_v27 = vadd.f32 %v970_v36, %v7790_v50 }
 0x350   : > { %v1000_v63 = vmax.f32 %v971_v27, 0.0 }
 0x352   : > { %v1012_v6 = vsel %vm7639_vm1, %v1000_v63, 0.0 }
 0x353   : > { %v951_v37 = vpop.f32.mrf.mxu3 }
 0x354   : > { %v952_v56 = vadd.f32 %v951_v37, %v7790_v50  ;;  %v991_v33 = vpop.f32.mrf.mxu1 }
 0x355   : > { %v972_v38 = vpop.f32.mrf.mxu0 }
 0x356   : > { %v973_v40 = vadd.f32 %v972_v38, %v7781_v39  ;;  %v999_v0 = vmax.f32 %v952_v56, 0.0 }
 0x358   : > { %v1003_v42 = vmax.f32 %v973_v40, 0.0  ;;  %v1011_v4 = vsel %vm7635_vm14, %v999_v0, 0.0 }
 0x359   : > { %v1023_v9 = vpack.c.bf16 %v1012_v6, %v1011_v4 }
 0x35a   : > { %v1015_v46 = vsel %vm7639_vm1, %v1003_v42, 0.0 }
 0x35b   : > { %v953_v41 = vpop.f32.mrf.mxu3 }
 0x35c   : > { %v954_v43 = vadd.f32 %v953_v41, %v7781_v39 }
 0x35d   : > { %v975_v44 = vpop.f32.mrf.mxu0 }
 0x35e   : > { %v1002_v45 = vmax.f32 %v954_v43, 0.0  ;;  %v976_v48 = vadd.f32 %v975_v44, %v7779_v35  ;;  %v994_v43 = vpop.f32.mrf.mxu1  ;;  %v990_v44 = vadd.f32 %v989_v29, %v7790_v50  ;;  %v992_v50 = vadd.f32 %v991_v33, %v7781_v39 }
 0x360   : > { %v1014_v47 = vsel %vm7635_vm14, %v1002_v45, 0.0  ;;  %v1006_v53 = vmax.f32 %v976_v48, 0.0  ;;  %v995_v45 = vadd.f32 %v994_v43, %v7779_v35  ;;  %v1004_v27 = vmax.f32 %v992_v50, 0.0 }
 0x361   : > { %v1025_v49 = vpack.c.bf16 %v1015_v46, %v1014_v47  ;;  %v1001_v46 = vmax.f32 %v990_v44, 0.0 }
 0x362   : > { %v1018_v59 = vsel %vm7639_vm1, %v1006_v53, 0.0  ;;  %v1007_v47 = vmax.f32 %v995_v45, 0.0  ;;  %v1016_v39 = vsel %vm7647_vm3, %v1004_v27, 0.0  ;;  %v7035_v27 = vld [vmem:[%s12177_s5 + $0x4] sm:$0xf] }
 0x363   : > { %v956_v52 = vpop.f32.mrf.mxu3  ;;  %1043 = vrot.lane.b32.xlu0 %v1025_v49, %s12492_s22 }
 0x364   : > { %v957_v54 = vadd.f32 %v956_v52, %v7779_v35  ;;  %v1013_v52 = vsel %vm7647_vm3, %v1001_v46, 0.0  ;;  %v1019_v35 = vsel %vm7647_vm3, %v1007_v47, 0.0  ;;  %v6401_v46 = vld [vmem:[%s12177_s5 + $0x10] sm:$0xf] }
 0x365   : > { %v977_v55 = vpop.f32.mrf.mxu0  ;;  %v1024_v53 = vpack.c.bf16 %v1013_v52, %v1013_v52  ;;  %v7042_v52 = vld [vmem:[%s12177_s5 + $0x34] sm:$0xf0] }
 0x366   : > { %v1005_v57 = vmax.f32 %v957_v54, 0.0  ;;  %v978_v61 = vadd.f32 %v977_v55, %v7796_v58  ;;  %v996_v48 = vpop.f32.mrf.mxu1  ;;  %v1028_v54 = vpack.c.bf16 %v1019_v35, %v1019_v35 }
 0x367   : > { %v997_v49 = vadd.f32 %v996_v48, %v7796_v58  ;;  %v7038_v48 = vld [vmem:[%s12177_s5 + $0x14] sm:$0xf0] }
 0x368   : > { %v1017_v60 = vsel %vm7635_vm14, %v1005_v57, 0.0  ;;  %v1009_v2 = vmax.f32 %v978_v61, 0.0  ;;  %v8003_v50 = vor.u32 %v7038_v48, %v6401_v46 }
 0x369   : > { %v1027_v62 = vpack.c.bf16 %v1018_v59, %v1017_v60  ;;  %v1010_v55 = vmax.f32 %v997_v49, 0.0  ;;  %v6417_v49 = vld [vmem:[%s12177_s5 + $0x30] sm:$0xf] }
 0x36a   : > { %v1021_v7 = vsel %vm7639_vm1, %v1009_v2, 0.0  ;;  %v8005_v35 = vor.u32 %v7042_v52, %v6417_v49 }
 0x36b   : > { %v958_v1 = vpop.f32.mrf.mxu3  ;;  %1047 = vrot.lane.b32.xlu2 %v1027_v62, %s12492_s22  ;;  %v1022_v56 = vsel %vm7647_vm3, %v1010_v55, 0.0  ;;  %v1226_v55 = vld [vmem:[%s12178_s6 + $0x38] sm:$0xff] }
 0x36c   : > { %v959_v3 = vadd.f32 %v958_v1, %v7796_v58  ;;  %v1030_v57 = vpack.c.bf16 %v1022_v56, %v1022_v56  ;;  %v1026_v58 = vpack.c.bf16 %v1016_v39, %v1016_v39  ;;  %v6395_v56 = vld [vmem:[%s12177_s5 + $0x8] sm:$0xf0] }
 0x36d   : > { %v8030_v39 = vor.u32 %v7035_v27, %v6395_v56 }
 0x36e   : > { %v1008_v5 = vmax.f32 %v959_v3, 0.0 }
 0x370   : > { %v1020_v8 = vsel %vm7635_vm14, %v1008_v5, 0.0 }
 0x371   : > { %v1029_v12 = vpack.c.bf16 %v1021_v7, %v1020_v8 }
 0x373   : > { %1039 = vrot.lane.b32.xlu2 %v1023_v9, %s12492_s22  ;;  %1051 = vrot.lane.b32.xlu1 %v1029_v12, %s12492_s22 }
 0x3c5   : > { %v7815_v13 = vpop.permute.xlu2 %1047 }
 0x3c6   : > { %v1057_v14 = vrot.slane %v7815_v13, 4 }
 0x3c8   : > { %v1063_v15 = vsel %vm612_vm0, %v1057_v14, %v7815_v13  ;;  %v6409_v13 = vld [vmem:[%s12177_s5 + $0x20] sm:$0xf] }
 0x3c9   : > { %1079 = vst.msk [vmem:[#allocation2 + $0x18] sm:$0xff] %vm7727_vm11, %v1063_v15 }
 0x3cd   : > { %v7824_v16 = vpop.permute.xlu2 %1039 }
 0x3ce   : > { %v1055_v17 = vrot.slane %v7824_v16, 4 }
 0x3d0   : > { %v1059_v18 = vsel %vm612_vm0, %v1055_v17, %v7824_v16  ;;  %v7032_v36 = vld [vmem:[#allocation2 + $0x1c] sm:$0xf]  ;;  %v6381_v38 = vld [vmem:[#allocation2 + $0x18] sm:$0xf] }
 0x3d1   : > { %1075 = vst.msk [vmem:[#allocation2] sm:$0xff] %vm7727_vm11, %v1059_v18 }
 0x3d5   : > { %v7833_v10 = vpop.permute.xlu0 %1043 }
 0x3d6   : > { %v1056_v19 = vrot.slane %v7833_v10, 4 }
 0x3d8   : > { %v1061_v20 = vsel %vm612_vm0, %v1056_v19, %v7833_v10  ;;  %v6369_v21 = vld [vmem:[#allocation2] sm:$0xf]  ;;  %v7029_v24 = vld [vmem:[#allocation2 + $0x4] sm:$0xf] }
 0x3d9   : > { %1077 = vst.msk [vmem:[#allocation2 + $0xc] sm:$0xff] %vm7727_vm11, %v1061_v20 }
 0x3e0   : > { %v7030_v23 = vld [vmem:[#allocation2 + $0x8] sm:$0xf0]  ;;  %v6371_v25 = vld [vmem:[#allocation2 + $0xc] sm:$0xf0] }
 0x3e1   : > { %v7842_v26 = vor.u32 %v7030_v23, %v6369_v21  ;;  %v7844_v28 = vor.u32 %v7029_v24, %v6371_v25 }
 0x3e3   : > { %1167 = vrot.lane.b32.xlu0 %v7842_v26, %s12192_s30  ;;  %1169 = vrot.lane.b32.xlu1 %v7844_v28, %s12192_s30 }
 0x3e5   : > { %v7850_v30 = vpop.permute.xlu1 %1051 }
 0x3e6   : > { %v1058_v31 = vrot.slane %v7850_v30, 4 }
 0x3e8   : > { %v1065_v32 = vsel %vm612_vm0, %v1058_v31, %v7850_v30  ;;  %v6393_v30 = vld [vmem:[%s12177_s5] sm:$0xf] }
 0x3e9   : > { %1081 = vst.msk [vmem:[#allocation2 + $0x24] sm:$0xff] %vm7727_vm11, %v1065_v32 }
 0x3f0   : > { %v6383_v37 = vld [vmem:[#allocation2 + $0x24] sm:$0xf0]  ;;  %v7033_v40 = vld [vmem:[#allocation2 + $0x20] sm:$0xf0] }
 0x3f1   : > { %v7859_v41 = vor.u32 %v7032_v36, %v6383_v37  ;;  %v7861_v42 = vor.u32 %v7033_v40, %v6381_v38 }
 0x3f3   : > { %1175 = vrot.lane.b32.xlu2 %v7859_v41, %s12192_s30  ;;  %1153 = vrot.lane.b32.xlu0 %v7859_v41, %s12194_s9 }
 0x3f4   : > { %1173 = vrot.lane.b32.xlu1 %v7861_v42, %s12192_s30  ;;  %s6242_s30 = scalar_lea.sflag [#allocation5], %s447_s1 }
 0x3fb   : > { %1151 = vrot.lane.b32.xlu2 %v7861_v42, %s12194_s9  ;;  %1129 = vrot.lane.b32.xlu0 %v7861_v42, %s12190_s29 }
 0x3fc   : > { %1145 = vrot.lane.b32.xlu1 %v7842_v26, %s12194_s9 }
 0x403   : > { %1125 = vrot.lane.b32.xlu0 %v7844_v28, %s12190_s29  ;;  %1147 = vrot.lane.b32.xlu2 %v7844_v28, %s12194_s9  ;;  %s12495_s9 = smov 125  }
 0x404   : > { %1131 = vrot.lane.b32.xlu1 %v7859_v41, %s12190_s29 }
 0x40b   : > { %1041 = vrot.lane.b32.xlu0 %v1024_v53, %s12492_s22  ;;  %1123 = vrot.lane.b32.xlu2 %v7842_v26, %s12190_s29  ;;  %s12496_s29 = smov 127   ;;  %v1225_v53 = vld [vmem:[%s12178_s6 + $0x30] sm:$0xff] }
 0x40c   : > { %1049 = vrot.lane.b32.xlu1 %v1028_v54, %s12492_s22  ;;  %v1224_v54 = vld [vmem:[%s12178_s6 + $0x28] sm:$0xff] }
 0x413   : > { %1197 = vrot.lane.b32.xlu0 %v7859_v41, %s12493_s15  ;;  %1053 = vrot.lane.b32.xlu2 %v1030_v57, %s12492_s22  ;;  %v1223_v57 = vld [vmem:[%s12178_s6 + $0x20] sm:$0xff] }
 0x414   : > { %1045 = vrot.lane.b32.xlu1 %v1026_v58, %s12492_s22  ;;  %v1219_v58 = vld [vmem:[%s12178_s6] sm:$0xff] }
 0x41b   : > { %1195 = vrot.lane.b32.xlu2 %v7861_v42, %s12493_s15 }
 0x41c   : > { %1189 = vrot.lane.b32.xlu1 %v7842_v26, %s12493_s15 }
 0x423   : > { %1191 = vrot.lane.b32.xlu2 %v7844_v28, %s12493_s15 }
 0x44d   : > { %v7907_v59 = vpop.permute.xlu2 %1175 }
 0x455   : > { %v1152_v60 = vpop.permute.xlu2 %1151  ;;  %v1168_v61 = vpop.permute.xlu0 %1167 }
 0x456   : > { %v7909_v62 = vpop.permute.xlu1 %1169 }
 0x457   : > { %v1179_v4 = vsel %vm660_vm6, %v1168_v61, %v7909_v62  ;;  %v1222_v61 = vld [vmem:[%s12178_s6 + $0x18] sm:$0xff] }
 0x45d   : > { %v7911_v63 = vpop.permute.xlu2 %1147 }
 0x465   : > { %v7913_v0 = vpop.permute.xlu0 %1153  ;;  %v1124_v2 = vpop.permute.xlu2 %1123 }
 0x466   : > { %v1174_v1 = vpop.permute.xlu1 %1173  ;;  %v1159_v9 = vsel %vm645_vm2, %v1152_v60, %v7913_v0  ;;  %v1221_v60 = vld [vmem:[%s12178_s6 + $0x10] sm:$0xff] }
 0x467   : > { %v1181_v3 = vsel %vm660_vm6, %v1174_v1, %v7907_v59  ;;  %v1220_v1 = vld [vmem:[%s12178_s6 + $0x8] sm:$0xff] }
 0x468   : > { %1316 = vmatpush.bf16.msra.mxu0 %v1181_v3  ;;  %7183 = vmatpush.bf16.msra.mxu2 %v1181_v3  ;;  %v6403_v3 = vld [vmem:[%s12177_s5 + $0x18] sm:$0xf0] }
 0x46c   : > { %1317 = vmatpush.bf16.msra.mxu0 %v1179_v4  ;;  %7184 = vmatpush.bf16.msra.mxu2 %v1179_v4 }
 0x46d   : > { %v1130_v5 = vpop.permute.xlu0 %1129  ;;  %v1054_v7 = vpop.permute.xlu2 %1053 }
 0x46e   : > { %v1146_v6 = vpop.permute.xlu1 %1145  ;;  %v1066_v8 = vsel %vm612_vm0, %v1058_v31, %v1054_v7  ;;  %v7036_v31 = vld [vmem:[%s12177_s5 + $0x4] sm:$0xf0] }
 0x46f   : > { %1082 = vst.msk [vmem:[#allocation2 + $0x2c] sm:$0xf] %vm825_vm12, %v1066_v8  ;;  %v1157_v12 = vsel %vm645_vm2, %v1146_v6, %v7911_v63  ;;  %v7957_v16 = vor.u32 %v7036_v31, %v6393_v30  ;;  %v6411_v6 = vld [vmem:[%s12177_s5 + $0x28] sm:$0xf0]  ;;  %v7041_v8 = vld [vmem:[%s12177_s5 + $0x34] sm:$0xf] }
 0x470   : > { %1318 = vmatpush.bf16.msra.mxu0 %v1159_v9  ;;  %7185 = vmatpush.bf16.msra.mxu2 %v1159_v9  ;;  %v6419_v9 = vld [vmem:[%s12177_s5 + $0x38] sm:$0xf0] }
 0x474   : > { %1319 = vmatpush.bf16.msra.mxu0 %v1157_v12  ;;  %7186 = vmatpush.bf16.msra.mxu2 %v1157_v12  ;;  %v8072_v12 = vor.u32 %v7041_v8, %v6419_v9 }
 0x475   : > { %v7927_v15 = vpop.permute.xlu0 %1125  ;;  %v1196_v32 = vpop.permute.xlu2 %1195 }
 0x476   : > { %v7929_v18 = vpop.permute.xlu1 %1131  ;;  %v1135_v21 = vsel %vm630_vm4, %v1124_v2, %v7927_v15  ;;  %v7037_v2 = vld [vmem:[%s12177_s5 + $0x14] sm:$0xf] }
 0x477   : > { %v1137_v20 = vsel %vm630_vm4, %v1130_v5, %v7929_v18  ;;  %v6406_v4 = vor.u32 %v7037_v2, %v6403_v3  ;;  %v7039_v5 = vld [vmem:[%s12177_s5 + $0x24] sm:$0xf] }
 0x478   : > { %1320 = vmatpush.bf16.msra.mxu0 %v1137_v20  ;;  %7187 = vmatpush.bf16.msra.mxu2 %v1137_v20  ;;  %v8062_v7 = vor.u32 %v7039_v5, %v6411_v6 }
 0x47c   : > { %1321 = vmatpush.bf16.msra.mxu0 %v1135_v21  ;;  %7188 = vmatpush.bf16.msra.mxu2 %v1135_v21 }
 0x47d   : > { %v1042_v23 = vpop.permute.xlu0 %1041  ;;  %v7979_v10 = vpop.permute.xlu2 %1191 }
 0x47e   : > { %v1060_v24 = vsel %vm612_vm0, %v1055_v17, %v1042_v23  ;;  %v1050_v25 = vpop.permute.xlu1 %1049 }
 0x47f   : > { %1076 = vst.msk [vmem:[#allocation2 + $0x8] sm:$0xf] %vm825_vm12, %v1060_v24  ;;  %v1064_v29 = vsel %vm612_vm0, %v1057_v14, %v1050_v25  ;;  %v7040_v14 = vld [vmem:[%s12177_s5 + $0x24] sm:$0xf0] }
 0x480   : > { %1080 = vst.msk [vmem:[#allocation2 + $0x20] sm:$0xf] %vm825_vm12, %v1064_v29  ;;  %1322 = vmatpush.bf16.msra.mxu0 %v7861_v42  ;;  %7189 = vmatpush.bf16.msra.mxu2 %v7861_v42  ;;  %v7959_v17 = vor.u32 %v7040_v14, %v6409_v13  ;;  %v7034_v42 = vld [vmem:[#allocation2 + $0x28] sm:$0xf0] }
 0x484   : > { %1323 = vmatpush.bf16.msra.mxu0 %v7842_v26  ;;  %7190 = vmatpush.bf16.msra.mxu2 %v7842_v26 }
 0x485   : > { %v7963_v33 = vpop.permute.xlu0 %1197 }
 0x486   : > { %v1046_v36 = vpop.permute.xlu1 %1045  ;;  %v1203_v37 = vsel %vm675_vm5, %v1196_v32, %v7963_v33  ;;  %v6377_v44 = vld [vmem:[#allocation2 + $0x8] sm:$0xf] }
 0x487   : > { %v1062_v38 = vsel %vm612_vm0, %v1056_v19, %v1046_v36  ;;  %1324 = vmatmul.bf16.vlgmr.msra.gmra.mxu0 %v7957_v16  ;;  %1334 = vmatmul.bf16.vlgmr.msra.gmra.mxu2 %v7959_v17  ;;  %v6389_v40 = vld [vmem:[#allocation2 + $0x20] sm:$0xf] }
 0x488   : > { %1078 = vst.msk [vmem:[#allocation2 + $0x14] sm:$0xf] %vm825_vm12, %v1062_v38  ;;  %1351 = vmatpush.bf16.msra.mxu0 %v1203_v37  ;;  %v7973_v26 = vor.u32 %v7034_v42, %v6389_v40 }
 0x48a   : > { %1155 = vrot.lane.b32.xlu2 %v7973_v26, %s12494_s0  ;;  %1177 = vrot.lane.b32.xlu0 %v7973_v26, %s12495_s9 }
 0x48e   : > { %v1190_v19 = vpop.permute.xlu1 %1189 }
 0x48f   : > { %v1201_v43 = vsel %vm675_vm5, %v1190_v19, %v7979_v10  ;;  %v7031_v45 = vld [vmem:[#allocation2 + $0x10] sm:$0xf0] }
 0x490   : > { %1352 = vmatpush.bf16.msra.mxu0 %v1201_v43  ;;  %v7986_v47 = vor.u32 %v7031_v45, %v6377_v44 }
 0x492   : > { %1171 = vrot.lane.b32.xlu1 %v7986_v47, %s12495_s9  ;;  %1127 = vrot.lane.b32.xlu2 %v7986_v47, %s12496_s29 }
 0x493   : > { %1149 = vrot.lane.b32.xlu0 %v7986_v47, %s12494_s0 }
 0x497   : > { %1329 = vmatmul.bf16.gmra.mxu0 %v8003_v50  ;;  %1339 = vmatmul.bf16.gmra.mxu2 %v8005_v35 }
 0x49a   : > { %1133 = vrot.lane.b32.xlu1 %v7973_v26, %s12496_s29  ;;  %1259 = vperm.xlu2 %7297, %v1225_v53  }
 0x49b   : > { %1199 = vrot.lane.b32.xlu0 %v7973_v26, %s12493_s15 }
 0x4a2   : > { %1193 = vrot.lane.b32.xlu1 %v7986_v47, %s12493_s15  ;;  %1254 = vperm.xlu2 %7297, %v1224_v54  }
 0x4a3   : > { %1264 = vperm.xlu0 %7298, %v1226_v55  }
 0x4a7   : > { %6423 = vmatmul.msk.bf16.vlgmr.msra.gmra.mxu0 %vm1303_vm15, %v8030_v39 }
 0x4aa   : > { %1249 = vperm.xlu1 %7296, %v1223_v57   ;;  %1229 = vperm.xlu2 %7297, %v1219_v58  }
 0x4ab   : > { %1239 = vperm.xlu0 %7298, %v1221_v60  }
 0x4b2   : > { %1244 = vperm.xlu1 %7296, %v1222_v61  }
 0x4b3   : > { %1234 = vperm.xlu0 %7298, %v1220_v1  }
 0x4b7   : > { %6424 = vmatmul.msk.bf16.gmra.mxu0 %vm1303_vm15, %v6406_v4 }
 0x4c7   : > { %6425 = vmatmul.msk.bf16.gmra.mxu0 %vm1303_vm15, %v8062_v7 }
 0x4d7   : > { %6426 = vmatmul.msk.bf16.gmra.mxu0 %vm1303_vm15, %v8072_v12 }
 0x4e4   : > { %v1156_v20 = vpop.permute.xlu2 %1155 }
 0x4e5   : > { %v1160_v13 = vsel %vm645_vm2, %v7913_v0, %v1156_v20 }
 0x4ec   : > { %v1128_v24 = vpop.permute.xlu2 %1127 }
 0x4ed   : > { %v1136_v42 = vsel %vm630_vm4, %v7927_v15, %v1128_v24 }
 0x4f4   : > { %v8082_v14 = vpop.permute.xlu2 %1259 }
 0x4fc   : > { %v1178_v21 = vpop.permute.xlu0 %1177  ;;  %v8096_v19 = vpop.permute.xlu2 %1254 }
 0x4fd   : > { %1432 = vmatpush.bf16.msrb.mxu2 %v1178_v21  ;;  %v1182_v23 = vsel %vm660_vm6, %v7907_v59, %v1178_v21 }
 0x4fe   : > { %1374 = vmatpush.bf16.msra.mxu0 %v1182_v23 }
 0x504   : > { %v1172_v25 = vpop.permute.xlu1 %1171  ;;  %v1325_v29 = vpop.f32.mrf.mxu0 }
 0x505   : > { %v1150_v30 = vpop.permute.xlu0 %1149  ;;  %1433 = vmatpush.bf16.msrb.mxu2 %v1172_v25  ;;  %v1180_v31 = vsel %vm660_vm6, %v7909_v62, %v1172_v25  ;;  %v1230_v15 = vpop.permute.xlu2 %1229 }
 0x506   : > { %1375 = vmatpush.bf16.msra.mxu0 %v1180_v31  ;;  %v1158_v37 = vsel %vm645_vm2, %v7911_v63, %v1150_v30 }
 0x509   : > { %1434 = vmatpush.bf16.msrb.mxu2 %v1156_v20 }
 0x50a   : > { %1376 = vmatpush.bf16.msra.mxu0 %v1160_v13  ;;  %v1335_v48 = vpop.f32.mrf.mxu2 }
 0x50c   : > { %v8084_v32 = vpop.f32.mrf.mxu0  ;;  %v1134_v59 = vpop.permute.xlu1 %1133 }
 0x50d   : > { %v1200_v36 = vpop.permute.xlu0 %1199  ;;  %1435 = vmatpush.bf16.msrb.mxu2 %v1150_v30  ;;  %v1138_v0 = vsel %vm630_vm4, %v7929_v18, %v1134_v59 }
 0x50e   : > { %1467 = vmatpush.bf16.msra.mxu3 %v1200_v36  ;;  %1377 = vmatpush.bf16.msra.mxu0 %v1158_v37  ;;  %v1204_v62 = vsel %vm675_vm5, %v7963_v33, %v1200_v36  ;;  %v1326_v33 = vadd.f32 %v1325_v29, %v1230_v15 }
 0x50f   : > { %1409 = vmatpush.bf16.msra.mxu1 %v1204_v62 }
 0x511   : > { %1436 = vmatpush.bf16.msrb.mxu2 %v1134_v59 }
 0x512   : > { %1378 = vmatpush.bf16.msra.mxu0 %v1138_v0  ;;  %v1337_v52 = vpop.f32.mrf.mxu2 }
 0x514   : > { %v1330_v38 = vpop.f32.mrf.mxu0  ;;  %v1194_v40 = vpop.permute.xlu1 %1193 }
 0x515   : > { %1437 = vmatpush.bf16.msrb.mxu2 %v1128_v24  ;;  %1468 = vmatpush.bf16.msra.mxu3 %v1194_v40  ;;  %v1202_v63 = vsel %vm675_vm5, %v7979_v10, %v1194_v40 }
 0x516   : > { %1379 = vmatpush.bf16.msra.mxu0 %v1136_v42  ;;  %1410 = vmatpush.bf16.msra.mxu1 %v1202_v63 }
 0x518   : > { %6431 = vmatmul.msk.bf16.vlgmr.msra.gmra.mxu3 %vm1303_vm15, %v8030_v39 }
 0x519   : > { %1438 = vmatpush.bf16.msrb.mxu2 %v7973_v26  ;;  %6427 = vmatmul.msk.bf16.vlgmr.msra.gmra.mxu1 %vm1303_vm15, %v8030_v39  ;;  %v8110_v26 = vpop.permute.xlu0 %1264 }
 0x51a   : > { %1380 = vmatpush.bf16.msra.mxu0 %v7859_v41  ;;  %v1340_v53 = vpop.f32.mrf.mxu2 }
 0x51c   : > { %v8104_v18 = vpop.f32.mrf.mxu0 }
 0x51d   : > { %1439 = vmatpush.bf16.msrb.mxu2 %v7986_v47 }
 0x51e   : > { %1381 = vmatpush.bf16.msra.mxu0 %v7844_v28 }
 0x520   : > { %1440 = vmatmul.bf16.vlgmr.msrb.gmra.mxu2 %v7957_v16 }
 0x521   : > { %1382 = vmatmul.bf16.vlgmr.msra.gmra.mxu0 %v7957_v16  ;;  %v8116_v44 = vpop.permute.xlu0 %1239 }
 0x522   : > { %v1331_v28 = vadd.f32 %v1330_v38, %v8116_v44  ;;  %v1342_v55 = vpop.f32.mrf.mxu2 }
 0x524   : > { %v1354_v10 = vpop.f32.mrf.mxu0 }
 0x525   : > { %v1355_v43 = vadd.f32 %v1354_v10, %v1326_v33 }
 0x527   : > { %v1490_v57 = vmax.f32 %v1355_v43, 0.0  ;;  %v1341_v43 = vadd.f32 %v1340_v53, %v8082_v14  ;;  %v1338_v53 = vadd.f32 %v1337_v52, %v8096_v19 }
 0x528   : > { %6432 = vmatmul.msk.bf16.gmra.mxu3 %vm1303_vm15, %v6406_v4 }
 0x529   : > { %6428 = vmatmul.msk.bf16.gmra.mxu1 %vm1303_vm15, %v6406_v4  ;;  %v8141_v2 = vsel %vm7635_vm14, %v1490_v57, 0.0 }
 0x52c   : > { %v8114_v41 = vpop.f32.mrf.mxu0 }
 0x530   : > { %1445 = vmatmul.bf16.gmra.mxu2 %v8003_v50 }
 0x531   : > { %1387 = vmatmul.bf16.gmra.mxu0 %v8003_v50 }
 0x534   : > { %v1359_v16 = vpop.f32.mrf.mxu0 }
 0x535   : > { %v8121_v45 = vadd.f32 %v1359_v16, %v1331_v28 }
 0x538   : > { %6433 = vmatmul.msk.bf16.gmra.mxu3 %vm1303_vm15, %v8062_v7 }
 0x539   : > { %6429 = vmatmul.msk.bf16.gmra.mxu1 %vm1303_vm15, %v8062_v7 }
 0x53c   : > { %v1361_v46 = vpop.f32.mrf.mxu0 }
 0x540   : > { %1450 = vmatmul.bf16.gmra.mxu2 %v7959_v17 }
 0x541   : > { %1392 = vmatmul.bf16.gmra.mxu0 %v7959_v17 }
 0x544   : > { %v1364_v47 = vpop.f32.mrf.mxu0 }
 0x548   : > { %6434 = vmatmul.msk.bf16.gmra.mxu3 %vm1303_vm15, %v8072_v12 }
 0x549   : > { %6430 = vmatmul.msk.bf16.gmra.mxu1 %vm1303_vm15, %v8072_v12  ;;  %v8153_v12 = vpop.permute.xlu1 %1249 }
 0x54a   : > { %v1336_v23 = vadd.f32 %v1335_v48, %v8153_v12 }
 0x54c   : > { %v8135_v49 = vpop.f32.mrf.mxu0  ;;  %v1365_v24 = vadd.f32 %v1364_v47, %v1336_v23 }
 0x54e   : > { %v1502_v13 = vmax.f32 %v1365_v24, 0.0 }
 0x550   : > { %1455 = vmatmul.bf16.gmra.mxu2 %v8005_v35  ;;  %v1526_v40 = vsel %vm7635_vm14, %v1502_v13, 0.0 }
 0x551   : > { %1397 = vmatmul.bf16.gmra.mxu0 %v8005_v35  ;;  %v8156_v25 = vpop.permute.xlu1 %1244 }
 0x552   : > { %v1333_v36 = vadd.f32 %v8104_v18, %v8156_v25 }
 0x554   : > { %v1369_v50 = vpop.f32.mrf.mxu0  ;;  %v1362_v38 = vadd.f32 %v1361_v46, %v1333_v36 }
 0x555   : > { %v1370_v16 = vadd.f32 %v1369_v50, %v1341_v43 }
 0x556   : > { %v1499_v10 = vmax.f32 %v1362_v38, 0.0 }
 0x558   : > { %v1523_v28 = vsel %vm7635_vm14, %v1499_v10, 0.0 }
 0x55c   : > { %v1371_v54 = vpop.f32.mrf.mxu0 }
 0x596   : > { %v1412_v17 = vpop.f32.mrf.mxu1 }
 0x59b   : > { %v1470_v35 = vpop.f32.mrf.mxu3 }
 0x59e   : > { %v1383_v27 = vpop.f32.mrf.mxu0  ;;  %v8137_v56 = vpop.f32.mrf.mxu1 }
 0x59f   : > { %v1384_v39 = vadd.f32 %v1383_v27, %v1230_v15 }
 0x5a1   : > { %v1413_v58 = vadd.f32 %v1412_v17, %v1384_v39  ;;  %v1508_v39 = vmax.f32 %v1370_v16, 0.0 }
 0x5a3   : > { %v1491_v60 = vmax.f32 %v1413_v58, 0.0  ;;  %v1441_v61 = vpop.f32.mrf.mxu2  ;;  %v1343_v58 = vadd.f32 %v1342_v55, %v8110_v26  ;;  %v1532_v50 = vsel %vm7635_vm14, %v1508_v39, 0.0 }
 0x5a4   : > { %v1442_v1 = vadd.f32 %v1441_v61, %v1230_v15 }
 0x5a5   : > { %v8145_v3 = vsel %vm7639_vm1, %v1491_v60, 0.0 }
 0x5a6   : > { %v8147_v4 = vadd.f32 %v1470_v35, %v1442_v1  ;;  %v8149_v5 = vpop.f32.mrf.mxu0  ;;  %v1417_v6 = vpop.f32.mrf.mxu1  ;;  %v1538_v7 = vpack.c.bf16 %v8145_v3, %v8141_v2  ;;  %v1367_v35 = vadd.f32 %v8135_v49, %v1338_v53  ;;  %v1372_v1 = vadd.f32 %v1371_v54, %v1343_v58 }
 0x5a8   : > { %v1505_v55 = vmax.f32 %v1367_v35, 0.0  ;;  %v8262_v35 = vpop.f32.mrf.mxu3 }
 0x5ae   : > { %v1388_v8 = vpop.f32.mrf.mxu0  ;;  %v1419_v9 = vpop.f32.mrf.mxu1 }
 0x5af   : > { %v1389_v23 = vadd.f32 %v1388_v8, %v8116_v44 }
 0x5b6   : > { %v1390_v20 = vpop.f32.mrf.mxu0  ;;  %v1422_v21 = vpop.f32.mrf.mxu1 }
 0x5b7   : > { %v1391_v30 = vadd.f32 %v1390_v20, %v8156_v25 }
 0x5b9   : > { %v1420_v37 = vadd.f32 %v1419_v9, %v1391_v30  ;;  %v1511_v30 = vmax.f32 %v1372_v1, 0.0 }
 0x5bb   : > { %v1500_v33 = vmax.f32 %v1420_v37, 0.0  ;;  %v1535_v8 = vsel %vm7635_vm14, %v1511_v30, 0.0  ;;  %v8193_v37 = vpop.permute.xlu0 %1234 }
 0x5bd   : > { %v1524_v18 = vsel %vm7639_vm1, %v1500_v33, 0.0 }
 0x5be   : > { %v1393_v29 = vpop.f32.mrf.mxu0  ;;  %v1424_v0 = vpop.f32.mrf.mxu1  ;;  %v1544_v48 = vpack.c.bf16 %v1524_v18, %v1523_v28 }
 0x5bf   : > { %v1394_v31 = vadd.f32 %v1393_v29, %v8153_v12 }
 0x5c1   : > { %v1423_v59 = vadd.f32 %v1422_v21, %v1394_v31  ;;  %v1418_v31 = vadd.f32 %v1417_v6, %v1389_v23  ;;  %v1386_v6 = vadd.f32 %v8149_v5, %v8193_v37 }
 0x5c3   : > { %v1503_v62 = vmax.f32 %v1423_v59, 0.0  ;;  %v1529_v59 = vsel %vm7635_vm14, %v1505_v55, 0.0  ;;  %v1497_v38 = vmax.f32 %v1418_v31, 0.0 }
 0x5c5   : > { %v1527_v42 = vsel %vm7639_vm1, %v1503_v62, 0.0 }
 0x5c6   : > { %v1395_v63 = vpop.f32.mrf.mxu0  ;;  %v1546_v15 = vpack.c.bf16 %v1527_v42, %v1526_v40  ;;  %v1427_v46 = vpop.f32.mrf.mxu1  ;;  %v1496_v40 = vmax.f32 %v8121_v45, 0.0  ;;  %v1328_v42 = vadd.f32 %v8084_v32, %v8193_v37 }
 0x5c7   : > { %v1396_v17 = vadd.f32 %v1395_v63, %v8096_v19  ;;  %v1415_v63 = vadd.f32 %v8137_v56, %v1386_v6 }
 0x5c8   : > { %1586 = vrot.lane.b32.xlu0 %v1546_v15, %s12492_s22  ;;  %v1521_v15 = vsel %vm7639_vm1, %v1497_v38, 0.0  ;;  %v1357_v33 = vadd.f32 %v8114_v41, %v1328_v42  ;;  %v1520_v5 = vsel %vm7635_vm14, %v1496_v40, 0.0 }
 0x5c9   : > { %v1425_v60 = vadd.f32 %v1424_v0, %v1396_v17  ;;  %v1542_v10 = vpack.c.bf16 %v1521_v15, %v1520_v5  ;;  %v1494_v43 = vmax.f32 %v1415_v63, 0.0 }
 0x5ca   : > { %v1493_v32 = vmax.f32 %v1357_v33, 0.0 }
 0x5cb   : > { %v1506_v24 = vmax.f32 %v1425_v60, 0.0  ;;  %v1518_v45 = vsel %vm7639_vm1, %v1494_v43, 0.0 }
 0x5cc   : > { %v1517_v56 = vsel %vm7635_vm14, %v1493_v32, 0.0 }
 0x5cd   : > { %v1530_v54 = vsel %vm7639_vm1, %v1506_v24, 0.0  ;;  %v1540_v41 = vpack.c.bf16 %v1518_v45, %v1517_v56 }
 0x5ce   : > { %v1398_v47 = vpop.f32.mrf.mxu0  ;;  %v1429_v29 = vpop.f32.mrf.mxu1  ;;  %v1548_v0 = vpack.c.bf16 %v1530_v54, %v1529_v59 }
 0x5cf   : > { %v1399_v27 = vadd.f32 %v1398_v47, %v8082_v14 }
 0x5d0   : > { %1582 = vrot.lane.b32.xlu0 %v1544_v48, %s12492_s22 }
 0x5d1   : > { %v1428_v57 = vadd.f32 %v1427_v46, %v1399_v27 }
 0x5d3   : > { %v1509_v61 = vmax.f32 %v1428_v57, 0.0  ;;  %v8254_v57 = vpop.f32.mrf.mxu2 }
 0x5d5   : > { %v1533_v9 = vsel %vm7639_vm1, %v1509_v61, 0.0 }
 0x5d6   : > { %v1400_v20 = vpop.f32.mrf.mxu0  ;;  %v1550_v21 = vpack.c.bf16 %v1533_v9, %v1532_v50 }
 0x5d7   : > { %v1401_v52 = vadd.f32 %v1400_v20, %v8110_v26 }
 0x5d8   : > { %1594 = vrot.lane.b32.xlu1 %v1550_v21, %s12492_s22 }
 0x5d9   : > { %v1430_v49 = vadd.f32 %v1429_v29, %v1401_v52 }
 0x5db   : > { %v1512_v13 = vmax.f32 %v1430_v49, 0.0  ;;  %v8282_v23 = vpop.f32.mrf.mxu2  ;;  %v8291_v49 = vpop.f32.mrf.mxu3 }
 0x5dd   : > { %v1536_v36 = vsel %vm7639_vm1, %v1512_v13, 0.0 }
 0x5de   : > { %v1552_v62 = vpack.c.bf16 %v1536_v36, %v1535_v8 }
 0x5e0   : > { %1598 = vrot.lane.b32.xlu2 %v1552_v62, %s12492_s22  ;;  %1590 = vrot.lane.b32.xlu1 %v1548_v0, %s12492_s22 }
 0x5e3   : > { %v1448_v59 = vpop.f32.mrf.mxu2  ;;  %v1477_v42 = vpop.f32.mrf.mxu3 }
 0x5e8   : > { %1578 = vrot.lane.b32.xlu2 %v1542_v10, %s12492_s22  ;;  %1570 = vrot.lane.b32.xlu1 %v1538_v7, %s12492_s22 }
 0x5eb   : > { %v1451_v5 = vpop.f32.mrf.mxu2  ;;  %v1480_v45 = vpop.f32.mrf.mxu3 }
 0x5f0   : > { %1574 = vrot.lane.b32.xlu2 %v1540_v41, %s12492_s22 }
 0x63a   : > { %v8218_v18 = vpop.permute.xlu0 %1586  ;;  %v8220_v28 = vpop.permute.xlu2 %1598 }
 0x63b   : > { %v1606_v16 = vrot.slane %v8218_v18, 4  ;;  %v1609_v46 = vrot.slane %v8220_v28, 4 }
 0x63d   : > { %v1618_v2 = vsel %vm612_vm0, %v1606_v16, %v8218_v18  ;;  %v1624_v3 = vsel %vm612_vm0, %v1609_v46, %v8220_v28 }
 0x63e   : > { %1650 = vst.msk [vmem:[#allocation2 + $0x30] sm:$0xff] %vm7727_vm11, %v1618_v2 }
 0x63f   : > { %1656 = vst.msk [vmem:[#allocation2 + $0x54] sm:$0xff] %vm7727_vm11, %v1624_v3  ;;  %v1453_v3 = vpop.f32.mrf.mxu2 }
 0x642   : > { %v8236_v7 = vpop.permute.xlu0 %1582  ;;  %v8238_v47 = vpop.permute.xlu2 %1578 }
 0x643   : > { %v1605_v48 = vrot.slane %v8236_v7, 4  ;;  %v1604_v17 = vrot.slane %v8238_v47, 4 }
 0x645   : > { %v1616_v27 = vsel %vm612_vm0, %v1605_v48, %v8236_v7  ;;  %v1614_v39 = vsel %vm612_vm0, %v1604_v17, %v8238_v47  ;;  %v6461_v8 = vld [vmem:[#allocation2 + $0x30] sm:$0xf]  ;;  %v7049_v0 = vld [vmem:[#allocation2 + $0x34] sm:$0xf] }
 0x646   : > { %1648 = vst.msk [vmem:[#allocation2 + $0x24] sm:$0xff] %vm7727_vm11, %v1616_v27  ;;  %v7053_v10 = vld [vmem:[#allocation2 + $0x50] sm:$0xf0]  ;;  %v6475_v41 = vld [vmem:[#allocation2 + $0x54] sm:$0xf0] }
 0x647   : > { %1646 = vst.msk [vmem:[#allocation2 + $0x18] sm:$0xff] %vm7727_vm11, %v1614_v39  ;;  %v1482_v39 = vpop.f32.mrf.mxu3 }
 0x64a   : > { %v8256_v53 = vpop.permute.xlu1 %1594  ;;  %v8258_v58 = vpop.permute.xlu2 %1574 }
 0x64b   : > { %v1608_v60 = vrot.slane %v8256_v53, 4  ;;  %v1603_v61 = vrot.slane %v8258_v58, 4 }
 0x64d   : > { %v1622_v50 = vsel %vm612_vm0, %v1608_v60, %v8256_v53  ;;  %v1612_v1 = vsel %vm612_vm0, %v1603_v61, %v8258_v58  ;;  %v7047_v9 = vld [vmem:[#allocation2 + $0x20] sm:$0xf0]  ;;  %v6451_v55 = vld [vmem:[#allocation2 + $0x24] sm:$0xf0] }
 0x64e   : > { %1654 = vst.msk [vmem:[#allocation2 + $0x48] sm:$0xff] %vm7727_vm11, %v1622_v50  ;;  %v6449_v20 = vld [vmem:[#allocation2 + $0x18] sm:$0xf]  ;;  %v7046_v29 = vld [vmem:[#allocation2 + $0x1c] sm:$0xf] }
 0x64f   : > { %1644 = vst.msk [vmem:[#allocation2 + $0xc] sm:$0xff] %vm7727_vm11, %v1612_v1  ;;  %v8276_v21 = vor.u32 %v7047_v9, %v6449_v20  ;;  %v8295_v31 = vor.u32 %v7046_v29, %v6451_v55  ;;  %v1456_v9 = vpop.f32.mrf.mxu2  ;;  %v1485_v20 = vpop.f32.mrf.mxu3  ;;  %v1452_v29 = vadd.f32 %v1451_v5, %v8153_v12  ;;  %v7059_v53 = vld [vmem:[%s12179_s7 + $0x20] sm:$0xf0] }
 0x651   : > { %1832 = vrot.lane.b32.xlu1 %v8276_v21, %s12495_s9  ;;  %1744 = vrot.lane.b32.xlu2 %v8276_v21, %s12496_s29  ;;  %v1481_v55 = vadd.f32 %v1480_v45, %v1452_v29  ;;  %v1457_v45 = vadd.f32 %v1456_v9, %v8082_v14 }
 0x652   : > { %v8284_v24 = vpop.permute.xlu1 %1590 }
 0x653   : > { %v1607_v52 = vrot.slane %v8284_v24, 4 }
 0x655   : > { %v1620_v30 = vsel %vm612_vm0, %v1607_v52, %v8284_v24  ;;  %v6473_v63 = vld [vmem:[#allocation2 + $0x48] sm:$0xf]  ;;  %v7052_v56 = vld [vmem:[#allocation2 + $0x4c] sm:$0xf] }
 0x656   : > { %1652 = vst.msk [vmem:[#allocation2 + $0x3c] sm:$0xff] %vm7727_vm11, %v1620_v30  ;;  %v7044_v33 = vld [vmem:[#allocation2 + $0x8] sm:$0xf0]  ;;  %v8318_v32 = vor.u32 %v7053_v10, %v6473_v63  ;;  %v8326_v2 = vor.u32 %v7052_v56, %v6475_v41  ;;  %v6439_v50 = vld [vmem:[#allocation2 + $0xc] sm:$0xf0] }
 0x657   : > { %v1458_v30 = vpop.f32.mrf.mxu2 }
 0x659   : > { %1834 = vrot.lane.b32.xlu2 %v8295_v31, %s12495_s9 }
 0x65a   : > { %v8299_v13 = vpop.permute.xlu1 %1570 }
 0x65b   : > { %v1602_v54 = vrot.slane %v8299_v13, 4 }
 0x65d   : > { %v1610_v36 = vsel %vm612_vm0, %v1602_v54, %v8299_v13  ;;  %v7050_v62 = vld [vmem:[#allocation2 + $0x38] sm:$0xf0]  ;;  %v6463_v6 = vld [vmem:[#allocation2 + $0x3c] sm:$0xf0] }
 0x65e   : > { %1642 = vst.msk [vmem:[#allocation2] sm:$0xff] %vm7727_vm11, %v1610_v36  ;;  %v8308_v38 = vor.u32 %v7050_v62, %v6461_v8  ;;  %v8310_v40 = vor.u32 %v7049_v0, %v6463_v6  ;;  %v1459_v8 = vadd.f32 %v1458_v30, %v8110_v26  ;;  %v1449_v36 = vadd.f32 %v1448_v59, %v8156_v25  ;;  %v1487_v0 = vpop.f32.mrf.mxu3  ;;  %v7062_v13 = vld [vmem:[%s12179_s7 + $0x38] sm:$0xf0] }
 0x65f   : > { %v1504_v62 = vmax.f32 %v1481_v55, 0.0  ;;  %v1447_v26 = vadd.f32 %v8282_v23, %v8116_v44  ;;  %v1444_v23 = vadd.f32 %v8254_v57, %v8193_v37  ;;  %v1454_v37 = vadd.f32 %v1453_v3, %v8096_v19 }
 0x660   : > { %1750 = vrot.lane.b32.xlu1 %v8308_v38, %s12496_s29  ;;  %v1488_v12 = vadd.f32 %v1487_v0, %v1459_v8  ;;  %v1478_v6 = vadd.f32 %v1477_v42, %v1449_v36 }
 0x661   : > { %1752 = vrot.lane.b32.xlu2 %v8310_v40, %s12496_s29  ;;  %v1528_v63 = vsel %vm7647_vm3, %v1504_v62, 0.0  ;;  %v1483_v14 = vadd.f32 %v1482_v39, %v1454_v37  ;;  %v1492_v39 = vmax.f32 %v8147_v4, 0.0 }
 0x662   : > { %v1547_v25 = vpack.c.bf16 %v1528_v63, %v1528_v63  ;;  %v1513_v59 = vmax.f32 %v1488_v12, 0.0 }
 0x663   : > { %v1516_v36 = vsel %vm7647_vm3, %v1492_v39, 0.0  ;;  %v6485_v39 = vld [vmem:[%s12179_s7] sm:$0xf] }
 0x664   : > { %v1537_v42 = vsel %vm7647_vm3, %v1513_v59, 0.0  ;;  %v1539_v0 = vpack.c.bf16 %v1516_v36, %v1516_v36  ;;  %v7056_v36 = vld [vmem:[%s12179_s7 + $0x8] sm:$0xf0] }
 0x665   : > { %v6437_v15 = vld [vmem:[#allocation2] sm:$0xf]  ;;  %v7043_v27 = vld [vmem:[#allocation2 + $0x4] sm:$0xf]  ;;  %v1553_v44 = vpack.c.bf16 %v1537_v42, %v1537_v42 }
 0x666   : > { %v8316_v43 = vor.u32 %v7044_v33, %v6437_v15  ;;  %v8334_v1 = vor.u32 %v7043_v27, %v6439_v50  ;;  %v1501_v15 = vmax.f32 %v1478_v6, 0.0  ;;  %v1476_v33 = vadd.f32 %v8291_v49, %v1447_v26 }
 0x667   : > { %v1473_v49 = vadd.f32 %v8262_v35, %v1444_v23  ;;  %v1486_v27 = vadd.f32 %v1485_v20, %v1457_v45  ;;  %v1507_v20 = vmax.f32 %v1483_v14, 0.0 }
 0x668   : > { %1840 = vrot.lane.b32.xlu1 %v8310_v40, %s12495_s9  ;;  %1738 = vrot.lane.b32.xlu0 %v8316_v43, %s12496_s29  ;;  %v1525_v5 = vsel %vm7647_vm3, %v1501_v15, 0.0  ;;  %v1498_v10 = vmax.f32 %v1476_v33, 0.0 }
 0x669   : > { %1844 = vrot.lane.b32.xlu2 %v8318_v32, %s12495_s9  ;;  %v1545_v56 = vpack.c.bf16 %v1525_v5, %v1525_v5  ;;  %v1495_v29 = vmax.f32 %v1473_v49, 0.0  ;;  %v1510_v57 = vmax.f32 %v1486_v27, 0.0  ;;  %v1531_v3 = vsel %vm7647_vm3, %v1507_v20, 0.0 }
 0x66a   : > { %v1522_v41 = vsel %vm7647_vm3, %v1498_v10, 0.0  ;;  %v1549_v8 = vpack.c.bf16 %v1531_v3, %v1531_v3 }
 0x66b   : > { %v1543_v50 = vpack.c.bf16 %v1522_v41, %v1522_v41  ;;  %v1534_v9 = vsel %vm7647_vm3, %v1510_v57, 0.0  ;;  %v1519_v35 = vsel %vm7647_vm3, %v1495_v29, 0.0 }
 0x66c   : > { %v1551_v55 = vpack.c.bf16 %v1534_v9, %v1534_v9  ;;  %v1541_v30 = vpack.c.bf16 %v1519_v35, %v1519_v35 }
 0x670   : > { %1758 = vrot.lane.b32.xlu1 %v8326_v2, %s12496_s29  ;;  %1746 = vrot.lane.b32.xlu0 %v8295_v31, %s12496_s29 }
 0x671   : > { %1826 = vrot.lane.b32.xlu2 %v8316_v43, %s12495_s9 }
 0x678   : > { %1838 = vrot.lane.b32.xlu0 %v8308_v38, %s12495_s9  ;;  %1740 = vrot.lane.b32.xlu1 %v8334_v1, %s12496_s29 }
 0x679   : > { %1802 = vrot.lane.b32.xlu2 %v8326_v2, %s12494_s0 }
 0x680   : > { %1756 = vrot.lane.b32.xlu0 %v8318_v32, %s12496_s29  ;;  %1800 = vrot.lane.b32.xlu1 %v8318_v32, %s12494_s0 }
 0x681   : > { %1788 = vrot.lane.b32.xlu2 %v8276_v21, %s12494_s0 }
 0x688   : > { %1846 = vrot.lane.b32.xlu0 %v8326_v2, %s12495_s9  ;;  %1796 = vrot.lane.b32.xlu1 %v8310_v40, %s12494_s0 }
 0x689   : > { %1784 = vrot.lane.b32.xlu2 %v8334_v1, %s12494_s0 }
 0x690   : > { %1828 = vrot.lane.b32.xlu0 %v8334_v1, %s12495_s9  ;;  %1782 = vrot.lane.b32.xlu1 %v8316_v43, %s12494_s0 }
 0x691   : > { %1588 = vrot.lane.b32.xlu2 %v1547_v25, %s12492_s22 }
 0x698   : > { %1794 = vrot.lane.b32.xlu0 %v8308_v38, %s12494_s0  ;;  %1600 = vrot.lane.b32.xlu1 %v1553_v44, %s12492_s22 }
 0x699   : > { %1584 = vrot.lane.b32.xlu2 %v1545_v56, %s12492_s22 }
 0x6a0   : > { %1790 = vrot.lane.b32.xlu0 %v8295_v31, %s12494_s0  ;;  %1580 = vrot.lane.b32.xlu1 %v1543_v50, %s12492_s22 }
 0x6a8   : > { %1596 = vrot.lane.b32.xlu0 %v1551_v55, %s12492_s22  ;;  %1576 = vrot.lane.b32.xlu1 %v1541_v30, %s12492_s22 }
 0x6ab   : > { %v1745_v19 = vpop.permute.xlu2 %1744 }
 0x6b0   : > { %1592 = vrot.lane.b32.xlu0 %v1549_v8, %s12492_s22 }
 0x6b3   : > { %v8397_v62 = vpop.permute.xlu2 %1834 }
 0x6b8   : > { %1572 = vrot.lane.b32.xlu0 %v1539_v0, %s12492_s22 }
 0x6bb   : > { %v8400_v12 = vpop.permute.xlu2 %1752 }
 0x6c3   : > { %v1845_v6 = vpop.permute.xlu2 %1844  ;;  %v1833_v63 = vpop.permute.xlu1 %1832 }
 0x6c4   : > { %v1852_v55 = vsel %vm660_vm6, %v1833_v63, %v8397_v62 }
 0x6cb   : > { %v1827_v26 = vpop.permute.xlu2 %1826 }
 0x6d2   : > { %v1751_v25 = vpop.permute.xlu1 %1750 }
 0x6d3   : > { %v8402_v59 = vpop.permute.xlu2 %1802  ;;  %v1766_v18 = vsel %vm630_vm4, %v1751_v25, %v8400_v12  ;;  %v7055_v25 = vld [vmem:[%s12179_s7 + $0x4] sm:$0xf] }
 0x6da   : > { %v8404_v15 = vpop.permute.xlu1 %1840  ;;  %v1739_v4 = vpop.permute.xlu0 %1738 }
 0x6db   : > { %v1789_v33 = vpop.permute.xlu2 %1788 }
 0x6e2   : > { %v8406_v42 = vpop.permute.xlu1 %1758  ;;  %v8408_v5 = vpop.permute.xlu0 %1746 }
 0x6e3   : > { %v8410_v44 = vpop.permute.xlu2 %1784  ;;  %v1764_v57 = vsel %vm630_vm4, %v1745_v19, %v8408_v5 }
 0x6ea   : > { %v1839_v23 = vpop.permute.xlu0 %1838  ;;  %v8412_v10 = vpop.permute.xlu1 %1740 }
 0x6eb   : > { %v1589_v45 = vpop.permute.xlu2 %1588  ;;  %v1762_v7 = vsel %vm630_vm4, %v1739_v4, %v8412_v10  ;;  %v6487_v4 = vld [vmem:[%s12179_s7 + $0xc] sm:$0xf0] }
 0x6ec   : > { %v1619_v56 = vsel %vm612_vm0, %v1606_v16, %v1589_v45 }
 0x6ed   : > { %1651 = vst.msk [vmem:[#allocation2 + $0x38] sm:$0xf] %vm825_vm12, %v1619_v56 }
 0x6f2   : > { %v1757_v49 = vpop.permute.xlu0 %1756  ;;  %v1801_v41 = vpop.permute.xlu1 %1800 }
 0x6f3   : > { %v1585_v27 = vpop.permute.xlu2 %1584  ;;  %v1768_v50 = vsel %vm630_vm4, %v1757_v49, %v8406_v42  ;;  %v1812_v8 = vsel %vm645_vm2, %v1801_v41, %v8402_v59 }
 0x6f4   : > { %v1617_v29 = vsel %vm612_vm0, %v1605_v48, %v1585_v27  ;;  %2187 = vmatpush.bf16.msra.mxu0 %v1768_v50  ;;  %v1854_v48 = vsel %vm660_vm6, %v1839_v23, %v8404_v15  ;;  %v6497_v50 = vld [vmem:[%s12179_s7 + $0x18] sm:$0xf] }
 0x6f5   : > { %1649 = vst.msk [vmem:[#allocation2 + $0x2c] sm:$0xf] %vm825_vm12, %v1617_v29  ;;  %v8504_v58 = vor.u32 %v7059_v53, %v6497_v50  ;;  %v7058_v29 = vld [vmem:[%s12179_s7 + $0x1c] sm:$0xf]  ;;  %v1959_v53 = vld [vmem:[%s12180_s8 + $0x68] sm:$0xff] }
 0x6f8   : > { %2188 = vmatpush.bf16.msra.mxu0 %v1766_v18  ;;  %v6499_v18 = vld [vmem:[%s12179_s7 + $0x24] sm:$0xf0] }
 0x6fa   : > { %v8426_v16 = vpop.permute.xlu0 %1846  ;;  %v8428_v37 = vpop.permute.xlu1 %1796 }
 0x6fb   : > { %v1856_v14 = vsel %vm660_vm6, %v1845_v6, %v8426_v16 }
 0x6fc   : > { %2189 = vmatpush.bf16.msra.mxu0 %v1764_v57  ;;  %2236 = vmatpush.bf16.msrb.mxu1 %v1856_v14  ;;  %v7048_v41 = vld [vmem:[#allocation2 + $0x28] sm:$0xf0]  ;;  %v8519_v57 = vor.u32 %v7058_v29, %v6499_v18  ;;  %v1961_v18 = vld [vmem:[%s12180_s8 + $0x78] sm:$0xff] }
 0x700   : > { %2190 = vmatpush.bf16.msra.mxu0 %v1762_v7  ;;  %2237 = vmatpush.bf16.msrb.mxu1 %v1854_v48  ;;  %v6469_v7 = vld [vmem:[#allocation2 + $0x38] sm:$0xf] }
 0x702   : > { %v8438_v9 = vpop.permute.xlu0 %1828  ;;  %v1783_v35 = vpop.permute.xlu1 %1782 }
 0x703   : > { %v1850_v30 = vsel %vm660_vm6, %v1827_v26, %v8438_v9  ;;  %v1806_v47 = vsel %vm645_vm2, %v1783_v35, %v8410_v44 }
 0x704   : > { %2191 = vmatpush.bf16.msra.mxu0 %v8318_v32  ;;  %2238 = vmatpush.bf16.msrb.mxu1 %v1852_v55 }
 0x708   : > { %2192 = vmatpush.bf16.msra.mxu0 %v8308_v38  ;;  %2239 = vmatpush.bf16.msrb.mxu1 %v1850_v30 }
 0x70a   : > { %v1795_v20 = vpop.permute.xlu0 %1794  ;;  %v1601_v19 = vpop.permute.xlu1 %1600 }
 0x70b   : > { %v1625_v3 = vsel %vm612_vm0, %v1609_v46, %v1601_v19  ;;  %v1810_v28 = vsel %vm645_vm2, %v1795_v20, %v8428_v37  ;;  %v8461_v46 = vor.u32 %v7056_v36, %v6485_v39  ;;  %v6509_v20 = vld [vmem:[%s12179_s7 + $0x30] sm:$0xf]  ;;  %v7061_v39 = vld [vmem:[%s12179_s7 + $0x34] sm:$0xf]  ;;  %v6511_v36 = vld [vmem:[%s12179_s7 + $0x3c] sm:$0xf0] }
 0x70c   : > { %1657 = vst.msk [vmem:[#allocation2 + $0x5c] sm:$0xf] %vm825_vm12, %v1625_v3  ;;  %2193 = vmatpush.bf16.msra.mxu0 %v8276_v21  ;;  %2240 = vmatpush.bf16.msrb.mxu1 %v1812_v8 }
 0x710   : > { %2194 = vmatpush.bf16.msra.mxu0 %v8316_v43  ;;  %2241 = vmatpush.bf16.msrb.mxu1 %v1810_v28  ;;  %v8559_v28 = vor.u32 %v7061_v39, %v6511_v36 }
 0x712   : > { %v8464_v0 = vpop.permute.xlu0 %1790  ;;  %v1581_v6 = vpop.permute.xlu1 %1580 }
 0x713   : > { %v1615_v63 = vsel %vm612_vm0, %v1604_v17, %v1581_v6  ;;  %2195 = vmatmul.bf16.vlgmr.msra.gmra.mxu0 %v8461_v46  ;;  %v1808_v26 = vsel %vm645_vm2, %v1789_v33, %v8464_v0  ;;  %v8481_v17 = vor.u32 %v7055_v25, %v6487_v4  ;;  %v7054_v35 = vld [vmem:[#allocation2 + $0x58] sm:$0xf0]  ;;  %v6521_v6 = vld [vmem:[%s12179_s7 + $0x48] sm:$0xf]  ;;  %v6523_v25 = vld [vmem:[%s12179_s7 + $0x54] sm:$0xf0] }
 0x714   : > { %1647 = vst.msk [vmem:[#allocation2 + $0x20] sm:$0xf] %vm825_vm12, %v1615_v63  ;;  %2242 = vmatpush.bf16.msrb.mxu1 %v1808_v26  ;;  %v7065_v63 = vld [vmem:[%s12179_s7 + $0x50] sm:$0xf0]  ;;  %v7064_v26 = vld [vmem:[%s12179_s7 + $0x4c] sm:$0xf] }
 0x715   : > { %v6533_v4 = vld [vmem:[%s12179_s7 + $0x60] sm:$0xf] }
 0x718   : > { %2243 = vmatpush.bf16.msrb.mxu1 %v1806_v47  ;;  %v7068_v47 = vld [vmem:[%s12179_s7 + $0x68] sm:$0xf0] }
 0x71a   : > { %v1597_v23 = vpop.permute.xlu0 %1596  ;;  %v1577_v45 = vpop.permute.xlu1 %1576 }
 0x71b   : > { %v1623_v33 = vsel %vm612_vm0, %v1608_v60, %v1597_v23  ;;  %v1613_v56 = vsel %vm612_vm0, %v1603_v61, %v1577_v45  ;;  %2244 = vmatmul.bf16.vlgmr.msrb.gmra.mxu1 %v8481_v17  ;;  %v6457_v49 = vld [vmem:[#allocation2 + $0x20] sm:$0xf]  ;;  %v7067_v23 = vld [vmem:[%s12179_s7 + $0x64] sm:$0xf]  ;;  %v6535_v45 = vld [vmem:[%s12179_s7 + $0x6c] sm:$0xf0] }
 0x71c   : > { %1655 = vst.msk [vmem:[#allocation2 + $0x50] sm:$0xf] %vm825_vm12, %v1623_v33  ;;  %v8491_v27 = vor.u32 %v7048_v41, %v6457_v49  ;;  %v8619_v33 = vor.u32 %v7067_v23, %v6535_v45  ;;  %v6545_v49 = vld [vmem:[%s12179_s7 + $0x78] sm:$0xf]  ;;  %v7071_v41 = vld [vmem:[%s12179_s7 + $0x80] sm:$0xf0] }
 0x71d   : > { %1645 = vst.msk [vmem:[#allocation2 + $0x14] sm:$0xf] %vm825_vm12, %v1613_v56  ;;  %v1960_v56 = vld [vmem:[%s12180_s8 + $0x70] sm:$0xff]  ;;  %v8635_v50 = vor.u32 %v7071_v41, %v6545_v49  ;;  %v1950_v45 = vld [vmem:[%s12180_s8 + $0x20] sm:$0xff]  ;;  %v7076_v41 = vld [vmem:[%s12179_s7 + $0xac] sm:$0xf] }
 0x71e   : > { %1836 = vrot.lane.b32.xlu2 %v8491_v27, %s12495_s9  ;;  %1748 = vrot.lane.b32.xlu1 %v8491_v27, %s12496_s29  ;;  %v1946_v49 = vld [vmem:[%s12180_s8] sm:$0xff] }
 0x722   : > { %v1593_v60 = vpop.permute.xlu0 %1592 }
 0x723   : > { %v1621_v61 = vsel %vm612_vm0, %v1607_v52, %v1593_v60  ;;  %2200 = vmatmul.bf16.gmra.mxu0 %v8504_v58  ;;  %v6481_v24 = vld [vmem:[#allocation2 + $0x50] sm:$0xf]  ;;  %v1958_v60 = vld [vmem:[%s12180_s8 + $0x60] sm:$0xff] }
 0x724   : > { %1653 = vst.msk [vmem:[#allocation2 + $0x44] sm:$0xf] %vm825_vm12, %v1621_v61  ;;  %v8528_v30 = vor.u32 %v7054_v35, %v6481_v24  ;;  %v7045_v3 = vld [vmem:[#allocation2 + $0x10] sm:$0xf0]  ;;  %v6547_v61 = vld [vmem:[%s12179_s7 + $0x84] sm:$0xf0] }
 0x725   : > { %v1954_v24 = vld [vmem:[%s12180_s8 + $0x40] sm:$0xff]  ;;  %v1956_v35 = vld [vmem:[%s12180_s8 + $0x50] sm:$0xff] }
 0x726   : > { %1884 = vrot.lane.b32.xlu2 %v8310_v40, %s12493_s15 }
 0x72a   : > { %v1573_v14 = vpop.permute.xlu0 %1572 }
 0x72b   : > { %v1611_v52 = vsel %vm612_vm0, %v1602_v54, %v1573_v14  ;;  %2249 = vmatmul.bf16.gmra.mxu1 %v8519_v57  ;;  %v7051_v48 = vld [vmem:[#allocation2 + $0x40] sm:$0xf0]  ;;  %v8542_v54 = vor.u32 %v7062_v13, %v6509_v20  ;;  %v1957_v14 = vld [vmem:[%s12180_s8 + $0x58] sm:$0xff]  ;;  %v1952_v13 = vld [vmem:[%s12180_s8 + $0x30] sm:$0xff] }
 0x72c   : > { %1643 = vst.msk [vmem:[#allocation2 + $0x8] sm:$0xf] %vm825_vm12, %v1611_v52  ;;  %v8526_v55 = vor.u32 %v7051_v48, %v6469_v7  ;;  %v6557_v52 = vld [vmem:[%s12179_s7 + $0x90] sm:$0xf]  ;;  %v7074_v7 = vld [vmem:[%s12179_s7 + $0x98] sm:$0xf0] }
 0x72d   : > { %v8670_v48 = vor.u32 %v7074_v7, %v6557_v52  ;;  %v1953_v20 = vld [vmem:[%s12180_s8 + $0x38] sm:$0xff] }
 0x72e   : > { %1754 = vrot.lane.b32.xlu0 %v8526_v55, %s12496_s29  ;;  %1760 = vrot.lane.b32.xlu2 %v8528_v30, %s12496_s29 }
 0x72f   : > { %1842 = vrot.lane.b32.xlu1 %v8526_v55, %s12495_s9  ;;  %12497 = vst [vmem:[#allocation12_spill] sm:$0xff] %v8670_v48 }
 0x733   : > { %2205 = vmatmul.bf16.gmra.mxu0 %v8542_v54  ;;  %v6445_v19 = vld [vmem:[#allocation2 + $0x8] sm:$0xf] }
 0x734   : > { %v8545_v8 = vor.u32 %v7045_v3, %v6445_v19  ;;  %v7073_v19 = vld [vmem:[%s12179_s7 + $0x94] sm:$0xf]  ;;  %v6559_v3 = vld [vmem:[%s12179_s7 + $0x9c] sm:$0xf0] }
 0x735   : > { %v8688_v39 = vor.u32 %v7073_v19, %v6559_v3 }
 0x736   : > { %1742 = vrot.lane.b32.xlu0 %v8545_v8, %s12496_s29  ;;  %1848 = vrot.lane.b32.xlu2 %v8528_v30, %s12495_s9 }
 0x737   : > { %1882 = vrot.lane.b32.xlu1 %v8308_v38, %s12493_s15  ;;  %v8574_v38 = vor.u32 %v7065_v63, %v6521_v6  ;;  %v1955_v6 = vld [vmem:[%s12180_s8 + $0x48] sm:$0xff]  ;;  %v1948_v63 = vld [vmem:[%s12180_s8 + $0x10] sm:$0xff] }
 0x73b   : > { %2254 = vmatmul.bf16.gmra.mxu1 %v8559_v28 }
 0x73e   : > { %1830 = vrot.lane.b32.xlu0 %v8545_v8, %s12495_s9  ;;  %1876 = vrot.lane.b32.xlu2 %v8276_v21, %s12493_s15  ;;  %v8589_v21 = vor.u32 %v7064_v26, %v6523_v25  ;;  %v1951_v26 = vld [vmem:[%s12180_s8 + $0x28] sm:$0xff] }
 0x73f   : > { %1798 = vrot.lane.b32.xlu1 %v8526_v55, %s12494_s0  ;;  %v6569_v25 = vld [vmem:[%s12179_s7 + $0xa8] sm:$0xf] }
 0x743   : > { %2210 = vmatmul.bf16.gmra.mxu0 %v8574_v38 }
 0x746   : > { %1878 = vrot.lane.b32.xlu0 %v8295_v31, %s12493_s15  ;;  %1890 = vrot.lane.b32.xlu2 %v8326_v2, %s12493_s15 }
 0x747   : > { %1888 = vrot.lane.b32.xlu1 %v8318_v32, %s12493_s15  ;;  %v8604_v32 = vor.u32 %v7068_v47, %v6533_v4  ;;  %v7077_v4 = vld [vmem:[%s12179_s7 + $0xb0] sm:$0xf0] }
 0x748   : > { %v8708_v47 = vor.u32 %v7077_v4, %v6569_v25 }
 0x74a   : > { %12498 = vst [vmem:[#allocation13_spill] sm:$0xff] %v8708_v47 }
 0x74b   : > { %2259 = vmatmul.bf16.gmra.mxu1 %v8589_v21 }
 0x74e   : > { %1804 = vrot.lane.b32.xlu0 %v8528_v30, %s12494_s0  ;;  %1792 = vrot.lane.b32.xlu2 %v8491_v27, %s12494_s0 }
 0x74f   : > { %1886 = vrot.lane.b32.xlu1 %v8526_v55, %s12493_s15 }
 0x753   : > { %2215 = vmatmul.bf16.gmra.mxu0 %v8604_v32 }
 0x756   : > { %1892 = vrot.lane.b32.xlu0 %v8528_v30, %s12493_s15  ;;  %1880 = vrot.lane.b32.xlu2 %v8491_v27, %s12493_s15 }
 0x757   : > { %1872 = vrot.lane.b32.xlu1 %v8334_v1, %s12493_s15 }
 0x75b   : > { %2264 = vmatmul.bf16.gmra.mxu1 %v8619_v33 }
 0x75e   : > { %1870 = vrot.lane.b32.xlu0 %v8316_v43, %s12493_s15  ;;  %2034 = vperm.xlu2 %7297, %v1960_v56   ;;  %v7070_v43 = vld [vmem:[%s12179_s7 + $0x7c] sm:$0xf]  ;;  %v1947_v56 = vld [vmem:[%s12180_s8 + $0x8] sm:$0xff] }
 0x75f   : > { %1874 = vrot.lane.b32.xlu1 %v8545_v8, %s12493_s15  ;;  %v8652_v29 = vor.u32 %v7070_v43, %v6547_v61 }
 0x763   : > { %2220 = vmatmul.bf16.gmra.mxu0 %v8635_v50 }
 0x766   : > { %1786 = vrot.lane.b32.xlu0 %v8545_v8, %s12494_s0  ;;  %2029 = vperm.xlu2 %7297, %v1959_v53   ;;  %v6571_v53 = vld [vmem:[%s12179_s7 + $0xb4] sm:$0xf0] }
 0x767   : > { %2024 = vperm.xlu1 %7296, %v1958_v60   ;;  %v8728_v60 = vor.u32 %v7076_v41, %v6571_v53 }
 0x76b   : > { %2269 = vmatmul.bf16.gmra.mxu1 %v8652_v29 }
 0x76e   : > { %2039 = vperm.xlu0 %7298, %v1961_v18   ;;  %2004 = vperm.xlu2 %7297, %v1954_v24   ;;  %v1949_v18 = vld [vmem:[%s12180_s8 + $0x18] sm:$0xff] }
 0x76f   : > { %2019 = vperm.xlu1 %7296, %v1957_v14  }
 0x773   : > { %2225 = vmatmul.bf16.gmra.mxu0 %v8670_v48 }
 0x776   : > { %2014 = vperm.xlu0 %7298, %v1956_v35   ;;  %1999 = vperm.xlu2 %7297, %v1953_v20  }
 0x777   : > { %1994 = vperm.xlu1 %7296, %v1952_v13  }
 0x778   : > { %v8690_v36 = vpop.permute.xlu2 %1836 }
 0x779   : > { %v1853_v4 = vsel %vm660_vm6, %v8397_v62, %v8690_v36 }
 0x77b   : > { %2274 = vmatmul.bf16.gmra.mxu1 %v8688_v39 }
 0x77e   : > { %2009 = vperm.xlu0 %7298, %v1955_v6   ;;  %1974 = vperm.xlu2 %7297, %v1948_v63  }
 0x77f   : > { %1989 = vperm.xlu1 %7296, %v1951_v26  }
 0x780   : > { %v8710_v23 = vpop.permute.xlu2 %1884 }
 0x783   : > { %2230 = vmatmul.bf16.gmra.mxu0 %v8708_v47 }
 0x786   : > { %1984 = vperm.xlu0 %7298, %v1950_v45   ;;  %1969 = vperm.xlu2 %7297, %v1947_v56  }
 0x787   : > { %1964 = vperm.xlu1 %7296, %v1946_v49  }
 0x788   : > { %v8730_v43 = vpop.permute.xlu2 %1760 }
 0x789   : > { %v1769_v61 = vsel %vm630_vm4, %v8406_v42, %v8730_v43 }
 0x78a   : > { %2334 = vmatpush.bf16.msrb.mxu3 %v1769_v61 }
 0x78b   : > { %2279 = vmatmul.bf16.gmra.mxu1 %v8728_v60 }
 0x78e   : > { %1979 = vperm.xlu0 %7298, %v1949_v18  }
 0x790   : > { %v8739_v24 = vpop.f32.mrf.mxu0  ;;  %v1849_v14 = vpop.permute.xlu2 %1848 }
 0x791   : > { %v1857_v52 = vsel %vm660_vm6, %v8426_v16, %v1849_v14  ;;  %v8747_v20 = vpop.permute.xlu1 %1748 }
 0x792   : > { %2383 = vmatpush.bf16.msra.mxu0 %v1857_v52  ;;  %v1765_v25 = vsel %vm630_vm4, %v8408_v5, %v8747_v20 }
 0x798   : > { %v8743_v7 = vpop.f32.mrf.mxu0  ;;  %v8745_v35 = vpop.f32.mrf.mxu1 }
 0x799   : > { %v1877_v42 = vpop.permute.xlu2 %1876 }
 0x7a0   : > { %v8749_v13 = vpop.f32.mrf.mxu0  ;;  %v8751_v19 = vpop.f32.mrf.mxu1 }
 0x7a1   : > { %v8753_v3 = vpop.permute.xlu0 %1754  ;;  %v1891_v6 = vpop.permute.xlu2 %1890 }
 0x7a2   : > { %v1843_v63 = vpop.permute.xlu1 %1842  ;;  %v1767_v16 = vsel %vm630_vm4, %v8400_v12, %v8753_v3 }
 0x7a3   : > { %2335 = vmatpush.bf16.msrb.mxu3 %v1767_v16  ;;  %v1855_v26 = vsel %vm660_vm6, %v8404_v15, %v1843_v63 }
 0x7a4   : > { %2384 = vmatpush.bf16.msra.mxu0 %v1855_v26 }
 0x7a7   : > { %2336 = vmatpush.bf16.msrb.mxu3 %v1765_v25 }
 0x7a8   : > { %2385 = vmatpush.bf16.msra.mxu0 %v1853_v4  ;;  %v8766_v45 = vpop.f32.mrf.mxu0  ;;  %v8768_v56 = vpop.f32.mrf.mxu1 }
 0x7a9   : > { %v8770_v12 = vpop.permute.xlu0 %1742  ;;  %v8772_v49 = vpop.permute.xlu2 %1792 }
 0x7aa   : > { %v1883_v15 = vpop.permute.xlu1 %1882  ;;  %v1763_v41 = vsel %vm630_vm4, %v8412_v10, %v8770_v12 }
 0x7ab   : > { %2337 = vmatpush.bf16.msrb.mxu3 %v1763_v41 }
 0x7af   : > { %2338 = vmatpush.bf16.msrb.mxu3 %v8326_v2 }
 0x7b0   : > { %v8778_v5 = vpop.f32.mrf.mxu0  ;;  %v8780_v62 = vpop.f32.mrf.mxu1 }
 0x7b1   : > { %v1831_v53 = vpop.permute.xlu0 %1830  ;;  %v8782_v61 = vpop.permute.xlu2 %1880 }
 0x7b2   : > { %v1799_v18 = vpop.permute.xlu1 %1798  ;;  %v1851_v52 = vsel %vm660_vm6, %v8438_v9, %v1831_v53 }
 0x7b3   : > { %2339 = vmatpush.bf16.msrb.mxu3 %v8310_v40  ;;  %2386 = vmatpush.bf16.msra.mxu0 %v1851_v52  ;;  %v1898_v40 = vsel %vm675_vm5, %v1883_v15, %v8710_v23 }
 0x7b7   : > { %2340 = vmatpush.bf16.msrb.mxu3 %v8295_v31 }
 0x7b8   : > { %v8788_v10 = vpop.f32.mrf.mxu0  ;;  %v8790_v16 = vpop.f32.mrf.mxu1 }
 0x7b9   : > { %v1879_v2 = vpop.permute.xlu0 %1878  ;;  %v8792_v26 = vpop.permute.xlu2 %2034 }
 0x7ba   : > { %12499 = vst [vmem:[#allocation14_spill] sm:$0xff] %v8792_v26  ;;  %v1889_v25 = vpop.permute.xlu1 %1888 }
 0x7bb   : > { %v1900_v4 = vsel %vm675_vm5, %v1889_v25, %v1891_v6  ;;  %2341 = vmatpush.bf16.msrb.mxu3 %v8334_v1 }
 0x7bc   : > { %2289 = vmatpush.bf16.msra.mxu2 %v1900_v4 }
 0x7be   : > { %2342 = vmatmul.bf16.vlgmr.msrb.gmra.mxu3 %v8461_v46 }
 0x7bf   : > { %2530 = vmatpush.bf16.msra.mxu3 %v1849_v14  ;;  %v1896_v14 = vsel %vm675_vm5, %v1877_v42, %v1879_v2 }
 0x7c0   : > { %2290 = vmatpush.bf16.msra.mxu2 %v1898_v40  ;;  %v8799_v31 = vpop.f32.mrf.mxu0  ;;  %v8801_v9 = vpop.f32.mrf.mxu1 }
 0x7c1   : > { %v1805_v41 = vpop.permute.xlu0 %1804  ;;  %v8803_v52 = vpop.permute.xlu2 %2029 }
 0x7c2   : > { %12500 = vst [vmem:[#allocation15_spill] sm:$0xff] %v8803_v52  ;;  %v8805_v34 = vpop.permute.xlu1 %1886  ;;  %v1813_v1 = vsel %vm645_vm2, %v8402_v59, %v1805_v41  ;;  %v1809_v59 = vsel %vm645_vm2, %v8464_v0, %v8772_v49  ;;  %v7057_v0 = vld [vmem:[%s12179_s7 + $0x10] sm:$0xf0] }
 0x7c3   : > { %2531 = vmatpush.bf16.msra.mxu3 %v1843_v63  ;;  %2387 = vmatpush.bf16.msra.mxu0 %v1813_v1  ;;  %v1811_v63 = vsel %vm645_vm2, %v8428_v37, %v1799_v18  ;;  %v1899_v37 = vsel %vm675_vm5, %v8710_v23, %v8805_v34  ;;  %v1897_v23 = vsel %vm675_vm5, %v1879_v2, %v8782_v61 }
 0x7c4   : > { %2291 = vmatpush.bf16.msra.mxu2 %v1896_v14 }
 0x7c7   : > { %2532 = vmatpush.bf16.msra.mxu3 %v8690_v36  ;;  %2388 = vmatpush.bf16.msra.mxu0 %v1811_v63  ;;  %v6493_v36 = vld [vmem:[%s12179_s7 + $0x8] sm:$0xf] }
 0x7c8   : > { %v8813_v15 = vpop.f32.mrf.mxu0  ;;  %v8815_v25 = vpop.f32.mrf.mxu1 }
 0x7c9   : > { %v1893_v4 = vpop.permute.xlu0 %1892  ;;  %v8817_v40 = vpop.permute.xlu2 %2004 }
 0x7ca   : > { %v1873_v51 = vpop.permute.xlu1 %1872  ;;  %v1901_v42 = vsel %vm675_vm5, %v1891_v6, %v1893_v4 }
 0x7cb   : > { %2533 = vmatpush.bf16.msra.mxu3 %v1831_v53  ;;  %2389 = vmatpush.bf16.msra.mxu0 %v1809_v59  ;;  %v8840_v59 = vor.u32 %v7057_v0, %v6493_v36 }
 0x7cc   : > { %2436 = vmatpush.bf16.msra.mxu1 %v1901_v42 }
 0x7ce   : > { %2347 = vmatmul.bf16.gmra.mxu3 %v8504_v58 }
 0x7cf   : > { %2534 = vmatpush.bf16.msra.mxu3 %v1805_v41 }
 0x7d0   : > { %2437 = vmatpush.bf16.msra.mxu1 %v1899_v37  ;;  %v2216_v6 = vpop.f32.mrf.mxu0  ;;  %v8833_v53 = vpop.f32.mrf.mxu1 }
 0x7d1   : > { %v1871_v41 = vpop.permute.xlu0 %1870  ;;  %v8835_v1 = vpop.permute.xlu2 %1999  ;;  %v2217_v42 = vadd.f32 %v2216_v6, %v8817_v40  ;;  %v6505_v6 = vld [vmem:[%s12179_s7 + $0x20] sm:$0xf] }
 0x7d2   : > { %v1875_v14 = vpop.permute.xlu1 %1874  ;;  %v1894_v63 = vsel %vm675_vm5, %v1871_v41, %v1873_v51 }
 0x7d3   : > { %2535 = vmatpush.bf16.msra.mxu3 %v1799_v18  ;;  %2292 = vmatpush.bf16.msra.mxu2 %v1894_v63  ;;  %v1895_v18 = vsel %vm675_vm5, %v1873_v51, %v1875_v14 }
 0x7d4   : > { %2438 = vmatpush.bf16.msra.mxu1 %v1897_v23 }
 0x7d6   : > { %6579 = vmatmul.msk.bf16.vlgmr.msra.gmra.mxu2 %vm2162_vm7, %v8840_v59 }
 0x7d7   : > { %2481 = vmatpush.bf16.msrb.mxu2 %v8730_v43  ;;  %2536 = vmatpush.bf16.msra.mxu3 %v8772_v49 }
 0x7d8   : > { %2439 = vmatpush.bf16.msra.mxu1 %v1895_v18  ;;  %v8849_v2 = vpop.f32.mrf.mxu0  ;;  %v2265_v37 = vpop.f32.mrf.mxu1 }
 0x7d9   : > { %v8851_v36 = vadd.f32 %v2265_v37, %v2217_v42  ;;  %v1787_v0 = vpop.permute.xlu0 %1786  ;;  %v8853_v41 = vpop.permute.xlu2 %1974  ;;  %v6517_v37 = vld [vmem:[%s12179_s7 + $0x38] sm:$0xf] }
 0x7da   : > { %v8855_v43 = vpop.permute.xlu1 %2024  ;;  %v1807_v51 = vsel %vm645_vm2, %v8410_v44, %v1787_v0  ;;  %v7060_v44 = vld [vmem:[%s12179_s7 + $0x28] sm:$0xf0] }
 0x7db   : > { %2482 = vmatpush.bf16.msrb.mxu2 %v8753_v3  ;;  %12501 = vst [vmem:[#allocation16_spill] sm:$0xff] %v8855_v43  ;;  %6587 = vmatmul.msk.bf16.vlgmr.msra.gmra.mxu1 %vm2162_vm7, %v8840_v59  ;;  %v2202_v3 = vadd.f32 %v8749_v13, %v8853_v41  ;;  %v8882_v23 = vor.u32 %v7060_v44, %v6505_v6  ;;  %v7066_v44 = vld [vmem:[%s12179_s7 + $0x58] sm:$0xf0] }
 0x7dc   : > { %2537 = vmatpush.bf16.msra.mxu3 %v1787_v0  ;;  %2390 = vmatpush.bf16.msra.mxu0 %v1807_v51 }
 0x7dd   : > { %v8865_v49 = vadd.f32 %v8768_v56, %v2202_v3 }
 0x7de   : > { %2352 = vmatmul.bf16.gmra.mxu3 %v8542_v54 }
 0x7df   : > { %2483 = vmatpush.bf16.msrb.mxu2 %v8747_v20  ;;  %2391 = vmatmul.bf16.vlgmr.msra.gmra.mxu0 %v8481_v17 }
 0x7e0   : > { %2583 = vmatpush.bf16.msra.mxu0 %v1893_v4  ;;  %v2221_v13 = vpop.f32.mrf.mxu0  ;;  %v8876_v20 = vpop.f32.mrf.mxu1 }
 0x7e1   : > { %v8878_v56 = vpop.permute.xlu0 %2039 }
 0x7e2   : > { %12502 = vst [vmem:[#allocation17_spill] sm:$0xff] %v8878_v56  ;;  %v8880_v63 = vpop.permute.xlu1 %2019 }
 0x7e3   : > { %2484 = vmatpush.bf16.msrb.mxu2 %v8770_v12 }
 0x7e4   : > { %2584 = vmatpush.bf16.msra.mxu0 %v8805_v34 }
 0x7e6   : > { %6580 = vmatmul.msk.bf16.gmra.mxu2 %vm2162_vm7, %v8882_v23 }
 0x7e7   : > { %2485 = vmatpush.bf16.msrb.mxu2 %v8528_v30 }
 0x7e8   : > { %2585 = vmatpush.bf16.msra.mxu0 %v8782_v61  ;;  %v8890_v12 = vpop.f32.mrf.mxu0  ;;  %v2270_v4 = vpop.f32.mrf.mxu1 }
 0x7e9   : > { %v8892_v18 = vpop.permute.xlu0 %2014 }
 0x7ea   : > { %v8894_v42 = vpop.permute.xlu1 %1994  ;;  %v2222_v34 = vadd.f32 %v2221_v13, %v8892_v18 }
 0x7eb   : > { %2486 = vmatpush.bf16.msrb.mxu2 %v8526_v55  ;;  %6588 = vmatmul.msk.bf16.gmra.mxu1 %vm2162_vm7, %v8882_v23  ;;  %v2212_v30 = vadd.f32 %v8799_v31, %v8894_v42 }
 0x7ec   : > { %2586 = vmatpush.bf16.msra.mxu0 %v1875_v14  ;;  %v8902_v61 = vadd.f32 %v2270_v4, %v2222_v34  ;;  %v7063_v14 = vld [vmem:[%s12179_s7 + $0x40] sm:$0xf0] }
 0x7ed   : > { %v8905_v55 = vadd.f32 %v8815_v25, %v2212_v30  ;;  %v8918_v0 = vor.u32 %v7063_v14, %v6517_v37 }
 0x7ee   : > { %2357 = vmatmul.bf16.gmra.mxu3 %v8574_v38 }
 0x7ef   : > { %2487 = vmatpush.bf16.msrb.mxu2 %v8491_v27  ;;  %2396 = vmatmul.bf16.gmra.mxu0 %v8519_v57 }
 0x7f0   : > { %v2226_v27 = vpop.f32.mrf.mxu0  ;;  %v8916_v31 = vpop.f32.mrf.mxu1 }
 0x7f1   : > { %12503 = vst [vmem:[#allocation18_spill] sm:$0xff] %v8916_v31  ;;  %v2227_v25 = vadd.f32 %v2226_v27, %v8855_v43  ;;  %v6541_v27 = vld [vmem:[%s12179_s7 + $0x68] sm:$0xf] }
 0x7f3   : > { %2488 = vmatpush.bf16.msrb.mxu2 %v8545_v8  ;;  %v6529_v8 = vld [vmem:[%s12179_s7 + $0x50] sm:$0xf] }
 0x7f4   : > { %v8939_v4 = vor.u32 %v7066_v44, %v6529_v8  ;;  %v6553_v8 = vld [vmem:[%s12179_s7 + $0x80] sm:$0xf]  ;;  %v7072_v44 = vld [vmem:[%s12179_s7 + $0x88] sm:$0xf0] }
 0x7f6   : > { %6581 = vmatmul.msk.bf16.gmra.mxu2 %vm2162_vm7, %v8918_v0 }
 0x7f8   : > { %v2275_v51 = vpop.f32.mrf.mxu1  ;;  %v8925_v6 = vpop.f32.mrf.mxu0 }
 0x7f9   : > { %v8923_v3 = vadd.f32 %v2275_v51, %v2227_v25  ;;  %12505 = vst [vmem:[#allocation20_spill] sm:$0xff] %v8925_v6  ;;  %v7069_v25 = vld [vmem:[%s12179_s7 + $0x70] sm:$0xf0] }
 0x7fa   : > { %v8956_v51 = vor.u32 %v7069_v25, %v6541_v27  ;;  %v6577_v25 = vld [vmem:[%s12179_s7 + $0xb0] sm:$0xf] }
 0x7fb   : > { %12504 = vst [vmem:[#allocation19_spill] sm:$0xff] %v8923_v3  ;;  %6589 = vmatmul.msk.bf16.gmra.mxu1 %vm2162_vm7, %v8918_v0 }
 0x7fe   : > { %2362 = vmatmul.bf16.gmra.mxu3 %v8604_v32 }
 0x7ff   : > { %2401 = vmatmul.bf16.gmra.mxu0 %v8559_v28 }
 0x800   : > { %v8937_v13 = vpop.f32.mrf.mxu1  ;;  %v2231_v34 = vpop.f32.mrf.mxu0 }
 0x801   : > { %12506 = vst [vmem:[#allocation21_spill] sm:$0xff] %v8937_v13  ;;  %v2232_v30 = vadd.f32 %v2231_v34, %v8792_v26  ;;  %v8970_v34 = vor.u32 %v7072_v44, %v6553_v8  ;;  %v7078_v8 = vld [vmem:[%s12179_s7 + $0xb8] sm:$0xf0] }
 0x806   : > { %6582 = vmatmul.msk.bf16.gmra.mxu2 %vm2162_vm7, %v8939_v4 }
 0x808   : > { %v2280_v37 = vpop.f32.mrf.mxu1 }
 0x809   : > { %v8944_v14 = vadd.f32 %v2280_v37, %v2232_v30  ;;  %v6565_v30 = vld [vmem:[%s12179_s7 + $0x98] sm:$0xf]  ;;  %v7075_v37 = vld [vmem:[%s12179_s7 + $0xa0] sm:$0xf0] }
 0x80a   : > { %v8984_v27 = vor.u32 %v7075_v37, %v6565_v30  ;;  %v8998_v30 = vor.u32 %v7078_v8, %v6577_v25  ;;  %v9002_v37 = vpop.permute.xlu1 %1989  ;;  %v9012_v25 = vpop.f32.mrf.mxu0 }
 0x80b   : > { %12507 = vst [vmem:[#allocation22_spill] sm:$0xff] %v8944_v14  ;;  %6590 = vmatmul.msk.bf16.gmra.mxu1 %vm2162_vm7, %v8939_v4  ;;  %v9014_v8 = vpop.permute.xlu0 %2009 }
 0x80c   : > { %12508 = vst [vmem:[#allocation23_spill] sm:$0xff] %v8984_v27 }
 0x80d   : > { %12509 = vst [vmem:[#allocation24_spill] sm:$0xff] %v8998_v30 }
 0x80e   : > { %2367 = vmatmul.bf16.gmra.mxu3 %v8635_v50  ;;  %12511 = vst [vmem:[#allocation26_spill] sm:$0xff] %v9012_v25 }
 0x80f   : > { %2406 = vmatmul.bf16.gmra.mxu0 %v8589_v21 }
 0x812   : > { %v9010_v14 = vpop.permute.xlu1 %1964 }
 0x816   : > { %6583 = vmatmul.msk.bf16.gmra.mxu2 %vm2162_vm7, %v8956_v51 }
 0x81b   : > { %6591 = vmatmul.msk.bf16.gmra.mxu1 %vm2162_vm7, %v8956_v51 }
 0x81e   : > { %2372 = vmatmul.bf16.gmra.mxu3 %v8670_v48  ;;  %v9025_v48 = vpop.permute.xlu0 %1984 }
 0x81f   : > { %2411 = vmatmul.bf16.gmra.mxu0 %v8619_v33 }
 0x826   : > { %6584 = vmatmul.msk.bf16.gmra.mxu2 %vm2162_vm7, %v8970_v34 }
 0x82b   : > { %6592 = vmatmul.msk.bf16.gmra.mxu1 %vm2162_vm7, %v8970_v34 }
 0x82e   : > { %2377 = vmatmul.bf16.gmra.mxu3 %v8708_v47  ;;  %v2197_v47 = vadd.f32 %v8739_v24, %v9010_v14 }
 0x82f   : > { %2416 = vmatmul.bf16.gmra.mxu0 %v8652_v29 }
 0x836   : > { %6585 = vmatmul.msk.bf16.gmra.mxu2 %vm2162_vm7, %v8984_v27 }
 0x83b   : > { %6593 = vmatmul.msk.bf16.gmra.mxu1 %vm2162_vm7, %v8984_v27  ;;  %v2246_v27 = vadd.f32 %v8745_v35, %v2197_v47 }
 0x83e   : > { %2538 = vmatmul.bf16.vlgmr.msra.gmra.mxu3 %v8481_v17  ;;  %v9008_v17 = vpop.f32.mrf.mxu1 }
 0x83f   : > { %2421 = vmatmul.bf16.gmra.mxu0 %v8688_v39  ;;  %12510 = vst [vmem:[#allocation25_spill] sm:$0xff] %v9008_v17 }
 0x841   : > { %v2343_v44 = vpop.f32.mrf.mxu3 }
 0x842   : > { %v2344_v17 = vadd.f32 %v2343_v44, %v9010_v14 }
 0x846   : > { %6586 = vmatmul.msk.bf16.gmra.mxu2 %vm2162_vm7, %v8998_v30 }
 0x849   : > { %v2345_v56 = vpop.f32.mrf.mxu3 }
 0x84b   : > { %6594 = vmatmul.msk.bf16.gmra.mxu1 %vm2162_vm7, %v8998_v30  ;;  %v9019_v30 = vpop.permute.xlu2 %1969 }
 0x84c   : > { %12512 = vst [vmem:[#allocation27_spill] sm:$0xff] %v9019_v30  ;;  %v2199_v25 = vadd.f32 %v8743_v7, %v9019_v30 }
 0x84e   : > { %2543 = vmatmul.bf16.gmra.mxu3 %v8519_v57  ;;  %v2248_v35 = vadd.f32 %v8751_v19, %v2199_v25  ;;  %v9038_v25 = vpop.permute.xlu0 %1979 }
 0x84f   : > { %2426 = vmatmul.bf16.gmra.mxu0 %v8728_v60 }
 0x851   : > { %v2348_v26 = vpop.f32.mrf.mxu3 }
 0x856   : > { %2489 = vmatmul.bf16.vlgmr.msrb.gmra.mxu2 %v8461_v46 }
 0x858   : > { %v2441_v13 = vpop.f32.mrf.mxu1 }
 0x859   : > { %v2294_v57 = vpop.f32.mrf.mxu2  ;;  %v2350_v6 = vpop.f32.mrf.mxu3 }
 0x85a   : > { %v2295_v52 = vadd.f32 %v2294_v57, %v2246_v27 }
 0x85c   : > { %v2392_v3 = vpop.f32.mrf.mxu0  ;;  %v2628_v24 = vmax.f32 %v2295_v52, 0.0 }
 0x85d   : > { %v2393_v43 = vadd.f32 %v2392_v3, %v2344_v17  ;;  %v2346_v3 = vadd.f32 %v2345_v56, %v9019_v30 }
 0x85e   : > { %2548 = vmatmul.bf16.gmra.mxu3 %v8559_v28  ;;  %v2676_v7 = vsel %vm7635_vm14, %v2628_v24, 0.0  ;;  %v2349_v24 = vadd.f32 %v2348_v26, %v8853_v41 }
 0x85f   : > { %v2442_v31 = vadd.f32 %v2441_v13, %v2393_v43  ;;  %6595 = vmatmul.msk.bf16.vlgmr.msra.gmra.mxu0 %vm2162_vm7, %v8840_v59 }
 0x860   : > { %v2443_v46 = vpop.f32.mrf.mxu1 }
 0x861   : > { %v2629_v47 = vmax.f32 %v2442_v31, 0.0  ;;  %v2296_v44 = vpop.f32.mrf.mxu2  ;;  %v2353_v27 = vpop.f32.mrf.mxu3 }
 0x862   : > { %v2297_v43 = vadd.f32 %v2296_v44, %v2248_v35 }
 0x863   : > { %v2677_v52 = vsel %vm7639_vm1, %v2629_v47, 0.0 }
 0x864   : > { %v2724_v13 = vpack.c.bf16 %v2677_v52, %v2676_v7  ;;  %v2394_v17 = vpop.f32.mrf.mxu0  ;;  %v2631_v28 = vmax.f32 %v2297_v43, 0.0 }
 0x865   : > { %v2395_v59 = vadd.f32 %v2394_v17, %v2346_v3 }
 0x866   : > { %2788 = vrot.lane.b32.xlu2 %v2724_v13, %s12492_s22  ;;  %2494 = vmatmul.bf16.gmra.mxu2 %v8504_v58  ;;  %v2679_v47 = vsel %vm7635_vm14, %v2631_v28, 0.0  ;;  %v2204_v58 = vadd.f32 %v8766_v45, %v9038_v25  ;;  %v2351_v28 = vadd.f32 %v2350_v6, %v9038_v25 }
 0x867   : > { %v2444_v31 = vadd.f32 %v2443_v46, %v2395_v59 }
 0x868   : > { %v2446_v19 = vpop.f32.mrf.mxu1  ;;  %v2253_v17 = vadd.f32 %v8780_v62, %v2204_v58 }
 0x869   : > { %v2632_v56 = vmax.f32 %v2444_v31, 0.0  ;;  %v2299_v57 = vpop.f32.mrf.mxu2  ;;  %v2355_v30 = vpop.f32.mrf.mxu3 }
 0x86a   : > { %v2300_v44 = vadd.f32 %v2299_v57, %v8865_v49 }
 0x86b   : > { %v2680_v35 = vsel %vm7639_vm1, %v2632_v56, 0.0 }
 0x86c   : > { %v2726_v3 = vpack.c.bf16 %v2680_v35, %v2679_v47  ;;  %v2397_v46 = vpop.f32.mrf.mxu0  ;;  %v2634_v52 = vmax.f32 %v2300_v44, 0.0 }
 0x86d   : > { %v2398_v7 = vadd.f32 %v2397_v46, %v2349_v24  ;;  %v2354_v46 = vadd.f32 %v2353_v27, %v9025_v48 }
 0x86e   : > { %2792 = vrot.lane.b32.xlu0 %v2726_v3, %s12492_s22  ;;  %2553 = vmatmul.bf16.gmra.mxu3 %v8589_v21  ;;  %v2682_v45 = vsel %vm7635_vm14, %v2634_v52, 0.0  ;;  %v2207_v21 = vadd.f32 %v8778_v5, %v9025_v48 }
 0x86f   : > { %v2447_v43 = vadd.f32 %v2446_v19, %v2398_v7  ;;  %6596 = vmatmul.msk.bf16.gmra.mxu0 %vm2162_vm7, %v8882_v23 }
 0x870   : > { %v2448_v26 = vpop.f32.mrf.mxu1  ;;  %v2256_v35 = vadd.f32 %v8790_v16, %v2207_v21 }
 0x871   : > { %v2635_v13 = vmax.f32 %v2447_v43, 0.0  ;;  %v2301_v49 = vpop.f32.mrf.mxu2  ;;  %v2358_v59 = vpop.f32.mrf.mxu3 }
 0x872   : > { %v2302_v19 = vadd.f32 %v2301_v49, %v2253_v17 }
 0x873   : > { %v2683_v31 = vsel %vm7639_vm1, %v2635_v13, 0.0 }
 0x874   : > { %v2728_v56 = vpack.c.bf16 %v2683_v31, %v2682_v45  ;;  %v2399_v57 = vpop.f32.mrf.mxu0  ;;  %v2637_v62 = vmax.f32 %v2302_v19, 0.0  ;;  %v2356_v31 = vadd.f32 %v2355_v30, %v9002_v37 }
 0x875   : > { %v2400_v23 = vadd.f32 %v2399_v57, %v2351_v28 }
 0x876   : > { %2796 = vrot.lane.b32.xlu0 %v2728_v56, %s12492_s22  ;;  %2499 = vmatmul.bf16.gmra.mxu2 %v8542_v54  ;;  %v2685_v7 = vsel %vm7635_vm14, %v2637_v62, 0.0  ;;  %v2209_v54 = vadd.f32 %v8788_v10, %v9002_v37 }
 0x877   : > { %v2449_v24 = vadd.f32 %v2448_v26, %v2400_v23 }
 0x878   : > { %v2451_v6 = vpop.f32.mrf.mxu1  ;;  %v2258_v49 = vadd.f32 %v8801_v9, %v2209_v54 }
 0x879   : > { %v2638_v47 = vmax.f32 %v2449_v24, 0.0  ;;  %v2304_v44 = vpop.f32.mrf.mxu2  ;;  %v2360_v3 = vpop.f32.mrf.mxu3 }
 0x87a   : > { %v2305_v58 = vadd.f32 %v2304_v44, %v2256_v35 }
 0x87b   : > { %v2686_v5 = vsel %vm7639_vm1, %v2638_v47, 0.0 }
 0x87c   : > { %v2730_v52 = vpack.c.bf16 %v2686_v5, %v2685_v7  ;;  %v2402_v43 = vpop.f32.mrf.mxu0  ;;  %v2640_v16 = vmax.f32 %v2305_v58, 0.0 }
 0x87d   : > { %v2403_v26 = vadd.f32 %v2402_v43, %v2354_v46 }
 0x87e   : > { %2800 = vrot.lane.b32.xlu1 %v2730_v52, %s12492_s22  ;;  %2558 = vmatmul.bf16.gmra.mxu3 %v8619_v33  ;;  %v2688_v10 = vsel %vm7635_vm14, %v2640_v16, 0.0  ;;  %v2361_v16 = vadd.f32 %v2360_v3, %v8835_v1 }
 0x87f   : > { %v2452_v13 = vadd.f32 %v2451_v6, %v2403_v26  ;;  %6597 = vmatmul.msk.bf16.gmra.mxu0 %vm2162_vm7, %v8918_v0  ;;  %v2359_v6 = vadd.f32 %v2358_v59, %v8894_v42 }
 0x880   : > { %v2453_v27 = vpop.f32.mrf.mxu1 }
 0x881   : > { %v2641_v17 = vmax.f32 %v2452_v13, 0.0  ;;  %v2306_v28 = vpop.f32.mrf.mxu2  ;;  %v2363_v45 = vpop.f32.mrf.mxu3 }
 0x882   : > { %v2307_v56 = vadd.f32 %v2306_v28, %v2258_v49 }
 0x883   : > { %v2689_v19 = vsel %vm7639_vm1, %v2641_v17, 0.0 }
 0x884   : > { %v2732_v57 = vpack.c.bf16 %v2689_v19, %v2688_v10  ;;  %v2404_v23 = vpop.f32.mrf.mxu0  ;;  %v2643_v33 = vmax.f32 %v2307_v56, 0.0  ;;  %v2364_v19 = vadd.f32 %v2363_v45, %v8817_v40 }
 0x885   : > { %v2405_v0 = vadd.f32 %v2404_v23, %v2356_v31 }
 0x886   : > { %2804 = vrot.lane.b32.xlu1 %v2732_v57, %s12492_s22  ;;  %2504 = vmatmul.bf16.gmra.mxu2 %v8574_v38  ;;  %v2691_v47 = vsel %vm7635_vm14, %v2643_v33, 0.0  ;;  %v2214_v38 = vadd.f32 %v8813_v15, %v8835_v1 }
 0x887   : > { %v2454_v21 = vadd.f32 %v2453_v27, %v2405_v0 }
 0x888   : > { %v2456_v9 = vpop.f32.mrf.mxu1  ;;  %v2263_v26 = vadd.f32 %v8833_v53, %v2214_v38 }
 0x889   : > { %v2644_v62 = vmax.f32 %v2454_v21, 0.0  ;;  %v2309_v24 = vpop.f32.mrf.mxu2  ;;  %v2365_v30 = vpop.f32.mrf.mxu3 }
 0x88a   : > { %v2310_v44 = vadd.f32 %v2309_v24, %v8905_v55 }
 0x88b   : > { %v2692_v35 = vsel %vm7639_vm1, %v2644_v62, 0.0 }
 0x88c   : > { %v2734_v46 = vpack.c.bf16 %v2692_v35, %v2691_v47  ;;  %v2407_v7 = vpop.f32.mrf.mxu0  ;;  %v2646_v58 = vmax.f32 %v2310_v44, 0.0  ;;  %v2366_v47 = vadd.f32 %v2365_v30, %v9014_v8 }
 0x88d   : > { %v2408_v5 = vadd.f32 %v2407_v7, %v2359_v6 }
 0x88e   : > { %2808 = vrot.lane.b32.xlu2 %v2734_v46, %s12492_s22  ;;  %2563 = vmatmul.bf16.gmra.mxu3 %v8652_v29  ;;  %v2694_v15 = vsel %vm7635_vm14, %v2646_v58, 0.0 }
 0x88f   : > { %v2457_v52 = vadd.f32 %v2456_v9, %v2408_v5  ;;  %6598 = vmatmul.msk.bf16.gmra.mxu0 %vm2162_vm7, %v8939_v4 }
 0x890   : > { %v2458_v59 = vpop.f32.mrf.mxu1 }
 0x891   : > { %v2647_v43 = vmax.f32 %v2457_v52, 0.0  ;;  %v2311_v55 = vpop.f32.mrf.mxu2  ;;  %v2368_v54 = vpop.f32.mrf.mxu3 }
 0x892   : > { %v2312_v27 = vadd.f32 %v2311_v55, %v2263_v26  ;;  %v2369_v52 = vadd.f32 %v2368_v54, %v8892_v18 }
 0x893   : > { %v2695_v13 = vsel %vm7639_vm1, %v2647_v43, 0.0 }
 0x894   : > { %v2736_v17 = vpack.c.bf16 %v2695_v13, %v2694_v15  ;;  %v2409_v49 = vpop.f32.mrf.mxu0  ;;  %v2649_v29 = vmax.f32 %v2312_v27, 0.0 }
 0x895   : > { %v2410_v4 = vadd.f32 %v2409_v49, %v2361_v16  ;;  %v12513_v49 = vld [vmem:[#allocation18_spill] sm:$0xff] }
 0x896   : > { %2812 = vrot.lane.b32.xlu2 %v2736_v17, %s12492_s22  ;;  %2509 = vmatmul.bf16.gmra.mxu2 %v8604_v32  ;;  %v2697_v56 = vsel %vm7635_vm14, %v2649_v29, 0.0  ;;  %v2219_v32 = vadd.f32 %v8849_v2, %v9014_v8 }
 0x897   : > { %v2459_v28 = vadd.f32 %v2458_v59, %v2410_v4 }
 0x898   : > { %v2461_v53 = vpop.f32.mrf.mxu1  ;;  %v2268_v6 = vadd.f32 %v8876_v20, %v2219_v32 }
 0x899   : > { %v2650_v31 = vmax.f32 %v2459_v28, 0.0  ;;  %v2314_v10 = vpop.f32.mrf.mxu2  ;;  %v2370_v3 = vpop.f32.mrf.mxu3 }
 0x89a   : > { %v2315_v23 = vadd.f32 %v2314_v10, %v8851_v36  ;;  %v2371_v28 = vadd.f32 %v2370_v3, %v8880_v63 }
 0x89b   : > { %v2698_v57 = vsel %vm7639_vm1, %v2650_v31, 0.0 }
 0x89c   : > { %v2738_v0 = vpack.c.bf16 %v2698_v57, %v2697_v56  ;;  %v2412_v33 = vpop.f32.mrf.mxu0  ;;  %v2652_v9 = vmax.f32 %v2315_v23, 0.0  ;;  %v12514_v23 = vld [vmem:[#allocation12_spill] sm:$0xff] }
 0x89d   : > { %v2413_v21 = vadd.f32 %v2412_v33, %v2364_v19 }
 0x89e   : > { %2816 = vrot.lane.b32.xlu0 %v2738_v0, %s12492_s22  ;;  %2568 = vmatmul.bf16.gmra.mxu3 %v8688_v39  ;;  %v2700_v35 = vsel %vm7635_vm14, %v2652_v9, 0.0 }
 0x89f   : > { %v2462_v62 = vadd.f32 %v2461_v53, %v2413_v21  ;;  %6599 = vmatmul.msk.bf16.gmra.mxu0 %vm2162_vm7, %v8956_v51  ;;  %v12515_v21 = vld [vmem:[#allocation16_spill] sm:$0xff] }
 0x8a0   : > { %v2463_v45 = vpop.f32.mrf.mxu1 }
 0x8a1   : > { %v2653_v24 = vmax.f32 %v2462_v62, 0.0  ;;  %v2316_v36 = vpop.f32.mrf.mxu2  ;;  %v2373_v46 = vpop.f32.mrf.mxu3 }
 0x8a2   : > { %v2317_v44 = vadd.f32 %v2316_v36, %v2268_v6  ;;  %v2374_v32 = vadd.f32 %v2373_v46, %v12515_v21 }
 0x8a3   : > { %v2701_v2 = vsel %vm7639_vm1, %v2653_v24, 0.0 }
 0x8a4   : > { %v2740_v7 = vpack.c.bf16 %v2701_v2, %v2700_v35  ;;  %v2414_v5 = vpop.f32.mrf.mxu0  ;;  %v2655_v39 = vmax.f32 %v2317_v44, 0.0  ;;  %v12517_v35 = vld [vmem:[#allocation15_spill] sm:$0xff]  ;;  %v12518_v2 = vld [vmem:[#allocation20_spill] sm:$0xff] }
 0x8a5   : > { %v2415_v51 = vadd.f32 %v2414_v5, %v2366_v47  ;;  %v2229_v44 = vadd.f32 %v12518_v2, %v12517_v35 }
 0x8a6   : > { %2820 = vrot.lane.b32.xlu0 %v2740_v7, %s12492_s22  ;;  %2514 = vmatmul.bf16.gmra.mxu2 %v8635_v50  ;;  %v2703_v59 = vsel %vm7635_vm14, %v2655_v39, 0.0  ;;  %v2224_v50 = vadd.f32 %v8890_v12, %v8880_v63  ;;  %v12521_v39 = vld [vmem:[#allocation21_spill] sm:$0xff] }
 0x8a7   : > { %v2464_v38 = vadd.f32 %v2463_v45, %v2415_v51  ;;  %v12516_v45 = vld [vmem:[#allocation19_spill] sm:$0xff] }
 0x8a8   : > { %v2466_v20 = vpop.f32.mrf.mxu1  ;;  %v2273_v4 = vadd.f32 %v12513_v49, %v2224_v50  ;;  %v12519_v51 = vld [vmem:[#allocation23_spill] sm:$0xff] }
 0x8a9   : > { %v2656_v58 = vmax.f32 %v2464_v38, 0.0  ;;  %v2319_v30 = vpop.f32.mrf.mxu2  ;;  %v2375_v15 = vpop.f32.mrf.mxu3  ;;  %v2278_v38 = vadd.f32 %v12521_v39, %v2229_v44 }
 0x8aa   : > { %v2320_v26 = vadd.f32 %v2319_v30, %v8902_v61 }
 0x8ab   : > { %v2704_v43 = vsel %vm7639_vm1, %v2656_v58, 0.0 }
 0x8ac   : > { %v2742_v55 = vpack.c.bf16 %v2704_v43, %v2703_v59  ;;  %v2417_v16 = vpop.f32.mrf.mxu0  ;;  %v2658_v27 = vmax.f32 %v2320_v26, 0.0 }
 0x8ad   : > { %v2418_v13 = vadd.f32 %v2417_v16, %v2369_v52  ;;  %v2376_v52 = vadd.f32 %v2375_v15, %v12517_v35 }
 0x8ae   : > { %2824 = vrot.lane.b32.xlu1 %v2742_v55, %s12492_s22  ;;  %2573 = vmatmul.bf16.gmra.mxu3 %v8728_v60  ;;  %v2706_v53 = vsel %vm7635_vm14, %v2658_v27, 0.0 }
 0x8af   : > { %v2467_v17 = vadd.f32 %v2466_v20, %v2418_v13  ;;  %6600 = vmatmul.msk.bf16.gmra.mxu0 %vm2162_vm7, %v8970_v34 }
 0x8b0   : > { %v2468_v54 = vpop.f32.mrf.mxu1 }
 0x8b1   : > { %v2659_v61 = vmax.f32 %v2467_v17, 0.0  ;;  %v2321_v29 = vpop.f32.mrf.mxu2  ;;  %v2378_v34 = vpop.f32.mrf.mxu3 }
 0x8b2   : > { %v2322_v31 = vadd.f32 %v2321_v29, %v2273_v4  ;;  %v12523_v4 = vld [vmem:[#allocation13_spill] sm:$0xff] }
 0x8b3   : > { %v2707_v12 = vsel %vm7639_vm1, %v2659_v61, 0.0 }
 0x8b4   : > { %v2744_v10 = vpack.c.bf16 %v2707_v12, %v2706_v53  ;;  %v2419_v19 = vpop.f32.mrf.mxu0  ;;  %v2661_v60 = vmax.f32 %v2322_v31, 0.0  ;;  %v12524_v53 = vld [vmem:[#allocation14_spill] sm:$0xff] }
 0x8b5   : > { %v2420_v56 = vadd.f32 %v2419_v19, %v2371_v28  ;;  %v2379_v12 = vadd.f32 %v2378_v34, %v12524_v53  ;;  %v12525_v19 = vld [vmem:[#allocation22_spill] sm:$0xff]  ;;  %v12528_v34 = vld [vmem:[#allocation24_spill] sm:$0xff] }
 0x8b6   : > { %2828 = vrot.lane.b32.xlu1 %v2744_v10, %s12492_s22  ;;  %2519 = vmatmul.bf16.gmra.mxu2 %v12514_v23  ;;  %v2709_v9 = vsel %vm7635_vm14, %v2661_v60, 0.0 }
 0x8b7   : > { %v2469_v57 = vadd.f32 %v2468_v54, %v2420_v56 }
 0x8b8   : > { %v2471_v0 = vpop.f32.mrf.mxu1 }
 0x8b9   : > { %v2662_v33 = vmax.f32 %v2469_v57, 0.0  ;;  %v2324_v3 = vpop.f32.mrf.mxu2  ;;  %v2380_v20 = vpop.f32.mrf.mxu3 }
 0x8ba   : > { %v2325_v24 = vadd.f32 %v2324_v3, %v12516_v45  ;;  %v12527_v3 = vld [vmem:[#allocation26_spill] sm:$0xff]  ;;  %v12529_v45 = vld [vmem:[#allocation25_spill] sm:$0xff] }
 0x8bb   : > { %v2710_v62 = vsel %vm7639_vm1, %v2662_v33, 0.0  ;;  %v12526_v33 = vld [vmem:[#allocation17_spill] sm:$0xff] }
 0x8bc   : > { %v2746_v6 = vpack.c.bf16 %v2710_v62, %v2709_v9  ;;  %v2422_v36 = vpop.f32.mrf.mxu0  ;;  %v2664_v7 = vmax.f32 %v2325_v24, 0.0 }
 0x8bd   : > { %v2423_v47 = vadd.f32 %v2422_v36, %v2374_v32  ;;  %v2234_v32 = vadd.f32 %v12527_v3, %v12526_v33 }
 0x8be   : > { %2832 = vrot.lane.b32.xlu2 %v2746_v6, %s12492_s22  ;;  %v2712_v26 = vsel %vm7635_vm14, %v2664_v7, 0.0 }
 0x8bf   : > { %v2472_v5 = vadd.f32 %v2471_v0, %v2423_v47  ;;  %6601 = vmatmul.msk.bf16.gmra.mxu0 %vm2162_vm7, %v12519_v51  ;;  %v2283_v24 = vadd.f32 %v12529_v45, %v2234_v32  ;;  %v2381_v47 = vadd.f32 %v2380_v20, %v12526_v33 }
 0x8c0   : > { %v9153_v46 = vpop.permute.xlu2 %2788  ;;  %v2473_v59 = vpop.f32.mrf.mxu1 }
 0x8c1   : > { %12520 = vst [vmem:[#allocation18_spill] sm:$0xff] %v9153_v46  ;;  %v2665_v58 = vmax.f32 %v2472_v5, 0.0  ;;  %v12219_v30 = vrot.slane %v9153_v46, 4  ;;  %v2326_v43 = vpop.f32.mrf.mxu2  ;;  %v2539_v29 = vpop.f32.mrf.mxu3 }
 0x8c2   : > { %v2327_v13 = vadd.f32 %v2326_v43, %v2278_v38 }
 0x8c3   : > { %v2713_v55 = vsel %vm7639_vm1, %v2665_v58, 0.0  ;;  %v2868_v16 = vsel %vm612_vm0, %v12219_v30, %v9153_v46 }
 0x8c4   : > { %v2748_v50 = vpack.c.bf16 %v2713_v55, %v2712_v26  ;;  %2932 = vst.msk [vmem:[#allocation2] sm:$0xff] %vm7727_vm11, %v2868_v16  ;;  %v2424_v17 = vpop.f32.mrf.mxu0  ;;  %v2667_v54 = vmax.f32 %v2327_v13, 0.0 }
 0x8c5   : > { %v2425_v15 = vadd.f32 %v2424_v17, %v2376_v52 }
 0x8c6   : > { %2836 = vrot.lane.b32.xlu2 %v2748_v50, %s12492_s22  ;;  %2524 = vmatmul.bf16.gmra.mxu2 %v12523_v4  ;;  %v2715_v31 = vsel %vm7635_vm14, %v2667_v54, 0.0 }
 0x8c7   : > { %v2474_v49 = vadd.f32 %v2473_v59, %v2425_v15 }
 0x8c8   : > { %v2476_v57 = vpop.f32.mrf.mxu1 }
 0x8c9   : > { %v2668_v61 = vmax.f32 %v2474_v49, 0.0  ;;  %v2329_v28 = vpop.f32.mrf.mxu2  ;;  %v9187_v5 = vpop.f32.mrf.mxu3 }
 0x8ca   : > { %v2330_v56 = vadd.f32 %v2329_v28, %v12525_v19 }
 0x8cb   : > { %v2716_v10 = vsel %vm7639_vm1, %v2668_v61, 0.0 }
 0x8cc   : > { %v2750_v60 = vpack.c.bf16 %v2716_v10, %v2715_v31  ;;  %v2427_v23 = vpop.f32.mrf.mxu0  ;;  %v2670_v9 = vmax.f32 %v2330_v56, 0.0 }
 0x8cd   : > { %v2428_v0 = vadd.f32 %v2427_v23, %v2379_v12 }
 0x8ce   : > { %2840 = vrot.lane.b32.xlu0 %v2750_v60, %s12492_s22  ;;  %v2718_v2 = vsel %vm7635_vm14, %v2670_v9, 0.0 }
 0x8cf   : > { %v2477_v62 = vadd.f32 %v2476_v57, %v2428_v0  ;;  %6602 = vmatmul.msk.bf16.gmra.mxu0 %vm2162_vm7, %v12528_v34 }
 0x8d0   : > { %v2478_v58 = vpop.f32.mrf.mxu1 }
 0x8d1   : > { %v2671_v6 = vmax.f32 %v2477_v62, 0.0  ;;  %v2331_v36 = vpop.f32.mrf.mxu2  ;;  %v2544_v15 = vpop.f32.mrf.mxu3 }
 0x8d2   : > { %v2332_v7 = vadd.f32 %v2331_v36, %v2283_v24 }
 0x8d3   : > { %v2719_v44 = vsel %vm7639_vm1, %v2671_v6, 0.0 }
 0x8d4   : > { %v2752_v51 = vpack.c.bf16 %v2719_v44, %v2718_v2  ;;  %v2429_v39 = vpop.f32.mrf.mxu0  ;;  %v2673_v52 = vmax.f32 %v2332_v7, 0.0 }
 0x8d5   : > { %v2430_v38 = vadd.f32 %v2429_v39, %v2381_v47 }
 0x8d6   : > { %2844 = vrot.lane.b32.xlu0 %v2752_v51, %s12492_s22  ;;  %v2721_v20 = vsel %vm7635_vm14, %v2673_v52, 0.0 }
 0x8d7   : > { %v2479_v59 = vadd.f32 %v2478_v58, %v2430_v38 }
 0x8d9   : > { %v2674_v43 = vmax.f32 %v2479_v59, 0.0  ;;  %v2490_v26 = vpop.f32.mrf.mxu2 }
 0x8da   : > { %v2491_v16 = vadd.f32 %v2490_v26, %v9010_v14  ;;  %v9211_v14 = vpop.f32.mrf.mxu3 }
 0x8db   : > { %v2722_v55 = vsel %vm7639_vm1, %v2674_v43, 0.0 }
 0x8dc   : > { %v2754_v13 = vpack.c.bf16 %v2722_v55, %v2721_v20  ;;  %v2588_v50 = vpop.f32.mrf.mxu0  ;;  %v2540_v17 = vadd.f32 %v2539_v29, %v2491_v16 }
 0x8de   : > { %2848 = vrot.lane.b32.xlu1 %v2754_v13, %s12492_s22  ;;  %v9196_v54 = vadd.f32 %v2588_v50, %v2540_v17 }
 0x8e0   : > { %v9198_v49 = vpop.permute.xlu0 %2792 }
 0x8e1   : > { %12530 = vst [vmem:[#allocation12_spill] sm:$0xff] %v9198_v49  ;;  %v12212_v4 = vrot.slane %v9198_v49, 4  ;;  %v9201_v61 = vpop.f32.mrf.mxu2 }
 0x8e3   : > { %v2870_v11 = vsel %vm612_vm0, %v12212_v4, %v9198_v49 }
 0x8e4   : > { %2934 = vst.msk [vmem:[#allocation2 + $0xc] sm:$0xff] %vm7727_vm11, %v2870_v11  ;;  %v9209_v22 = vpop.f32.mrf.mxu0 }
 0x8e8   : > { %v9213_v29 = vpop.permute.xlu0 %2796  ;;  %v9215_v28 = vpop.permute.xlu2 %2808 }
 0x8e9   : > { %12531 = vst [vmem:[#allocation16_spill] sm:$0xff] %v9213_v29  ;;  %v12214_v12 = vrot.slane %v9213_v29, 4  ;;  %v12220_v31 = vrot.slane %v9215_v28, 4  ;;  %v2495_v10 = vpop.f32.mrf.mxu2 }
 0x8ea   : > { %12532 = vst [vmem:[#allocation19_spill] sm:$0xff] %v9215_v28  ;;  %v2496_v60 = vadd.f32 %v2495_v10, %v8853_v41  ;;  %v2549_v41 = vpop.f32.mrf.mxu3 }
 0x8eb   : > { %v2872_v19 = vsel %vm612_vm0, %v12214_v12, %v9213_v29  ;;  %v2878_v56 = vsel %vm612_vm0, %v12220_v31, %v9215_v28 }
 0x8ec   : > { %2936 = vst.msk [vmem:[#allocation2 + $0x18] sm:$0xff] %vm7727_vm11, %v2872_v19  ;;  %v2593_v57 = vpop.f32.mrf.mxu0  ;;  %v2545_v23 = vadd.f32 %v2544_v15, %v2496_v60 }
 0x8ed   : > { %2942 = vst.msk [vmem:[#allocation2 + $0x3c] sm:$0xff] %vm7727_vm11, %v2878_v56 }
 0x8ee   : > { %v9232_v0 = vadd.f32 %v2593_v57, %v2545_v23 }
 0x8f0   : > { %v9234_v3 = vpop.permute.xlu2 %2812  ;;  %v9236_v32 = vpop.permute.xlu1 %2800 }
 0x8f1   : > { %12533 = vst [vmem:[#allocation15_spill] sm:$0xff] %v9234_v3  ;;  %v12222_v9 = vrot.slane %v9234_v3, 4  ;;  %v12211_v62 = vrot.slane %v9236_v32, 4  ;;  %v9240_v34 = vpop.f32.mrf.mxu2 }
 0x8f2   : > { %12534 = vst [vmem:[#allocation20_spill] sm:$0xff] %v9236_v32  ;;  %v9266_v39 = vpop.f32.mrf.mxu3 }
 0x8f3   : > { %v2880_v45 = vsel %vm612_vm0, %v12222_v9, %v9234_v3  ;;  %v2874_v24 = vsel %vm612_vm0, %v12211_v62, %v9236_v32 }
 0x8f4   : > { %2944 = vst.msk [vmem:[#allocation2 + $0x48] sm:$0xff] %vm7727_vm11, %v2880_v45  ;;  %v9252_v6 = vpop.f32.mrf.mxu0 }
 0x8f5   : > { %2938 = vst.msk [vmem:[#allocation2 + $0x24] sm:$0xff] %vm7727_vm11, %v2874_v24 }
 0x8f8   : > { %v9256_v36 = vpop.permute.xlu1 %2804 }
 0x8f9   : > { %12535 = vst [vmem:[#allocation23_spill] sm:$0xff] %v9256_v36  ;;  %v12213_v47 = vrot.slane %v9256_v36, 4  ;;  %v2500_v2 = vpop.f32.mrf.mxu2 }
 0x8fa   : > { %v2501_v7 = vadd.f32 %v2500_v2, %v9025_v48  ;;  %v2554_v43 = vpop.f32.mrf.mxu3 }
 0x8fb   : > { %v2876_v44 = vsel %vm612_vm0, %v12213_v47, %v9256_v36 }
 0x8fc   : > { %2940 = vst.msk [vmem:[#allocation2 + $0x30] sm:$0xff] %vm7727_vm11, %v2876_v44  ;;  %v2598_v51 = vpop.f32.mrf.mxu0  ;;  %v2550_v38 = vadd.f32 %v2549_v41, %v2501_v7  ;;  %v6641_v41 = vld [vmem:[#allocation2 + $0x48] sm:$0xf]  ;;  %v7088_v7 = vld [vmem:[#allocation2 + $0x4c] sm:$0xf] }
 0x8fd   : > { %v6619_v46 = vld [vmem:[#allocation2 + $0x24] sm:$0xf0] }
 0x8fe   : > { %v9268_v58 = vadd.f32 %v2598_v51, %v2550_v38 }
 0x901   : > { %v9270_v52 = vpop.f32.mrf.mxu2 }
 0x902   : > { %v9279_v50 = vpop.f32.mrf.mxu3 }
 0x904   : > { %v9272_v59 = vpop.f32.mrf.mxu0 }
 0x909   : > { %v2505_v26 = vpop.f32.mrf.mxu2 }
 0x90a   : > { %v2506_v20 = vadd.f32 %v2505_v26, %v8894_v42  ;;  %v2559_v23 = vpop.f32.mrf.mxu3 }
 0x90c   : > { %v2603_v55 = vpop.f32.mrf.mxu0  ;;  %v2555_v16 = vadd.f32 %v2554_v43, %v2506_v20 }
 0x90e   : > { %v9275_v48 = vadd.f32 %v2603_v55, %v2555_v16 }
 0x910   : > { %v9277_v13 = vpop.permute.xlu0 %2816 }
 0x911   : > { %12536 = vst [vmem:[#allocation21_spill] sm:$0xff] %v9277_v13  ;;  %v12216_v17 = vrot.slane %v9277_v13, 4  ;;  %v9282_v15 = vpop.f32.mrf.mxu2 }
 0x913   : > { %v2882_v11 = vsel %vm612_vm0, %v12216_v17, %v9277_v13 }
 0x914   : > { %2946 = vst.msk [vmem:[#allocation2 + $0x54] sm:$0xff] %vm7727_vm11, %v2882_v11  ;;  %v9290_v42 = vpop.f32.mrf.mxu0 }
 0x918   : > { %v9292_v10 = vpop.permute.xlu0 %2820  ;;  %v9294_v19 = vpop.permute.xlu2 %2832 }
 0x919   : > { %12537 = vst [vmem:[#allocation11_spill] sm:$0xff] %v9292_v10  ;;  %v12218_v56 = vrot.slane %v9292_v10, 4  ;;  %v12223_v60 = vrot.slane %v9294_v19, 4  ;;  %v2510_v57 = vpop.f32.mrf.mxu2 }
 0x91a   : > { %12538 = vst [vmem:[#allocation13_spill] sm:$0xff] %v9294_v19  ;;  %v2511_v2 = vadd.f32 %v2510_v57, %v8817_v40 }
 0x91b   : > { %v2884_v45 = vsel %vm612_vm0, %v12218_v56, %v9292_v10  ;;  %v2890_v24 = vsel %vm612_vm0, %v12223_v60, %v9294_v19  ;;  %v7089_v44 = vld [vmem:[#allocation2 + $0x50] sm:$0xf0]  ;;  %v6643_v51 = vld [vmem:[#allocation2 + $0x54] sm:$0xf0]  ;;  %v7083_v19 = vld [vmem:[#allocation2 + $0x20] sm:$0xf0] }
 0x91c   : > { %2948 = vst.msk [vmem:[#allocation2 + $0x60] sm:$0xff] %vm7727_vm11, %v2884_v45  ;;  %v2608_v38 = vpop.f32.mrf.mxu0  ;;  %v9309_v43 = vor.u32 %v7089_v44, %v6641_v41  ;;  %v9311_v26 = vor.u32 %v7088_v7, %v6643_v51  ;;  %v2560_v20 = vadd.f32 %v2559_v23, %v2511_v2 }
 0x91d   : > { %2954 = vst.msk [vmem:[#allocation2 + $0x84] sm:$0xff] %vm7727_vm11, %v2890_v24 }
 0x91e   : > { %12539 = vst [vmem:[#allocation14_spill] sm:$0xff] %v9309_v43  ;;  %3230 = vrot.lane.b32.xlu1 %v9309_v43, %s12494_s0  ;;  %3142 = vrot.lane.b32.xlu2 %v9309_v43, %s12496_s29  ;;  %v9319_v40 = vadd.f32 %v2608_v38, %v2560_v20 }
 0x91f   : > { %12540 = vst [vmem:[#allocation22_spill] sm:$0xff] %v9311_v26  ;;  %3144 = vrot.lane.b32.xlu0 %v9311_v26, %s12496_s29 }
 0x920   : > { %v9323_v55 = vpop.permute.xlu2 %2836  ;;  %v9325_v16 = vpop.permute.xlu1 %2824 }
 0x921   : > { %12541 = vst [vmem:[#allocation17_spill] sm:$0xff] %v9323_v55  ;;  %v12224_v11 = vrot.slane %v9323_v55, 4  ;;  %v12215_v57 = vrot.slane %v9325_v16, 4 }
 0x922   : > { %12542 = vst [vmem:[#allocation26_spill] sm:$0xff] %v9325_v16 }
 0x923   : > { %v2892_v23 = vsel %vm612_vm0, %v12224_v11, %v9323_v55  ;;  %v2886_v41 = vsel %vm612_vm0, %v12215_v57, %v9325_v16  ;;  %v6653_v44 = vld [vmem:[#allocation2 + $0x60] sm:$0xf]  ;;  %v7091_v7 = vld [vmem:[#allocation2 + $0x64] sm:$0xf] }
 0x924   : > { %2956 = vst.msk [vmem:[#allocation2 + $0x90] sm:$0xff] %vm7727_vm11, %v2892_v23  ;;  %v7095_v62 = vld [vmem:[#allocation2 + $0x80] sm:$0xf0]  ;;  %v9383_v47 = vpop.f32.mrf.mxu0  ;;  %v6605_v55 = vld [vmem:[#allocation2] sm:$0xf] }
 0x925   : > { %2950 = vst.msk [vmem:[#allocation2 + $0x6c] sm:$0xff] %vm7727_vm11, %v2886_v41 }
 0x926   : > { %3232 = vrot.lane.b32.xlu2 %v9311_v26, %s12494_s0 }
 0x928   : > { %v9343_v45 = vpop.permute.xlu1 %2828 }
 0x929   : > { %12543 = vst [vmem:[#allocation24_spill] sm:$0xff] %v9343_v45  ;;  %v12217_v24 = vrot.slane %v9343_v45, 4 }
 0x92b   : > { %v2888_v2 = vsel %vm612_vm0, %v12217_v24, %v9343_v45  ;;  %v6677_v24 = vld [vmem:[#allocation2 + $0x90] sm:$0xf]  ;;  %v7097_v31 = vld [vmem:[#allocation2 + $0x94] sm:$0xf] }
 0x92c   : > { %2952 = vst.msk [vmem:[#allocation2 + $0x78] sm:$0xff] %vm7727_vm11, %v2888_v2  ;;  %v7092_v51 = vld [vmem:[#allocation2 + $0x68] sm:$0xf0]  ;;  %v6655_v38 = vld [vmem:[#allocation2 + $0x6c] sm:$0xf0]  ;;  %v9370_v2 = vpop.f32.mrf.mxu2  ;;  %v9402_v9 = vpop.f32.mrf.mxu0 }
 0x92d   : > { %v9352_v20 = vor.u32 %v7092_v51, %v6653_v44  ;;  %v9354_v23 = vor.u32 %v7091_v7, %v6655_v38  ;;  %v6667_v7 = vld [vmem:[#allocation2 + $0x84] sm:$0xf0]  ;;  %v9374_v38 = vpop.f32.mrf.mxu3 }
 0x92f   : > { %3236 = vrot.lane.b32.xlu0 %v9352_v20, %s12494_s0  ;;  %3148 = vrot.lane.b32.xlu1 %v9352_v20, %s12496_s29 }
 0x930   : > { %3150 = vrot.lane.b32.xlu2 %v9354_v23, %s12496_s29 }
 0x933   : > { %v6665_v41 = vld [vmem:[#allocation2 + $0x78] sm:$0xf]  ;;  %v7094_v44 = vld [vmem:[#allocation2 + $0x7c] sm:$0xf] }
 0x934   : > { %v9362_v4 = vor.u32 %v7095_v62, %v6665_v41  ;;  %v9372_v51 = vor.u32 %v7094_v44, %v6667_v7  ;;  %v9389_v7 = vpop.f32.mrf.mxu2 }
 0x935   : > { %v9393_v12 = vpop.f32.mrf.mxu3 }
 0x937   : > { %3238 = vrot.lane.b32.xlu1 %v9354_v23, %s12494_s0  ;;  %3154 = vrot.lane.b32.xlu0 %v9362_v4, %s12496_s29 }
 0x938   : > { %3242 = vrot.lane.b32.xlu2 %v9362_v4, %s12494_s0 }
 0x93c   : > { %v9410_v11 = vpop.f32.mrf.mxu2 }
 0x93f   : > { %3244 = vrot.lane.b32.xlu0 %v9372_v51, %s12494_s0  ;;  %3156 = vrot.lane.b32.xlu1 %v9372_v51, %s12496_s29 }
 0x940   : > { %v9380_v62 = vpop.permute.xlu0 %2840 }
 0x941   : > { %12544 = vst [vmem:[#allocation25_spill] sm:$0xff] %v9380_v62  ;;  %v12221_v41 = vrot.slane %v9380_v62, 4 }
 0x943   : > { %v2894_v44 = vsel %vm612_vm0, %v12221_v41, %v9380_v62  ;;  %v7082_v62 = vld [vmem:[#allocation2 + $0x1c] sm:$0xf] }
 0x944   : > { %2958 = vst.msk [vmem:[#allocation2 + $0x9c] sm:$0xff] %vm7727_vm11, %v2894_v44  ;;  %v9457_v28 = vor.u32 %v7082_v62, %v6619_v46  ;;  %v6617_v46 = vld [vmem:[#allocation2 + $0x18] sm:$0xf] }
 0x948   : > { %v9395_v57 = vpop.permute.xlu0 %2844 }
 0x949   : > { %12545 = vst [vmem:[#allocation28_spill] sm:$0xff] %v9395_v57  ;;  %v12225_v17 = vrot.slane %v9395_v57, 4 }
 0x94b   : > { %v2896_v56 = vsel %vm612_vm0, %v12225_v17, %v9395_v57  ;;  %v7098_v30 = vld [vmem:[#allocation2 + $0x98] sm:$0xf0]  ;;  %v6679_v41 = vld [vmem:[#allocation2 + $0x9c] sm:$0xf0] }
 0x94c   : > { %2960 = vst.msk [vmem:[#allocation2 + $0xa8] sm:$0xff] %vm7727_vm11, %v2896_v56  ;;  %v9406_v44 = vor.u32 %v7098_v30, %v6677_v24  ;;  %v9408_v60 = vor.u32 %v7097_v31, %v6679_v41  ;;  %v9421_v56 = vpop.f32.mrf.mxu3  ;;  %v9429_v31 = vpop.f32.mrf.mxu0 }
 0x94d   : > { %v2520_v24 = vpop.f32.mrf.mxu2 }
 0x94e   : > { %3160 = vrot.lane.b32.xlu2 %v9406_v44, %s12496_s29  ;;  %3162 = vrot.lane.b32.xlu0 %v9408_v60, %s12496_s29 }
 0x94f   : > { %3248 = vrot.lane.b32.xlu1 %v9406_v44, %s12494_s0 }
 0x950   : > { %v9418_v17 = vpop.permute.xlu1 %2848 }
 0x951   : > { %12546 = vst [vmem:[#allocation29_spill] sm:$0xff] %v9418_v17  ;;  %v12233_v32 = vrot.slane %v9418_v17, 4 }
 0x953   : > { %v2898_v30 = vsel %vm612_vm0, %v12233_v32, %v9418_v17  ;;  %v6689_v41 = vld [vmem:[#allocation2 + $0xa8] sm:$0xf]  ;;  %v7100_v36 = vld [vmem:[#allocation2 + $0xac] sm:$0xf]  ;;  %v6631_v17 = vld [vmem:[#allocation2 + $0x3c] sm:$0xf0] }
 0x954   : > { %2962 = vst.msk [vmem:[#allocation2 + $0xb4] sm:$0xff] %vm7727_vm11, %v2898_v30  ;;  %v2569_v16 = vpop.f32.mrf.mxu3  ;;  %v2618_v27 = vpop.f32.mrf.mxu0  ;;  %v6629_v30 = vld [vmem:[#allocation2 + $0x30] sm:$0xf] }
 0x955   : > { %v2522_v32 = vpop.f32.mrf.mxu2 }
 0x956   : > { %3250 = vrot.lane.b32.xlu2 %v9408_v60, %s12494_s0 }
 0x95b   : > { %v7101_v49 = vld [vmem:[#allocation2 + $0xb0] sm:$0xf0]  ;;  %v6691_v29 = vld [vmem:[#allocation2 + $0xb4] sm:$0xf0] }
 0x95c   : > { %v9433_v13 = vor.u32 %v7101_v49, %v6689_v41  ;;  %v9435_v45 = vor.u32 %v7100_v36, %v6691_v29  ;;  %v7086_v49 = vld [vmem:[#allocation2 + $0x38] sm:$0xf0]  ;;  %v2571_v29 = vpop.f32.mrf.mxu3  ;;  %v7085_v36 = vld [vmem:[#allocation2 + $0x34] sm:$0xf]  ;;  %v2620_v10 = vpop.f32.mrf.mxu0 }
 0x95d   : > { %v9445_v41 = vor.u32 %v7086_v49, %v6629_v30  ;;  %v2525_v30 = vpop.f32.mrf.mxu2  ;;  %v9455_v49 = vor.u32 %v7085_v36, %v6631_v17  ;;  %v2521_v17 = vadd.f32 %v2520_v24, %v12515_v21  ;;  %v7080_v36 = vld [vmem:[#allocation2 + $0x8] sm:$0xf0]  ;;  %v2523_v21 = vadd.f32 %v2522_v32, %v12517_v35  ;;  %v7079_v24 = vld [vmem:[#allocation2 + $0x4] sm:$0xf] }
 0x95e   : > { %12547 = vst [vmem:[#allocation30_spill] sm:$0xff] %v9433_v13  ;;  %3254 = vrot.lane.b32.xlu0 %v9433_v13, %s12494_s0  ;;  %3166 = vrot.lane.b32.xlu1 %v9433_v13, %s12496_s29  ;;  %v2526_v3 = vadd.f32 %v2525_v30, %v12524_v53 }
 0x95f   : > { %12548 = vst [vmem:[#allocation31_spill] sm:$0xff] %v9435_v45  ;;  %4180 = vmatpush.bf16.msrb.mxu1 %v9433_v13  ;;  %3168 = vrot.lane.b32.xlu2 %v9435_v45, %s12496_s29  ;;  %v9471_v13 = vor.u32 %v7080_v36, %v6605_v55  ;;  %v2518_v55 = vadd.f32 %v9410_v11, %v8880_v63 }
 0x960   : > { %12549 = vst [vmem:[#allocation32_spill] sm:$0xff] %v9455_v49  ;;  %v2516_v63 = vadd.f32 %v9389_v7, %v8892_v18  ;;  %v2508_v18 = vadd.f32 %v9282_v15, %v8835_v1 }
 0x963   : > { %4181 = vmatpush.bf16.msrb.mxu1 %v9406_v44 }
 0x964   : > { %v2574_v57 = vpop.f32.mrf.mxu3  ;;  %v2623_v62 = vpop.f32.mrf.mxu0 }
 0x965   : > { %v2527_v26 = vpop.f32.mrf.mxu2 }
 0x966   : > { %3136 = vrot.lane.b32.xlu0 %v9445_v41, %s12496_s29  ;;  %3256 = vrot.lane.b32.xlu1 %v9435_v45, %s12494_s0  ;;  %v9469_v45 = vor.u32 %v7083_v19, %v6617_v46  ;;  %v6607_v19 = vld [vmem:[#allocation2 + $0xc] sm:$0xf0] }
 0x967   : > { %4182 = vmatpush.bf16.msrb.mxu1 %v9362_v4  ;;  %3224 = vrot.lane.b32.xlu2 %v9445_v41, %s12494_s0  ;;  %v9485_v30 = vor.u32 %v7079_v24, %v6607_v19 }
 0x968   : > { %12550 = vst [vmem:[#allocation33_spill] sm:$0xff] %v9469_v45 }
 0x96b   : > { %4183 = vmatpush.bf16.msrb.mxu1 %v9352_v20 }
 0x96c   : > { %v2625_v32 = vpop.f32.mrf.mxu0 }
 0x96e   : > { %3226 = vrot.lane.b32.xlu0 %v9455_v49, %s12494_s0  ;;  %3138 = vrot.lane.b32.xlu1 %v9455_v49, %s12496_s29  ;;  %v2575_v49 = vadd.f32 %v2574_v57, %v2526_v3  ;;  %v2528_v3 = vadd.f32 %v2527_v26, %v12526_v33  ;;  %v2576_v57 = vpop.f32.mrf.mxu3 }
 0x96f   : > { %4184 = vmatpush.bf16.msrb.mxu1 %v9309_v43  ;;  %3132 = vrot.lane.b32.xlu2 %v9457_v28, %s12496_s29  ;;  %v2570_v43 = vadd.f32 %v2569_v16, %v2521_v17  ;;  %v2572_v17 = vadd.f32 %v2571_v29, %v2523_v21 }
 0x970   : > { %v2624_v53 = vadd.f32 %v2623_v62, %v2575_v49  ;;  %v2577_v46 = vadd.f32 %v2576_v57, %v2528_v3  ;;  %v2565_v62 = vadd.f32 %v9393_v12, %v2516_v63 }
 0x971   : > { %v2619_v16 = vadd.f32 %v2618_v27, %v2570_v43  ;;  %v2621_v33 = vadd.f32 %v2620_v10, %v2572_v17  ;;  %v2513_v10 = vadd.f32 %v9370_v2, %v9014_v8  ;;  %v2654_v8 = vmax.f32 %v9319_v40, 0.0 }
 0x972   : > { %v2672_v36 = vmax.f32 %v2624_v53, 0.0  ;;  %v2626_v11 = vadd.f32 %v2625_v32, %v2577_v46 }
 0x973   : > { %4185 = vmatpush.bf16.msrb.mxu1 %v9445_v41  ;;  %v2666_v35 = vmax.f32 %v2619_v16, 0.0  ;;  %v2669_v53 = vmax.f32 %v2621_v33, 0.0  ;;  %v2557_v16 = vadd.f32 %v9279_v50, %v2508_v18 }
 0x974   : > { %v2720_v26 = vsel %vm7647_vm3, %v2672_v36, 0.0  ;;  %v2675_v3 = vmax.f32 %v2626_v11, 0.0  ;;  %v2648_v36 = vmax.f32 %v9275_v48, 0.0 }
 0x975   : > { %v2714_v27 = vsel %vm7647_vm3, %v2666_v35, 0.0  ;;  %v2753_v49 = vpack.c.bf16 %v2720_v26, %v2720_v26  ;;  %v2717_v12 = vsel %vm7647_vm3, %v2669_v53, 0.0  ;;  %v2498_v26 = vadd.f32 %v9240_v34, %v9038_v25 }
 0x976   : > { %3218 = vrot.lane.b32.xlu0 %v9469_v45, %s12494_s0  ;;  %3130 = vrot.lane.b32.xlu1 %v9469_v45, %s12496_s29  ;;  %v2749_v21 = vpack.c.bf16 %v2714_v27, %v2714_v27  ;;  %v2723_v7 = vsel %vm7647_vm3, %v2675_v3, 0.0  ;;  %v2751_v1 = vpack.c.bf16 %v2717_v12, %v2717_v12  ;;  %v2696_v48 = vsel %vm7647_vm3, %v2648_v36, 0.0  ;;  %v6701_v27 = vld [vmem:[#allocation3] sm:$0xf] }
 0x977   : > { %4186 = vmatpush.bf16.msrb.mxu1 %v9469_v45  ;;  %3124 = vrot.lane.b32.xlu2 %v9471_v13, %s12496_s29  ;;  %v2567_v45 = vadd.f32 %v9421_v56, %v2518_v55  ;;  %v2755_v15 = vpack.c.bf16 %v2723_v7, %v2723_v7  ;;  %v2737_v35 = vpack.c.bf16 %v2696_v48, %v2696_v48  ;;  %v2636_v25 = vmax.f32 %v9232_v0, 0.0  ;;  %v6741_v48 = vld [vmem:[#allocation3 + $0x50] sm:$0xf] }
 0x978   : > { %v9501_v29 = vpop.permute.xlu2 %3142  ;;  %v2547_v34 = vadd.f32 %v9211_v14, %v2498_v26 }
 0x979   : > { %v2616_v56 = vadd.f32 %v9429_v31, %v2567_v45  ;;  %v2614_v45 = vadd.f32 %v9402_v9, %v2565_v62  ;;  %v2503_v31 = vadd.f32 %v9270_v52, %v9002_v37  ;;  %v2562_v9 = vadd.f32 %v9374_v38, %v2513_v10 }
 0x97a   : > { %v2606_v37 = vadd.f32 %v9290_v42, %v2557_v16  ;;  %v2702_v52 = vsel %vm7647_vm3, %v2654_v8, 0.0  ;;  %v2630_v10 = vmax.f32 %v9196_v54, 0.0  ;;  %v2684_v0 = vsel %vm7647_vm3, %v2636_v25, 0.0 }
 0x97b   : > { %4187 = vmatpush.bf16.msrb.mxu1 %v9471_v13  ;;  %v2663_v19 = vmax.f32 %v2616_v56, 0.0  ;;  %v2660_v2 = vmax.f32 %v2614_v45, 0.0  ;;  %v2552_v17 = vadd.f32 %v9266_v39, %v2503_v31  ;;  %v2611_v50 = vadd.f32 %v9383_v47, %v2562_v9  ;;  %v12552_v47 = vld [vmem:[#allocation27_spill] sm:$0xff]  ;;  %v6721_v9 = vld [vmem:[#allocation3 + $0x28] sm:$0xf] }
 0x97c   : > { %v2741_v38 = vpack.c.bf16 %v2702_v52, %v2702_v52  ;;  %v2651_v32 = vmax.f32 %v2606_v37, 0.0  ;;  %v2596_v14 = vadd.f32 %v9252_v6, %v2547_v34  ;;  %v2678_v54 = vsel %vm7647_vm3, %v2630_v10, 0.0  ;;  %v7125_v10 = vld [vmem:[#allocation3 + $0xb0] sm:$0xf0] }
 0x97d   : > { %v2711_v55 = vsel %vm7647_vm3, %v2663_v19, 0.0  ;;  %v2708_v40 = vsel %vm7647_vm3, %v2660_v2, 0.0  ;;  %v2601_v39 = vadd.f32 %v9272_v59, %v2552_v17  ;;  %v2657_v63 = vmax.f32 %v2611_v50, 0.0  ;;  %v7110_v2 = vld [vmem:[#allocation3 + $0x38] sm:$0xf0] }
 0x97e   : > { %3126 = vrot.lane.b32.xlu0 %v9485_v30, %s12496_s29  ;;  %3220 = vrot.lane.b32.xlu1 %v9457_v28, %s12494_s0  ;;  %v2747_v24 = vpack.c.bf16 %v2711_v55, %v2711_v55  ;;  %v2745_v46 = vpack.c.bf16 %v2708_v40, %v2708_v40  ;;  %v2493_v59 = vadd.f32 %v9201_v61, %v12552_v47  ;;  %v2699_v11 = vsel %vm7647_vm3, %v2651_v32, 0.0  ;;  %v6761_v47 = vld [vmem:[#allocation3 + $0x78] sm:$0xf] }
 0x97f   : > { %3214 = vrot.lane.b32.xlu2 %v9485_v30, %s12494_s0  ;;  %v2645_v33 = vmax.f32 %v2601_v39, 0.0  ;;  %v2705_v56 = vsel %vm7647_vm3, %v2657_v63, 0.0  ;;  %v2739_v3 = vpack.c.bf16 %v2699_v11, %v2699_v11  ;;  %v2642_v19 = vmax.f32 %v9268_v58, 0.0  ;;  %v12557_v11 = vld [vmem:[#allocation22_spill] sm:$0xff] }
 0x980   : > { %v9522_v57 = vpop.permute.xlu2 %3232  ;;  %v2542_v53 = vadd.f32 %v9187_v5, %v2493_v59  ;;  %v2743_v61 = vpack.c.bf16 %v2705_v56, %v2705_v56  ;;  %v2729_v12 = vpack.c.bf16 %v2684_v0, %v2684_v0  ;;  %v2725_v16 = vpack.c.bf16 %v2678_v54, %v2678_v54  ;;  %v7120_v59 = vld [vmem:[#allocation3 + $0x88] sm:$0xf0] }
 0x981   : > { %v2693_v62 = vsel %vm7647_vm3, %v2645_v33, 0.0  ;;  %v2690_v58 = vsel %vm7647_vm3, %v2642_v19, 0.0  ;;  %v9633_v26 = vor.u32 %v7120_v59, %v6761_v47  ;;  %v7103_v59 = vld [vmem:[#allocation3 + $0x4] sm:$0xf] }
 0x982   : > { %v2735_v18 = vpack.c.bf16 %v2693_v62, %v2693_v62  ;;  %v2591_v45 = vadd.f32 %v9209_v22, %v2542_v53  ;;  %v2733_v7 = vpack.c.bf16 %v2690_v58, %v2690_v58  ;;  %v2639_v22 = vmax.f32 %v2596_v14, 0.0  ;;  %v12558_v53 = vld [vmem:[#allocation14_spill] sm:$0xff] }
 0x983   : > { %12556 = vst [vmem:[#allocation35_spill] sm:$0xff] %v9633_v26  ;;  %v12560_v14 = vld [vmem:[#allocation30_spill] sm:$0xff] }
 0x984   : > { %v2687_v8 = vsel %vm7647_vm3, %v2639_v22, 0.0 }
 0x985   : > { %v2731_v36 = vpack.c.bf16 %v2687_v8, %v2687_v8  ;;  %v12564_v8 = vld [vmem:[#allocation32_spill] sm:$0xff] }
 0x986   : > { %2846 = vrot.lane.b32.xlu0 %v2753_v49, %s12492_s22  ;;  %3212 = vrot.lane.b32.xlu1 %v9471_v13, %s12494_s0  ;;  %v7105_v49 = vld [vmem:[#allocation3 + $0x10] sm:$0xf0] }
 0x987   : > { %2838 = vrot.lane.b32.xlu2 %v2749_v21, %s12492_s22  ;;  %v9555_v21 = vor.u32 %v7105_v49, %v6701_v27 }
 0x989   : > { %12553 = vst [vmem:[#allocation10_spill] sm:$0xff] %v9555_v21  ;;  %4188 = vmatmul.bf16.vlgmr.msrb.gmra.mxu1 %v9555_v21 }
 0x98a   : > { %v9540_v42 = vpop.permute.xlu2 %3150 }
 0x98e   : > { %2842 = vrot.lane.b32.xlu0 %v2751_v1, %s12492_s22  ;;  %2850 = vrot.lane.b32.xlu1 %v2755_v15, %s12492_s22  ;;  %v2633_v1 = vmax.f32 %v2591_v45, 0.0 }
 0x98f   : > { %2834 = vrot.lane.b32.xlu2 %v2747_v24, %s12492_s22  ;;  %v9587_v24 = vor.u32 %v7110_v2, %v6721_v9 }
 0x990   : > { %v9578_v55 = vpop.permute.xlu1 %3230  ;;  %v2681_v15 = vsel %vm7647_vm3, %v2633_v1, 0.0 }
 0x991   : > { %v9576_v31 = vpop.permute.xlu0 %3144  ;;  %12554 = vst [vmem:[#allocation27_spill] sm:$0xff] %v9587_v24  ;;  %v2727_v17 = vpack.c.bf16 %v2681_v15, %v2681_v15  ;;  %v12563_v15 = vld [vmem:[#allocation31_spill] sm:$0xff] }
 0x992   : > { %v9566_v5 = vpop.permute.xlu2 %3242  ;;  %v3178_v22 = vsel %vm630_vm4, %v9501_v29, %v9576_v31 }
 0x996   : > { %2822 = vrot.lane.b32.xlu0 %v2741_v38, %s12492_s22  ;;  %2830 = vrot.lane.b32.xlu1 %v2745_v46, %s12492_s22  ;;  %v7115_v38 = vld [vmem:[#allocation3 + $0x60] sm:$0xf0] }
 0x997   : > { %2814 = vrot.lane.b32.xlu2 %v2737_v35, %s12492_s22  ;;  %v9608_v46 = vor.u32 %v7115_v38, %v6741_v48  ;;  %v6801_v38 = vld [vmem:[#allocation3 + $0xc8] sm:$0xf] }
 0x999   : > { %4193 = vmatmul.bf16.gmra.mxu1 %v9587_v24  ;;  %12555 = vst [vmem:[#allocation34_spill] sm:$0xff] %v9608_v46 }
 0x99e   : > { %2818 = vrot.lane.b32.xlu0 %v2739_v3, %s12492_s22  ;;  %2826 = vrot.lane.b32.xlu1 %v2743_v61, %s12492_s22 }
 0x99f   : > { %2810 = vrot.lane.b32.xlu2 %v2735_v18, %s12492_s22  ;;  %v6781_v18 = vld [vmem:[#allocation3 + $0xa0] sm:$0xf] }
 0x9a0   : > { %v9662_v45 = vor.u32 %v7125_v10, %v6781_v18 }
 0x9a1   : > { %v9589_v37 = vpop.permute.xlu0 %3236  ;;  %v3149_v52 = vpop.permute.xlu1 %3148 }
 0x9a2   : > { %12559 = vst [vmem:[#allocation22_spill] sm:$0xff] %v9662_v45  ;;  %v3180_v0 = vsel %vm630_vm4, %v3149_v52, %v9540_v42  ;;  %v12565_v52 = vld [vmem:[#allocation13_spill] sm:$0xff] }
 0x9a6   : > { %2798 = vrot.lane.b32.xlu0 %v2729_v12, %s12492_s22  ;;  %2806 = vrot.lane.b32.xlu1 %v2733_v7, %s12492_s22 }
 0x9a7   : > { %2790 = vrot.lane.b32.xlu2 %v2725_v16, %s12492_s22 }
 0x9a8   : > { %v3161_v6 = vpop.permute.xlu2 %3160 }
 0x9a9   : > { %v3155_v50 = vpop.permute.xlu0 %3154  ;;  %v9598_v40 = vpop.permute.xlu1 %3238  ;;  %4198 = vmatmul.bf16.gmra.mxu1 %v9608_v46 }
 0x9aa   : > { %v3268_v29 = vsel %vm645_vm2, %v9589_v37, %v9598_v40  ;;  %v3266_v37 = vsel %vm645_vm2, %v9578_v55, %v9522_v57 }
 0x9ae   : > { %2794 = vrot.lane.b32.xlu0 %v2727_v17, %s12492_s22  ;;  %2802 = vrot.lane.b32.xlu1 %v2731_v36, %s12492_s22  ;;  %s6331_s22 = sshll.u32 %s447_s1, 1 }
 0x9af   : > { %3338 = vrot.lane.b32.xlu2 %v9408_v60, %s12495_s9  ;;  %s449_s24 = scalar_lea.vmem [#allocation6], %s6331_s22 }
 0x9b0   : > { %v9596_v43 = vpop.permute.xlu2 %3250  ;;  %s6254_s20 = sshll.u32 %s449_s24, 4  ;;  %s6255_s20 = int_to_ptr.vmem [resolvable:$true] %s6254_s20 }
 0x9b1   : > { %v9619_v35 = vpop.permute.xlu1 %3156 }
 0x9b2   : > { %v3182_v19 = vsel %vm630_vm4, %v3155_v50, %v9619_v35  ;;  %v12566_v50 = vrot.slane %v12565_v52, 4 }
 0x9b6   : > { %3424 = vrot.lane.b32.xlu0 %v9406_v44, %s12493_s15  ;;  %3336 = vrot.lane.b32.xlu1 %v9406_v44, %s12495_s9  ;;  %v9617_v44 = vpop.permute.xlu0 %3244 }
 0x9b7   : > { %3418 = vrot.lane.b32.xlu2 %v9362_v4, %s12493_s15 }
 0x9b9   : > { %v9606_v39 = vpop.permute.xlu2 %3168  ;;  %4203 = vmatmul.bf16.gmra.mxu1 %v9633_v26 }
 0x9be   : > { %3330 = vrot.lane.b32.xlu0 %v9362_v4, %s12495_s9  ;;  %3426 = vrot.lane.b32.xlu1 %v9408_v60, %s12493_s15 }
 0x9bf   : > { %3324 = vrot.lane.b32.xlu2 %v9352_v20, %s12495_s9 }
 0x9c0   : > { %v9629_v4 = vpop.permute.xlu0 %3162 }
 0x9c1   : > { %v9621_v32 = vpop.permute.xlu2 %3224  ;;  %v3249_v63 = vpop.permute.xlu1 %3248 }
 0x9c2   : > { %v3272_v58 = vsel %vm645_vm2, %v3249_v63, %v9596_v43  ;;  %v7130_v63 = vld [vmem:[#allocation3 + $0xd8] sm:$0xf0] }
 0x9c3   : > { %v9709_v47 = vor.u32 %v7130_v63, %v6801_v38 }
 0x9c5   : > { %12567 = vst [vmem:[#allocation14_spill] sm:$0xff] %v9709_v47 }
 0x9c6   : > { %3420 = vrot.lane.b32.xlu0 %v9372_v51, %s12493_s15  ;;  %3332 = vrot.lane.b32.xlu1 %v9372_v51, %s12495_s9 }
 0x9c7   : > { %3414 = vrot.lane.b32.xlu2 %v9354_v23, %s12493_s15 }
 0x9c9   : > { %v9631_v33 = vpop.permute.xlu2 %3132  ;;  %4208 = vmatmul.bf16.gmra.mxu1 %v9662_v45 }
 0x9ce   : > { %3326 = vrot.lane.b32.xlu0 %v9354_v23, %s12495_s9  ;;  %3412 = vrot.lane.b32.xlu1 %v9352_v20, %s12493_s15  ;;  %v3184_v20 = vsel %vm630_vm4, %v3161_v6, %v9629_v4  ;;  %v3270_v6 = vsel %vm645_vm2, %v9566_v5, %v9617_v44 }
 0x9cf   : > { %3320 = vrot.lane.b32.xlu2 %v12557_v11, %s12495_s9 }
 0x9d0   : > { %v3255_v56 = vpop.permute.xlu0 %3254  ;;  %v3167_v27 = vpop.permute.xlu1 %3166 }
 0x9d1   : > { %v9642_v49 = vpop.permute.xlu2 %3124  ;;  %v3186_v62 = vsel %vm630_vm4, %v3167_v27, %v9606_v39 }
 0x9d2   : > { %4269 = vmatpush.bf16.msra.mxu2 %v3186_v62 }
 0x9d6   : > { %3406 = vrot.lane.b32.xlu0 %v12558_v53, %s12493_s15  ;;  %3318 = vrot.lane.b32.xlu1 %v12558_v53, %s12495_s9 }
 0x9d7   : > { %3400 = vrot.lane.b32.xlu2 %v9445_v41, %s12493_s15  ;;  %4270 = vmatpush.bf16.msra.mxu2 %v3184_v20 }
 0x9d8   : > { %v3137_v3 = vpop.permute.xlu0 %3136  ;;  %v9654_v61 = vpop.permute.xlu1 %3256 }
 0x9d9   : > { %v9656_v25 = vpop.permute.xlu2 %3214  ;;  %v3274_v34 = vsel %vm645_vm2, %v3255_v56, %v9654_v61  ;;  %4213 = vmatmul.bf16.gmra.mxu1 %v9709_v47  ;;  %v6703_v56 = vld [vmem:[#allocation3 + $0x14] sm:$0xf0] }
 0x9da   : > { %4358 = vmatpush.bf16.msrb.mxu3 %v3274_v34  ;;  %v9726_v34 = vor.u32 %v7103_v59, %v6703_v56 }
 0x9db   : > { %4271 = vmatpush.bf16.msra.mxu2 %v3182_v19  ;;  %v12569_v19 = vld [vmem:[#allocation15_spill] sm:$0xff] }
 0x9dc   : > { %12568 = vst [vmem:[#allocation30_spill] sm:$0xff] %v9726_v34  ;;  %v12570_v18 = vrot.slane %v12569_v19, 4 }
 0x9de   : > { %3312 = vrot.lane.b32.xlu0 %v9445_v41, %s12495_s9  ;;  %3408 = vrot.lane.b32.xlu1 %v12557_v11, %s12493_s15  ;;  %v12561_v41 = vld [vmem:[#allocation17_spill] sm:$0xff] }
 0x9df   : > { %3342 = vrot.lane.b32.xlu2 %v12560_v14, %s12495_s9  ;;  %4272 = vmatpush.bf16.msra.mxu2 %v3180_v0  ;;  %v12562_v16 = vrot.slane %v12561_v41, 4  ;;  %v7106_v0 = vld [vmem:[#allocation3 + $0x18] sm:$0xf0] }
 0x9e0   : > { %4359 = vmatpush.bf16.msrb.mxu3 %v3272_v58  ;;  %v9675_v54 = vpop.permute.xlu0 %3226  ;;  %v9677_v12 = vpop.permute.xlu1 %3138  ;;  %v12571_v58 = vld [vmem:[#allocation28_spill] sm:$0xff] }
 0x9e1   : > { %v2839_v7 = vpop.permute.xlu2 %2838  ;;  %v3176_v9 = vsel %vm630_vm4, %v3137_v3, %v9677_v12  ;;  %v3264_v27 = vsel %vm645_vm2, %v9621_v32, %v9675_v54  ;;  %v6709_v32 = vld [vmem:[#allocation3 + $0x8] sm:$0xf] }
 0x9e2   : > { %v2893_v1 = vsel %vm612_vm0, %v12562_v16, %v2839_v7  ;;  %v12572_v7 = vrot.slane %v12571_v58, 4 }
 0x9e3   : > { %2957 = vst.msk [vmem:[#allocation2 + $0x98] sm:$0xf] %vm825_vm12, %v2893_v1  ;;  %4273 = vmatpush.bf16.msra.mxu2 %v3178_v22  ;;  %v9740_v22 = vor.u32 %v7106_v0, %v6709_v32 }
 0x9e4   : > { %4360 = vmatpush.bf16.msrb.mxu3 %v3270_v6  ;;  %v12574_v6 = vld [vmem:[#allocation19_spill] sm:$0xff] }
 0x9e5   : > { %12573 = vst [vmem:[#allocation17_spill] sm:$0xff] %v9740_v22 }
 0x9e6   : > { %3344 = vrot.lane.b32.xlu0 %v12563_v15, %s12495_s9  ;;  %3314 = vrot.lane.b32.xlu1 %v12564_v8, %s12495_s9 }
 0x9e7   : > { %3432 = vrot.lane.b32.xlu2 %v12563_v15, %s12493_s15  ;;  %4274 = vmatpush.bf16.msra.mxu2 %v3176_v9 }
 0x9e8   : > { %4361 = vmatpush.bf16.msrb.mxu3 %v3268_v29  ;;  %v3219_v5 = vpop.permute.xlu0 %3218  ;;  %v3131_v2 = vpop.permute.xlu1 %3130  ;;  %v7135_v29 = vld [vmem:[#allocation3 + $0x100] sm:$0xf0] }
 0x9e9   : > { %v2835_v17 = vpop.permute.xlu2 %2834  ;;  %v3174_v36 = vsel %vm630_vm4, %v3131_v2, %v9631_v33  ;;  %v7108_v2 = vld [vmem:[#allocation3 + $0x2c] sm:$0xf] }
 0x9ea   : > { %v2891_v48 = vsel %vm612_vm0, %v12566_v50, %v2835_v17  ;;  %v6723_v17 = vld [vmem:[#allocation3 + $0x3c] sm:$0xf0] }
 0x9eb   : > { %2955 = vst.msk [vmem:[#allocation2 + $0x8c] sm:$0xf] %vm825_vm12, %v2891_v48  ;;  %4275 = vmatpush.bf16.msra.mxu2 %v3174_v36  ;;  %v12577_v50 = vld [vmem:[#allocation25_spill] sm:$0xff]  ;;  %v9759_v56 = vor.u32 %v7108_v2, %v6723_v17  ;;  %v12592_v17 = vld [vmem:[#allocation26_spill] sm:$0xff] }
 0x9ec   : > { %4362 = vmatpush.bf16.msrb.mxu3 %v3266_v37  ;;  %v12578_v48 = vrot.slane %v12577_v50, 4  ;;  %v12579_v37 = vld [vmem:[#allocation29_spill] sm:$0xff] }
 0x9ed   : > { %v12580_v59 = vrot.slane %v12579_v37, 4  ;;  %12581 = vst [vmem:[#allocation32_spill] sm:$0xff] %v9759_v56 }
 0x9ee   : > { %3430 = vrot.lane.b32.xlu1 %v12560_v14, %s12493_s15 }
 0x9f0   : > { %4363 = vmatpush.bf16.msrb.mxu3 %v3264_v27  ;;  %v9717_v62 = vpop.permute.xlu0 %3126  ;;  %v9719_v53 = vpop.permute.xlu1 %3220  ;;  %v12582_v27 = vld [vmem:[#allocation18_spill] sm:$0xff] }
 0x9f1   : > { %v2815_v55 = vpop.permute.xlu2 %2814  ;;  %v3172_v20 = vsel %vm630_vm4, %v9642_v49, %v9717_v62  ;;  %v3262_v3 = vsel %vm645_vm2, %v3219_v5, %v9719_v53 }
 0x9f2   : > { %v2881_v10 = vsel %vm612_vm0, %v12570_v18, %v2815_v55  ;;  %4276 = vmatpush.bf16.msra.mxu2 %v3172_v20  ;;  %v12583_v55 = vrot.slane %v12582_v27, 4  ;;  %v12595_v27 = vld [vmem:[#allocation16_spill] sm:$0xff] }
 0x9f3   : > { %2945 = vst.msk [vmem:[#allocation2 + $0x50] sm:$0xf] %vm825_vm12, %v2881_v10  ;;  %v12584_v10 = vld [vmem:[#allocation11_spill] sm:$0xff] }
 0x9f4   : > { %4364 = vmatpush.bf16.msrb.mxu3 %v3262_v3  ;;  %v7111_v3 = vld [vmem:[#allocation3 + $0x40] sm:$0xf0]  ;;  %v12585_v32 = vrot.slane %v12584_v10, 4 }
 0x9f5   : > { %4277 = vmatmul.bf16.vlgmr.msra.gmra.mxu2 %v9726_v34 }
 0x9f6   : > { %4625 = vmatpush.bf16.msrb.mxu2 %v12563_v15  ;;  %v12575_v15 = vrot.slane %v12574_v6, 4  ;;  %v6743_v6 = vld [vmem:[#allocation3 + $0x64] sm:$0xf0] }
 0x9f8   : > { %v2847_v49 = vpop.permute.xlu0 %2846  ;;  %v3213_v14 = vpop.permute.xlu1 %3212 }
 0x9f9   : > { %v2897_v41 = vsel %vm612_vm0, %v12572_v7, %v2847_v49  ;;  %v2811_v16 = vpop.permute.xlu2 %2810  ;;  %v3260_v1 = vsel %vm645_vm2, %v3213_v14, %v9656_v25  ;;  %v12586_v49 = vld [vmem:[#allocation24_spill] sm:$0xff] }
 0x9fa   : > { %4626 = vmatpush.bf16.msrb.mxu2 %v9408_v60  ;;  %2961 = vst.msk [vmem:[#allocation2 + $0xb0] sm:$0xf] %vm825_vm12, %v2897_v41  ;;  %v2879_v9 = vsel %vm612_vm0, %v12575_v15, %v2811_v16  ;;  %4365 = vmatpush.bf16.msrb.mxu3 %v3260_v1  ;;  %v6821_v60 = vld [vmem:[#allocation3 + $0xf0] sm:$0xf]  ;;  %v12587_v14 = vrot.slane %v12586_v49, 4 }
 0x9fb   : > { %2943 = vst.msk [vmem:[#allocation2 + $0x44] sm:$0xf] %vm825_vm12, %v2879_v9  ;;  %v9748_v5 = vor.u32 %v7135_v29, %v6821_v60  ;;  %v7140_v41 = vld [vmem:[#allocation3 + $0x128] sm:$0xf0]  ;;  %v7113_v1 = vld [vmem:[#allocation3 + $0x54] sm:$0xf] }
 0x9fc   : > { %v12590_v60 = vld [vmem:[#allocation21_spill] sm:$0xff]  ;;  %v9792_v50 = vor.u32 %v7113_v1, %v6743_v6  ;;  %v7145_v49 = vld [vmem:[#allocation3 + $0x150] sm:$0xf0] }
 0x9fd   : > { %12576 = vst [vmem:[#allocation31_spill] sm:$0xff] %v9748_v5  ;;  %4366 = vmatmul.bf16.vlgmr.msrb.gmra.mxu3 %v9740_v22  ;;  %4218 = vmatmul.bf16.gmra.mxu1 %v9748_v5  ;;  %v12591_v29 = vrot.slane %v12590_v60, 4  ;;  %v6901_v22 = vld [vmem:[#allocation3 + $0x190] sm:$0xf]  ;;  %v7160_v5 = vld [vmem:[#allocation3 + $0x1c8] sm:$0xf0] }
 0x9fe   : > { %4627 = vmatpush.bf16.msrb.mxu2 %v9372_v51  ;;  %12594 = vst [vmem:[#allocation28_spill] sm:$0xff] %v9792_v50 }
 0xa00   : > { %v2843_v36 = vpop.permute.xlu0 %2842  ;;  %v2851_v52 = vpop.permute.xlu1 %2850 }
 0xa01   : > { %v2895_v38 = vsel %vm612_vm0, %v12578_v48, %v2843_v36  ;;  %v2791_v63 = vpop.permute.xlu2 %2790  ;;  %v2899_v51 = vsel %vm612_vm0, %v12580_v59, %v2851_v52  ;;  %v12593_v36 = vrot.slane %v12592_v17, 4  ;;  %v6749_v48 = vld [vmem:[#allocation3 + $0x58] sm:$0xf]  ;;  %v6649_v59 = vld [vmem:[#allocation2 + $0x50] sm:$0xf] }
 0xa02   : > { %4628 = vmatpush.bf16.msrb.mxu2 %v9354_v23  ;;  %2959 = vst.msk [vmem:[#allocation2 + $0xa4] sm:$0xf] %vm825_vm12, %v2895_v38  ;;  %v2869_v20 = vsel %vm612_vm0, %v12583_v55, %v2791_v63  ;;  %v6729_v23 = vld [vmem:[#allocation3 + $0x30] sm:$0xf]  ;;  %v7116_v38 = vld [vmem:[#allocation3 + $0x68] sm:$0xf0] }
 0xa03   : > { %2933 = vst.msk [vmem:[#allocation2 + $0x8] sm:$0xf] %vm825_vm12, %v2869_v20  ;;  %v9776_v7 = vor.u32 %v7111_v3, %v6729_v23  ;;  %v12596_v55 = vrot.slane %v12595_v27, 4  ;;  %v12597_v23 = vld [vmem:[#allocation23_spill] sm:$0xff]  ;;  %v9805_v10 = vor.u32 %v7116_v38, %v6749_v48  ;;  %v12601_v17 = vld [vmem:[#allocation12_spill] sm:$0xff] }
 0xa04   : > { %2963 = vst.msk [vmem:[#allocation2 + $0xbc] sm:$0xf] %vm825_vm12, %v2899_v51  ;;  %v12598_v3 = vrot.slane %v12597_v23, 4  ;;  %v12603_v48 = vld [vmem:[#allocation20_spill] sm:$0xff]  ;;  %v7087_v23 = vld [vmem:[#allocation2 + $0x40] sm:$0xf0] }
 0xa05   : > { %4282 = vmatmul.bf16.gmra.mxu2 %v9759_v56  ;;  %12588 = vst [vmem:[#allocation13_spill] sm:$0xff] %v9776_v7  ;;  %v12604_v38 = vrot.slane %v12603_v48, 4 }
 0xa06   : > { %4629 = vmatpush.bf16.msrb.mxu2 %v12557_v11  ;;  %v6841_v11 = vld [vmem:[#allocation3 + $0x118] sm:$0xf]  ;;  %12599 = vst [vmem:[#allocation19_spill] sm:$0xff] %v9805_v10 }
 0xa07   : > { %v9779_v16 = vor.u32 %v7140_v41, %v6841_v11 }
 0xa08   : > { %v2823_v19 = vpop.permute.xlu0 %2822  ;;  %v2831_v18 = vpop.permute.xlu1 %2830 }
 0xa09   : > { %v2885_v0 = vsel %vm612_vm0, %v12585_v32, %v2823_v19  ;;  %v2889_v58 = vsel %vm612_vm0, %v12587_v14, %v2831_v18  ;;  %12589 = vst [vmem:[#allocation15_spill] sm:$0xff] %v9779_v16  ;;  %v9797_v51 = vpop.permute.xlu2 %3338  ;;  %v9807_v32 = vpop.f32.mrf.mxu1  ;;  %v7099_v6 = vld [vmem:[#allocation2 + $0xa0] sm:$0xf0] }
 0xa0a   : > { %4630 = vmatpush.bf16.msrb.mxu2 %v12564_v8  ;;  %2949 = vst.msk [vmem:[#allocation2 + $0x68] sm:$0xf] %vm825_vm12, %v2885_v0  ;;  %v6861_v0 = vld [vmem:[#allocation3 + $0x140] sm:$0xf] }
 0xa0b   : > { %2953 = vst.msk [vmem:[#allocation2 + $0x80] sm:$0xf] %vm825_vm12, %v2889_v58  ;;  %v9812_v41 = vor.u32 %v7145_v49, %v6861_v0  ;;  %v6769_v49 = vld [vmem:[#allocation3 + $0x80] sm:$0xf] }
 0xa0d   : > { %4371 = vmatmul.bf16.gmra.mxu3 %v9776_v7  ;;  %4223 = vmatmul.bf16.gmra.mxu1 %v9779_v16  ;;  %12600 = vst [vmem:[#allocation25_spill] sm:$0xff] %v9812_v41 }
 0xa0e   : > { %4631 = vmatpush.bf16.msrb.mxu2 %v9457_v28 }
 0xa10   : > { %v2819_v15 = vpop.permute.xlu0 %2818  ;;  %v2827_v9 = vpop.permute.xlu1 %2826 }
 0xa11   : > { %v2883_v2 = vsel %vm612_vm0, %v12591_v29, %v2819_v15  ;;  %v2887_v52 = vsel %vm612_vm0, %v12593_v36, %v2827_v9  ;;  %v6661_v58 = vld [vmem:[#allocation2 + $0x68] sm:$0xf]  ;;  %v7118_v15 = vld [vmem:[#allocation3 + $0x7c] sm:$0xf]  ;;  %v6763_v9 = vld [vmem:[#allocation3 + $0x8c] sm:$0xf0]  ;;  %v9829_v27 = vpop.f32.mrf.mxu1 }
 0xa12   : > { %4632 = vmatpush.bf16.msrb.mxu2 %v9485_v30  ;;  %2947 = vst.msk [vmem:[#allocation2 + $0x5c] sm:$0xf] %vm825_vm12, %v2883_v2  ;;  %v7102_v2 = vld [vmem:[#allocation2 + $0xb8] sm:$0xf0]  ;;  %v12602_v36 = vrot.slane %v12601_v17, 4 }
 0xa13   : > { %2951 = vst.msk [vmem:[#allocation2 + $0x74] sm:$0xf] %vm825_vm12, %v2887_v52 }
 0xa14   : > { %12605 = vst [vmem:[#allocation29_spill] sm:$0xff] %v9829_v27  ;;  %v7153_v27 = vld [vmem:[#allocation3 + $0x194] sm:$0xf] }
 0xa15   : > { %4287 = vmatmul.bf16.gmra.mxu2 %v9792_v50 }
 0xa18   : > { %v2799_v63 = vpop.permute.xlu0 %2798  ;;  %v2807_v37 = vpop.permute.xlu1 %2806 }
 0xa19   : > { %v2873_v20 = vsel %vm612_vm0, %v12596_v55, %v2799_v63  ;;  %v2877_v19 = vsel %vm612_vm0, %v12598_v3, %v2807_v37  ;;  %v7090_v18 = vld [vmem:[#allocation2 + $0x58] sm:$0xf0]  ;;  %v6685_v37 = vld [vmem:[#allocation2 + $0x98] sm:$0xf]  ;;  %v9834_v3 = vor.u32 %v7118_v15, %v6763_v9  ;;  %v6673_v15 = vld [vmem:[#allocation2 + $0x80] sm:$0xf] }
 0xa1a   : > { %2937 = vst.msk [vmem:[#allocation2 + $0x20] sm:$0xf] %vm825_vm12, %v2873_v20  ;;  %v9810_v14 = vor.u32 %v7090_v18, %v6649_v59  ;;  %v7093_v11 = vld [vmem:[#allocation2 + $0x70] sm:$0xf0]  ;;  %v6697_v59 = vld [vmem:[#allocation2 + $0xb0] sm:$0xf]  ;;  %v9832_v55 = vor.u32 %v7099_v6, %v6685_v37 }
 0xa1b   : > { %2941 = vst.msk [vmem:[#allocation2 + $0x38] sm:$0xf] %vm825_vm12, %v2877_v19  ;;  %v9815_v1 = vor.u32 %v7093_v11, %v6661_v58  ;;  %v9836_v19 = vpop.permute.xlu2 %3418  ;;  %v9839_v18 = vor.u32 %v7102_v2, %v6697_v59  ;;  %v7121_v58 = vld [vmem:[#allocation3 + $0x90] sm:$0xf0]  ;;  %v6881_v9 = vld [vmem:[#allocation3 + $0x168] sm:$0xf] }
 0xa1c   : > { %3146 = vrot.lane.b32.xlu0 %v9810_v14, %s12496_s29  ;;  %12606 = vst [vmem:[#allocation18_spill] sm:$0xff] %v9834_v3  ;;  %v7096_v2 = vld [vmem:[#allocation2 + $0x88] sm:$0xf0]  ;;  %v7123_v59 = vld [vmem:[#allocation3 + $0xa4] sm:$0xf] }
 0xa1d   : > { %3152 = vrot.lane.b32.xlu1 %v9815_v1, %s12496_s29  ;;  %4376 = vmatmul.bf16.gmra.mxu3 %v9805_v10 }
 0xa1e   : > { %4228 = vmatmul.bf16.gmra.mxu1 %v9812_v41 }
 0xa20   : > { %v2795_v60 = vpop.permute.xlu0 %2794  ;;  %v2803_v29 = vpop.permute.xlu1 %2802 }
 0xa21   : > { %v2871_v52 = vsel %vm612_vm0, %v12602_v36, %v2795_v60  ;;  %v2875_v63 = vsel %vm612_vm0, %v12604_v38, %v2803_v29  ;;  %v7150_v60 = vld [vmem:[#allocation3 + $0x178] sm:$0xf0]  ;;  %v9854_v29 = vpop.f32.mrf.mxu1  ;;  %v6625_v17 = vld [vmem:[#allocation2 + $0x20] sm:$0xf]  ;;  %v9860_v38 = vor.u32 %v7096_v2, %v6673_v15  ;;  %v6789_v2 = vld [vmem:[#allocation3 + $0xa8] sm:$0xf] }
 0xa22   : > { %2935 = vst.msk [vmem:[#allocation2 + $0x14] sm:$0xf] %vm825_vm12, %v2871_v52  ;;  %v6637_v20 = vld [vmem:[#allocation2 + $0x38] sm:$0xf]  ;;  %v9856_v52 = vor.u32 %v7121_v58, %v6769_v49  ;;  %v9858_v48 = vor.u32 %v7150_v60, %v6881_v9  ;;  %v12612_v15 = vld [vmem:[#allocation33_spill] sm:$0xff] }
 0xa23   : > { %2939 = vst.msk [vmem:[#allocation2 + $0x2c] sm:$0xf] %vm825_vm12, %v2875_v63  ;;  %v9841_v0 = vor.u32 %v7087_v23, %v6637_v20  ;;  %v9866_v37 = vpop.permute.xlu2 %3324  ;;  %v6783_v20 = vld [vmem:[#allocation3 + $0xb4] sm:$0xf0] }
 0xa24   : > { %3164 = vrot.lane.b32.xlu0 %v9832_v55, %s12496_s29  ;;  %12607 = vst [vmem:[#allocation11_spill] sm:$0xff] %v9854_v29 }
 0xa25   : > { %3170 = vrot.lane.b32.xlu1 %v9839_v18, %s12496_s29  ;;  %3140 = vrot.lane.b32.xlu2 %v9841_v0, %s12496_s29  ;;  %12608 = vst [vmem:[#allocation24_spill] sm:$0xff] %v9856_v52 }
 0xa26   : > { %4292 = vmatmul.bf16.gmra.mxu2 %v9834_v3  ;;  %12609 = vst [vmem:[#allocation21_spill] sm:$0xff] %v9858_v48 }
 0xa28   : > { %v9850_v11 = vpop.permute.xlu0 %3424  ;;  %v9852_v6 = vpop.permute.xlu1 %3336 }
 0xa29   : > { %v9878_v58 = vpop.f32.mrf.mxu1  ;;  %v7081_v60 = vld [vmem:[#allocation2 + $0x10] sm:$0xf0] }
 0xa2a   : > { %v7084_v36 = vld [vmem:[#allocation2 + $0x28] sm:$0xf0]  ;;  %12610 = vst [vmem:[#allocation26_spill] sm:$0xff] %v9878_v58 }
 0xa2b   : > { %v9862_v63 = vor.u32 %v7084_v36, %v6625_v17  ;;  %v9889_v9 = vpop.permute.xlu2 %3414  ;;  %v7126_v17 = vld [vmem:[#allocation3 + $0xb8] sm:$0xf0] }
 0xa2c   : > { %3402 = vrot.lane.b32.xlu0 %v12564_v8, %s12493_s15  ;;  %v9880_v8 = vor.u32 %v7123_v59, %v6783_v20  ;;  %v6613_v20 = vld [vmem:[#allocation2 + $0x8] sm:$0xf]  ;;  %v9897_v10 = vor.u32 %v7126_v17, %v6789_v2  ;;  %v6803_v2 = vld [vmem:[#allocation3 + $0xdc] sm:$0xf0] }
 0xa2d   : > { %3158 = vrot.lane.b32.xlu2 %v9860_v38, %s12496_s29  ;;  %3134 = vrot.lane.b32.xlu1 %v9862_v63, %s12496_s29 }
 0xa2e   : > { %4381 = vmatmul.bf16.gmra.mxu3 %v9856_v52  ;;  %4233 = vmatmul.bf16.gmra.mxu1 %v9858_v48  ;;  %12611 = vst [vmem:[#allocation16_spill] sm:$0xff] %v9880_v8  ;;  %v9895_v52 = vor.u32 %v7081_v60, %v6613_v20  ;;  %v7128_v60 = vld [vmem:[#allocation3 + $0xcc] sm:$0xf] }
 0xa2f   : > { %12614 = vst [vmem:[#allocation12_spill] sm:$0xff] %v9897_v10 }
 0xa30   : > { %v9874_v23 = vpop.permute.xlu0 %3330  ;;  %v9876_v49 = vpop.permute.xlu1 %3426 }
 0xa31   : > { %v9899_v7 = vpop.f32.mrf.mxu1 }
 0xa32   : > { %12615 = vst [vmem:[#allocation20_spill] sm:$0xff] %v9899_v7 }
 0xa34   : > { %3308 = vrot.lane.b32.xlu0 %v9457_v28, %s12495_s9 }
 0xa35   : > { %3306 = vrot.lane.b32.xlu2 %v12612_v15, %s12495_s9  ;;  %3394 = vrot.lane.b32.xlu1 %v12612_v15, %s12493_s15  ;;  %v7155_v15 = vld [vmem:[#allocation3 + $0x1a0] sm:$0xf0] }
 0xa36   : > { %4297 = vmatmul.bf16.gmra.mxu2 %v9880_v8  ;;  %v9901_v48 = vor.u32 %v7155_v15, %v6901_v22  ;;  %v9915_v22 = vpop.permute.xlu2 %3320  ;;  %v9917_v15 = vor.u32 %v7128_v60, %v6803_v2 }
 0xa37   : > { %12618 = vst [vmem:[#allocation37_spill] sm:$0xff] %v9915_v22 }
 0xa38   : > { %v9891_v36 = vpop.permute.xlu0 %3420  ;;  %v9893_v59 = vpop.permute.xlu1 %3332  ;;  %12616 = vst [vmem:[#allocation33_spill] sm:$0xff] %v9901_v48 }
 0xa39   : > { %12613 = vst [vmem:[#allocation23_spill] sm:$0xff] %v9893_v59  ;;  %v9919_v41 = vpop.f32.mrf.mxu1 }
 0xa3a   : > { %12619 = vst [vmem:[#allocation38_spill] sm:$0xff] %v9917_v15 }
 0xa3b   : > { %12620 = vst [vmem:[#allocation39_spill] sm:$0xff] %v9919_v41  ;;  %v6921_v41 = vld [vmem:[#allocation3 + $0x1b8] sm:$0xf] }
 0xa3c   : > { %3128 = vrot.lane.b32.xlu0 %v9895_v52, %s12496_s29 }
 0xa3d   : > { %3396 = vrot.lane.b32.xlu2 %v9457_v28, %s12493_s15  ;;  %3300 = vrot.lane.b32.xlu1 %v9471_v13, %s12495_s9  ;;  %v6809_v28 = vld [vmem:[#allocation3 + $0xd0] sm:$0xf] }
 0xa3e   : > { %4386 = vmatmul.bf16.gmra.mxu3 %v9897_v10  ;;  %4238 = vmatmul.bf16.gmra.mxu1 %v9901_v48  ;;  %v7131_v10 = vld [vmem:[#allocation3 + $0xe0] sm:$0xf0]  ;;  %v9936_v7 = vpop.permute.xlu2 %3400 }
 0xa3f   : > { %v9930_v60 = vor.u32 %v7131_v10, %v6809_v28  ;;  %v6823_v10 = vld [vmem:[#allocation3 + $0x104] sm:$0xf0] }
 0xa40   : > { %v9911_v17 = vpop.permute.xlu0 %3326  ;;  %v9913_v20 = vpop.permute.xlu1 %3412 }
 0xa41   : > { %12617 = vst [vmem:[#allocation36_spill] sm:$0xff] %v9911_v17  ;;  %v9932_v2 = vpop.f32.mrf.mxu1 }
 0xa42   : > { %12621 = vst [vmem:[#allocation40_spill] sm:$0xff] %v9930_v60 }
 0xa43   : > { %12622 = vst [vmem:[#allocation41_spill] sm:$0xff] %v9932_v2 }
 0xa44   : > { %3388 = vrot.lane.b32.xlu0 %v9471_v13, %s12493_s15  ;;  %v9934_v13 = vor.u32 %v7160_v5, %v6921_v41 }
 0xa45   : > { %3302 = vrot.lane.b32.xlu2 %v9485_v30, %s12495_s9  ;;  %3390 = vrot.lane.b32.xlu1 %v9485_v30, %s12493_s15  ;;  %v7133_v30 = vld [vmem:[#allocation3 + $0xf4] sm:$0xf] }
 0xa46   : > { %4302 = vmatmul.bf16.gmra.mxu2 %v9917_v15  ;;  %12623 = vst [vmem:[#allocation42_spill] sm:$0xff] %v9934_v13  ;;  %v9948_v41 = vor.u32 %v7133_v30, %v6823_v10  ;;  %v7136_v15 = vld [vmem:[#allocation3 + $0x108] sm:$0xf0]  ;;  %v6941_v10 = vld [vmem:[#allocation3 + $0x1e0] sm:$0xf] }
 0xa48   : > { %v9928_v48 = vpop.permute.xlu0 %3406  ;;  %v3319_v16 = vpop.permute.xlu1 %3318  ;;  %12624 = vst [vmem:[#allocation43_spill] sm:$0xff] %v9948_v41 }
 0xa49   : > { %v9950_v2 = vpop.f32.mrf.mxu1 }
 0xa4a   : > { %12625 = vst [vmem:[#allocation44_spill] sm:$0xff] %v9950_v2  ;;  %v7165_v2 = vld [vmem:[#allocation3 + $0x1f0] sm:$0xf0] }
 0xa4b   : > { %v9969_v45 = vor.u32 %v7165_v2, %v6941_v10 }
 0xa4c   : > { %3252 = vrot.lane.b32.xlu0 %v9832_v55, %s12494_s0 }
 0xa4d   : > { %3428 = vrot.lane.b32.xlu2 %v9832_v55, %s12493_s15  ;;  %3340 = vrot.lane.b32.xlu1 %v9832_v55, %s12495_s9  ;;  %12629 = vst [vmem:[#allocation48_spill] sm:$0xff] %v9969_v45 }
 0xa4e   : > { %4391 = vmatmul.bf16.gmra.mxu3 %v9930_v60  ;;  %4243 = vmatmul.bf16.gmra.mxu1 %v9934_v13  ;;  %v3343_v60 = vpop.permute.xlu2 %3342  ;;  %v6829_v13 = vld [vmem:[#allocation3 + $0xf8] sm:$0xf] }
 0xa4f   : > { %v9965_v29 = vor.u32 %v7136_v15, %v6829_v13  ;;  %v6843_v15 = vld [vmem:[#allocation3 + $0x12c] sm:$0xf0] }
 0xa50   : > { %v3313_v28 = vpop.permute.xlu0 %3312  ;;  %v9946_v5 = vpop.permute.xlu1 %3408 }
 0xa51   : > { %12627 = vst [vmem:[#allocation46_spill] sm:$0xff] %v9965_v29  ;;  %v9967_v8 = vpop.f32.mrf.mxu1 }
 0xa52   : > { %12628 = vst [vmem:[#allocation47_spill] sm:$0xff] %v9967_v8  ;;  %v3358_v8 = vsel %vm660_vm6, %v9874_v23, %v9893_v59  ;;  %v3448_v23 = vsel %vm675_vm5, %v9850_v11, %v9876_v49 }
 0xa54   : > { %3246 = vrot.lane.b32.xlu0 %v9860_v38, %s12494_s0 }
 0xa55   : > { %3422 = vrot.lane.b32.xlu2 %v9860_v38, %s12493_s15  ;;  %3334 = vrot.lane.b32.xlu1 %v9860_v38, %s12495_s9 }
 0xa56   : > { %4307 = vmatmul.bf16.gmra.mxu2 %v9948_v41  ;;  %v9982_v2 = vpop.permute.xlu2 %3432 }
 0xa58   : > { %v9959_v58 = vpop.permute.xlu0 %3344  ;;  %v9961_v30 = vpop.permute.xlu1 %3314 }
 0xa59   : > { %12626 = vst [vmem:[#allocation45_spill] sm:$0xff] %v9961_v30  ;;  %v3362_v47 = vsel %vm660_vm6, %v3343_v60, %v9959_v58  ;;  %v3360_v60 = vsel %vm660_vm6, %v9852_v6, %v9797_v51 }
 0xa5a   : > { %4447 = vmatpush.bf16.msra.mxu0 %v3362_v47  ;;  %v7138_v47 = vld [vmem:[#allocation3 + $0x11c] sm:$0xf] }
 0xa5b   : > { %v9989_v6 = vor.u32 %v7138_v47, %v6843_v15  ;;  %v7141_v47 = vld [vmem:[#allocation3 + $0x130] sm:$0xf0]  ;;  %v3354_v15 = vsel %vm660_vm6, %v3319_v16, %v9915_v22  ;;  %v3352_v16 = vsel %vm660_vm6, %v3313_v28, %v9961_v30  ;;  %v7146_v28 = vld [vmem:[#allocation3 + $0x158] sm:$0xf0]  ;;  %v7001_v30 = vld [vmem:[#allocation3 + $0x258] sm:$0xf] }
 0xa5c   : > { %3240 = vrot.lane.b32.xlu0 %v9815_v1, %s12494_s0 }
 0xa5d   : > { %3416 = vrot.lane.b32.xlu2 %v9815_v1, %s12493_s15  ;;  %3328 = vrot.lane.b32.xlu1 %v9815_v1, %s12495_s9  ;;  %12630 = vst [vmem:[#allocation49_spill] sm:$0xff] %v9989_v6 }
 0xa5e   : > { %4396 = vmatmul.bf16.gmra.mxu3 %v9965_v29  ;;  %4448 = vmatpush.bf16.msra.mxu0 %v3360_v60  ;;  %v9991_v29 = vpop.f32.mrf.mxu1  ;;  %v3356_v60 = vsel %vm660_vm6, %v9866_v37, %v9911_v17  ;;  %v3446_v37 = vsel %vm675_vm5, %v9836_v19, %v9891_v36  ;;  %v3444_v19 = vsel %vm675_vm5, %v9913_v20, %v9889_v9  ;;  %v6869_v20 = vld [vmem:[#allocation3 + $0x148] sm:$0xf] }
 0xa5f   : > { %4248 = vmatmul.bf16.gmra.mxu1 %v9969_v45  ;;  %v6903_v17 = vld [vmem:[#allocation3 + $0x1a4] sm:$0xf0] }
 0xa60   : > { %v3431_v13 = vpop.permute.xlu1 %3430 }
 0xa61   : > { %v3450_v10 = vsel %vm675_vm5, %v3431_v13, %v9982_v2  ;;  %v6961_v13 = vld [vmem:[#allocation3 + $0x208] sm:$0xf] }
 0xa62   : > { %4449 = vmatpush.bf16.msra.mxu0 %v3358_v8  ;;  %4536 = vmatpush.bf16.msra.mxu1 %v3450_v10  ;;  %v6849_v8 = vld [vmem:[#allocation3 + $0x120] sm:$0xf]  ;;  %v7170_v10 = vld [vmem:[#allocation3 + $0x218] sm:$0xf0] }
 0xa63   : > { %v10011_v45 = vor.u32 %v7141_v47, %v6849_v8  ;;  %v10017_v11 = vor.u32 %v7170_v10, %v6961_v13  ;;  %v6863_v8 = vld [vmem:[#allocation3 + $0x154] sm:$0xf0]  ;;  %v3442_v47 = vsel %vm675_vm5, %v9928_v48, %v9946_v5  ;;  %v6981_v48 = vld [vmem:[#allocation3 + $0x230] sm:$0xf] }
 0xa64   : > { %3234 = vrot.lane.b32.xlu0 %v9810_v14, %s12494_s0 }
 0xa65   : > { %3434 = vrot.lane.b32.xlu2 %v9839_v18, %s12493_s15  ;;  %3322 = vrot.lane.b32.xlu1 %v9810_v14, %s12495_s9  ;;  %12631 = vst [vmem:[#allocation50_spill] sm:$0xff] %v10011_v45 }
 0xa66   : > { %4312 = vmatmul.bf16.gmra.mxu2 %v9989_v6  ;;  %4450 = vmatpush.bf16.msra.mxu0 %v3356_v60  ;;  %v10013_v60 = vpop.f32.mrf.mxu1  ;;  %12633 = vst [vmem:[#allocation52_spill] sm:$0xff] %v10017_v11 }
 0xa67   : > { %4537 = vmatpush.bf16.msra.mxu1 %v3448_v23  ;;  %12632 = vst [vmem:[#allocation51_spill] sm:$0xff] %v10013_v60  ;;  %v7143_v23 = vld [vmem:[#allocation3 + $0x144] sm:$0xf] }
 0xa68   : > { %v7151_v60 = vld [vmem:[#allocation3 + $0x180] sm:$0xf0] }
 0xa6a   : > { %4451 = vmatpush.bf16.msra.mxu0 %v3354_v15  ;;  %v10033_v15 = vor.u32 %v7143_v23, %v6863_v8 }
 0xa6b   : > { %4538 = vmatpush.bf16.msra.mxu1 %v3446_v37  ;;  %v7175_v37 = vld [vmem:[#allocation3 + $0x240] sm:$0xf0] }
 0xa6c   : > { %3228 = vrot.lane.b32.xlu0 %v9841_v0, %s12494_s0  ;;  %12634 = vst [vmem:[#allocation53_spill] sm:$0xff] %v10033_v15  ;;  %v10052_v23 = vor.u32 %v7175_v37, %v6981_v48  ;;  %v3574_v48 = vld [vmem:[%s12182_s10 + $0x10] sm:$0xff] }
 0xa6d   : > { %3410 = vrot.lane.b32.xlu2 %v9810_v14, %s12493_s15  ;;  %3316 = vrot.lane.b32.xlu1 %v9841_v0, %s12495_s9 }
 0xa6e   : > { %4401 = vmatmul.bf16.gmra.mxu3 %v10011_v45  ;;  %4452 = vmatpush.bf16.msra.mxu0 %v3352_v16  ;;  %v10035_v13 = vpop.f32.mrf.mxu1  ;;  %v10046_v16 = vor.u32 %v7146_v28, %v6869_v20  ;;  %12637 = vst [vmem:[#allocation56_spill] sm:$0xff] %v10052_v23  ;;  %v6883_v20 = vld [vmem:[#allocation3 + $0x17c] sm:$0xf0] }
 0xa6f   : > { %4539 = vmatpush.bf16.msra.mxu1 %v3444_v19 }
 0xa70   : > { %4253 = vmatmul.bf16.gmra.mxu1 %v10017_v11  ;;  %12636 = vst [vmem:[#allocation55_spill] sm:$0xff] %v10046_v16 }
 0xa73   : > { %4540 = vmatpush.bf16.msra.mxu1 %v3442_v47  ;;  %v7148_v47 = vld [vmem:[#allocation3 + $0x16c] sm:$0xf] }
 0xa74   : > { %3258 = vrot.lane.b32.xlu0 %v9839_v18, %s12494_s0  ;;  %v10069_v37 = vor.u32 %v7148_v47, %v6883_v20  ;;  %v3573_v47 = vld [vmem:[%s12182_s10 + $0x8] sm:$0xff]  ;;  %v3572_v20 = vld [vmem:[%s12182_s10] sm:$0xff] }
 0xa75   : > { %3404 = vrot.lane.b32.xlu2 %v9841_v0, %s12493_s15  ;;  %3310 = vrot.lane.b32.xlu1 %v9862_v63, %s12495_s9 }
 0xa76   : > { %4317 = vmatmul.bf16.gmra.mxu2 %v10033_v15  ;;  %12641 = vst [vmem:[#allocation60_spill] sm:$0xff] %v10069_v37 }
 0xa78   : > { %v10044_v10 = vpop.f32.mrf.mxu2 }
 0xa79   : > { %12635 = vst [vmem:[#allocation54_spill] sm:$0xff] %v10044_v10 }
 0xa7a   : > { %v10048_v19 = vpop.f32.mrf.mxu1 }
 0xa7c   : > { %3222 = vrot.lane.b32.xlu0 %v9862_v63, %s12494_s0 }
 0xa7d   : > { %3398 = vrot.lane.b32.xlu2 %v9862_v63, %s12493_s15  ;;  %3304 = vrot.lane.b32.xlu1 %v9895_v52, %s12495_s9 }
 0xa7e   : > { %4406 = vmatmul.bf16.gmra.mxu3 %v10046_v16 }
 0xa7f   : > { %v10059_v8 = vpop.permute.xlu2 %3140 }
 0xa80   : > { %12638 = vst [vmem:[#allocation57_spill] sm:$0xff] %v10059_v8  ;;  %v10061_v28 = vpop.f32.mrf.mxu2  ;;  %v10063_v45 = vpop.f32.mrf.mxu3  ;;  %4258 = vmatmul.bf16.gmra.mxu1 %v10052_v23  ;;  %v6889_v23 = vld [vmem:[#allocation3 + $0x170] sm:$0xf] }
 0xa81   : > { %12639 = vst [vmem:[#allocation58_spill] sm:$0xff] %v10061_v28 }
 0xa82   : > { %12640 = vst [vmem:[#allocation59_spill] sm:$0xff] %v10063_v45  ;;  %v10071_v11 = vpop.f32.mrf.mxu1 }
 0xa84   : > { %3216 = vrot.lane.b32.xlu0 %v9895_v52, %s12494_s0  ;;  %s6252_s0 = scalar_lea.hbm %s12185_s13, %s7544_s16 }
 0xa85   : > { %3392 = vrot.lane.b32.xlu2 %v9895_v52, %s12493_s15  ;;  %3616 = vperm.xlu1 %7296, %v3574_v48   ;;  %v3577_v48 = vld [vmem:[%s12182_s10 + $0x28] sm:$0xff]  ;;  %s6256_s21 = sshll.u32 %s6252_s0, 4  ;;  %s6257_s21 = int_to_ptr.hbm [resolvable:$true] %s6256_s21 }
 0xa86   : > { %4322 = vmatmul.bf16.gmra.mxu2 %v10069_v37  ;;  %v10093_v37 = vor.u32 %v7151_v60, %v6889_v23 }
 0xa87   : > { %v10078_v16 = vpop.permute.xlu2 %3158 }
 0xa88   : > { %12642 = vst [vmem:[#allocation61_spill] sm:$0xff] %v10078_v16  ;;  %v10080_v15 = vpop.f32.mrf.mxu2  ;;  %v10082_v6 = vpop.f32.mrf.mxu3 }
 0xa89   : > { %12643 = vst [vmem:[#allocation62_spill] sm:$0xff] %v10080_v15  ;;  %v7180_v15 = vld [vmem:[#allocation3 + $0x268] sm:$0xf0] }
 0xa8a   : > { %12644 = vst [vmem:[#allocation63_spill] sm:$0xff] %v10082_v6  ;;  %v10095_v41 = vpop.f32.mrf.mxu1  ;;  %v10097_v6 = vor.u32 %v7180_v15, %v7001_v30  ;;  %v3576_v30 = vld [vmem:[%s12182_s10 + $0x20] sm:$0xff]  ;;  %v3575_v15 = vld [vmem:[%s12182_s10 + $0x18] sm:$0xff] }
 0xa8b   : > { %12645 = vst [vmem:[#allocation64_spill] sm:$0xff] %v10093_v37 }
 0xa8c   : > { %3611 = vperm.xlu0 %7298, %v3573_v47   ;;  %12646 = vst [vmem:[#allocation65_spill] sm:$0xff] %v10097_v6  ;;  %v3580_v47 = vld [vmem:[%s12182_s10 + $0x40] sm:$0xff] }
 0xa8d   : > { %3606 = vperm.xlu2 %7297, %v3572_v20   ;;  %3631 = vperm.xlu1 %7296, %v3577_v48   ;;  %v10118_v20 = vor.u32 %v7153_v27, %v6903_v17  ;;  %v6909_v17 = vld [vmem:[#allocation3 + $0x198] sm:$0xf] }
 0xa8e   : > { %4411 = vmatmul.bf16.gmra.mxu3 %v10093_v37  ;;  %v10100_v28 = vpop.permute.xlu0 %3146 }
 0xa8f   : > { %12647 = vst [vmem:[#allocation66_spill] sm:$0xff] %v10100_v28  ;;  %v3307_v22 = vpop.permute.xlu2 %3306  ;;  %v10102_v45 = vpop.permute.xlu1 %3152 }
 0xa90   : > { %12648 = vst [vmem:[#allocation67_spill] sm:$0xff] %v10102_v45  ;;  %v10104_v60 = vpop.f32.mrf.mxu2  ;;  %v10106_v23 = vpop.f32.mrf.mxu3  ;;  %4263 = vmatmul.bf16.gmra.mxu1 %v10097_v6 }
 0xa91   : > { %12649 = vst [vmem:[#allocation68_spill] sm:$0xff] %v10104_v60 }
 0xa92   : > { %12650 = vst [vmem:[#allocation69_spill] sm:$0xff] %v10106_v23  ;;  %v10120_v48 = vpop.f32.mrf.mxu1 }
 0xa93   : > { %12651 = vst [vmem:[#allocation70_spill] sm:$0xff] %v10118_v20 }
 0xa94   : > { %3626 = vperm.xlu0 %7298, %v3576_v30   ;;  %v7156_v30 = vld [vmem:[#allocation3 + $0x1a8] sm:$0xf0] }
 0xa95   : > { %3621 = vperm.xlu2 %7297, %v3575_v15   ;;  %3646 = vperm.xlu1 %7296, %v3580_v47   ;;  %v3579_v15 = vld [vmem:[%s12182_s10 + $0x38] sm:$0xff]  ;;  %v3578_v47 = vld [vmem:[%s12182_s10 + $0x30] sm:$0xff] }
 0xa96   : > { %4327 = vmatmul.bf16.gmra.mxu2 %v10118_v20  ;;  %v10123_v37 = vpop.permute.xlu0 %3164  ;;  %v3583_v20 = vld [vmem:[%s12182_s10 + $0x58] sm:$0xff] }
 0xa97   : > { %12652 = vst [vmem:[#allocation71_spill] sm:$0xff] %v10123_v37  ;;  %v10125_v6 = vpop.permute.xlu2 %3396  ;;  %v10127_v60 = vpop.permute.xlu1 %3170 }
 0xa98   : > { %12653 = vst [vmem:[#allocation72_spill] sm:$0xff] %v10127_v60  ;;  %v10129_v23 = vpop.f32.mrf.mxu2  ;;  %v10131_v10 = vpop.f32.mrf.mxu3  ;;  %v3187_v27 = vsel %vm630_vm4, %v9606_v39, %v10127_v60  ;;  %v3185_v39 = vsel %vm630_vm4, %v9629_v4, %v10123_v37  ;;  %v3183_v4 = vsel %vm630_vm4, %v9619_v35, %v10078_v16  ;;  %v3181_v35 = vsel %vm630_vm4, %v9540_v42, %v10102_v45  ;;  %v3585_v45 = vld [vmem:[%s12182_s10 + $0x68] sm:$0xff] }
 0xa99   : > { %12654 = vst [vmem:[#allocation73_spill] sm:$0xff] %v10129_v23  ;;  %4714 = vmatpush.bf16.msra.mxu3 %v3187_v27  ;;  %v10145_v23 = vor.u32 %v7156_v30, %v6909_v17  ;;  %v7158_v30 = vld [vmem:[#allocation3 + $0x1bc] sm:$0xf] }
 0xa9a   : > { %12655 = vst [vmem:[#allocation74_spill] sm:$0xff] %v10131_v10 }
 0xa9b   : > { %12656 = vst [vmem:[#allocation75_spill] sm:$0xff] %v10145_v23  ;;  %v10147_v10 = vpop.f32.mrf.mxu1 }
 0xa9c   : > { %3641 = vperm.xlu0 %7298, %v3579_v15   ;;  %v6923_v15 = vld [vmem:[#allocation3 + $0x1cc] sm:$0xf0] }
 0xa9d   : > { %3636 = vperm.xlu2 %7297, %v3578_v47   ;;  %3661 = vperm.xlu1 %7296, %v3583_v20   ;;  %v10178_v37 = vor.u32 %v7158_v30, %v6923_v15 }
 0xa9e   : > { %4715 = vmatpush.bf16.msra.mxu3 %v3185_v39  ;;  %v10152_v27 = vpop.permute.xlu0 %3402  ;;  %v3582_v39 = vld [vmem:[%s12182_s10 + $0x50] sm:$0xff] }
 0xa9f   : > { %4416 = vmatmul.bf16.gmra.mxu3 %v10145_v23  ;;  %v10155_v60 = vpop.permute.xlu2 %3302  ;;  %v10157_v59 = vpop.permute.xlu1 %3134  ;;  %v3440_v17 = vsel %vm675_vm5, %v9936_v7, %v10152_v27  ;;  %v3581_v7 = vld [vmem:[%s12182_s10 + $0x48] sm:$0xff]  ;;  %v3586_v23 = vld [vmem:[%s12182_s10 + $0x70] sm:$0xff]  ;;  %12661 = vst [vmem:[#allocation80_spill] sm:$0xff] %v10178_v37 }
 0xaa0   : > { %12657 = vst [vmem:[#allocation76_spill] sm:$0xff] %v10155_v60  ;;  %v10162_v20 = vpop.f32.mrf.mxu2  ;;  %v10164_v47 = vpop.f32.mrf.mxu3  ;;  %4541 = vmatpush.bf16.msra.mxu1 %v3440_v17 }
 0xaa1   : > { %12658 = vst [vmem:[#allocation77_spill] sm:$0xff] %v10157_v59 }
 0xaa2   : > { %12659 = vst [vmem:[#allocation78_spill] sm:$0xff] %v10162_v20  ;;  %4716 = vmatpush.bf16.msra.mxu3 %v3183_v4 }
 0xaa3   : > { %12660 = vst [vmem:[#allocation79_spill] sm:$0xff] %v10164_v47  ;;  %v10180_v17 = vpop.f32.mrf.mxu1 }
 0xaa4   : > { %3656 = vperm.xlu0 %7298, %v3582_v39   ;;  %v6929_v39 = vld [vmem:[#allocation3 + $0x1c0] sm:$0xf] }
 0xaa5   : > { %3651 = vperm.xlu2 %7297, %v3581_v7   ;;  %3676 = vperm.xlu1 %7296, %v3586_v23   ;;  %v7161_v7 = vld [vmem:[#allocation3 + $0x1d0] sm:$0xf0] }
 0xaa6   : > { %4717 = vmatpush.bf16.msra.mxu3 %v3181_v35  ;;  %4332 = vmatmul.bf16.gmra.mxu2 %v10178_v37  ;;  %v10186_v4 = vpop.permute.xlu0 %3308  ;;  %v3179_v35 = vsel %vm630_vm4, %v9576_v31, %v10100_v28  ;;  %v3177_v31 = vsel %vm630_vm4, %v9677_v12, %v10059_v8  ;;  %v6711_v28 = vld [vmem:[#allocation3 + $0x1c] sm:$0xf0] }
 0xaa7   : > { %12662 = vst [vmem:[#allocation81_spill] sm:$0xff] %v10186_v4  ;;  %v10188_v16 = vpop.permute.xlu2 %3428  ;;  %v3395_v20 = vpop.permute.xlu1 %3394  ;;  %v3350_v30 = vsel %vm660_vm6, %v3307_v22, %v10186_v4  ;;  %v3584_v22 = vld [vmem:[%s12182_s10 + $0x60] sm:$0xff] }
 0xaa8   : > { %v10192_v15 = vpop.f32.mrf.mxu3  ;;  %4453 = vmatpush.bf16.msra.mxu0 %v3350_v30  ;;  %v3438_v23 = vsel %vm675_vm5, %v3395_v20, %v10125_v6  ;;  %v3589_v20 = vld [vmem:[%s12182_s10 + $0x88] sm:$0xff]  ;;  %v10210_v30 = vor.u32 %v7161_v7, %v6929_v39  ;;  %v7163_v7 = vld [vmem:[#allocation3 + $0x1e4] sm:$0xf] }
 0xaa9   : > { %12663 = vst [vmem:[#allocation82_spill] sm:$0xff] %v10192_v15  ;;  %v10196_v42 = vpop.f32.mrf.mxu2  ;;  %4542 = vmatpush.bf16.msra.mxu1 %v3438_v23  ;;  %v7104_v23 = vld [vmem:[#allocation3 + $0xc] sm:$0xf] }
 0xaaa   : > { %12664 = vst [vmem:[#allocation83_spill] sm:$0xff] %v10196_v42  ;;  %4718 = vmatpush.bf16.msra.mxu3 %v3179_v35 }
 0xaab   : > { %12665 = vst [vmem:[#allocation84_spill] sm:$0xff] %v10210_v30  ;;  %v10217_v37 = vpop.f32.mrf.mxu1 }
 0xaac   : > { %3671 = vperm.xlu0 %7298, %v3585_v45   ;;  %v6943_v45 = vld [vmem:[#allocation3 + $0x1f4] sm:$0xf0] }
 0xaad   : > { %3666 = vperm.xlu2 %7297, %v3584_v22   ;;  %3691 = vperm.xlu1 %7296, %v3589_v20   ;;  %v10224_v20 = vor.u32 %v7104_v23, %v6711_v28  ;;  %v10239_v28 = vor.u32 %v7163_v7, %v6943_v45  ;;  %v6717_v23 = vld [vmem:[#allocation3 + $0x10] sm:$0xf] }
 0xaae   : > { %4719 = vmatpush.bf16.msra.mxu3 %v3177_v31  ;;  %v10215_v35 = vpop.permute.xlu0 %3128  ;;  %v3175_v31 = vsel %vm630_vm4, %v9631_v33, %v10157_v59  ;;  %v6949_v59 = vld [vmem:[#allocation3 + $0x1e8] sm:$0xf] }
 0xaaf   : > { %12666 = vst [vmem:[#allocation85_spill] sm:$0xff] %v10215_v35  ;;  %4421 = vmatmul.bf16.gmra.mxu3 %v10210_v30  ;;  %v10220_v42 = vpop.permute.xlu2 %3422  ;;  %v3301_v39 = vpop.permute.xlu1 %3300  ;;  %v3588_v30 = vld [vmem:[%s12182_s10 + $0x80] sm:$0xff]  ;;  %v3173_v33 = vsel %vm630_vm4, %v9717_v62, %v10215_v35  ;;  %vm6239_vm4 = vcmask 517120  }
 0xab0   : > { %v3348_v22 = vsel %vm660_vm6, %v3301_v39, %v10155_v60  ;;  %12667 = vst [vmem:[#allocation86_spill] sm:$0xff] %v10224_v20  ;;  %v3587_v39 = vld [vmem:[%s12182_s10 + $0x78] sm:$0xff] }
 0xab1   : > { %v10226_v12 = vpop.f32.mrf.mxu2  ;;  %v10228_v8 = vpop.f32.mrf.mxu3  ;;  %4454 = vmatpush.bf16.msra.mxu0 %v3348_v22  ;;  %12670 = vst [vmem:[#allocation89_spill] sm:$0xff] %v10239_v28  ;;  %v7107_v22 = vld [vmem:[#allocation3 + $0x20] sm:$0xf0] }
 0xab2   : > { %12668 = vst [vmem:[#allocation87_spill] sm:$0xff] %v10226_v12  ;;  %4720 = vmatpush.bf16.msra.mxu3 %v3175_v31 }
 0xab3   : > { %12669 = vst [vmem:[#allocation88_spill] sm:$0xff] %v10228_v8  ;;  %v10257_v62 = vpop.f32.mrf.mxu1 }
 0xab4   : > { %4455 = vmatmul.bf16.vlgmr.msra.gmra.mxu0 %v10224_v20  ;;  %3686 = vperm.xlu0 %7298, %v3588_v30   ;;  %v7166_v20 = vld [vmem:[#allocation3 + $0x1f8] sm:$0xf0] }
 0xab5   : > { %3681 = vperm.xlu2 %7297, %v3587_v39   ;;  %3346 = vrot.lane.b32.xlu1 %v9839_v18, %s12495_s9  ;;  %v10255_v39 = vor.u32 %v7107_v22, %v6717_v23  ;;  %v3592_v23 = vld [vmem:[%s12182_s10 + $0xa0] sm:$0xff]  ;;  %v10273_v22 = vor.u32 %v7166_v20, %v6949_v59  ;;  %v7168_v20 = vld [vmem:[#allocation3 + $0x20c] sm:$0xf] }
 0xab6   : > { %4721 = vmatpush.bf16.msra.mxu3 %v3173_v33  ;;  %4337 = vmatmul.bf16.gmra.mxu2 %v10239_v28  ;;  %v3389_v31 = vpop.permute.xlu0 %3388  ;;  %v3590_v28 = vld [vmem:[%s12182_s10 + $0x90] sm:$0xff] }
 0xab7   : > { %v10249_v7 = vpop.permute.xlu2 %3416  ;;  %v10251_v45 = vpop.permute.xlu1 %3390  ;;  %12671 = vst [vmem:[#allocation90_spill] sm:$0xff] %v10255_v39 }
 0xab8   : > { %v3436_v30 = vsel %vm675_vm5, %v3389_v31, %v10251_v45  ;;  %12674 = vst [vmem:[#allocation93_spill] sm:$0xff] %v10273_v22  ;;  %v7109_v31 = vld [vmem:[#allocation3 + $0x34] sm:$0xf] }
 0xab9   : > { %v10259_v35 = vpop.f32.mrf.mxu2  ;;  %v10261_v33 = vpop.f32.mrf.mxu3  ;;  %4543 = vmatpush.bf16.msra.mxu1 %v3436_v30  ;;  %v6731_v30 = vld [vmem:[#allocation3 + $0x44] sm:$0xf0] }
 0xaba   : > { %5070 = vmatpush.bf16.msrb.mxu3 %v9839_v18  ;;  %12672 = vst [vmem:[#allocation91_spill] sm:$0xff] %v10259_v35  ;;  %v3591_v18 = vld [vmem:[%s12182_s10 + $0x98] sm:$0xff]  ;;  %v10287_v59 = vor.u32 %v7109_v31, %v6731_v30  ;;  %v3449_v30 = vsel %vm675_vm5, %v9876_v49, %v10188_v16 }
 0xabb   : > { %12673 = vst [vmem:[#allocation92_spill] sm:$0xff] %v10261_v33 }
 0xabc   : > { %4544 = vmatmul.bf16.vlgmr.msra.gmra.mxu1 %v10255_v39  ;;  %3701 = vperm.xlu0 %7298, %v3591_v18   ;;  %12676 = vst [vmem:[#allocation95_spill] sm:$0xff] %v10287_v59  ;;  %v10299_v39 = vpop.f32.mrf.mxu1 }
 0xabd   : > { %3696 = vperm.xlu2 %7297, %v3590_v28   ;;  %3706 = vperm.xlu1 %7296, %v3592_v23   ;;  %v6963_v28 = vld [vmem:[#allocation3 + $0x21c] sm:$0xf0]  ;;  %12678 = vst [vmem:[#allocation97_spill] sm:$0xff] %v10299_v39 }
 0xabe   : > { %5071 = vmatpush.bf16.msrb.mxu3 %v9832_v55  ;;  %v10276_v35 = vpop.permute.xlu0 %3252  ;;  %v10304_v31 = vor.u32 %v7168_v20, %v6963_v28 }
 0xabf   : > { %12675 = vst [vmem:[#allocation94_spill] sm:$0xff] %v10276_v35  ;;  %4426 = vmatmul.bf16.gmra.mxu3 %v10273_v22  ;;  %v10279_v33 = vpop.permute.xlu2 %3434  ;;  %v10281_v12 = vpop.permute.xlu1 %3340  ;;  %v3594_v22 = vld [vmem:[%s12182_s10 + $0xb0] sm:$0xff] }
 0xac0   : > { %v3451_v55 = vsel %vm675_vm5, %v9982_v2, %v10279_v33  ;;  %v3595_v2 = vld [vmem:[%s12182_s10 + $0xb8] sm:$0xff]  ;;  %12679 = vst [vmem:[#allocation98_spill] sm:$0xff] %v10304_v31 }
 0xac1   : > { %v10289_v18 = vpop.f32.mrf.mxu2  ;;  %v10291_v23 = vpop.f32.mrf.mxu3  ;;  %4981 = vmatpush.bf16.msra.mxu2 %v3451_v55  ;;  %v6737_v55 = vld [vmem:[#allocation3 + $0x38] sm:$0xf] }
 0xac2   : > { %5072 = vmatpush.bf16.msrb.mxu3 %v9860_v38  ;;  %12677 = vst [vmem:[#allocation96_spill] sm:$0xff] %v10291_v23  ;;  %v3593_v38 = vld [vmem:[%s12182_s10 + $0xa8] sm:$0xff] }
 0xac3   : > { %v7112_v23 = vld [vmem:[#allocation3 + $0x48] sm:$0xf0] }
 0xac4   : > { %4460 = vmatmul.bf16.gmra.mxu0 %v10287_v59  ;;  %3716 = vperm.xlu0 %7298, %v3594_v22   ;;  %v6969_v22 = vld [vmem:[#allocation3 + $0x210] sm:$0xf] }
 0xac5   : > { %3711 = vperm.xlu2 %7297, %v3593_v38   ;;  %3721 = vperm.xlu1 %7296, %v3595_v2   ;;  %v7171_v38 = vld [vmem:[#allocation3 + $0x220] sm:$0xf0]  ;;  %v3447_v2 = vsel %vm675_vm5, %v9891_v36, %v10220_v42  ;;  %v10341_v36 = vpop.f32.mrf.mxu1 }
 0xac6   : > { %5073 = vmatpush.bf16.msrb.mxu3 %v9815_v1  ;;  %4982 = vmatpush.bf16.msra.mxu2 %v3449_v30  ;;  %v10311_v8 = vpop.permute.xlu0 %3246  ;;  %v10319_v1 = vor.u32 %v7112_v23, %v6737_v55  ;;  %v3597_v30 = vld [vmem:[%s12182_s10 + $0xc8] sm:$0xff]  ;;  %v3598_v23 = vld [vmem:[%s12182_s10 + $0xd0] sm:$0xff]  ;;  %v10337_v55 = vor.u32 %v7171_v38, %v6969_v22 }
 0xac7   : > { %12680 = vst [vmem:[#allocation99_spill] sm:$0xff] %v10311_v8  ;;  %4342 = vmatmul.bf16.gmra.mxu2 %v10304_v31  ;;  %v10314_v20 = vpop.permute.xlu2 %3410  ;;  %v10316_v28 = vpop.permute.xlu1 %3334  ;;  %v7114_v31 = vld [vmem:[#allocation3 + $0x5c] sm:$0xf] }
 0xac8   : > { %12681 = vst [vmem:[#allocation100_spill] sm:$0xff] %v10316_v28 }
 0xac9   : > { %12682 = vst [vmem:[#allocation101_spill] sm:$0xff] %v10319_v1  ;;  %v10321_v59 = vpop.f32.mrf.mxu2  ;;  %v10323_v49 = vpop.f32.mrf.mxu3 }
 0xaca   : > { %5074 = vmatpush.bf16.msrb.mxu3 %v9810_v14  ;;  %12683 = vst [vmem:[#allocation102_spill] sm:$0xff] %v10321_v59  ;;  %4983 = vmatpush.bf16.msra.mxu2 %v3447_v2  ;;  %v3596_v14 = vld [vmem:[%s12182_s10 + $0xc0] sm:$0xff]  ;;  %v3445_v2 = vsel %vm675_vm5, %v9889_v9, %v10249_v7  ;;  %v6751_v59 = vld [vmem:[#allocation3 + $0x6c] sm:$0xf0] }
 0xacb   : > { %12684 = vst [vmem:[#allocation103_spill] sm:$0xff] %v10337_v55  ;;  %v10354_v38 = vor.u32 %v7114_v31, %v6751_v59  ;;  %v3601_v59 = vld [vmem:[%s12182_s10 + $0xe8] sm:$0xff] }
 0xacc   : > { %4549 = vmatmul.bf16.gmra.mxu1 %v10319_v1  ;;  %3731 = vperm.xlu0 %7298, %v3597_v30   ;;  %v7173_v30 = vld [vmem:[#allocation3 + $0x234] sm:$0xf] }
 0xacd   : > { %3726 = vperm.xlu2 %7297, %v3596_v14   ;;  %3736 = vperm.xlu1 %7296, %v3598_v23   ;;  %12687 = vst [vmem:[#allocation106_spill] sm:$0xff] %v10354_v38  ;;  %v6983_v14 = vld [vmem:[#allocation3 + $0x244] sm:$0xf0]  ;;  %v3443_v23 = vsel %vm675_vm5, %v9946_v5, %v10314_v20  ;;  %v10381_v47 = vpop.f32.mrf.mxu1 }
 0xace   : > { %5075 = vmatpush.bf16.msrb.mxu3 %v9841_v0  ;;  %4984 = vmatpush.bf16.msra.mxu2 %v3445_v2  ;;  %v10346_v15 = vpop.permute.xlu0 %3240  ;;  %v3600_v2 = vld [vmem:[%s12182_s10 + $0xe0] sm:$0xff]  ;;  %v10372_v31 = vor.u32 %v7173_v30, %v6983_v14  ;;  %12690 = vst [vmem:[#allocation109_spill] sm:$0xff] %v10381_v47 }
 0xacf   : > { %12685 = vst [vmem:[#allocation104_spill] sm:$0xff] %v10346_v15  ;;  %4431 = vmatmul.bf16.gmra.mxu3 %v10337_v55  ;;  %v10349_v22 = vpop.permute.xlu2 %3404  ;;  %v10351_v0 = vpop.permute.xlu1 %3328  ;;  %v7117_v55 = vld [vmem:[#allocation3 + $0x70] sm:$0xf0] }
 0xad0   : > { %12686 = vst [vmem:[#allocation105_spill] sm:$0xff] %v10351_v0  ;;  %v3441_v5 = vsel %vm675_vm5, %v10152_v27, %v10349_v22  ;;  %v6989_v27 = vld [vmem:[#allocation3 + $0x238] sm:$0xf]  ;;  %v7122_v0 = vld [vmem:[#allocation3 + $0x98] sm:$0xf0] }
 0xad1   : > { %v10356_v1 = vpop.f32.mrf.mxu2  ;;  %v10358_v9 = vpop.f32.mrf.mxu3  ;;  %12689 = vst [vmem:[#allocation108_spill] sm:$0xff] %v10372_v31 }
 0xad2   : > { %5076 = vmatpush.bf16.msrb.mxu3 %v9862_v63  ;;  %12688 = vst [vmem:[#allocation107_spill] sm:$0xff] %v10358_v9  ;;  %4985 = vmatpush.bf16.msra.mxu2 %v3443_v23  ;;  %v3599_v63 = vld [vmem:[%s12182_s10 + $0xd8] sm:$0xff]  ;;  %v6757_v23 = vld [vmem:[#allocation3 + $0x60] sm:$0xf] }
 0xad4   : > { %4465 = vmatmul.bf16.gmra.mxu0 %v10354_v38  ;;  %3746 = vperm.xlu0 %7298, %v3600_v2   ;;  %v10391_v2 = vor.u32 %v7117_v55, %v6757_v23  ;;  %v3602_v38 = vld [vmem:[%s12182_s10 + $0xf0] sm:$0xff]  ;;  %v6771_v55 = vld [vmem:[#allocation3 + $0x94] sm:$0xf0] }
 0xad5   : > { %3741 = vperm.xlu2 %7297, %v3599_v63   ;;  %3751 = vperm.xlu1 %7296, %v3601_v59   ;;  %v7176_v63 = vld [vmem:[#allocation3 + $0x248] sm:$0xf0] }
 0xad6   : > { %5077 = vmatpush.bf16.msrb.mxu3 %v9895_v52  ;;  %4986 = vmatpush.bf16.msra.mxu2 %v3441_v5  ;;  %v10379_v9 = vpop.permute.xlu0 %3234  ;;  %12692 = vst [vmem:[#allocation111_spill] sm:$0xff] %v10391_v2  ;;  %v10403_v60 = vor.u32 %v7176_v63, %v6989_v27  ;;  %v7178_v63 = vld [vmem:[#allocation3 + $0x25c] sm:$0xf] }
 0xad7   : > { %4347 = vmatmul.bf16.gmra.mxu2 %v10372_v31  ;;  %v10384_v30 = vpop.permute.xlu2 %3398  ;;  %v10386_v52 = vpop.permute.xlu1 %3322  ;;  %v3603_v31 = vld [vmem:[%s12182_s10 + $0xf8] sm:$0xff] }
 0xad8   : > { %12691 = vst [vmem:[#allocation110_spill] sm:$0xff] %v10386_v52  ;;  %v3439_v14 = vsel %vm675_vm5, %v10125_v6, %v10384_v30  ;;  %v7119_v6 = vld [vmem:[#allocation3 + $0x84] sm:$0xf] }
 0xad9   : > { %v10393_v59 = vpop.f32.mrf.mxu2  ;;  %v10395_v5 = vpop.f32.mrf.mxu3  ;;  %12693 = vst [vmem:[#allocation112_spill] sm:$0xff] %v10403_v60  ;;  %v10416_v27 = vor.u32 %v7119_v6, %v6771_v55 }
 0xada   : > { %4987 = vmatpush.bf16.msra.mxu2 %v3439_v14 }
 0xadb   : > { %12695 = vst [vmem:[#allocation114_spill] sm:$0xff] %v10416_v27 }
 0xadc   : > { %4554 = vmatmul.bf16.gmra.mxu1 %v10391_v2  ;;  %3761 = vperm.xlu0 %7298, %v3603_v31   ;;  %v7003_v2 = vld [vmem:[#allocation3 + $0x26c] sm:$0xf0]  ;;  %v10418_v31 = vpop.f32.mrf.mxu1 }
 0xadd   : > { %3756 = vperm.xlu2 %7297, %v3602_v38   ;;  %12696 = vst [vmem:[#allocation115_spill] sm:$0xff] %v10418_v31 }
 0xade   : > { %v10406_v23 = vpop.permute.xlu0 %3228 }
 0xadf   : > { %4436 = vmatmul.bf16.gmra.mxu3 %v10403_v60  ;;  %v10409_v14 = vpop.permute.xlu2 %3392  ;;  %v10411_v4 = vpop.permute.xlu1 %3316  ;;  %v10424_v60 = vor.u32 %v7178_v63, %v7003_v2  ;;  %v7009_v2 = vld [vmem:[#allocation3 + $0x260] sm:$0xf]  ;;  %v7181_v63 = vld [vmem:[#allocation3 + $0x270] sm:$0xf0] }
 0xae0   : > { %12694 = vst [vmem:[#allocation113_spill] sm:$0xff] %v10411_v4  ;;  %v3437_v52 = vsel %vm675_vm5, %v10251_v45, %v10409_v14  ;;  %v6777_v4 = vld [vmem:[#allocation3 + $0x88] sm:$0xf] }
 0xae1   : > { %v10420_v38 = vpop.f32.mrf.mxu2  ;;  %v10422_v47 = vpop.f32.mrf.mxu3  ;;  %4988 = vmatpush.bf16.msra.mxu2 %v3437_v52  ;;  %12697 = vst [vmem:[#allocation116_spill] sm:$0xff] %v10424_v60  ;;  %v10437_v52 = vor.u32 %v7122_v0, %v6777_v4  ;;  %v6791_v4 = vld [vmem:[#allocation3 + $0xbc] sm:$0xf0] }
 0xae3   : > { %12701 = vst [vmem:[#allocation120_spill] sm:$0xff] %v10437_v52 }
 0xae4   : > { %4470 = vmatmul.bf16.gmra.mxu0 %v10416_v27  ;;  %v10443_v39 = vpop.f32.mrf.mxu1 }
 0xae5   : > { %12702 = vst [vmem:[#allocation121_spill] sm:$0xff] %v10443_v39  ;;  %v3271_v39 = vsel %vm645_vm2, %v9617_v44, %v10311_v8 }
 0xae6   : > { %v10427_v28 = vpop.permute.xlu0 %3258 }
 0xae7   : > { %12698 = vst [vmem:[#allocation117_spill] sm:$0xff] %v10427_v28  ;;  %4352 = vmatmul.bf16.gmra.mxu2 %v10424_v60  ;;  %v10430_v45 = vpop.permute.xlu2 %3606  ;;  %v10432_v6 = vpop.permute.xlu1 %3310  ;;  %v3275_v55 = vsel %vm645_vm2, %v9654_v61, %v10427_v28  ;;  %v3273_v60 = vsel %vm645_vm2, %v9596_v43, %v10276_v35  ;;  %v7124_v61 = vld [vmem:[#allocation3 + $0xac] sm:$0xf]  ;;  %v7127_v35 = vld [vmem:[#allocation3 + $0xc0] sm:$0xf0] }
 0xae8   : > { %12699 = vst [vmem:[#allocation118_spill] sm:$0xff] %v10430_v45  ;;  %4803 = vmatpush.bf16.msra.mxu0 %v3275_v55  ;;  %v10461_v43 = vor.u32 %v7124_v61, %v6791_v4  ;;  %v3267_v61 = vsel %vm645_vm2, %v9522_v57, %v10379_v9 }
 0xae9   : > { %12700 = vst [vmem:[#allocation119_spill] sm:$0xff] %v10432_v6  ;;  %v10439_v27 = vpop.f32.mrf.mxu2  ;;  %v10441_v31 = vpop.f32.mrf.mxu3  ;;  %v10448_v6 = vor.u32 %v7181_v63, %v7009_v2  ;;  %v3269_v63 = vsel %vm645_vm2, %v9598_v40, %v10346_v15 }
 0xaea   : > { %12705 = vst [vmem:[#allocation124_spill] sm:$0xff] %v10461_v43 }
 0xaeb   : > { %12703 = vst [vmem:[#allocation122_spill] sm:$0xff] %v10448_v6 }
 0xaec   : > { %4559 = vmatmul.bf16.gmra.mxu1 %v10437_v52  ;;  %4804 = vmatpush.bf16.msra.mxu0 %v3273_v60  ;;  %v6797_v52 = vld [vmem:[#allocation3 + $0xb0] sm:$0xf] }
 0xaed   : > { %v10483_v4 = vor.u32 %v7127_v35, %v6797_v52 }
 0xaee   : > { %v10451_v0 = vpop.permute.xlu0 %3222 }
 0xaef   : > { %4441 = vmatmul.bf16.gmra.mxu3 %v10448_v6  ;;  %v10454_v55 = vpop.permute.xlu2 %3621  ;;  %v10456_v28 = vpop.permute.xlu1 %3304  ;;  %12708 = vst [vmem:[#allocation127_spill] sm:$0xff] %v10483_v4 }
 0xaf0   : > { %12704 = vst [vmem:[#allocation123_spill] sm:$0xff] %v10454_v55  ;;  %4805 = vmatpush.bf16.msra.mxu0 %v3271_v39  ;;  %v10471_v6 = vpop.f32.mrf.mxu1 }
 0xaf1   : > { %v10463_v2 = vpop.f32.mrf.mxu2  ;;  %v10465_v60 = vpop.f32.mrf.mxu3 }
 0xaf4   : > { %4475 = vmatmul.bf16.gmra.mxu0 %v10461_v43 }
 0xaf5   : > { %4806 = vmatpush.bf16.msra.mxu0 %v3269_v63  ;;  %v3265_v63 = vsel %vm645_vm2, %v9675_v54, %v10406_v23  ;;  %v3263_v54 = vsel %vm645_vm2, %v9719_v53, %v10451_v0  ;;  %v7132_v53 = vld [vmem:[#allocation3 + $0xe8] sm:$0xf0] }
 0xaf6   : > { %v10473_v55 = vpop.permute.xlu0 %3216 }
 0xaf7   : > { %4633 = vmatmul.bf16.vlgmr.msrb.gmra.mxu2 %v9555_v21  ;;  %v10476_v44 = vpop.permute.xlu2 %3636  ;;  %v10478_v39 = vpop.permute.xlu1 %3616  ;;  %v7129_v21 = vld [vmem:[#allocation3 + $0xd4] sm:$0xf] }
 0xaf8   : > { %12706 = vst [vmem:[#allocation125_spill] sm:$0xff] %v10476_v44  ;;  %v6811_v44 = vld [vmem:[#allocation3 + $0xe4] sm:$0xf0]  ;;  %v10493_v8 = vpop.f32.mrf.mxu1 }
 0xaf9   : > { %12707 = vst [vmem:[#allocation126_spill] sm:$0xff] %v10478_v39  ;;  %v10485_v40 = vpop.f32.mrf.mxu2  ;;  %v4404_v43 = vpop.f32.mrf.mxu3  ;;  %4807 = vmatpush.bf16.msra.mxu0 %v3267_v61  ;;  %v10506_v61 = vor.u32 %v7129_v21, %v6811_v44  ;;  %v6817_v21 = vld [vmem:[#allocation3 + $0xd8] sm:$0xf] }
 0xafb   : > { %12712 = vst [vmem:[#allocation131_spill] sm:$0xff] %v10506_v61 }
 0xafc   : > { %4564 = vmatmul.bf16.gmra.mxu1 %v10483_v4 }
 0xafd   : > { %4808 = vmatpush.bf16.msra.mxu0 %v3265_v63 }
 0xafe   : > { %v10491_v15 = vpop.permute.xlu0 %3611 }
 0xaff   : > { %12709 = vst [vmem:[#allocation128_spill] sm:$0xff] %v10491_v15  ;;  %4722 = vmatmul.bf16.vlgmr.msra.gmra.mxu3 %v9726_v34  ;;  %v10496_v57 = vpop.permute.xlu2 %3651  ;;  %v10498_v35 = vpop.permute.xlu1 %3631 }
 0xb00   : > { %12710 = vst [vmem:[#allocation129_spill] sm:$0xff] %v10496_v57  ;;  %5426 = vmatpush.bf16.msra.mxu3 %v10279_v33  ;;  %v4212_v52 = vadd.f32 %v9991_v29, %v10496_v57  ;;  %v3261_v29 = vsel %vm645_vm2, %v9656_v25, %v10473_v55  ;;  %v10531_v25 = vor.u32 %v7132_v53, %v6817_v21  ;;  %vm6066_vm2 = vcmask 7168  }
 0xb01   : > { %12711 = vst [vmem:[#allocation130_spill] sm:$0xff] %v10498_v35  ;;  %v10508_v63 = vpop.f32.mrf.mxu2  ;;  %v10510_v4 = vpop.f32.mrf.mxu3  ;;  %4809 = vmatpush.bf16.msra.mxu0 %v3263_v54 }
 0xb02   : > { %v4301_v34 = vadd.f32 %v10289_v18, %v4212_v52  ;;  %12716 = vst [vmem:[#allocation135_spill] sm:$0xff] %v10531_v25 }
 0xb04   : > { %5427 = vmatpush.bf16.msra.mxu3 %v10188_v16  ;;  %4480 = vmatmul.bf16.gmra.mxu0 %v10506_v61  ;;  %v10519_v33 = vadd.f32 %v10323_v49, %v4301_v34  ;;  %v10533_v34 = vpop.f32.mrf.mxu1  ;;  %v7134_v61 = vld [vmem:[#allocation3 + $0xfc] sm:$0xf] }
 0xb05   : > { %4810 = vmatpush.bf16.msra.mxu0 %v3261_v29 }
 0xb06   : > { %v10521_v44 = vpop.permute.xlu0 %3626 }
 0xb07   : > { %12713 = vst [vmem:[#allocation132_spill] sm:$0xff] %v10521_v44  ;;  %4638 = vmatmul.bf16.gmra.mxu2 %v9587_v24  ;;  %v10524_v54 = vpop.permute.xlu2 %3666  ;;  %v10526_v18 = vpop.permute.xlu1 %3646 }
 0xb08   : > { %12714 = vst [vmem:[#allocation133_spill] sm:$0xff] %v10524_v54  ;;  %5428 = vmatpush.bf16.msra.mxu3 %v10220_v42  ;;  %v4220_v16 = vadd.f32 %v10048_v19, %v10524_v54  ;;  %v6831_v42 = vld [vmem:[#allocation3 + $0x10c] sm:$0xf0] }
 0xb09   : > { %12715 = vst [vmem:[#allocation134_spill] sm:$0xff] %v10526_v18  ;;  %v4323_v49 = vpop.f32.mrf.mxu2  ;;  %v4409_v52 = vpop.f32.mrf.mxu3 }
 0xb0a   : > { %v4309_v29 = vadd.f32 %v10393_v59, %v4220_v16 }
 0xb0c   : > { %5429 = vmatpush.bf16.msra.mxu3 %v10249_v7  ;;  %4569 = vmatmul.bf16.gmra.mxu1 %v10531_v25  ;;  %v10539_v24 = vadd.f32 %v10422_v47, %v4309_v29  ;;  %v10553_v47 = vor.u32 %v7134_v61, %v6831_v42  ;;  %v7137_v61 = vld [vmem:[#allocation3 + $0x110] sm:$0xf0] }
 0xb0e   : > { %v10541_v57 = vpop.permute.xlu0 %3641  ;;  %12720 = vst [vmem:[#allocation139_spill] sm:$0xff] %v10553_v47 }
 0xb0f   : > { %12717 = vst [vmem:[#allocation136_spill] sm:$0xff] %v10541_v57  ;;  %4727 = vmatmul.bf16.gmra.mxu3 %v9759_v56  ;;  %v10544_v19 = vpop.permute.xlu2 %3681  ;;  %v10546_v21 = vpop.permute.xlu1 %3661 }
 0xb10   : > { %12718 = vst [vmem:[#allocation137_spill] sm:$0xff] %v10544_v19  ;;  %5430 = vmatpush.bf16.msra.mxu3 %v10314_v20  ;;  %v4227_v7 = vadd.f32 %v10120_v48, %v10544_v19  ;;  %v4217_v59 = vadd.f32 %v10035_v13, %v10546_v21  ;;  %v10558_v56 = vpop.f32.mrf.mxu1  ;;  %v6837_v13 = vld [vmem:[#allocation3 + $0x100] sm:$0xf] }
 0xb11   : > { %12719 = vst [vmem:[#allocation138_spill] sm:$0xff] %v10546_v21  ;;  %v10555_v53 = vpop.f32.mrf.mxu2  ;;  %v4412_v16 = vpop.f32.mrf.mxu3 }
 0xb12   : > { %v4306_v29 = vadd.f32 %v10356_v1, %v4217_v59  ;;  %v4316_v25 = vadd.f32 %v10463_v2, %v4227_v7 }
 0xb14   : > { %5431 = vmatpush.bf16.msra.mxu3 %v10349_v22  ;;  %4485 = vmatmul.bf16.gmra.mxu0 %v10553_v47  ;;  %v10564_v48 = vadd.f32 %v10395_v5, %v4306_v29  ;;  %v10566_v20 = vadd.f32 %v4404_v43, %v4316_v25  ;;  %v10580_v43 = vor.u32 %v7137_v61, %v6837_v13  ;;  %v6851_v13 = vld [vmem:[#allocation3 + $0x134] sm:$0xf0] }
 0xb16   : > { %v10568_v42 = vpop.permute.xlu0 %3656  ;;  %12724 = vst [vmem:[#allocation143_spill] sm:$0xff] %v10580_v43 }
 0xb17   : > { %12721 = vst [vmem:[#allocation140_spill] sm:$0xff] %v10568_v42  ;;  %4643 = vmatmul.bf16.gmra.mxu2 %v9608_v46  ;;  %v10571_v1 = vpop.permute.xlu2 %3696  ;;  %v10573_v59 = vpop.permute.xlu1 %3676 }
 0xb18   : > { %12722 = vst [vmem:[#allocation141_spill] sm:$0xff] %v10571_v1  ;;  %5432 = vmatpush.bf16.msra.mxu3 %v10384_v30  ;;  %v4235_v22 = vadd.f32 %v10217_v37, %v10571_v1  ;;  %v4225_v5 = vadd.f32 %v10095_v41, %v10573_v59  ;;  %v10589_v30 = vpop.f32.mrf.mxu1  ;;  %v7139_v41 = vld [vmem:[#allocation3 + $0x124] sm:$0xf] }
 0xb19   : > { %12723 = vst [vmem:[#allocation142_spill] sm:$0xff] %v10573_v59  ;;  %v10582_v2 = vpop.f32.mrf.mxu2  ;;  %v10584_v25 = vpop.f32.mrf.mxu3 }
 0xb1a   : > { %v4314_v7 = vadd.f32 %v10439_v27, %v4225_v5  ;;  %v4324_v29 = vadd.f32 %v4323_v49, %v4235_v22  ;;  %v10605_v22 = vor.u32 %v7139_v41, %v6851_v13  ;;  %v6857_v41 = vld [vmem:[#allocation3 + $0x128] sm:$0xf]  ;;  %v7142_v13 = vld [vmem:[#allocation3 + $0x138] sm:$0xf0] }
 0xb1c   : > { %5433 = vmatpush.bf16.msra.mxu3 %v10409_v14  ;;  %4574 = vmatmul.bf16.gmra.mxu1 %v10580_v43  ;;  %v10592_v37 = vadd.f32 %v10465_v60, %v4314_v7  ;;  %v10594_v46 = vadd.f32 %v4412_v16, %v4324_v29  ;;  %12727 = vst [vmem:[#allocation146_spill] sm:$0xff] %v10605_v22 }
 0xb1e   : > { %v10596_v61 = vpop.permute.xlu0 %3671 }
 0xb1f   : > { %12725 = vst [vmem:[#allocation144_spill] sm:$0xff] %v10596_v61  ;;  %4732 = vmatmul.bf16.gmra.mxu3 %v9792_v50  ;;  %v4222_v27 = vadd.f32 %v10071_v11, %v10596_v61  ;;  %v10601_v49 = vpop.permute.xlu1 %3691  ;;  %v10608_v5 = vpop.permute.xlu2 %3711 }
 0xb20   : > { %12726 = vst [vmem:[#allocation145_spill] sm:$0xff] %v10601_v49  ;;  %v4232_v14 = vadd.f32 %v10180_v17, %v10601_v49  ;;  %v4242_v17 = vadd.f32 %v10341_v36, %v10608_v5 }
 0xb21   : > { %v4311_v60 = vadd.f32 %v10420_v38, %v4222_v27  ;;  %v4330_v16 = vpop.f32.mrf.mxu2  ;;  %12728 = vst [vmem:[#allocation147_spill] sm:$0xff] %v10608_v5  ;;  %v10621_v38 = vpop.f32.mrf.mxu1  ;;  %v12738_v5 = vld [vmem:[#allocation105_spill] sm:$0xff] }
 0xb22   : > { %v4321_v7 = vadd.f32 %v10508_v63, %v4232_v14  ;;  %v4417_v29 = vpop.f32.mrf.mxu3  ;;  %v4331_v14 = vadd.f32 %v4330_v16, %v4242_v17  ;;  %v6871_v16 = vld [vmem:[#allocation3 + $0x15c] sm:$0xf0] }
 0xb23   : > { %v10612_v50 = vadd.f32 %v10441_v31, %v4311_v60 }
 0xb24   : > { %4490 = vmatmul.bf16.gmra.mxu0 %v10605_v22  ;;  %v10615_v11 = vadd.f32 %v4409_v52, %v4321_v7  ;;  %v10628_v52 = vor.u32 %v7142_v13, %v6857_v41  ;;  %v12733_v13 = vld [vmem:[#allocation97_spill] sm:$0xff] }
 0xb26   : > { %v10619_v43 = vpop.permute.xlu0 %3686  ;;  %12730 = vst [vmem:[#allocation149_spill] sm:$0xff] %v10628_v52 }
 0xb27   : > { %12729 = vst [vmem:[#allocation148_spill] sm:$0xff] %v10619_v43  ;;  %4648 = vmatmul.bf16.gmra.mxu2 %v9633_v26  ;;  %v4230_v63 = vadd.f32 %v10147_v10, %v10619_v43  ;;  %v3347_v31 = vpop.permute.xlu1 %3346  ;;  %v7144_v10 = vld [vmem:[#allocation3 + $0x14c] sm:$0xf]  ;;  %v10692_v43 = vpop.permute.xlu2 %3726 }
 0xb28   : > { %v3363_v27 = vsel %vm660_vm6, %v9959_v58, %v3347_v31  ;;  %5337 = vmatpush.bf16.msrb.mxu2 %v3347_v31  ;;  %v3361_v58 = vsel %vm660_vm6, %v9797_v51, %v10281_v12  ;;  %v12734_v31 = vld [vmem:[#allocation100_spill] sm:$0xff]  ;;  %12751 = vst [vmem:[#allocation105_spill] sm:$0xff] %v10692_v43 }
 0xb29   : > { %v4333_v36 = vpop.f32.mrf.mxu2  ;;  %4892 = vmatpush.bf16.msrb.mxu1 %v3363_v27  ;;  %v4319_v60 = vadd.f32 %v10485_v40, %v4230_v63  ;;  %v4190_v40 = vadd.f32 %v9807_v32, %v10430_v45  ;;  %v10653_v51 = vpop.f32.mrf.mxu1 }
 0xb2a   : > { %v4419_v7 = vpop.f32.mrf.mxu3 }
 0xb2b   : > { %v10631_v22 = vadd.f32 %v4419_v7, %v4331_v14  ;;  %v10634_v26 = vadd.f32 %v10510_v4, %v4319_v60  ;;  %v10658_v14 = vor.u32 %v7144_v10, %v6871_v16  ;;  %v12739_v10 = vld [vmem:[#allocation36_spill] sm:$0xff] }
 0xb2c   : > { %4579 = vmatmul.bf16.gmra.mxu1 %v10628_v52  ;;  %5338 = vmatpush.bf16.msrb.mxu2 %v10281_v12  ;;  %v12735_v12 = vld [vmem:[#allocation23_spill] sm:$0xff]  ;;  %v3357_v16 = vsel %vm660_vm6, %v12739_v10, %v12738_v5 }
 0xb2d   : > { %4893 = vmatpush.bf16.msrb.mxu1 %v3361_v58  ;;  %v3359_v27 = vsel %vm660_vm6, %v12735_v12, %v12734_v31  ;;  %12736 = vst [vmem:[#allocation97_spill] sm:$0xff] %v10658_v14 }
 0xb2e   : > { %v10641_v17 = vpop.permute.xlu0 %3701 }
 0xb2f   : > { %12731 = vst [vmem:[#allocation150_spill] sm:$0xff] %v10641_v17  ;;  %4737 = vmatmul.bf16.gmra.mxu3 %v9834_v3  ;;  %v4237_v4 = vadd.f32 %v10257_v62, %v10641_v17  ;;  %v10648_v41 = vpop.permute.xlu1 %3706  ;;  %v12737_v3 = vld [vmem:[#allocation54_spill] sm:$0xff] }
 0xb30   : > { %12732 = vst [vmem:[#allocation151_spill] sm:$0xff] %v10648_v41  ;;  %v4240_v63 = vadd.f32 %v12733_v13, %v10648_v41  ;;  %5339 = vmatpush.bf16.msrb.mxu2 %v12734_v31  ;;  %v4279_v13 = vadd.f32 %v12737_v3, %v4190_v40  ;;  %v7147_v31 = vld [vmem:[#allocation3 + $0x160] sm:$0xf0]  ;;  %v12741_v3 = vld [vmem:[#allocation59_spill] sm:$0xff] }
 0xb31   : > { %v4326_v32 = vadd.f32 %v10555_v53, %v4237_v4  ;;  %v4335_v60 = vpop.f32.mrf.mxu2  ;;  %v4456_v7 = vpop.f32.mrf.mxu0  ;;  %4894 = vmatpush.bf16.msrb.mxu1 %v3359_v27  ;;  %v6877_v4 = vld [vmem:[#allocation3 + $0x150] sm:$0xf]  ;;  %v12744_v27 = vld [vmem:[#allocation109_spill] sm:$0xff]  ;;  %v12750_v17 = vld [vmem:[#allocation58_spill] sm:$0xff] }
 0xb32   : > { %v4422_v62 = vpop.f32.mrf.mxu3  ;;  %v4329_v58 = vadd.f32 %v10582_v2, %v4240_v63  ;;  %v12740_v2 = vld [vmem:[#allocation29_spill] sm:$0xff]  ;;  %v4368_v40 = vadd.f32 %v12741_v3, %v4279_v13  ;;  %v10687_v10 = vor.u32 %v7147_v31, %v6877_v4  ;;  %v12749_v13 = vld [vmem:[#allocation115_spill] sm:$0xff] }
 0xb33   : > { %v10664_v52 = vadd.f32 %v10584_v25, %v4326_v32  ;;  %v4192_v63 = vadd.f32 %v12740_v2, %v10491_v15  ;;  %v12742_v25 = vld [vmem:[#allocation22_spill] sm:$0xff]  ;;  %v12752_v4 = vld [vmem:[#allocation113_spill] sm:$0xff] }
 0xb34   : > { %4495 = vmatmul.bf16.gmra.mxu0 %v10658_v14  ;;  %5340 = vmatpush.bf16.msrb.mxu2 %v12738_v5  ;;  %v10671_v53 = vadd.f32 %v4417_v29, %v4329_v58  ;;  %v12746_v5 = vld [vmem:[#allocation110_spill] sm:$0xff]  ;;  %v12747_v29 = vld [vmem:[#allocation37_spill] sm:$0xff]  ;;  %12748 = vst [vmem:[#allocation54_spill] sm:$0xff] %v10687_v10 }
 0xb35   : > { %4895 = vmatpush.bf16.msrb.mxu1 %v3357_v16  ;;  %v3355_v58 = vsel %vm660_vm6, %v12747_v29, %v12746_v5  ;;  %v4457_v16 = vadd.f32 %v4456_v7, %v4368_v40  ;;  %v4281_v1 = vadd.f32 %v12750_v17, %v4192_v63  ;;  %v12753_v7 = vld [vmem:[#allocation45_spill] sm:$0xff]  ;;  %v12755_v63 = vld [vmem:[#allocation63_spill] sm:$0xff] }
 0xb36   : > { %v10677_v12 = vpop.permute.xlu0 %3716  ;;  %v3353_v31 = vsel %vm660_vm6, %v12753_v7, %v12752_v4 }
 0xb37   : > { %4653 = vmatmul.bf16.gmra.mxu2 %v12742_v25  ;;  %12743 = vst [vmem:[#allocation100_spill] sm:$0xff] %v10677_v12  ;;  %v4245_v32 = vadd.f32 %v12744_v27, %v10677_v12  ;;  %v10681_v14 = vpop.permute.xlu1 %3721 }
 0xb38   : > { %12745 = vst [vmem:[#allocation23_spill] sm:$0xff] %v10681_v14  ;;  %5341 = vmatpush.bf16.msrb.mxu2 %v12746_v5  ;;  %v4247_v2 = vadd.f32 %v12749_v13, %v10681_v14 }
 0xb39   : > { %v4338_v3 = vpop.f32.mrf.mxu2  ;;  %v4458_v25 = vpop.f32.mrf.mxu0  ;;  %4896 = vmatpush.bf16.msrb.mxu1 %v3355_v58  ;;  %v4334_v27 = vadd.f32 %v4333_v36, %v4245_v32  ;;  %v7149_v36 = vld [vmem:[#allocation3 + $0x174] sm:$0xf]  ;;  %v4370_v32 = vadd.f32 %v12755_v63, %v4281_v1 }
 0xb3a   : > { %v4424_v41 = vpop.f32.mrf.mxu3  ;;  %v4545_v47 = vpop.f32.mrf.mxu1  ;;  %v4336_v12 = vadd.f32 %v4335_v60, %v4247_v2  ;;  %v6891_v60 = vld [vmem:[#allocation3 + $0x184] sm:$0xf0]  ;;  %v12756_v58 = vld [vmem:[#allocation16_spill] sm:$0xff] }
 0xb3b   : > { %v4546_v49 = vadd.f32 %v4545_v47, %v4457_v16  ;;  %v10699_v40 = vadd.f32 %v4422_v62, %v4334_v27  ;;  %v12754_v47 = vld [vmem:[#allocation121_spill] sm:$0xff]  ;;  %v12757_v16 = vld [vmem:[#allocation11_spill] sm:$0xff] }
 0xb3c   : > { %4584 = vmatmul.bf16.gmra.mxu1 %v10687_v10  ;;  %5342 = vmatpush.bf16.msrb.mxu2 %v12752_v4  ;;  %v10701_v5 = vadd.f32 %v4424_v41, %v4336_v12  ;;  %v4250_v17 = vadd.f32 %v12754_v47, %v10692_v43  ;;  %v4195_v13 = vadd.f32 %v12757_v16, %v10478_v39  ;;  %v12759_v62 = vld [vmem:[#allocation119_spill] sm:$0xff]  ;;  %v12762_v16 = vld [vmem:[#allocation62_spill] sm:$0xff] }
 0xb3d   : > { %v5515_v29 = vmax.f32 %v4546_v49, 0.0  ;;  %4897 = vmatpush.bf16.msrb.mxu1 %v3353_v31  ;;  %v12760_v49 = vld [vmem:[#allocation81_spill] sm:$0xff]  ;;  %v10715_v12 = vor.u32 %v7149_v36, %v6891_v60  ;;  %v4459_v4 = vadd.f32 %v4458_v25, %v4370_v32  ;;  %v6897_v60 = vld [vmem:[#allocation3 + $0x178] sm:$0xf] }
 0xb3e   : > { %v10709_v2 = vpop.permute.xlu0 %3731  ;;  %v3351_v41 = vsel %vm660_vm6, %v12760_v49, %v12759_v62  ;;  %v4339_v27 = vadd.f32 %v4338_v3, %v4250_v17  ;;  %v7152_v17 = vld [vmem:[#allocation3 + $0x188] sm:$0xf0]  ;;  %v12764_v32 = vld [vmem:[#allocation117_spill] sm:$0xff]  ;;  %v12765_v49 = vld [vmem:[#allocation14_spill] sm:$0xff] }
 0xb3f   : > { %4742 = vmatmul.bf16.gmra.mxu3 %v12756_v58  ;;  %5611 = vadd.xlane.f32.xlu1 %v5515_v29  ;;  %12758 = vst [vmem:[#allocation36_spill] sm:$0xff] %v10709_v2  ;;  %v4284_v58 = vadd.f32 %v12762_v16, %v4195_v13  ;;  %v4252_v25 = vadd.f32 %v10471_v6, %v10709_v2  ;;  %v12766_v13 = vld [vmem:[#allocation123_spill] sm:$0xff] }
 0xb40   : > { %5343 = vmatpush.bf16.msrb.mxu2 %v12759_v62  ;;  %12761 = vst [vmem:[#allocation29_spill] sm:$0xff] %v10715_v12  ;;  %v12763_v62 = vld [vmem:[#allocation76_spill] sm:$0xff] }
 0xb41   : > { %v4340_v7 = vpop.f32.mrf.mxu2  ;;  %v4461_v1 = vpop.f32.mrf.mxu0  ;;  %4898 = vmatpush.bf16.msrb.mxu1 %v3351_v41  ;;  %v3349_v36 = vsel %vm660_vm6, %v12763_v62, %v10456_v28  ;;  %v12767_v41 = vld [vmem:[#allocation26_spill] sm:$0xff] }
 0xb42   : > { %v4427_v31 = vpop.f32.mrf.mxu3  ;;  %v4547_v29 = vpop.f32.mrf.mxu1 }
 0xb43   : > { %v10717_v47 = vadd.f32 %v4427_v31, %v4339_v27  ;;  %v4548_v63 = vadd.f32 %v4547_v29, %v4459_v4  ;;  %v4197_v27 = vadd.f32 %v12767_v41, %v12766_v13  ;;  %v12768_v4 = vld [vmem:[#allocation69_spill] sm:$0xff]  ;;  %v10732_v29 = vor.u32 %v7152_v17, %v6897_v60  ;;  %v6911_v60 = vld [vmem:[#allocation3 + $0x1ac] sm:$0xf0]  ;;  %v12775_v41 = vld [vmem:[#allocation20_spill] sm:$0xff] }
 0xb44   : > { %4500 = vmatmul.bf16.gmra.mxu0 %v10715_v12  ;;  %5344 = vmatpush.bf16.msrb.mxu2 %v10456_v28  ;;  %v4373_v31 = vadd.f32 %v12768_v4, %v4284_v58  ;;  %v4341_v28 = vadd.f32 %v4340_v7, %v4252_v25  ;;  %v10737_v12 = vpop.permute.xlu1 %3736  ;;  %v7154_v58 = vld [vmem:[#allocation3 + $0x19c] sm:$0xf]  ;;  %v12773_v7 = vld [vmem:[#allocation99_spill] sm:$0xff]  ;;  %v12774_v25 = vld [vmem:[#allocation38_spill] sm:$0xff]  ;;  %v4200_v4 = vadd.f32 %v12775_v41, %v10521_v44 }
 0xb45   : > { %v5518_v3 = vmax.f32 %v4548_v63, 0.0  ;;  %4899 = vmatpush.bf16.msrb.mxu1 %v3349_v36  ;;  %12769 = vst [vmem:[#allocation59_spill] sm:$0xff] %v10732_v29  ;;  %v12770_v36 = vld [vmem:[#allocation94_spill] sm:$0xff] }
 0xb46   : > { %v4462_v62 = vadd.f32 %v4461_v1, %v4373_v31  ;;  %12771 = vst [vmem:[#allocation109_spill] sm:$0xff] %v10737_v12  ;;  %v4255_v1 = vadd.f32 %v10493_v8, %v10737_v12  ;;  %v12776_v31 = vld [vmem:[#allocation74_spill] sm:$0xff] }
 0xb47   : > { %4658 = vmatmul.bf16.gmra.mxu2 %v12765_v49  ;;  %5613 = vadd.xlane.f32.xlu2 %v5518_v3  ;;  %v12772_v3 = vld [vmem:[#allocation68_spill] sm:$0xff] }
 0xb48   : > { %v4286_v49 = vadd.f32 %v12772_v3, %v4197_v27  ;;  %v10748_v27 = vor.u32 %v7154_v58, %v6911_v60  ;;  %v12778_v3 = vld [vmem:[#allocation104_spill] sm:$0xff] }
 0xb49   : > { %5248 = vmatpush.bf16.msra.mxu1 %v12764_v32  ;;  %v4463_v16 = vpop.f32.mrf.mxu0  ;;  %v7157_v58 = vld [vmem:[#allocation3 + $0x1b0] sm:$0xf0] }
 0xb4a   : > { %v4343_v6 = vpop.f32.mrf.mxu2  ;;  %v4429_v63 = vpop.f32.mrf.mxu3  ;;  %12777 = vst [vmem:[#allocation110_spill] sm:$0xff] %v10748_v27 }
 0xb4b   : > { %v10735_v10 = vadd.f32 %v4429_v63, %v4341_v28  ;;  %v4550_v32 = vpop.f32.mrf.mxu1  ;;  %v4375_v28 = vadd.f32 %v12776_v31, %v4286_v49  ;;  %v6917_v49 = vld [vmem:[#allocation3 + $0x1a0] sm:$0xf]  ;;  %v12783_v31 = vld [vmem:[#allocation79_spill] sm:$0xff] }
 0xb4c   : > { %v4551_v2 = vadd.f32 %v4550_v32, %v4462_v62  ;;  %4589 = vmatmul.bf16.gmra.mxu1 %v10732_v29  ;;  %v4344_v62 = vadd.f32 %v4343_v6, %v4255_v1  ;;  %v10753_v29 = vpop.permute.xlu2 %3741  ;;  %v12781_v6 = vld [vmem:[#allocation31_spill] sm:$0xff] }
 0xb4d   : > { %5249 = vmatpush.bf16.msra.mxu1 %v12770_v36  ;;  %v4464_v36 = vadd.f32 %v4463_v16, %v4375_v28  ;;  %12779 = vst [vmem:[#allocation37_spill] sm:$0xff] %v10753_v29  ;;  %v4257_v16 = vadd.f32 %v10533_v34, %v10753_v29 }
 0xb4e   : > { %v5521_v17 = vmax.f32 %v4551_v2, 0.0 }
 0xb4f   : > { %4747 = vmatmul.bf16.gmra.mxu3 %v12774_v25  ;;  %v12780_v25 = vld [vmem:[#allocation73_spill] sm:$0xff] }
 0xb50   : > { %5615 = vadd.xlane.f32.xlu0 %v5521_v17  ;;  %v4289_v12 = vadd.f32 %v12780_v25, %v4200_v4  ;;  %v12782_v17 = vld [vmem:[#allocation39_spill] sm:$0xff]  ;;  %v10764_v25 = vor.u32 %v7157_v58, %v6917_v49  ;;  %v6931_v49 = vld [vmem:[#allocation3 + $0x1d4] sm:$0xf0] }
 0xb51   : > { %5250 = vmatpush.bf16.msra.mxu1 %v12773_v7  ;;  %v4466_v63 = vpop.f32.mrf.mxu0  ;;  %v4202_v1 = vadd.f32 %v12782_v17, %v10498_v35 }
 0xb52   : > { %v4345_v32 = vpop.f32.mrf.mxu2  ;;  %v4432_v2 = vpop.f32.mrf.mxu3  ;;  %v4378_v28 = vadd.f32 %v12783_v31, %v4289_v12  ;;  %12784 = vst [vmem:[#allocation115_spill] sm:$0xff] %v10764_v25  ;;  %v7159_v12 = vld [vmem:[#allocation3 + $0x1c4] sm:$0xf] }
 0xb53   : > { %v10751_v7 = vadd.f32 %v4432_v2, %v4344_v62  ;;  %v4552_v8 = vpop.f32.mrf.mxu1  ;;  %v4346_v4 = vadd.f32 %v4345_v32, %v4257_v16  ;;  %v12787_v32 = vld [vmem:[#allocation43_spill] sm:$0xff]  ;;  %v12790_v31 = vld [vmem:[#allocation82_spill] sm:$0xff] }
 0xb54   : > { %v4553_v41 = vadd.f32 %v4552_v8, %v4464_v36  ;;  %4505 = vmatmul.bf16.gmra.mxu0 %v10748_v27  ;;  %v4467_v36 = vadd.f32 %v4466_v63, %v4378_v28  ;;  %v10769_v8 = vpop.permute.xlu0 %3746 }
 0xb55   : > { %5251 = vmatpush.bf16.msra.mxu1 %v12778_v3  ;;  %12785 = vst [vmem:[#allocation58_spill] sm:$0xff] %v10769_v8  ;;  %v4260_v63 = vadd.f32 %v10558_v56, %v10769_v8 }
 0xb56   : > { %v5524_v60 = vmax.f32 %v4553_v41, 0.0  ;;  %v12786_v41 = vld [vmem:[#allocation78_spill] sm:$0xff] }
 0xb57   : > { %4663 = vmatmul.bf16.gmra.mxu2 %v12781_v6  ;;  %v4291_v6 = vadd.f32 %v12786_v41, %v4202_v1  ;;  %v10780_v1 = vor.u32 %v7159_v12, %v6931_v49  ;;  %v7162_v12 = vld [vmem:[#allocation3 + $0x1d8] sm:$0xf0]  ;;  %v10789_v49 = vpop.permute.xlu2 %3756 }
 0xb58   : > { %5617 = vadd.xlane.f32.xlu2 %v5524_v60  ;;  %v12789_v60 = vld [vmem:[#allocation41_spill] sm:$0xff]  ;;  %12794 = vst [vmem:[#allocation121_spill] sm:$0xff] %v10789_v49 }
 0xb59   : > { %5252 = vmatpush.bf16.msra.mxu1 %v10379_v9  ;;  %v4468_v62 = vpop.f32.mrf.mxu0  ;;  %v4380_v28 = vadd.f32 %v12790_v31, %v4291_v6  ;;  %12791 = vst [vmem:[#allocation113_spill] sm:$0xff] %v10780_v1  ;;  %v6937_v6 = vld [vmem:[#allocation3 + $0x1c8] sm:$0xf]  ;;  %v12797_v31 = vld [vmem:[#allocation88_spill] sm:$0xff] }
 0xb5a   : > { %v4348_v2 = vpop.f32.mrf.mxu2  ;;  %v4434_v3 = vpop.f32.mrf.mxu3 }
 0xb5b   : > { %v10767_v9 = vadd.f32 %v4434_v3, %v4346_v4  ;;  %v4555_v34 = vpop.f32.mrf.mxu1  ;;  %v4349_v4 = vadd.f32 %v4348_v2, %v4260_v63  ;;  %v4469_v3 = vadd.f32 %v4468_v62, %v4380_v28 }
 0xb5c   : > { %v4556_v17 = vadd.f32 %v4555_v34, %v4467_v36  ;;  %4594 = vmatmul.bf16.gmra.mxu1 %v10764_v25 }
 0xb5d   : > { %5253 = vmatpush.bf16.msra.mxu1 %v10406_v23  ;;  %v12788_v23 = vld [vmem:[#allocation125_spill] sm:$0xff] }
 0xb5e   : > { %v5527_v58 = vmax.f32 %v4556_v17, 0.0  ;;  %v4205_v16 = vadd.f32 %v12789_v60, %v12788_v23  ;;  %v10785_v17 = vpop.permute.xlu1 %3751 }
 0xb5f   : > { %4752 = vmatmul.bf16.gmra.mxu3 %v12787_v32  ;;  %12792 = vst [vmem:[#allocation45_spill] sm:$0xff] %v10785_v17  ;;  %v12793_v32 = vld [vmem:[#allocation83_spill] sm:$0xff]  ;;  %v4262_v62 = vadd.f32 %v10589_v30, %v10785_v17 }
 0xb60   : > { %5619 = vadd.xlane.f32.xlu1 %v5527_v58  ;;  %v4294_v25 = vadd.f32 %v12793_v32, %v4205_v16  ;;  %v12795_v58 = vld [vmem:[#allocation15_spill] sm:$0xff]  ;;  %v10797_v32 = vor.u32 %v7162_v12, %v6937_v6  ;;  %v6951_v6 = vld [vmem:[#allocation3 + $0x1fc] sm:$0xf0]  ;;  %v10805_v12 = vpop.permute.xlu0 %3761 }
 0xb61   : > { %5254 = vmatpush.bf16.msra.mxu1 %v10451_v0  ;;  %v4471_v36 = vpop.f32.mrf.mxu0  ;;  %v12799_v17 = vld [vmem:[#allocation87_spill] sm:$0xff]  ;;  %12800 = vst [vmem:[#allocation11_spill] sm:$0xff] %v10805_v12 }
 0xb62   : > { %v4350_v34 = vpop.f32.mrf.mxu2  ;;  %v4437_v41 = vpop.f32.mrf.mxu3  ;;  %v4383_v28 = vadd.f32 %v12797_v31, %v4294_v25  ;;  %12798 = vst [vmem:[#allocation63_spill] sm:$0xff] %v10797_v32  ;;  %v7164_v25 = vld [vmem:[#allocation3 + $0x1ec] sm:$0xf] }
 0xb63   : > { %v10783_v0 = vadd.f32 %v4437_v41, %v4349_v4  ;;  %v4557_v56 = vpop.f32.mrf.mxu1  ;;  %v4351_v16 = vadd.f32 %v4350_v34, %v4262_v62  ;;  %v4265_v4 = vadd.f32 %v10621_v38, %v10789_v49  ;;  %v12802_v38 = vld [vmem:[#allocation47_spill] sm:$0xff]  ;;  %v12803_v62 = vld [vmem:[#allocation92_spill] sm:$0xff] }
 0xb64   : > { %v4558_v60 = vadd.f32 %v4557_v56, %v4469_v3  ;;  %4510 = vmatmul.bf16.gmra.mxu0 %v10780_v1  ;;  %v4472_v41 = vadd.f32 %v4471_v36, %v4383_v28  ;;  %v4210_v36 = vadd.f32 %v12802_v38, %v10526_v18  ;;  %v10811_v28 = vor.u32 %v7164_v25, %v6951_v6  ;;  %v12806_v6 = vld [vmem:[#allocation25_spill] sm:$0xff]  ;;  %v12807_v38 = vld [vmem:[#allocation96_spill] sm:$0xff] }
 0xb65   : > { %5255 = vmatpush.bf16.msra.mxu1 %v10473_v55  ;;  %v12796_v55 = vld [vmem:[#allocation44_spill] sm:$0xff] }
 0xb66   : > { %v5530_v2 = vmax.f32 %v4558_v60, 0.0  ;;  %v4207_v63 = vadd.f32 %v12796_v55, %v10541_v57  ;;  %12804 = vst [vmem:[#allocation119_spill] sm:$0xff] %v10811_v28 }
 0xb67   : > { %4668 = vmatmul.bf16.gmra.mxu2 %v12795_v58 }
 0xb68   : > { %5621 = vadd.xlane.f32.xlu2 %v5530_v2  ;;  %v4296_v8 = vadd.f32 %v12799_v17, %v4207_v63  ;;  %v12801_v2 = vld [vmem:[#allocation49_spill] sm:$0xff]  ;;  %v4267_v17 = vadd.f32 %v10653_v51, %v10805_v12 }
 0xb69   : > { %v4473_v3 = vpop.f32.mrf.mxu0 }
 0xb6a   : > { %v4353_v56 = vpop.f32.mrf.mxu2  ;;  %v4439_v60 = vpop.f32.mrf.mxu3  ;;  %v4385_v31 = vadd.f32 %v12803_v62, %v4296_v8  ;;  %v6957_v8 = vld [vmem:[#allocation3 + $0x1f0] sm:$0xf] }
 0xb6b   : > { %v4354_v1 = vadd.f32 %v4353_v56, %v4265_v4  ;;  %v10801_v30 = vadd.f32 %v4439_v60, %v4351_v16  ;;  %v4560_v58 = vpop.f32.mrf.mxu1 }
 0xb6c   : > { %v4561_v55 = vadd.f32 %v4560_v58, %v4472_v41  ;;  %4599 = vmatmul.bf16.gmra.mxu1 %v10797_v32  ;;  %v4474_v63 = vadd.f32 %v4473_v3, %v4385_v31 }
 0xb6e   : > { %v5533_v34 = vmax.f32 %v4561_v55, 0.0  ;;  %v12805_v55 = vld [vmem:[#allocation91_spill] sm:$0xff] }
 0xb6f   : > { %4757 = vmatmul.bf16.gmra.mxu3 %v12801_v2  ;;  %v4299_v2 = vadd.f32 %v12805_v55, %v4210_v36  ;;  %v12809_v55 = vld [vmem:[#allocation53_spill] sm:$0xff] }
 0xb70   : > { %5623 = vadd.xlane.f32.xlu0 %v5533_v34  ;;  %v7167_v34 = vld [vmem:[#allocation3 + $0x200] sm:$0xf0] }
 0xb71   : > { %v4476_v58 = vpop.f32.mrf.mxu0  ;;  %v4388_v51 = vadd.f32 %v12807_v38, %v4299_v2  ;;  %v10821_v3 = vor.u32 %v7167_v34, %v6957_v8  ;;  %v12810_v2 = vld [vmem:[#allocation51_spill] sm:$0xff] }
 0xb72   : > { %v4355_v16 = vpop.f32.mrf.mxu2  ;;  %v4442_v4 = vpop.f32.mrf.mxu3 }
 0xb73   : > { %v4356_v41 = vadd.f32 %v4355_v16, %v4267_v17  ;;  %v10815_v56 = vadd.f32 %v4442_v4, %v4354_v1  ;;  %v4562_v60 = vpop.f32.mrf.mxu1  ;;  %12808 = vst [vmem:[#allocation81_spill] sm:$0xff] %v10821_v3  ;;  %v4477_v31 = vadd.f32 %v4476_v58, %v4388_v51  ;;  %v7169_v4 = vld [vmem:[#allocation3 + $0x214] sm:$0xf] }
 0xb74   : > { %v4563_v32 = vadd.f32 %v4562_v60, %v4474_v63  ;;  %4515 = vmatmul.bf16.gmra.mxu0 %v10811_v28  ;;  %v6971_v60 = vld [vmem:[#allocation3 + $0x224] sm:$0xf0] }
 0xb75   : > { %v10829_v8 = vor.u32 %v7169_v4, %v6971_v60  ;;  %v12813_v4 = vld [vmem:[#allocation21_spill] sm:$0xff]  ;;  %v12814_v60 = vld [vmem:[#allocation107_spill] sm:$0xff] }
 0xb76   : > { %v5536_v25 = vmax.f32 %v4563_v32, 0.0 }
 0xb77   : > { %4673 = vmatmul.bf16.gmra.mxu2 %v12806_v6  ;;  %12811 = vst [vmem:[#allocation62_spill] sm:$0xff] %v10829_v8 }
 0xb78   : > { %5625 = vadd.xlane.f32.xlu1 %v5536_v25  ;;  %v4215_v25 = vadd.f32 %v12810_v2, %v10568_v42  ;;  %v7172_v2 = vld [vmem:[#allocation3 + $0x228] sm:$0xf0] }
 0xb79   : > { %v4478_v62 = vpop.f32.mrf.mxu0 }
 0xb7a   : > { %v4444_v1 = vpop.f32.mrf.mxu3  ;;  %v4634_v17 = vpop.f32.mrf.mxu2 }
 0xb7b   : > { %v10823_v16 = vadd.f32 %v4444_v1, %v4356_v41  ;;  %v4565_v36 = vpop.f32.mrf.mxu1  ;;  %v4635_v58 = vadd.f32 %v4634_v17, %v10430_v45  ;;  %v4479_v41 = vadd.f32 %v4478_v62, %v10519_v33 }
 0xb7c   : > { %v4566_v63 = vadd.f32 %v4565_v36, %v4477_v31  ;;  %4604 = vmatmul.bf16.gmra.mxu1 %v10821_v3  ;;  %v12812_v36 = vld [vmem:[#allocation102_spill] sm:$0xff] }
 0xb7e   : > { %v5539_v32 = vmax.f32 %v4566_v63, 0.0  ;;  %v4304_v63 = vadd.f32 %v12812_v36, %v4215_v25  ;;  %v6991_v36 = vld [vmem:[#allocation3 + $0x24c] sm:$0xf0] }
 0xb7f   : > { %4762 = vmatmul.bf16.gmra.mxu3 %v12809_v55  ;;  %v6977_v55 = vld [vmem:[#allocation3 + $0x218] sm:$0xf] }
 0xb80   : > { %5627 = vadd.xlane.f32.xlu2 %v5539_v32  ;;  %v4393_v17 = vadd.f32 %v12814_v60, %v4304_v63  ;;  %v10839_v45 = vor.u32 %v7172_v2, %v6977_v55 }
 0xb81   : > { %v4481_v34 = vpop.f32.mrf.mxu0 }
 0xb82   : > { %v4636_v38 = vpop.f32.mrf.mxu2  ;;  %v4723_v51 = vpop.f32.mrf.mxu3 }
 0xb83   : > { %v4567_v31 = vpop.f32.mrf.mxu1  ;;  %v10833_v1 = vadd.f32 %v4723_v51, %v4635_v58  ;;  %v4637_v33 = vadd.f32 %v4636_v38, %v10491_v15  ;;  %v4482_v58 = vadd.f32 %v4481_v34, %v4393_v17  ;;  %v12817_v15 = vld [vmem:[#allocation70_spill] sm:$0xff] }
 0xb84   : > { %v4568_v3 = vadd.f32 %v4567_v31, %v4479_v41  ;;  %4520 = vmatmul.bf16.gmra.mxu0 %v10829_v8  ;;  %v12815_v8 = vld [vmem:[#allocation60_spill] sm:$0xff] }
 0xb86   : > { %v5542_v32 = vmax.f32 %v4568_v3, 0.0  ;;  %v7174_v3 = vld [vmem:[#allocation3 + $0x23c] sm:$0xf] }
 0xb87   : > { %4678 = vmatmul.bf16.gmra.mxu2 %v12813_v4  ;;  %v10846_v55 = vor.u32 %v7174_v3, %v6991_v36 }
 0xb88   : > { %5629 = vadd.xlane.f32.xlu0 %v5542_v32 }
 0xb89   : > { %v4483_v62 = vpop.f32.mrf.mxu0 }
 0xb8a   : > { %v4639_v51 = vpop.f32.mrf.mxu2  ;;  %v4725_v6 = vpop.f32.mrf.mxu3  ;;  %v4484_v34 = vadd.f32 %v4483_v62, %v10564_v48 }
 0xb8b   : > { %v4570_v25 = vpop.f32.mrf.mxu1  ;;  %v10842_v41 = vadd.f32 %v4725_v6, %v4637_v33  ;;  %v4640_v38 = vadd.f32 %v4639_v51, %v10478_v39  ;;  %v6997_v33 = vld [vmem:[#allocation3 + $0x240] sm:$0xf] }
 0xb8c   : > { %v4571_v31 = vadd.f32 %v4570_v25, %v4482_v58  ;;  %4609 = vmatmul.bf16.gmra.mxu1 %v10839_v45  ;;  %v7177_v58 = vld [vmem:[#allocation3 + $0x250] sm:$0xf0] }
 0xb8e   : > { %v5545_v4 = vmax.f32 %v4571_v31, 0.0  ;;  %v12816_v31 = vld [vmem:[#allocation33_spill] sm:$0xff] }
 0xb8f   : > { %4767 = vmatmul.bf16.gmra.mxu3 %v12815_v8 }
 0xb90   : > { %5631 = vadd.xlane.f32.xlu1 %v5545_v4  ;;  %v10854_v4 = vor.u32 %v7177_v58, %v6997_v33 }
 0xb91   : > { %v4486_v63 = vpop.f32.mrf.mxu0 }
 0xb92   : > { %v4641_v2 = vpop.f32.mrf.mxu2  ;;  %v4728_v32 = vpop.f32.mrf.mxu3  ;;  %v4487_v48 = vadd.f32 %v4486_v63, %v10539_v24 }
 0xb93   : > { %v4572_v6 = vpop.f32.mrf.mxu1  ;;  %v10850_v60 = vadd.f32 %v4728_v32, %v4640_v38  ;;  %v4642_v51 = vadd.f32 %v4641_v2, %v12766_v13 }
 0xb94   : > { %v4573_v17 = vadd.f32 %v4572_v6, %v4484_v34  ;;  %4525 = vmatmul.bf16.gmra.mxu0 %v10846_v55  ;;  %v7179_v6 = vld [vmem:[#allocation3 + $0x264] sm:$0xf] }
 0xb96   : > { %v5548_v25 = vmax.f32 %v4573_v17, 0.0  ;;  %v7011_v17 = vld [vmem:[#allocation3 + $0x274] sm:$0xf0] }
 0xb97   : > { %4683 = vmatmul.bf16.gmra.mxu2 %v12816_v31  ;;  %v10862_v33 = vor.u32 %v7179_v6, %v7011_v17 }
 0xb98   : > { %5633 = vadd.xlane.f32.xlu2 %v5548_v25 }
 0xb99   : > { %v4488_v3 = vpop.f32.mrf.mxu0  ;;  %12818 = vst [vmem:[#allocation76_spill] sm:$0xff] %v10862_v33 }
 0xb9a   : > { %v4644_v62 = vpop.f32.mrf.mxu2  ;;  %v4730_v36 = vpop.f32.mrf.mxu3  ;;  %v4489_v24 = vadd.f32 %v4488_v3, %v10612_v50 }
 0xb9b   : > { %v4575_v38 = vpop.f32.mrf.mxu1  ;;  %v10858_v32 = vadd.f32 %v4730_v36, %v4642_v51  ;;  %v4645_v2 = vadd.f32 %v4644_v62, %v10521_v44 }
 0xb9c   : > { %v4576_v34 = vadd.f32 %v4575_v38, %v4487_v48  ;;  %4614 = vmatmul.bf16.gmra.mxu1 %v10854_v4  ;;  %v7017_v38 = vld [vmem:[#allocation3 + $0x268] sm:$0xf] }
 0xb9e   : > { %v5551_v39 = vmax.f32 %v4576_v34, 0.0  ;;  %v7182_v34 = vld [vmem:[#allocation3 + $0x278] sm:$0xf0] }
 0xb9f   : > { %4772 = vmatmul.bf16.gmra.mxu3 %v12817_v15  ;;  %v12819_v15 = vld [vmem:[#allocation42_spill] sm:$0xff] }
 0xba0   : > { %5635 = vadd.xlane.f32.xlu0 %v5551_v39  ;;  %v10870_v39 = vor.u32 %v7182_v34, %v7017_v38 }
 0xba1   : > { %v4491_v58 = vpop.f32.mrf.mxu0 }
 0xba2   : > { %v4646_v63 = vpop.f32.mrf.mxu2  ;;  %v4733_v25 = vpop.f32.mrf.mxu3  ;;  %12820 = vst [vmem:[#allocation117_spill] sm:$0xff] %v10870_v39  ;;  %v4492_v50 = vadd.f32 %v4491_v58, %v10592_v37 }
 0xba3   : > { %v4577_v51 = vpop.f32.mrf.mxu1  ;;  %v10866_v36 = vadd.f32 %v4733_v25, %v4645_v2  ;;  %v4647_v62 = vadd.f32 %v4646_v63, %v10498_v35 }
 0xba4   : > { %v4578_v48 = vadd.f32 %v4577_v51, %v4489_v24  ;;  %4530 = vmatmul.bf16.gmra.mxu0 %v10862_v33 }
 0xba6   : > { %v5554_v13 = vmax.f32 %v4578_v48, 0.0  ;;  %v12821_v48 = vld [vmem:[#allocation80_spill] sm:$0xff] }
 0xba7   : > { %4688 = vmatmul.bf16.gmra.mxu2 %v12819_v15 }
 0xba8   : > { %5637 = vadd.xlane.f32.xlu1 %v5554_v13 }
 0xba9   : > { %v4493_v6 = vpop.f32.mrf.mxu0 }
 0xbaa   : > { %v4649_v3 = vpop.f32.mrf.mxu2  ;;  %v4735_v17 = vpop.f32.mrf.mxu3  ;;  %v4494_v63 = vadd.f32 %v4493_v6, %v10566_v20 }
 0xbab   : > { %v4580_v2 = vpop.f32.mrf.mxu1  ;;  %v10874_v25 = vadd.f32 %v4735_v17, %v4647_v62  ;;  %v4650_v13 = vadd.f32 %v4649_v3, %v12788_v23  ;;  %v12822_v62 = vld [vmem:[#allocation17_spill] sm:$0xff]  ;;  %v12825_v3 = vld [vmem:[#allocation71_spill] sm:$0xff] }
 0xbac   : > { %v4581_v24 = vadd.f32 %v4580_v2, %v4492_v50  ;;  %4619 = vmatmul.bf16.gmra.mxu1 %v10870_v39  ;;  %v12823_v50 = vld [vmem:[#allocation72_spill] sm:$0xff] }
 0xbad   : > { %v12824_v2 = vld [vmem:[#allocation48_spill] sm:$0xff] }
 0xbae   : > { %v5557_v51 = vmax.f32 %v4581_v24, 0.0 }
 0xbaf   : > { %4777 = vmatmul.bf16.gmra.mxu3 %v12821_v48  ;;  %v12828_v48 = vld [vmem:[#allocation89_spill] sm:$0xff] }
 0xbb0   : > { %5639 = vadd.xlane.f32.xlu2 %v5557_v51 }
 0xbb1   : > { %v4496_v38 = vpop.f32.mrf.mxu0 }
 0xbb2   : > { %v4651_v34 = vpop.f32.mrf.mxu2  ;;  %v4738_v35 = vpop.f32.mrf.mxu3  ;;  %v4497_v20 = vadd.f32 %v4496_v38, %v10634_v26 }
 0xbb3   : > { %v4582_v37 = vpop.f32.mrf.mxu1  ;;  %v10880_v58 = vadd.f32 %v4738_v35, %v4650_v13  ;;  %v4652_v24 = vadd.f32 %v4651_v34, %v10541_v57 }
 0xbb4   : > { %v4583_v44 = vadd.f32 %v4582_v37, %v4494_v63  ;;  %4811 = vmatmul.bf16.vlgmr.msra.gmra.mxu0 %v12822_v62  ;;  %v12826_v37 = vld [vmem:[#allocation86_spill] sm:$0xff] }
 0xbb5   : > { %5159 = vmatpush.bf16.msra.mxu0 %v12823_v50  ;;  %v12827_v50 = vld [vmem:[#allocation61_spill] sm:$0xff] }
 0xbb6   : > { %v5560_v17 = vmax.f32 %v4583_v44, 0.0 }
 0xbb7   : > { %4693 = vmatmul.bf16.gmra.mxu2 %v12824_v2 }
 0xbb8   : > { %5641 = vadd.xlane.f32.xlu0 %v5560_v17  ;;  %v12829_v17 = vld [vmem:[#allocation67_spill] sm:$0xff] }
 0xbb9   : > { %5160 = vmatpush.bf16.msra.mxu0 %v12825_v3  ;;  %v4498_v51 = vpop.f32.mrf.mxu0 }
 0xbba   : > { %v4654_v6 = vpop.f32.mrf.mxu2  ;;  %v4740_v23 = vpop.f32.mrf.mxu3  ;;  %v4499_v26 = vadd.f32 %v4498_v51, %v10615_v11 }
 0xbbb   : > { %v4585_v35 = vpop.f32.mrf.mxu1  ;;  %v10888_v13 = vadd.f32 %v4740_v23, %v4652_v24  ;;  %v4655_v34 = vadd.f32 %v4654_v6, %v10526_v18  ;;  %v12833_v6 = vld [vmem:[#allocation129_spill] sm:$0xff] }
 0xbbc   : > { %v4586_v63 = vadd.f32 %v4585_v35, %v4497_v20  ;;  %4900 = vmatmul.bf16.vlgmr.msrb.gmra.mxu1 %v12826_v37  ;;  %v12830_v35 = vld [vmem:[#allocation13_spill] sm:$0xff]  ;;  %v12837_v37 = vld [vmem:[#allocation98_spill] sm:$0xff] }
 0xbbd   : > { %5161 = vmatpush.bf16.msra.mxu0 %v12827_v50  ;;  %v12831_v50 = vld [vmem:[#allocation66_spill] sm:$0xff] }
 0xbbe   : > { %v5563_v44 = vmax.f32 %v4586_v63, 0.0 }
 0xbbf   : > { %4782 = vmatmul.bf16.gmra.mxu3 %v12828_v48  ;;  %v12832_v48 = vld [vmem:[#allocation52_spill] sm:$0xff] }
 0xbc0   : > { %5643 = vadd.xlane.f32.xlu1 %v5563_v44 }
 0xbc1   : > { %5162 = vmatpush.bf16.msra.mxu0 %v12829_v17  ;;  %v4501_v3 = vpop.f32.mrf.mxu0  ;;  %v12834_v17 = vld [vmem:[#allocation57_spill] sm:$0xff] }
 0xbc2   : > { %v4656_v38 = vpop.f32.mrf.mxu2  ;;  %v4743_v57 = vpop.f32.mrf.mxu3  ;;  %v4502_v11 = vadd.f32 %v4501_v3, %v10594_v46 }
 0xbc3   : > { %v4587_v23 = vpop.f32.mrf.mxu1  ;;  %v10896_v24 = vadd.f32 %v4743_v57, %v4655_v34  ;;  %v4657_v44 = vadd.f32 %v4656_v38, %v12833_v6 }
 0xbc4   : > { %v4588_v20 = vadd.f32 %v4587_v23, %v4499_v26  ;;  %4816 = vmatmul.bf16.gmra.mxu0 %v12830_v35  ;;  %v12835_v23 = vld [vmem:[#allocation95_spill] sm:$0xff] }
 0xbc5   : > { %5163 = vmatpush.bf16.msra.mxu0 %v12831_v50  ;;  %v12836_v50 = vld [vmem:[#allocation77_spill] sm:$0xff] }
 0xbc6   : > { %v5566_v63 = vmax.f32 %v4588_v20, 0.0 }
 0xbc7   : > { %4698 = vmatmul.bf16.gmra.mxu2 %v12832_v48 }
 0xbc8   : > { %5645 = vadd.xlane.f32.xlu2 %v5566_v63  ;;  %v12838_v63 = vld [vmem:[#allocation85_spill] sm:$0xff] }
 0xbc9   : > { %5164 = vmatpush.bf16.msra.mxu0 %v12834_v17  ;;  %v4503_v18 = vpop.f32.mrf.mxu0 }
 0xbca   : > { %v4659_v51 = vpop.f32.mrf.mxu2  ;;  %v4745_v8 = vpop.f32.mrf.mxu3  ;;  %v4504_v46 = vadd.f32 %v4503_v18, %v10664_v52 }
 0xbcb   : > { %v4590_v57 = vpop.f32.mrf.mxu1  ;;  %v10904_v34 = vadd.f32 %v4745_v8, %v4657_v44  ;;  %v4660_v38 = vadd.f32 %v4659_v51, %v10568_v42 }
 0xbcc   : > { %v4591_v26 = vadd.f32 %v4590_v57, %v4502_v11  ;;  %4905 = vmatmul.bf16.gmra.mxu1 %v12835_v23  ;;  %v12839_v57 = vld [vmem:[#allocation19_spill] sm:$0xff] }
 0xbcd   : > { %5165 = vmatpush.bf16.msra.mxu0 %v12836_v50 }
 0xbce   : > { %v5569_v20 = vmax.f32 %v4591_v26, 0.0  ;;  %v12840_v26 = vld [vmem:[#allocation56_spill] sm:$0xff] }
 0xbcf   : > { %4787 = vmatmul.bf16.gmra.mxu3 %v12837_v37 }
 0xbd0   : > { %5647 = vadd.xlane.f32.xlu0 %v5569_v20 }
 0xbd1   : > { %5166 = vmatpush.bf16.msra.mxu0 %v12838_v63  ;;  %v4506_v17 = vpop.f32.mrf.mxu0 }
 0xbd2   : > { %v4661_v3 = vpop.f32.mrf.mxu2  ;;  %v4748_v6 = vpop.f32.mrf.mxu3  ;;  %v4507_v63 = vadd.f32 %v4506_v17, %v10671_v53 }
 0xbd3   : > { %v4592_v8 = vpop.f32.mrf.mxu1  ;;  %v10912_v44 = vadd.f32 %v4748_v6, %v4660_v38  ;;  %v4662_v20 = vadd.f32 %v4661_v3, %v10546_v21  ;;  %v12841_v6 = vld [vmem:[#allocation106_spill] sm:$0xff] }
 0xbd4   : > { %v4593_v11 = vadd.f32 %v4592_v8, %v4504_v46  ;;  %4821 = vmatmul.bf16.gmra.mxu0 %v12839_v57  ;;  %v12842_v46 = vld [vmem:[#allocation108_spill] sm:$0xff] }
 0xbd6   : > { %v5572_v50 = vmax.f32 %v4593_v11, 0.0 }
 0xbd7   : > { %4703 = vmatmul.bf16.gmra.mxu2 %v12840_v26 }
 0xbd8   : > { %5649 = vadd.xlane.f32.xlu1 %v5572_v50 }
 0xbd9   : > { %v4508_v51 = vpop.f32.mrf.mxu0 }
 0xbda   : > { %v4664_v42 = vpop.f32.mrf.mxu2  ;;  %v4750_v37 = vpop.f32.mrf.mxu3  ;;  %v4509_v3 = vadd.f32 %v4508_v51, %v10631_v22 }
 0xbdb   : > { %v4595_v18 = vpop.f32.mrf.mxu1  ;;  %v10918_v52 = vadd.f32 %v4750_v37, %v4662_v20  ;;  %v4665_v8 = vadd.f32 %v4664_v42, %v10524_v54  ;;  %v12843_v37 = vld [vmem:[#allocation24_spill] sm:$0xff] }
 0xbdc   : > { %v4596_v23 = vadd.f32 %v4595_v18, %v4507_v63  ;;  %4910 = vmatmul.bf16.gmra.mxu1 %v12841_v6  ;;  %v12844_v63 = vld [vmem:[#allocation65_spill] sm:$0xff] }
 0xbde   : > { %v5575_v38 = vmax.f32 %v4596_v23, 0.0 }
 0xbdf   : > { %4792 = vmatmul.bf16.gmra.mxu3 %v12842_v46 }
 0xbe0   : > { %5651 = vadd.xlane.f32.xlu2 %v5575_v38 }
 0xbe1   : > { %v4511_v11 = vpop.f32.mrf.mxu0 }
 0xbe2   : > { %v4666_v50 = vpop.f32.mrf.mxu2  ;;  %v4753_v21 = vpop.f32.mrf.mxu3  ;;  %v4512_v42 = vadd.f32 %v4511_v11, %v10699_v40 }
 0xbe3   : > { %v4597_v53 = vpop.f32.mrf.mxu1  ;;  %v10924_v17 = vadd.f32 %v4753_v21, %v4665_v8  ;;  %v4667_v23 = vadd.f32 %v4666_v50, %v10596_v61  ;;  %v12845_v21 = vld [vmem:[#allocation114_spill] sm:$0xff] }
 0xbe4   : > { %v4598_v39 = vadd.f32 %v4597_v53, %v4509_v3  ;;  %4826 = vmatmul.bf16.gmra.mxu0 %v12843_v37  ;;  %v12846_v3 = vld [vmem:[#allocation116_spill] sm:$0xff] }
 0xbe6   : > { %v5578_v20 = vmax.f32 %v4598_v39, 0.0 }
 0xbe7   : > { %4708 = vmatmul.bf16.gmra.mxu2 %v12844_v63 }
 0xbe8   : > { %5653 = vadd.xlane.f32.xlu0 %v5578_v20 }
 0xbe9   : > { %v4513_v18 = vpop.f32.mrf.mxu0 }
 0xbea   : > { %v4669_v38 = vpop.f32.mrf.mxu2  ;;  %v4755_v54 = vpop.f32.mrf.mxu3  ;;  %v4514_v50 = vadd.f32 %v4513_v18, %v10701_v5 }
 0xbeb   : > { %v4600_v22 = vpop.f32.mrf.mxu1  ;;  %v10930_v51 = vadd.f32 %v4755_v54, %v4667_v23  ;;  %v4670_v39 = vadd.f32 %v4669_v38, %v10573_v59  ;;  %v12847_v54 = vld [vmem:[#allocation12_spill] sm:$0xff] }
 0xbec   : > { %v4601_v46 = vadd.f32 %v4600_v22, %v4512_v42  ;;  %4915 = vmatmul.bf16.gmra.mxu1 %v12845_v21  ;;  %v12848_v42 = vld [vmem:[#allocation90_spill] sm:$0xff] }
 0xbee   : > { %v5581_v8 = vmax.f32 %v4601_v46, 0.0 }
 0xbef   : > { %4797 = vmatmul.bf16.gmra.mxu3 %v12846_v3 }
 0xbf0   : > { %5655 = vadd.xlane.f32.xlu1 %v5581_v8 }
 0xbf1   : > { %v4516_v53 = vpop.f32.mrf.mxu0 }
 0xbf2   : > { %v4671_v20 = vpop.f32.mrf.mxu2  ;;  %v4758_v61 = vpop.f32.mrf.mxu3  ;;  %v4517_v38 = vadd.f32 %v4516_v53, %v10717_v47 }
 0xbf3   : > { %v4602_v40 = vpop.f32.mrf.mxu1  ;;  %v10936_v11 = vadd.f32 %v4758_v61, %v4670_v39  ;;  %v4672_v46 = vadd.f32 %v4671_v20, %v10544_v19  ;;  %v12849_v61 = vld [vmem:[#allocation124_spill] sm:$0xff] }
 0xbf4   : > { %v4603_v6 = vadd.f32 %v4602_v40, %v4514_v50  ;;  %4831 = vmatmul.bf16.gmra.mxu0 %v12847_v54  ;;  %v12850_v50 = vld [vmem:[#allocation10_spill] sm:$0xff] }
 0xbf6   : > { %v5584_v23 = vmax.f32 %v4603_v6, 0.0  ;;  %v12851_v6 = vld [vmem:[#allocation148_spill] sm:$0xff] }
 0xbf7   : > { %4989 = vmatmul.bf16.vlgmr.msra.gmra.mxu2 %v12848_v42 }
 0xbf8   : > { %5657 = vadd.xlane.f32.xlu2 %v5584_v23 }
 0xbf9   : > { %v4518_v22 = vpop.f32.mrf.mxu0 }
 0xbfa   : > { %v4674_v8 = vpop.f32.mrf.mxu2  ;;  %v4760_v59 = vpop.f32.mrf.mxu3  ;;  %v4519_v20 = vadd.f32 %v4518_v22, %v10735_v10 }
 0xbfb   : > { %v4605_v5 = vpop.f32.mrf.mxu1  ;;  %v10942_v18 = vadd.f32 %v4760_v59, %v4672_v46  ;;  %v4675_v40 = vadd.f32 %v4674_v8, %v12851_v6  ;;  %v12852_v59 = vld [vmem:[#allocation40_spill] sm:$0xff] }
 0xbfc   : > { %v4606_v3 = vadd.f32 %v4605_v5, %v4517_v38  ;;  %4920 = vmatmul.bf16.gmra.mxu1 %v12849_v61  ;;  %v12853_v38 = vld [vmem:[#allocation101_spill] sm:$0xff] }
 0xbfe   : > { %v5587_v39 = vmax.f32 %v4606_v3, 0.0  ;;  %v12854_v3 = vld [vmem:[#allocation145_spill] sm:$0xff] }
 0xbff   : > { %5078 = vmatmul.bf16.vlgmr.msrb.gmra.mxu3 %v12850_v50 }
 0xc00   : > { %5659 = vadd.xlane.f32.xlu0 %v5587_v39 }
 0xc01   : > { %v4521_v23 = vpop.f32.mrf.mxu0 }
 0xc02   : > { %v4676_v19 = vpop.f32.mrf.mxu2  ;;  %v4763_v21 = vpop.f32.mrf.mxu3  ;;  %v4522_v8 = vadd.f32 %v4521_v23, %v10751_v7 }
 0xc03   : > { %v4607_v47 = vpop.f32.mrf.mxu1  ;;  %v10948_v53 = vadd.f32 %v4763_v21, %v4675_v40  ;;  %v4677_v5 = vadd.f32 %v4676_v19, %v12854_v3  ;;  %v12856_v21 = vld [vmem:[#allocation131_spill] sm:$0xff] }
 0xc04   : > { %v4608_v42 = vadd.f32 %v4607_v47, %v4519_v20  ;;  %4836 = vmatmul.bf16.gmra.mxu0 %v12852_v59  ;;  %v12857_v20 = vld [vmem:[#allocation27_spill] sm:$0xff] }
 0xc06   : > { %v5590_v46 = vmax.f32 %v4608_v42, 0.0  ;;  %v12858_v42 = vld [vmem:[#allocation141_spill] sm:$0xff] }
 0xc07   : > { %4994 = vmatmul.bf16.gmra.mxu2 %v12853_v38 }
 0xc08   : > { %5661 = vadd.xlane.f32.xlu1 %v5590_v46 }
 0xc09   : > { %v4523_v39 = vpop.f32.mrf.mxu0 }
 0xc0a   : > { %v4679_v50 = vpop.f32.mrf.mxu2  ;;  %v4765_v6 = vpop.f32.mrf.mxu3  ;;  %v4524_v19 = vadd.f32 %v4523_v39, %v10767_v9 }
 0xc0b   : > { %v4610_v10 = vpop.f32.mrf.mxu1  ;;  %v10954_v22 = vadd.f32 %v4765_v6, %v4677_v5  ;;  %v4680_v47 = vadd.f32 %v4679_v50, %v12858_v42  ;;  %v12860_v6 = vld [vmem:[#allocation46_spill] sm:$0xff] }
 0xc0c   : > { %v4611_v61 = vadd.f32 %v4610_v10, %v4522_v8  ;;  %4925 = vmatmul.bf16.gmra.mxu1 %v12856_v21  ;;  %v12861_v8 = vld [vmem:[#allocation111_spill] sm:$0xff] }
 0xc0d   : > { %12855 = vst [vmem:[#allocation26_spill] sm:$0xff] %v10954_v22 }
 0xc0e   : > { %v5593_v40 = vmax.f32 %v4611_v61, 0.0  ;;  %v12862_v61 = vld [vmem:[#allocation150_spill] sm:$0xff] }
 0xc0f   : > { %5083 = vmatmul.bf16.gmra.mxu3 %v12857_v20 }
 0xc10   : > { %5663 = vadd.xlane.f32.xlu2 %v5593_v40 }
 0xc11   : > { %v4526_v46 = vpop.f32.mrf.mxu0 }
 0xc12   : > { %v4681_v3 = vpop.f32.mrf.mxu2  ;;  %v4768_v38 = vpop.f32.mrf.mxu3  ;;  %v4527_v50 = vadd.f32 %v4526_v46, %v10783_v0 }
 0xc13   : > { %v4612_v7 = vpop.f32.mrf.mxu1  ;;  %v10960_v23 = vadd.f32 %v4768_v38, %v4680_v47  ;;  %v4682_v10 = vadd.f32 %v4681_v3, %v12862_v61  ;;  %v12864_v38 = vld [vmem:[#allocation139_spill] sm:$0xff] }
 0xc14   : > { %v4613_v59 = vadd.f32 %v4612_v7, %v4524_v19  ;;  %4841 = vmatmul.bf16.gmra.mxu0 %v12860_v6  ;;  %v12865_v19 = vld [vmem:[#allocation34_spill] sm:$0xff] }
 0xc15   : > { %12859 = vst [vmem:[#allocation69_spill] sm:$0xff] %v10960_v23 }
 0xc16   : > { %v5596_v5 = vmax.f32 %v4613_v59, 0.0  ;;  %v12866_v59 = vld [vmem:[#allocation151_spill] sm:$0xff] }
 0xc17   : > { %4999 = vmatmul.bf16.gmra.mxu2 %v12861_v8 }
 0xc18   : > { %5665 = vadd.xlane.f32.xlu0 %v5596_v5 }
 0xc19   : > { %v4528_v40 = vpop.f32.mrf.mxu0 }
 0xc1a   : > { %v4684_v20 = vpop.f32.mrf.mxu2  ;;  %v4770_v42 = vpop.f32.mrf.mxu3  ;;  %v4529_v3 = vadd.f32 %v4528_v40, %v10801_v30 }
 0xc1b   : > { %v4615_v9 = vpop.f32.mrf.mxu1  ;;  %v10966_v39 = vadd.f32 %v4770_v42, %v4682_v10  ;;  %v4685_v7 = vadd.f32 %v4684_v20, %v12866_v59  ;;  %v12868_v42 = vld [vmem:[#allocation50_spill] sm:$0xff] }
 0xc1c   : > { %v4616_v21 = vadd.f32 %v4615_v9, %v4527_v50  ;;  %4930 = vmatmul.bf16.gmra.mxu1 %v12864_v38  ;;  %v12869_v50 = vld [vmem:[#allocation120_spill] sm:$0xff] }
 0xc1d   : > { %12863 = vst [vmem:[#allocation94_spill] sm:$0xff] %v10966_v39 }
 0xc1e   : > { %v5599_v47 = vmax.f32 %v4616_v21, 0.0  ;;  %v12870_v21 = vld [vmem:[#allocation147_spill] sm:$0xff] }
 0xc1f   : > { %5088 = vmatmul.bf16.gmra.mxu3 %v12865_v19 }
 0xc20   : > { %5667 = vadd.xlane.f32.xlu1 %v5599_v47 }
 0xc21   : > { %v4531_v5 = vpop.f32.mrf.mxu0 }
 0xc22   : > { %v4686_v61 = vpop.f32.mrf.mxu2  ;;  %v4773_v8 = vpop.f32.mrf.mxu3  ;;  %v4532_v20 = vadd.f32 %v4531_v5, %v10815_v56 }
 0xc23   : > { %v4617_v0 = vpop.f32.mrf.mxu1  ;;  %v10972_v46 = vadd.f32 %v4773_v8, %v4685_v7  ;;  %v4687_v9 = vadd.f32 %v4686_v61, %v12870_v21  ;;  %v12872_v8 = vld [vmem:[#allocation146_spill] sm:$0xff] }
 0xc24   : > { %v4618_v6 = vadd.f32 %v4617_v0, %v4529_v3  ;;  %4846 = vmatmul.bf16.gmra.mxu0 %v12868_v42  ;;  %v12873_v3 = vld [vmem:[#allocation35_spill] sm:$0xff] }
 0xc25   : > { %12867 = vst [vmem:[#allocation68_spill] sm:$0xff] %v10972_v46 }
 0xc26   : > { %v5602_v10 = vmax.f32 %v4618_v6, 0.0  ;;  %v12874_v6 = vld [vmem:[#allocation100_spill] sm:$0xff] }
 0xc27   : > { %5004 = vmatmul.bf16.gmra.mxu2 %v12869_v50 }
 0xc28   : > { %5669 = vadd.xlane.f32.xlu2 %v5602_v10 }
 0xc29   : > { %v4533_v47 = vpop.f32.mrf.mxu0 }
 0xc2a   : > { %v4689_v19 = vpop.f32.mrf.mxu2  ;;  %v4775_v59 = vpop.f32.mrf.mxu3  ;;  %v4534_v61 = vadd.f32 %v4533_v47, %v10823_v16  ;;  %v12879_v47 = vld [vmem:[#allocation97_spill] sm:$0xff] }
 0xc2b   : > { %v4620_v30 = vpop.f32.mrf.mxu1  ;;  %v10978_v40 = vadd.f32 %v4775_v59, %v4687_v9  ;;  %v4690_v0 = vadd.f32 %v4689_v19, %v12874_v6  ;;  %v12876_v9 = vld [vmem:[#allocation55_spill] sm:$0xff] }
 0xc2c   : > { %v4621_v38 = vadd.f32 %v4620_v30, %v4532_v20  ;;  %4935 = vmatmul.bf16.gmra.mxu1 %v12872_v8  ;;  %v12877_v30 = vld [vmem:[#allocation127_spill] sm:$0xff] }
 0xc2d   : > { %12871 = vst [vmem:[#allocation99_spill] sm:$0xff] %v10978_v40  ;;  %v12883_v8 = vld [vmem:[#allocation135_spill] sm:$0xff] }
 0xc2e   : > { %v5605_v7 = vmax.f32 %v4621_v38, 0.0 }
 0xc2f   : > { %5093 = vmatmul.bf16.gmra.mxu3 %v12873_v3 }
 0xc30   : > { %5671 = vadd.xlane.f32.xlu0 %v5605_v7 }
 0xc31   : > { %v10983_v10 = vpop.f32.mrf.mxu0 }
 0xc32   : > { %v4691_v21 = vpop.f32.mrf.mxu2  ;;  %v4778_v56 = vpop.f32.mrf.mxu3 }
 0xc33   : > { %v4622_v5 = vpop.f32.mrf.mxu1  ;;  %v10986_v50 = vadd.f32 %v4778_v56, %v4690_v0  ;;  %v4692_v38 = vadd.f32 %v4691_v21, %v10681_v14  ;;  %v12880_v0 = vld [vmem:[#allocation22_spill] sm:$0xff]  ;;  %v12882_v14 = vld [vmem:[#allocation64_spill] sm:$0xff] }
 0xc34   : > { %v4623_v59 = vadd.f32 %v4622_v5, %v4534_v61  ;;  %4851 = vmatmul.bf16.gmra.mxu0 %v12876_v9 }
 0xc35   : > { %12875 = vst [vmem:[#allocation20_spill] sm:$0xff] %v10986_v50 }
 0xc36   : > { %v5608_v20 = vmax.f32 %v4623_v59, 0.0 }
 0xc37   : > { %5009 = vmatmul.bf16.gmra.mxu2 %v12877_v30 }
 0xc38   : > { %5673 = vadd.xlane.f32.xlu1 %v5608_v20 }
 0xc39   : > { %v10991_v7 = vpop.f32.mrf.mxu0 }
 0xc3a   : > { %v4694_v19 = vpop.f32.mrf.mxu2  ;;  %v4780_v3 = vpop.f32.mrf.mxu3 }
 0xc3b   : > { %v10993_v6 = vadd.f32 %v4780_v3, %v4692_v38  ;;  %v4901_v16 = vpop.f32.mrf.mxu1  ;;  %v4695_v61 = vadd.f32 %v4694_v19, %v10692_v43  ;;  %v12884_v38 = vld [vmem:[#allocation36_spill] sm:$0xff]  ;;  %v12886_v43 = vld [vmem:[#allocation29_spill] sm:$0xff] }
 0xc3c   : > { %4940 = vmatmul.bf16.gmra.mxu1 %v12879_v47 }
 0xc3d   : > { %12878 = vst [vmem:[#allocation74_spill] sm:$0xff] %v10993_v6 }
 0xc3f   : > { %5098 = vmatmul.bf16.gmra.mxu3 %v12880_v0 }
 0xc41   : > { %v10998_v56 = vpop.f32.mrf.mxu0 }
 0xc42   : > { %v4696_v5 = vpop.f32.mrf.mxu2  ;;  %v4783_v59 = vpop.f32.mrf.mxu3 }
 0xc43   : > { %v11000_v20 = vadd.f32 %v4783_v59, %v4695_v61  ;;  %v11002_v21 = vpop.f32.mrf.mxu1  ;;  %v4697_v3 = vadd.f32 %v4696_v5, %v12884_v38  ;;  %v12887_v61 = vld [vmem:[#allocation14_spill] sm:$0xff]  ;;  %v12888_v59 = vld [vmem:[#allocation109_spill] sm:$0xff]  ;;  %v12890_v38 = vld [vmem:[#allocation75_spill] sm:$0xff] }
 0xc44   : > { %4856 = vmatmul.bf16.gmra.mxu0 %v12882_v14 }
 0xc45   : > { %12881 = vst [vmem:[#allocation104_spill] sm:$0xff] %v11000_v20 }
 0xc47   : > { %5014 = vmatmul.bf16.gmra.mxu2 %v12883_v8 }
 0xc49   : > { %v11007_v30 = vpop.f32.mrf.mxu0 }
 0xc4a   : > { %v4699_v47 = vpop.f32.mrf.mxu2  ;;  %v4785_v0 = vpop.f32.mrf.mxu3 }
 0xc4b   : > { %v11009_v9 = vadd.f32 %v4785_v0, %v4697_v3  ;;  %v11011_v19 = vpop.f32.mrf.mxu1  ;;  %v4700_v20 = vadd.f32 %v4699_v47, %v12888_v59  ;;  %v12891_v3 = vld [vmem:[#allocation143_spill] sm:$0xff] }
 0xc4c   : > { %4945 = vmatmul.bf16.gmra.mxu1 %v12886_v43 }
 0xc4d   : > { %12885 = vst [vmem:[#allocation73_spill] sm:$0xff] %v11009_v9 }
 0xc4f   : > { %5103 = vmatmul.bf16.gmra.mxu3 %v12887_v61 }
 0xc51   : > { %v11016_v6 = vpop.f32.mrf.mxu0 }
 0xc52   : > { %v4701_v14 = vpop.f32.mrf.mxu2  ;;  %v4788_v8 = vpop.f32.mrf.mxu3 }
 0xc53   : > { %v11018_v42 = vadd.f32 %v4788_v8, %v4700_v20  ;;  %v11020_v5 = vpop.f32.mrf.mxu1  ;;  %v4702_v0 = vadd.f32 %v4701_v14, %v10753_v29  ;;  %v12893_v8 = vld [vmem:[#allocation31_spill] sm:$0xff]  ;;  %v12894_v20 = vld [vmem:[#allocation58_spill] sm:$0xff]  ;;  %v12896_v29 = vld [vmem:[#allocation84_spill] sm:$0xff] }
 0xc54   : > { %4861 = vmatmul.bf16.gmra.mxu0 %v12890_v38 }
 0xc55   : > { %12889 = vst [vmem:[#allocation39_spill] sm:$0xff] %v11018_v42 }
 0xc57   : > { %5019 = vmatmul.bf16.gmra.mxu2 %v12891_v3 }
 0xc59   : > { %v11025_v9 = vpop.f32.mrf.mxu0 }
 0xc5a   : > { %v4704_v43 = vpop.f32.mrf.mxu2  ;;  %v4790_v61 = vpop.f32.mrf.mxu3 }
 0xc5b   : > { %v11027_v50 = vadd.f32 %v4790_v61, %v4702_v0  ;;  %v11029_v47 = vpop.f32.mrf.mxu1  ;;  %v4705_v59 = vadd.f32 %v4704_v43, %v12894_v20  ;;  %v12897_v0 = vld [vmem:[#allocation149_spill] sm:$0xff] }
 0xc5c   : > { %4950 = vmatmul.bf16.gmra.mxu1 %v10748_v27  ;;  %v12898_v61 = vld [vmem:[#allocation45_spill] sm:$0xff] }
 0xc5d   : > { %12892 = vst [vmem:[#allocation79_spill] sm:$0xff] %v11027_v50  ;;  %v12900_v20 = vld [vmem:[#allocation113_spill] sm:$0xff] }
 0xc5f   : > { %5108 = vmatmul.bf16.gmra.mxu3 %v12893_v8 }
 0xc61   : > { %v11034_v42 = vpop.f32.mrf.mxu0 }
 0xc62   : > { %v4706_v38 = vpop.f32.mrf.mxu2  ;;  %v4793_v3 = vpop.f32.mrf.mxu3 }
 0xc63   : > { %v11036_v40 = vadd.f32 %v4793_v3, %v4705_v59  ;;  %v11038_v14 = vpop.f32.mrf.mxu1  ;;  %v4707_v50 = vadd.f32 %v4706_v38, %v12898_v61  ;;  %v12901_v59 = vld [vmem:[#allocation15_spill] sm:$0xff]  ;;  %v12902_v61 = vld [vmem:[#allocation93_spill] sm:$0xff] }
 0xc64   : > { %4866 = vmatmul.bf16.gmra.mxu0 %v12896_v29 }
 0xc65   : > { %12895 = vst [vmem:[#allocation78_spill] sm:$0xff] %v11036_v40 }
 0xc67   : > { %5024 = vmatmul.bf16.gmra.mxu2 %v12897_v0 }
 0xc69   : > { %v11043_v46 = vpop.f32.mrf.mxu0 }
 0xc6a   : > { %v4709_v27 = vpop.f32.mrf.mxu2  ;;  %v4795_v8 = vpop.f32.mrf.mxu3 }
 0xc6b   : > { %v11045_v39 = vadd.f32 %v4795_v8, %v4707_v50  ;;  %v11047_v43 = vpop.f32.mrf.mxu1  ;;  %v4710_v3 = vadd.f32 %v4709_v27, %v10789_v49  ;;  %v4813_v50 = vadd.f32 %v10983_v10, %v10833_v1  ;;  %v12903_v8 = vld [vmem:[#allocation54_spill] sm:$0xff]  ;;  %v4815_v1 = vadd.f32 %v10991_v7, %v10842_v41  ;;  %v12904_v10 = vld [vmem:[#allocation25_spill] sm:$0xff]  ;;  %v12906_v7 = vld [vmem:[#allocation59_spill] sm:$0xff] }
 0xc6c   : > { %4955 = vmatmul.bf16.gmra.mxu1 %v12900_v20  ;;  %v4818_v41 = vadd.f32 %v10998_v56, %v10850_v60  ;;  %v4820_v60 = vadd.f32 %v11007_v30, %v10858_v32  ;;  %v12908_v56 = vld [vmem:[#allocation21_spill] sm:$0xff]  ;;  %v4823_v32 = vadd.f32 %v11016_v6, %v10866_v36  ;;  %v12910_v30 = vld [vmem:[#allocation115_spill] sm:$0xff]  ;;  %v4825_v36 = vadd.f32 %v11025_v9, %v10874_v25 }
 0xc6d   : > { %12899 = vst [vmem:[#allocation41_spill] sm:$0xff] %v11045_v39  ;;  %v4902_v20 = vadd.f32 %v4901_v16, %v4813_v50  ;;  %v4828_v25 = vadd.f32 %v11034_v42, %v10880_v58  ;;  %v12912_v9 = vld [vmem:[#allocation63_spill] sm:$0xff]  ;;  %v4830_v58 = vadd.f32 %v11043_v46, %v10888_v13  ;;  %v12914_v46 = vld [vmem:[#allocation81_spill] sm:$0xff] }
 0xc6e   : > { %v4914_v6 = vadd.f32 %v11038_v14, %v4825_v36 }
 0xc6f   : > { %5113 = vmatmul.bf16.gmra.mxu3 %v12901_v59 }
 0xc71   : > { %v11052_v40 = vpop.f32.mrf.mxu0 }
 0xc72   : > { %v4711_v29 = vpop.f32.mrf.mxu2  ;;  %v4798_v0 = vpop.f32.mrf.mxu3  ;;  %v4833_v13 = vadd.f32 %v11052_v40, %v10896_v24 }
 0xc73   : > { %v11054_v23 = vadd.f32 %v4798_v0, %v4710_v3  ;;  %v11056_v38 = vpop.f32.mrf.mxu1  ;;  %v4712_v59 = vadd.f32 %v4711_v29, %v10805_v12  ;;  %v4904_v29 = vadd.f32 %v11002_v21, %v4815_v1  ;;  %v4907_v21 = vadd.f32 %v11011_v19, %v4818_v41 }
 0xc74   : > { %4871 = vmatmul.bf16.gmra.mxu0 %v12902_v61  ;;  %v4909_v19 = vadd.f32 %v11020_v5, %v4820_v60  ;;  %v4912_v5 = vadd.f32 %v11029_v47, %v4823_v32  ;;  %v4919_v42 = vadd.f32 %v11056_v38, %v4830_v58 }
 0xc77   : > { %5029 = vmatmul.bf16.gmra.mxu2 %v12903_v8 }
 0xc79   : > { %v11063_v39 = vpop.f32.mrf.mxu0 }
 0xc7a   : > { %v4800_v27 = vpop.f32.mrf.mxu3  ;;  %v4990_v49 = vpop.f32.mrf.mxu2  ;;  %v4835_v24 = vadd.f32 %v11063_v39, %v10904_v34 }
 0xc7b   : > { %v11065_v22 = vadd.f32 %v4800_v27, %v4712_v59  ;;  %v11067_v0 = vpop.f32.mrf.mxu1  ;;  %v4991_v3 = vadd.f32 %v4990_v49, %v4902_v20  ;;  %v12905_v20 = vld [vmem:[#allocation103_spill] sm:$0xff] }
 0xc7c   : > { %4960 = vmatmul.bf16.gmra.mxu1 %v10811_v28 }
 0xc7d   : > { %v5516_v61 = vmax.f32 %v4991_v3, 0.0 }
 0xc7f   : > { %5118 = vmatmul.bf16.gmra.mxu3 %v12904_v10  ;;  %5778 = vrot.lane.b32.xlu2 %v5516_v61, %s12493_s15 }
 0xc81   : > { %v11075_v16 = vpop.f32.mrf.mxu0 }
 0xc82   : > { %v4992_v50 = vpop.f32.mrf.mxu2  ;;  %v11077_v59 = vpop.f32.mrf.mxu3  ;;  %v4838_v34 = vadd.f32 %v11075_v16, %v10912_v44 }
 0xc83   : > { %v11079_v27 = vpop.f32.mrf.mxu1  ;;  %v4993_v49 = vadd.f32 %v4992_v50, %v4904_v29  ;;  %v12907_v29 = vld [vmem:[#allocation62_spill] sm:$0xff] }
 0xc84   : > { %4876 = vmatmul.bf16.gmra.mxu0 %v12905_v20  ;;  %v4924_v40 = vadd.f32 %v11079_v27, %v4835_v24 }
 0xc85   : > { %v5519_v3 = vmax.f32 %v4993_v49, 0.0 }
 0xc87   : > { %5034 = vmatmul.bf16.gmra.mxu2 %v12906_v7  ;;  %5782 = vrot.lane.b32.xlu1 %v5519_v3, %s12493_s15  ;;  %v12909_v7 = vld [vmem:[#allocation112_spill] sm:$0xff] }
 0xc89   : > { %v11087_v61 = vpop.f32.mrf.mxu0 }
 0xc8a   : > { %v4995_v1 = vpop.f32.mrf.mxu2  ;;  %v11089_v10 = vpop.f32.mrf.mxu3  ;;  %v4840_v44 = vadd.f32 %v11087_v61, %v10918_v52 }
 0xc8b   : > { %v4996_v12 = vadd.f32 %v4995_v1, %v4907_v21  ;;  %v11091_v28 = vpop.f32.mrf.mxu1 }
 0xc8c   : > { %4965 = vmatmul.bf16.gmra.mxu1 %v12907_v29 }
 0xc8d   : > { %v5522_v50 = vmax.f32 %v4996_v12, 0.0 }
 0xc8f   : > { %5123 = vmatmul.bf16.gmra.mxu3 %v12908_v56  ;;  %5786 = vrot.lane.b32.xlu2 %v5522_v50, %s12493_s15 }
 0xc91   : > { %v11099_v49 = vpop.f32.mrf.mxu0 }
 0xc92   : > { %v4997_v3 = vpop.f32.mrf.mxu2  ;;  %v11101_v41 = vpop.f32.mrf.mxu3  ;;  %v4843_v52 = vadd.f32 %v11099_v49, %v10924_v17 }
 0xc93   : > { %v11103_v21 = vpop.f32.mrf.mxu1  ;;  %v4998_v1 = vadd.f32 %v4997_v3, %v4909_v19 }
 0xc94   : > { %4881 = vmatmul.bf16.gmra.mxu0 %v12909_v7 }
 0xc95   : > { %v5525_v12 = vmax.f32 %v4998_v1, 0.0 }
 0xc97   : > { %5039 = vmatmul.bf16.gmra.mxu2 %v12910_v30  ;;  %5790 = vrot.lane.b32.xlu0 %v5525_v12, %s12493_s15 }
 0xc99   : > { %v11111_v50 = vpop.f32.mrf.mxu0 }
 0xc9a   : > { %v5000_v60 = vpop.f32.mrf.mxu2  ;;  %v11113_v56 = vpop.f32.mrf.mxu3  ;;  %v4845_v17 = vadd.f32 %v11111_v50, %v10930_v51  ;;  %v12918_v50 = vld [vmem:[#allocation117_spill] sm:$0xff] }
 0xc9b   : > { %v11115_v29 = vpop.f32.mrf.mxu1  ;;  %v5001_v19 = vadd.f32 %v5000_v60, %v4912_v5  ;;  %v12911_v5 = vld [vmem:[#allocation122_spill] sm:$0xff] }
 0xc9c   : > { %4970 = vmatmul.bf16.gmra.mxu1 %v10846_v55 }
 0xc9d   : > { %v5528_v3 = vmax.f32 %v5001_v19, 0.0 }
 0xc9f   : > { %5128 = vmatmul.bf16.gmra.mxu3 %v12816_v31  ;;  %5794 = vrot.lane.b32.xlu1 %v5528_v3, %s12493_s15  ;;  %v4917_v31 = vadd.f32 %v11047_v43, %v4828_v25 }
 0xca1   : > { %v11123_v47 = vpop.f32.mrf.mxu0 }
 0xca2   : > { %v5002_v1 = vpop.f32.mrf.mxu2  ;;  %v11125_v12 = vpop.f32.mrf.mxu3  ;;  %v4848_v51 = vadd.f32 %v11123_v47, %v10936_v11 }
 0xca3   : > { %v5003_v32 = vadd.f32 %v5002_v1, %v4914_v6  ;;  %v11127_v30 = vpop.f32.mrf.mxu1 }
 0xca4   : > { %4886 = vmatmul.bf16.gmra.mxu0 %v12911_v5 }
 0xca5   : > { %v5531_v60 = vmax.f32 %v5003_v32, 0.0 }
 0xca7   : > { %5044 = vmatmul.bf16.gmra.mxu2 %v12912_v9  ;;  %5798 = vrot.lane.b32.xlu2 %v5531_v60, %s12493_s15 }
 0xca9   : > { %v11135_v14 = vpop.f32.mrf.mxu0 }
 0xcaa   : > { %v5005_v19 = vpop.f32.mrf.mxu2  ;;  %v11137_v3 = vpop.f32.mrf.mxu3  ;;  %v4850_v11 = vadd.f32 %v11135_v14, %v10942_v18  ;;  %v12920_v14 = vld [vmem:[#allocation86_spill] sm:$0xff] }
 0xcab   : > { %v11139_v36 = vpop.f32.mrf.mxu1  ;;  %v5006_v6 = vadd.f32 %v5005_v19, %v4917_v31  ;;  %v12913_v19 = vld [vmem:[#allocation30_spill] sm:$0xff] }
 0xcac   : > { %4975 = vmatmul.bf16.gmra.mxu1 %v10862_v33 }
 0xcad   : > { %v5534_v1 = vmax.f32 %v5006_v6, 0.0 }
 0xcaf   : > { %5133 = vmatmul.bf16.gmra.mxu3 %v12819_v15  ;;  %5802 = vrot.lane.b32.xlu0 %v5534_v1, %s12493_s15  ;;  %v4922_v15 = vadd.f32 %v11067_v0, %v4833_v13 }
 0xcb1   : > { %v11147_v43 = vpop.f32.mrf.mxu0 }
 0xcb2   : > { %v5007_v32 = vpop.f32.mrf.mxu2  ;;  %v11149_v60 = vpop.f32.mrf.mxu3  ;;  %v4853_v18 = vadd.f32 %v11147_v43, %v10948_v53  ;;  %v12922_v43 = vld [vmem:[#allocation90_spill] sm:$0xff] }
 0xcb3   : > { %v11151_v25 = vpop.f32.mrf.mxu1  ;;  %v5008_v31 = vadd.f32 %v5007_v32, %v4919_v42 }
 0xcb4   : > { %5167 = vmatmul.bf16.vlgmr.msra.gmra.mxu0 %v12913_v19  ;;  %v4939_v47 = vadd.f32 %v11151_v25, %v4850_v11 }
 0xcb5   : > { %v5537_v6 = vmax.f32 %v5008_v31, 0.0 }
 0xcb7   : > { %5049 = vmatmul.bf16.gmra.mxu2 %v12914_v46  ;;  %5806 = vrot.lane.b32.xlu1 %v5537_v6, %s12493_s15 }
 0xcb9   : > { %v11159_v38 = vpop.f32.mrf.mxu0 }
 0xcba   : > { %v5010_v1 = vpop.f32.mrf.mxu2  ;;  %v11161_v58 = vpop.f32.mrf.mxu3 }
 0xcbb   : > { %v11163_v33 = vpop.f32.mrf.mxu1  ;;  %v5011_v42 = vadd.f32 %v5010_v1, %v4922_v15  ;;  %v12915_v15 = vld [vmem:[#allocation32_spill] sm:$0xff] }
 0xcbc   : > { %5256 = vmatmul.bf16.vlgmr.msra.gmra.mxu1 %v12822_v62 }
 0xcbd   : > { %v5540_v32 = vmax.f32 %v5011_v42, 0.0 }
 0xcbf   : > { %5138 = vmatmul.bf16.gmra.mxu3 %v12824_v2  ;;  %5810 = vrot.lane.b32.xlu2 %v5540_v32, %s12493_s15  ;;  %v4927_v2 = vadd.f32 %v11091_v28, %v4838_v34  ;;  %v4929_v28 = vadd.f32 %v11103_v21, %v4840_v44 }
 0xcc1   : > { %v11171_v0 = vpop.f32.mrf.mxu0 }
 0xcc2   : > { %v5012_v31 = vpop.f32.mrf.mxu2  ;;  %v11173_v19 = vpop.f32.mrf.mxu3 }
 0xcc3   : > { %v11175_v6 = vpop.f32.mrf.mxu1  ;;  %v5013_v13 = vadd.f32 %v5012_v31, %v4924_v40 }
 0xcc4   : > { %5172 = vmatmul.bf16.gmra.mxu0 %v12915_v15 }
 0xcc5   : > { %v5543_v62 = vmax.f32 %v5013_v13, 0.0 }
 0xcc7   : > { %5054 = vmatmul.bf16.gmra.mxu2 %v10839_v45  ;;  %5814 = vrot.lane.b32.xlu1 %v5543_v62, %s12493_s15  ;;  %v12916_v62 = vld [vmem:[#allocation28_spill] sm:$0xff] }
 0xcc9   : > { %v11183_v39 = vpop.f32.mrf.mxu0 }
 0xcca   : > { %v5015_v27 = vpop.f32.mrf.mxu2  ;;  %v11185_v1 = vpop.f32.mrf.mxu3 }
 0xccb   : > { %v11187_v42 = vpop.f32.mrf.mxu1  ;;  %v5016_v32 = vadd.f32 %v5015_v27, %v4927_v2 }
 0xccc   : > { %5261 = vmatmul.bf16.gmra.mxu1 %v12830_v35 }
 0xccd   : > { %v5546_v24 = vmax.f32 %v5016_v32, 0.0 }
 0xccf   : > { %5143 = vmatmul.bf16.gmra.mxu3 %v12832_v48  ;;  %5818 = vrot.lane.b32.xlu0 %v5546_v24, %s12493_s15  ;;  %v4932_v48 = vadd.f32 %v11115_v29, %v4843_v52  ;;  %v4934_v29 = vadd.f32 %v11127_v30, %v4845_v17 }
 0xcd1   : > { %v11195_v16 = vpop.f32.mrf.mxu0 }
 0xcd2   : > { %v5017_v40 = vpop.f32.mrf.mxu2  ;;  %v11197_v31 = vpop.f32.mrf.mxu3 }
 0xcd3   : > { %v11199_v13 = vpop.f32.mrf.mxu1  ;;  %v5018_v15 = vadd.f32 %v5017_v40, %v4929_v28 }
 0xcd4   : > { %5177 = vmatmul.bf16.gmra.mxu0 %v12916_v62 }
 0xcd5   : > { %v5549_v35 = vmax.f32 %v5018_v15, 0.0  ;;  %v12917_v15 = vld [vmem:[#allocation18_spill] sm:$0xff] }
 0xcd7   : > { %5059 = vmatmul.bf16.gmra.mxu2 %v10854_v4  ;;  %5822 = vrot.lane.b32.xlu2 %v5549_v35, %s12493_s15 }
 0xcd9   : > { %v11207_v61 = vpop.f32.mrf.mxu0 }
 0xcda   : > { %v5020_v21 = vpop.f32.mrf.mxu2  ;;  %v11209_v34 = vpop.f32.mrf.mxu3 }
 0xcdb   : > { %v11211_v2 = vpop.f32.mrf.mxu1  ;;  %v5021_v27 = vadd.f32 %v5020_v21, %v4932_v48 }
 0xcdc   : > { %5266 = vmatmul.bf16.gmra.mxu1 %v12839_v57 }
 0xcdd   : > { %v5552_v32 = vmax.f32 %v5021_v27, 0.0 }
 0xcdf   : > { %5148 = vmatmul.bf16.gmra.mxu3 %v12840_v26  ;;  %5826 = vrot.lane.b32.xlu1 %v5552_v32, %s12493_s15  ;;  %v4937_v26 = vadd.f32 %v11139_v36, %v4848_v51 }
 0xce1   : > { %v11219_v49 = vpop.f32.mrf.mxu0 }
 0xce2   : > { %v5022_v24 = vpop.f32.mrf.mxu2  ;;  %v11221_v44 = vpop.f32.mrf.mxu3 }
 0xce3   : > { %v11223_v28 = vpop.f32.mrf.mxu1  ;;  %v5023_v40 = vadd.f32 %v5022_v24, %v4934_v29  ;;  %v12919_v24 = vld [vmem:[#allocation16_spill] sm:$0xff] }
 0xce4   : > { %5182 = vmatmul.bf16.gmra.mxu0 %v12917_v15 }
 0xce5   : > { %v5555_v57 = vmax.f32 %v5023_v40, 0.0 }
 0xce7   : > { %5064 = vmatmul.bf16.gmra.mxu2 %v12918_v50  ;;  %5830 = vrot.lane.b32.xlu0 %v5555_v57, %s12493_s15 }
 0xce9   : > { %v11231_v30 = vpop.f32.mrf.mxu0 }
 0xcea   : > { %v5025_v62 = vpop.f32.mrf.mxu2  ;;  %v11233_v35 = vpop.f32.mrf.mxu3 }
 0xceb   : > { %v11235_v52 = vpop.f32.mrf.mxu1  ;;  %v5026_v48 = vadd.f32 %v5025_v62, %v4937_v26  ;;  %v12921_v62 = vld [vmem:[#allocation26_spill] sm:$0xff] }
 0xcec   : > { %5271 = vmatmul.bf16.gmra.mxu1 %v12843_v37  ;;  %v4855_v53 = vadd.f32 %v11159_v38, %v12921_v62 }
 0xced   : > { %v5558_v21 = vmax.f32 %v5026_v48, 0.0 }
 0xcef   : > { %5153 = vmatmul.bf16.gmra.mxu3 %v12844_v63  ;;  %5834 = vrot.lane.b32.xlu2 %v5558_v21, %s12493_s15  ;;  %v4942_v63 = vadd.f32 %v11163_v33, %v4853_v18  ;;  %v4944_v33 = vadd.f32 %v11175_v6, %v4855_v53  ;;  %v12927_v53 = vld [vmem:[#allocation94_spill] sm:$0xff] }
 0xcf1   : > { %v11243_v36 = vpop.f32.mrf.mxu0 }
 0xcf2   : > { %v5027_v27 = vpop.f32.mrf.mxu2  ;;  %v11245_v32 = vpop.f32.mrf.mxu3 }
 0xcf3   : > { %v11247_v17 = vpop.f32.mrf.mxu1  ;;  %v5028_v29 = vadd.f32 %v5027_v27, %v4939_v47 }
 0xcf4   : > { %5187 = vmatmul.bf16.gmra.mxu0 %v12919_v24  ;;  %v12924_v24 = vld [vmem:[#allocation69_spill] sm:$0xff] }
 0xcf5   : > { %v5561_v37 = vmax.f32 %v5028_v29, 0.0  ;;  %v12923_v29 = vld [vmem:[#allocation38_spill] sm:$0xff]  ;;  %v4858_v38 = vadd.f32 %v11171_v0, %v12924_v24  ;;  %v4860_v0 = vadd.f32 %v11183_v39, %v12927_v53  ;;  %v12929_v24 = vld [vmem:[#allocation43_spill] sm:$0xff] }
 0xcf7   : > { %5345 = vmatmul.bf16.vlgmr.msrb.gmra.mxu2 %v12920_v14  ;;  %5838 = vrot.lane.b32.xlu1 %v5561_v37, %s12493_s15  ;;  %v12925_v37 = vld [vmem:[#allocation95_spill] sm:$0xff]  ;;  %v4947_v6 = vadd.f32 %v11187_v42, %v4858_v38  ;;  %v4949_v42 = vadd.f32 %v11199_v13, %v4860_v0  ;;  %v12933_v0 = vld [vmem:[#allocation46_spill] sm:$0xff] }
 0xcf9   : > { %v11255_v25 = vpop.f32.mrf.mxu0 }
 0xcfa   : > { %v5030_v40 = vpop.f32.mrf.mxu2  ;;  %v11257_v15 = vpop.f32.mrf.mxu3 }
 0xcfb   : > { %v11259_v57 = vpop.f32.mrf.mxu1  ;;  %v5031_v51 = vadd.f32 %v5030_v40, %v4942_v63 }
 0xcfc   : > { %5276 = vmatmul.bf16.gmra.mxu1 %v12847_v54 }
 0xcfd   : > { %v5564_v26 = vmax.f32 %v5031_v51, 0.0 }
 0xcff   : > { %5434 = vmatmul.bf16.vlgmr.msra.gmra.mxu3 %v12922_v43  ;;  %5842 = vrot.lane.b32.xlu1 %v5564_v26, %s12493_s15  ;;  %v12926_v26 = vld [vmem:[#allocation40_spill] sm:$0xff]  ;;  %v12928_v43 = vld [vmem:[#allocation101_spill] sm:$0xff] }
 0xd01   : > { %v11267_v48 = vpop.f32.mrf.mxu0 }
 0xd02   : > { %v5032_v21 = vpop.f32.mrf.mxu2  ;;  %v11269_v11 = vpop.f32.mrf.mxu3 }
 0xd03   : > { %v11271_v47 = vpop.f32.mrf.mxu1  ;;  %v5033_v27 = vadd.f32 %v5032_v21, %v4944_v33 }
 0xd04   : > { %5192 = vmatmul.bf16.gmra.mxu0 %v12923_v29 }
 0xd05   : > { %v5567_v54 = vmax.f32 %v5033_v27, 0.0 }
 0xd07   : > { %5350 = vmatmul.bf16.gmra.mxu2 %v12925_v37  ;;  %5846 = vrot.lane.b32.xlu2 %v5567_v54, %s12493_s15  ;;  %v12930_v37 = vld [vmem:[#allocation68_spill] sm:$0xff] }
 0xd08   : > { %v4863_v39 = vadd.f32 %v11195_v16, %v12930_v37 }
 0xd09   : > { %v11279_v18 = vpop.f32.mrf.mxu0 }
 0xd0a   : > { %v5035_v14 = vpop.f32.mrf.mxu2  ;;  %v11281_v63 = vpop.f32.mrf.mxu3  ;;  %v4952_v13 = vadd.f32 %v11211_v2, %v4863_v39 }
 0xd0b   : > { %v11283_v40 = vpop.f32.mrf.mxu1  ;;  %v5036_v51 = vadd.f32 %v5035_v14, %v4947_v6  ;;  %v12931_v6 = vld [vmem:[#allocation106_spill] sm:$0xff] }
 0xd0c   : > { %5281 = vmatmul.bf16.gmra.mxu1 %v12926_v26 }
 0xd0d   : > { %v5570_v62 = vmax.f32 %v5036_v51, 0.0 }
 0xd0f   : > { %5439 = vmatmul.bf16.gmra.mxu3 %v12928_v43  ;;  %5850 = vrot.lane.b32.xlu0 %v5570_v62, %s12493_s15 }
 0xd11   : > { %v11291_v33 = vpop.f32.mrf.mxu0 }
 0xd12   : > { %v5037_v21 = vpop.f32.mrf.mxu2  ;;  %v11293_v27 = vpop.f32.mrf.mxu3 }
 0xd13   : > { %v11295_v29 = vpop.f32.mrf.mxu1  ;;  %v5038_v54 = vadd.f32 %v5037_v21, %v4949_v42  ;;  %v12934_v42 = vld [vmem:[#allocation99_spill] sm:$0xff] }
 0xd14   : > { %5197 = vmatmul.bf16.gmra.mxu0 %v12929_v24  ;;  %v4865_v16 = vadd.f32 %v11207_v61, %v12934_v42  ;;  %v12935_v21 = vld [vmem:[#allocation111_spill] sm:$0xff] }
 0xd15   : > { %v5573_v38 = vmax.f32 %v5038_v54, 0.0 }
 0xd16   : > { %v4954_v2 = vadd.f32 %v11223_v28, %v4865_v16 }
 0xd17   : > { %5355 = vmatmul.bf16.gmra.mxu2 %v12931_v6  ;;  %5854 = vrot.lane.b32.xlu2 %v5573_v38, %s12493_s15 }
 0xd19   : > { %v11303_v14 = vpop.f32.mrf.mxu0 }
 0xd1a   : > { %v5040_v51 = vpop.f32.mrf.mxu2  ;;  %v11305_v26 = vpop.f32.mrf.mxu3 }
 0xd1b   : > { %12932 = vst [vmem:[#allocation82_spill] sm:$0xff] %v11305_v26  ;;  %v11307_v62 = vpop.f32.mrf.mxu1  ;;  %v5041_v53 = vadd.f32 %v5040_v51, %v4952_v13  ;;  %v12936_v13 = vld [vmem:[#allocation49_spill] sm:$0xff] }
 0xd1c   : > { %5286 = vmatmul.bf16.gmra.mxu1 %v12933_v0  ;;  %v12938_v0 = vld [vmem:[#allocation114_spill] sm:$0xff] }
 0xd1d   : > { %v5576_v43 = vmax.f32 %v5041_v53, 0.0  ;;  %v12937_v53 = vld [vmem:[#allocation20_spill] sm:$0xff] }
 0xd1e   : > { %v4868_v61 = vadd.f32 %v11219_v49, %v12937_v53  ;;  %v12940_v49 = vld [vmem:[#allocation74_spill] sm:$0xff]  ;;  %v12941_v53 = vld [vmem:[#allocation120_spill] sm:$0xff] }
 0xd1f   : > { %5444 = vmatmul.bf16.gmra.mxu3 %v12935_v21  ;;  %5858 = vrot.lane.b32.xlu1 %v5576_v43, %s12493_s15 }
 0xd20   : > { %v4957_v28 = vadd.f32 %v11235_v52, %v4868_v61 }
 0xd21   : > { %v4887_v54 = vpop.f32.mrf.mxu0 }
 0xd22   : > { %v4888_v24 = vadd.f32 %v4887_v54, %v11054_v23  ;;  %v5042_v38 = vpop.f32.mrf.mxu2  ;;  %v11316_v37 = vpop.f32.mrf.mxu3 }
 0xd23   : > { %v11318_v39 = vpop.f32.mrf.mxu1  ;;  %v5043_v6 = vadd.f32 %v5042_v38, %v4954_v2  ;;  %v12939_v38 = vld [vmem:[#allocation50_spill] sm:$0xff] }
 0xd24   : > { %5202 = vmatmul.bf16.gmra.mxu0 %v12936_v13  ;;  %v4870_v13 = vadd.f32 %v11231_v30, %v12940_v49 }
 0xd25   : > { %v5579_v51 = vmax.f32 %v5043_v6, 0.0 }
 0xd26   : > { %v4959_v52 = vadd.f32 %v11247_v17, %v4870_v13 }
 0xd27   : > { %5360 = vmatmul.bf16.gmra.mxu2 %v12938_v0  ;;  %5862 = vrot.lane.b32.xlu1 %v5579_v51, %s12493_s15 }
 0xd29   : > { %v4889_v43 = vpop.f32.mrf.mxu0 }
 0xd2a   : > { %v4890_v23 = vadd.f32 %v4889_v43, %v11065_v22  ;;  %v5045_v42 = vpop.f32.mrf.mxu2  ;;  %v11327_v16 = vpop.f32.mrf.mxu3  ;;  %v12942_v43 = vld [vmem:[#allocation53_spill] sm:$0xff] }
 0xd2b   : > { %v4976_v21 = vpop.f32.mrf.mxu1  ;;  %v5046_v2 = vadd.f32 %v5045_v42, %v4957_v28 }
 0xd2c   : > { %v11329_v54 = vadd.f32 %v4976_v21, %v4888_v24  ;;  %5291 = vmatmul.bf16.gmra.mxu1 %v12939_v38  ;;  %v12943_v21 = vld [vmem:[#allocation104_spill] sm:$0xff] }
 0xd2d   : > { %v5582_v6 = vmax.f32 %v5046_v2, 0.0  ;;  %v4873_v30 = vadd.f32 %v11243_v36, %v12943_v21  ;;  %v12944_v2 = vld [vmem:[#allocation124_spill] sm:$0xff] }
 0xd2f   : > { %5449 = vmatmul.bf16.gmra.mxu3 %v12941_v53  ;;  %5866 = vrot.lane.b32.xlu2 %v5582_v6, %s12493_s15  ;;  %v4962_v17 = vadd.f32 %v11259_v57, %v4873_v30  ;;  %v12946_v53 = vld [vmem:[#allocation55_spill] sm:$0xff] }
 0xd31   : > { %v11337_v22 = vpop.f32.mrf.mxu0 }
 0xd32   : > { %v5047_v51 = vpop.f32.mrf.mxu2  ;;  %v11339_v61 = vpop.f32.mrf.mxu3 }
 0xd33   : > { %v4978_v0 = vpop.f32.mrf.mxu1  ;;  %v5048_v24 = vadd.f32 %v5047_v51, %v4959_v52  ;;  %v12947_v51 = vld [vmem:[#allocation73_spill] sm:$0xff] }
 0xd34   : > { %v11341_v28 = vadd.f32 %v4978_v0, %v4890_v23  ;;  %5207 = vmatmul.bf16.gmra.mxu0 %v12942_v43  ;;  %v4875_v36 = vadd.f32 %v11255_v25, %v12947_v51  ;;  %v12948_v0 = vld [vmem:[#allocation127_spill] sm:$0xff] }
 0xd35   : > { %v5585_v42 = vmax.f32 %v5048_v24, 0.0 }
 0xd36   : > { %v4964_v57 = vadd.f32 %v11271_v47, %v4875_v36 }
 0xd37   : > { %5365 = vmatmul.bf16.gmra.mxu2 %v12944_v2  ;;  %5870 = vrot.lane.b32.xlu0 %v5585_v42, %s12493_s15  ;;  %v12950_v2 = vld [vmem:[#allocation60_spill] sm:$0xff] }
 0xd39   : > { %v11349_v38 = vpop.f32.mrf.mxu0 }
 0xd3a   : > { %v5050_v6 = vpop.f32.mrf.mxu2  ;;  %v11351_v49 = vpop.f32.mrf.mxu3 }
 0xd3b   : > { %12945 = vst [vmem:[#allocation83_spill] sm:$0xff] %v11351_v49  ;;  %v5051_v13 = vadd.f32 %v5050_v6, %v4962_v17  ;;  %v11353_v23 = vpop.f32.mrf.mxu1  ;;  %v12951_v6 = vld [vmem:[#allocation39_spill] sm:$0xff] }
 0xd3c   : > { %5296 = vmatmul.bf16.gmra.mxu1 %v12946_v53  ;;  %v4878_v25 = vadd.f32 %v11267_v48, %v12951_v6 }
 0xd3d   : > { %v5588_v52 = vmax.f32 %v5051_v13, 0.0  ;;  %v12952_v13 = vld [vmem:[#allocation131_spill] sm:$0xff] }
 0xd3e   : > { %v4967_v47 = vadd.f32 %v11283_v40, %v4878_v25 }
 0xd3f   : > { %5454 = vmatmul.bf16.gmra.mxu3 %v12948_v0  ;;  %5874 = vrot.lane.b32.xlu1 %v5588_v52, %s12493_s15 }
 0xd41   : > { %v11361_v24 = vpop.f32.mrf.mxu0 }
 0xd42   : > { %v5052_v43 = vpop.f32.mrf.mxu2  ;;  %v11363_v42 = vpop.f32.mrf.mxu3 }
 0xd43   : > { %12949 = vst [vmem:[#allocation44_spill] sm:$0xff] %v11363_v42  ;;  %v5053_v21 = vadd.f32 %v5052_v43, %v4964_v57  ;;  %v11365_v30 = vpop.f32.mrf.mxu1  ;;  %v12954_v57 = vld [vmem:[#allocation64_spill] sm:$0xff] }
 0xd44   : > { %5212 = vmatmul.bf16.gmra.mxu0 %v12950_v2  ;;  %v12956_v2 = vld [vmem:[#allocation135_spill] sm:$0xff] }
 0xd45   : > { %v5591_v17 = vmax.f32 %v5053_v21, 0.0  ;;  %v12955_v21 = vld [vmem:[#allocation79_spill] sm:$0xff] }
 0xd46   : > { %v4880_v48 = vadd.f32 %v11279_v18, %v12955_v21  ;;  %v12960_v21 = vld [vmem:[#allocation139_spill] sm:$0xff] }
 0xd47   : > { %5370 = vmatmul.bf16.gmra.mxu2 %v12952_v13  ;;  %5878 = vrot.lane.b32.xlu2 %v5591_v17, %s12493_s15 }
 0xd48   : > { %v4969_v40 = vadd.f32 %v11295_v29, %v4880_v48 }
 0xd49   : > { %v11373_v53 = vpop.f32.mrf.mxu0 }
 0xd4a   : > { %v5055_v52 = vpop.f32.mrf.mxu2  ;;  %v11375_v51 = vpop.f32.mrf.mxu3 }
 0xd4b   : > { %12953 = vst [vmem:[#allocation88_spill] sm:$0xff] %v11375_v51  ;;  %v5056_v36 = vadd.f32 %v5055_v52, %v4967_v47  ;;  %v11377_v0 = vpop.f32.mrf.mxu1  ;;  %v12958_v52 = vld [vmem:[#allocation70_spill] sm:$0xff] }
 0xd4c   : > { %5301 = vmatmul.bf16.gmra.mxu1 %v12954_v57  ;;  %v12959_v57 = vld [vmem:[#allocation78_spill] sm:$0xff] }
 0xd4d   : > { %v5594_v43 = vmax.f32 %v5056_v36, 0.0  ;;  %v4883_v18 = vadd.f32 %v11291_v33, %v12959_v57  ;;  %v12964_v57 = vld [vmem:[#allocation143_spill] sm:$0xff]  ;;  %v12980_v51 = vld [vmem:[#allocation118_spill] sm:$0xff] }
 0xd4f   : > { %5459 = vmatmul.bf16.gmra.mxu3 %v12956_v2  ;;  %5882 = vrot.lane.b32.xlu0 %v5594_v43, %s12493_s15  ;;  %v4972_v29 = vadd.f32 %v11307_v62, %v4883_v18 }
 0xd51   : > { %v11385_v17 = vpop.f32.mrf.mxu0 }
 0xd52   : > { %v5057_v6 = vpop.f32.mrf.mxu2  ;;  %v11387_v25 = vpop.f32.mrf.mxu3 }
 0xd53   : > { %12957 = vst [vmem:[#allocation87_spill] sm:$0xff] %v11387_v25  ;;  %v5058_v13 = vadd.f32 %v5057_v6, %v4969_v40  ;;  %v11389_v47 = vpop.f32.mrf.mxu1  ;;  %v12962_v25 = vld [vmem:[#allocation75_spill] sm:$0xff] }
 0xd54   : > { %5217 = vmatmul.bf16.gmra.mxu0 %v12958_v52  ;;  %v12963_v52 = vld [vmem:[#allocation41_spill] sm:$0xff] }
 0xd55   : > { %v5597_v36 = vmax.f32 %v5058_v13, 0.0  ;;  %v4885_v33 = vadd.f32 %v11303_v14, %v12963_v52 }
 0xd57   : > { %5375 = vmatmul.bf16.gmra.mxu2 %v12960_v21  ;;  %5886 = vrot.lane.b32.xlu2 %v5597_v36, %s12493_s15  ;;  %v4974_v62 = vadd.f32 %v11318_v39, %v4885_v33 }
 0xd59   : > { %v11397_v43 = vpop.f32.mrf.mxu0 }
 0xd5a   : > { %v5060_v48 = vpop.f32.mrf.mxu2  ;;  %v11399_v2 = vpop.f32.mrf.mxu3 }
 0xd5b   : > { %12961 = vst [vmem:[#allocation47_spill] sm:$0xff] %v11399_v2  ;;  %v5061_v40 = vadd.f32 %v5060_v48, %v4972_v29  ;;  %v11401_v6 = vpop.f32.mrf.mxu1  ;;  %v12966_v2 = vld [vmem:[#allocation80_spill] sm:$0xff] }
 0xd5c   : > { %5306 = vmatmul.bf16.gmra.mxu1 %v12962_v25 }
 0xd5d   : > { %v5600_v13 = vmax.f32 %v5061_v40, 0.0  ;;  %v12967_v40 = vld [vmem:[#allocation146_spill] sm:$0xff] }
 0xd5f   : > { %5464 = vmatmul.bf16.gmra.mxu3 %v12964_v57  ;;  %5890 = vrot.lane.b32.xlu0 %v5600_v13, %s12493_s15  ;;  %v12970_v57 = vld [vmem:[#allocation84_spill] sm:$0xff] }
 0xd61   : > { %v11409_v36 = vpop.f32.mrf.mxu0 }
 0xd62   : > { %v5062_v18 = vpop.f32.mrf.mxu2  ;;  %v11411_v21 = vpop.f32.mrf.mxu3 }
 0xd63   : > { %12965 = vst [vmem:[#allocation92_spill] sm:$0xff] %v11411_v21  ;;  %v5063_v29 = vadd.f32 %v5062_v18, %v4974_v62  ;;  %v11413_v48 = vpop.f32.mrf.mxu1  ;;  %v12971_v62 = vld [vmem:[#allocation149_spill] sm:$0xff] }
 0xd64   : > { %5222 = vmatmul.bf16.gmra.mxu0 %v12966_v2  ;;  %v11429_v2 = vpop.xlane.xlu1 %5611 }
 0xd65   : > { %v5603_v25 = vmax.f32 %v5063_v29, 0.0  ;;  %12972 = vst [vmem:[#allocation51_spill] sm:$0xff] %v11429_v2 }
 0xd67   : > { %5380 = vmatmul.bf16.gmra.mxu2 %v12967_v40  ;;  %5894 = vrot.lane.b32.xlu2 %v5603_v25, %s12493_s15 }
 0xd69   : > { %v11418_v14 = vpop.f32.mrf.mxu0 }
 0xd6a   : > { %v5065_v13 = vpop.f32.mrf.mxu2  ;;  %v11420_v52 = vpop.f32.mrf.mxu3 }
 0xd6b   : > { %12968 = vst [vmem:[#allocation91_spill] sm:$0xff] %v11420_v52  ;;  %v11423_v39 = vadd.f32 %v5065_v13, %v11329_v54  ;;  %v11425_v33 = vpop.f32.mrf.mxu1  ;;  %v12975_v54 = vld [vmem:[#allocation89_spill] sm:$0xff] }
 0xd6c   : > { %5311 = vmatmul.bf16.gmra.mxu1 %v12970_v57  ;;  %v12976_v13 = vld [vmem:[#allocation97_spill] sm:$0xff]  ;;  %v11444_v57 = vpop.xlane.xlu1 %5619 }
 0xd6d   : > { %12969 = vst [vmem:[#allocation96_spill] sm:$0xff] %v11423_v39  ;;  %v11442_v39 = vpop.xlane.xlu0 %5615 }
 0xd6e   : > { %12977 = vst [vmem:[#allocation33_spill] sm:$0xff] %v11442_v39 }
 0xd6f   : > { %5469 = vmatmul.bf16.gmra.mxu3 %v12971_v62  ;;  %12978 = vst [vmem:[#allocation42_spill] sm:$0xff] %v11444_v57 }
 0xd71   : > { %v11436_v40 = vpop.f32.mrf.mxu0 }
 0xd72   : > { %v5067_v18 = vpop.f32.mrf.mxu2  ;;  %v11431_v29 = vpop.f32.mrf.mxu3 }
 0xd73   : > { %12973 = vst [vmem:[#allocation102_spill] sm:$0xff] %v11431_v29  ;;  %v11434_v25 = vadd.f32 %v5067_v18, %v11341_v28  ;;  %v11438_v52 = vpop.f32.mrf.mxu1  ;;  %v5080_v29 = vadd.f32 %v11077_v59, %v12980_v51  ;;  %v12984_v59 = vld [vmem:[#allocation128_spill] sm:$0xff] }
 0xd74   : > { %5227 = vmatmul.bf16.gmra.mxu0 %v12975_v54  ;;  %v11460_v57 = vpop.xlane.xlu1 %5625  ;;  %v5082_v51 = vadd.f32 %v11089_v10, %v12984_v59 }
 0xd75   : > { %12974 = vst [vmem:[#allocation107_spill] sm:$0xff] %v11434_v25  ;;  %v12981_v25 = vld [vmem:[#allocation93_spill] sm:$0xff]  ;;  %v5169_v54 = vadd.f32 %v11337_v22, %v5080_v29  ;;  %v11458_v39 = vpop.xlane.xlu0 %5623  ;;  %v12985_v22 = vld [vmem:[#allocation98_spill] sm:$0xff] }
 0xd76   : > { %12982 = vst [vmem:[#allocation72_spill] sm:$0xff] %v11458_v39 }
 0xd77   : > { %5385 = vmatmul.bf16.gmra.mxu2 %v12976_v13  ;;  %v5258_v13 = vadd.f32 %v11353_v23, %v5169_v54  ;;  %12983 = vst [vmem:[#allocation48_spill] sm:$0xff] %v11460_v57  ;;  %v5171_v23 = vadd.f32 %v11349_v38, %v5082_v51  ;;  %v12986_v54 = vld [vmem:[#allocation29_spill] sm:$0xff]  ;;  %v12987_v57 = vld [vmem:[#allocation126_spill] sm:$0xff] }
 0xd79   : > { %v11450_v28 = vpop.f32.mrf.mxu0  ;;  %v5260_v29 = vadd.f32 %v11365_v30, %v5171_v23  ;;  %v12988_v23 = vld [vmem:[#allocation59_spill] sm:$0xff] }
 0xd7a   : > { %v11446_v62 = vpop.f32.mrf.mxu3  ;;  %v5346_v21 = vpop.f32.mrf.mxu2 }
 0xd7b   : > { %12979 = vst [vmem:[#allocation17_spill] sm:$0xff] %v11446_v62  ;;  %v11452_v18 = vpop.f32.mrf.mxu1  ;;  %v5347_v62 = vadd.f32 %v5346_v21, %v5258_v13 }
 0xd7c   : > { %5316 = vmatmul.bf16.gmra.mxu1 %v12981_v25  ;;  %v11475_v13 = vpop.xlane.xlu1 %5631 }
 0xd7d   : > { %v11473_v21 = vpop.xlane.xlu0 %5629 }
 0xd7f   : > { %5474 = vmatmul.bf16.gmra.mxu3 %v12903_v8 }
 0xd81   : > { %v11464_v49 = vpop.f32.mrf.mxu0 }
 0xd82   : > { %v5348_v2 = vpop.f32.mrf.mxu2  ;;  %v5435_v42 = vpop.f32.mrf.mxu3 }
 0xd83   : > { %v11466_v26 = vpop.f32.mrf.mxu1  ;;  %v5436_v25 = vadd.f32 %v5435_v42, %v5347_v62  ;;  %v5349_v10 = vadd.f32 %v5348_v2, %v5260_v29  ;;  %v5085_v42 = vadd.f32 %v11101_v41, %v12987_v57 }
 0xd84   : > { %5232 = vmatmul.bf16.gmra.mxu0 %v12985_v22 }
 0xd85   : > { %v5517_v8 = vmax.f32 %v5436_v25, 0.0  ;;  %v5174_v30 = vadd.f32 %v11361_v24, %v5085_v42  ;;  %v11488_v2 = vpop.xlane.xlu0 %5635 }
 0xd86   : > { %12989 = vst [vmem:[#allocation71_spill] sm:$0xff] %v11488_v2 }
 0xd87   : > { %5390 = vmatmul.bf16.gmra.mxu2 %v12986_v54  ;;  %5780 = vrot.lane.b32.xlu0 %v5517_v8, %s12493_s15  ;;  %v5263_v22 = vadd.f32 %v11377_v0, %v5174_v30  ;;  %v11490_v8 = vpop.xlane.xlu1 %5637  ;;  %v12991_v54 = vld [vmem:[#allocation123_spill] sm:$0xff]  ;;  %v12992_v0 = vld [vmem:[#allocation108_spill] sm:$0xff] }
 0xd88   : > { %12990 = vst [vmem:[#allocation61_spill] sm:$0xff] %v11490_v8 }
 0xd89   : > { %v11479_v62 = vpop.f32.mrf.mxu0 }
 0xd8a   : > { %v5351_v59 = vpop.f32.mrf.mxu2  ;;  %v5437_v39 = vpop.f32.mrf.mxu3 }
 0xd8b   : > { %v11481_v38 = vpop.f32.mrf.mxu1  ;;  %v5438_v51 = vadd.f32 %v5437_v39, %v5349_v10  ;;  %v5352_v41 = vadd.f32 %v5351_v59, %v5263_v22  ;;  %v5087_v39 = vadd.f32 %v11113_v56, %v12991_v54  ;;  %v11503_v59 = vpop.xlane.xlu2 %5613 }
 0xd8c   : > { %5321 = vmatmul.bf16.gmra.mxu1 %v12905_v20 }
 0xd8d   : > { %v5520_v25 = vmax.f32 %v5438_v51, 0.0  ;;  %v5176_v42 = vadd.f32 %v11373_v53, %v5087_v39  ;;  %v11505_v22 = vpop.xlane.xlu0 %5641 }
 0xd8e   : > { %12994 = vst [vmem:[#allocation67_spill] sm:$0xff] %v11505_v22 }
 0xd8f   : > { %5479 = vmatmul.bf16.gmra.mxu3 %v12988_v23  ;;  %5784 = vrot.lane.b32.xlu0 %v5520_v25, %s12493_s15  ;;  %v5265_v30 = vadd.f32 %v11389_v47, %v5176_v42  ;;  %v12993_v25 = vld [vmem:[#allocation110_spill] sm:$0xff]  ;;  %v11507_v56 = vpop.xlane.xlu1 %5643 }
 0xd90   : > { %12995 = vst [vmem:[#allocation13_spill] sm:$0xff] %v11507_v56 }
 0xd91   : > { %v11494_v20 = vpop.f32.mrf.mxu0 }
 0xd92   : > { %v5353_v57 = vpop.f32.mrf.mxu2  ;;  %v5440_v29 = vpop.f32.mrf.mxu3 }
 0xd93   : > { %v11496_v24 = vpop.f32.mrf.mxu1  ;;  %v5441_v10 = vadd.f32 %v5440_v29, %v5352_v41  ;;  %v5354_v23 = vadd.f32 %v5353_v57, %v5265_v30  ;;  %v12996_v29 = vld [vmem:[#allocation132_spill] sm:$0xff]  ;;  %v11520_v57 = vpop.xlane.xlu2 %5617 }
 0xd94   : > { %5237 = vmatmul.bf16.gmra.mxu0 %v12992_v0  ;;  %v5090_v0 = vadd.f32 %v11125_v12, %v12996_v29 }
 0xd95   : > { %v5523_v51 = vmax.f32 %v5441_v10, 0.0  ;;  %v11522_v30 = vpop.xlane.xlu0 %5647 }
 0xd96   : > { %v5179_v10 = vadd.f32 %v11385_v17, %v5090_v0  ;;  %12998 = vst [vmem:[#allocation66_spill] sm:$0xff] %v11522_v30  ;;  %v13002_v30 = vld [vmem:[#allocation113_spill] sm:$0xff] }
 0xd97   : > { %5395 = vmatmul.bf16.gmra.mxu2 %v12993_v25  ;;  %5788 = vrot.lane.b32.xlu1 %v5523_v51, %s12493_s15  ;;  %v12997_v25 = vld [vmem:[#allocation115_spill] sm:$0xff]  ;;  %v11524_v12 = vpop.xlane.xlu1 %5649 }
 0xd98   : > { %v5268_v51 = vadd.f32 %v11401_v6, %v5179_v10  ;;  %12999 = vst [vmem:[#allocation52_spill] sm:$0xff] %v11524_v12 }
 0xd99   : > { %v11511_v53 = vpop.f32.mrf.mxu0 }
 0xd9a   : > { %v5356_v54 = vpop.f32.mrf.mxu2  ;;  %v5442_v41 = vpop.f32.mrf.mxu3 }
 0xd9b   : > { %v11513_v39 = vpop.f32.mrf.mxu1  ;;  %v5443_v47 = vadd.f32 %v5442_v41, %v5354_v23  ;;  %v5357_v29 = vadd.f32 %v5356_v54, %v5268_v51  ;;  %v13000_v41 = vld [vmem:[#allocation130_spill] sm:$0xff]  ;;  %v11537_v54 = vpop.xlane.xlu2 %5621 }
 0xd9c   : > { %5326 = vmatmul.bf16.gmra.mxu1 %v12909_v7  ;;  %v5092_v7 = vadd.f32 %v11137_v3, %v13000_v41 }
 0xd9d   : > { %v5526_v42 = vmax.f32 %v5443_v47, 0.0  ;;  %v13001_v47 = vld [vmem:[#allocation116_spill] sm:$0xff]  ;;  %v11539_v51 = vpop.xlane.xlu0 %5653 }
 0xd9e   : > { %v5181_v10 = vadd.f32 %v11397_v43, %v5092_v7  ;;  %13003 = vst [vmem:[#allocation57_spill] sm:$0xff] %v11539_v51 }
 0xd9f   : > { %5484 = vmatmul.bf16.gmra.mxu3 %v12997_v25  ;;  %5792 = vrot.lane.b32.xlu2 %v5526_v42, %s12493_s15  ;;  %v11541_v3 = vpop.xlane.xlu1 %5655 }
 0xda0   : > { %v5270_v25 = vadd.f32 %v11413_v48, %v5181_v10  ;;  %13004 = vst [vmem:[#allocation77_spill] sm:$0xff] %v11541_v3  ;;  %v13014_v3 = vld [vmem:[#allocation134_spill] sm:$0xff] }
 0xda1   : > { %v11528_v17 = vpop.f32.mrf.mxu0 }
 0xda2   : > { %v5358_v2 = vpop.f32.mrf.mxu2  ;;  %v5445_v23 = vpop.f32.mrf.mxu3 }
 0xda3   : > { %v11530_v0 = vpop.f32.mrf.mxu1  ;;  %v5446_v6 = vadd.f32 %v5445_v23, %v5357_v29  ;;  %v5359_v41 = vadd.f32 %v5358_v2, %v5270_v25  ;;  %v13005_v23 = vld [vmem:[#allocation125_spill] sm:$0xff]  ;;  %v11554_v2 = vpop.xlane.xlu2 %5627 }
 0xda4   : > { %5242 = vmatmul.bf16.gmra.mxu0 %v13001_v47  ;;  %v5095_v47 = vadd.f32 %v11149_v60, %v13005_v23  ;;  %13006 = vst [vmem:[#allocation85_spill] sm:$0xff] %v11554_v2 }
 0xda5   : > { %v5529_v42 = vmax.f32 %v5446_v6, 0.0 }
 0xda7   : > { %5400 = vmatmul.bf16.gmra.mxu2 %v13002_v30  ;;  %5796 = vrot.lane.b32.xlu0 %v5529_v42, %s12493_s15  ;;  %v5184_v30 = vadd.f32 %v11409_v36, %v5095_v47  ;;  %v11556_v42 = vpop.xlane.xlu0 %5659  ;;  %v11558_v60 = vpop.xlane.xlu1 %5661 }
 0xda8   : > { %13007 = vst [vmem:[#allocation19_spill] sm:$0xff] %v11556_v42 }
 0xda9   : > { %v11545_v43 = vpop.f32.mrf.mxu0  ;;  %v5273_v10 = vadd.f32 %v11425_v33, %v5184_v30  ;;  %13008 = vst [vmem:[#allocation56_spill] sm:$0xff] %v11558_v60 }
 0xdaa   : > { %v5361_v12 = vpop.f32.mrf.mxu2  ;;  %v5447_v29 = vpop.f32.mrf.mxu3 }
 0xdab   : > { %v11547_v7 = vpop.f32.mrf.mxu1  ;;  %v5448_v48 = vadd.f32 %v5447_v29, %v5359_v41  ;;  %v5362_v25 = vadd.f32 %v5361_v12, %v5273_v10  ;;  %v13009_v29 = vld [vmem:[#allocation136_spill] sm:$0xff]  ;;  %v11570_v12 = vpop.xlane.xlu2 %5633 }
 0xdac   : > { %5331 = vmatmul.bf16.gmra.mxu1 %v12911_v5  ;;  %v5097_v5 = vadd.f32 %v11161_v58, %v13009_v29  ;;  %13011 = vst [vmem:[#allocation24_spill] sm:$0xff] %v11570_v12  ;;  %v13038_v12 = vld [vmem:[#allocation137_spill] sm:$0xff] }
 0xdad   : > { %v5532_v6 = vmax.f32 %v5448_v48, 0.0  ;;  %v5117_v8 = vadd.f32 %v11257_v15, %v13038_v12 }
 0xdaf   : > { %5489 = vmatmul.bf16.gmra.mxu3 %v12912_v9  ;;  %5800 = vrot.lane.b32.xlu1 %v5532_v6, %s12493_s15  ;;  %v5186_v9 = vadd.f32 %v11418_v14, %v5097_v5  ;;  %v13010_v6 = vld [vmem:[#allocation119_spill] sm:$0xff]  ;;  %v11572_v10 = vpop.xlane.xlu0 %5665  ;;  %v11574_v60 = vpop.xlane.xlu1 %5667  ;;  %v5206_v56 = vadd.f32 %v11545_v43, %v5117_v8 }
 0xdb0   : > { %13012 = vst [vmem:[#allocation65_spill] sm:$0xff] %v11572_v10  ;;  %v13023_v10 = vld [vmem:[#allocation138_spill] sm:$0xff] }
 0xdb1   : > { %v11562_v36 = vpop.f32.mrf.mxu0  ;;  %v5275_v30 = vadd.f32 %v11438_v52, %v5186_v9  ;;  %13013 = vst [vmem:[#allocation12_spill] sm:$0xff] %v11574_v60  ;;  %v13018_v60 = vld [vmem:[#allocation129_spill] sm:$0xff] }
 0xdb2   : > { %v5363_v23 = vpop.f32.mrf.mxu2  ;;  %v5450_v41 = vpop.f32.mrf.mxu3 }
 0xdb3   : > { %v11564_v47 = vpop.f32.mrf.mxu1  ;;  %v5451_v33 = vadd.f32 %v5450_v41, %v5362_v25  ;;  %v5364_v58 = vadd.f32 %v5363_v23, %v5275_v30  ;;  %v5100_v25 = vadd.f32 %v11173_v19, %v13014_v3  ;;  %v11586_v23 = vpop.xlane.xlu2 %5639 }
 0xdb4   : > { %13015 = vst [vmem:[#allocation10_spill] sm:$0xff] %v11586_v23 }
 0xdb5   : > { %v5535_v48 = vmax.f32 %v5451_v33, 0.0  ;;  %v5189_v5 = vadd.f32 %v11436_v40, %v5100_v25 }
 0xdb7   : > { %5405 = vmatmul.bf16.gmra.mxu2 %v13010_v6  ;;  %5804 = vrot.lane.b32.xlu2 %v5535_v48, %s12493_s15  ;;  %v5278_v9 = vadd.f32 %v11452_v18, %v5189_v5  ;;  %v11588_v48 = vpop.xlane.xlu0 %5671  ;;  %v11590_v30 = vpop.xlane.xlu1 %5673  ;;  %v13019_v5 = vld [vmem:[#allocation62_spill] sm:$0xff] }
 0xdb8   : > { %13016 = vst [vmem:[#allocation27_spill] sm:$0xff] %v11588_v48  ;;  %v13021_v48 = vld [vmem:[#allocation140_spill] sm:$0xff] }
 0xdb9   : > { %v11578_v14 = vpop.f32.mrf.mxu0  ;;  %13017 = vst [vmem:[#allocation34_spill] sm:$0xff] %v11590_v30 }
 0xdba   : > { %v5366_v29 = vpop.f32.mrf.mxu2  ;;  %v5452_v42 = vpop.f32.mrf.mxu3 }
 0xdbb   : > { %v11580_v41 = vpop.f32.mrf.mxu1  ;;  %v5453_v52 = vadd.f32 %v5452_v42, %v5364_v58  ;;  %v5367_v19 = vadd.f32 %v5366_v29, %v5278_v9  ;;  %v5102_v42 = vadd.f32 %v11185_v1, %v13018_v60  ;;  %v11602_v29 = vpop.xlane.xlu2 %5645 }
 0xdbc   : > { %13020 = vst [vmem:[#allocation35_spill] sm:$0xff] %v11602_v29 }
 0xdbd   : > { %v5538_v33 = vmax.f32 %v5453_v52, 0.0 }
 0xdbf   : > { %5494 = vmatmul.bf16.gmra.mxu3 %v12914_v46  ;;  %5808 = vrot.lane.b32.xlu0 %v5538_v33, %s12493_s15  ;;  %v5191_v46 = vadd.f32 %v11450_v28, %v5102_v42  ;;  %v11604_v33 = vpop.permute.xlu1 %5782  ;;  %v11606_v9 = vpop.permute.xlu0 %5790 }
 0xdc1   : > { %v11594_v40 = vpop.f32.mrf.mxu0  ;;  %v5280_v52 = vadd.f32 %v11466_v26, %v5191_v46 }
 0xdc2   : > { %v5368_v3 = vpop.f32.mrf.mxu2  ;;  %v5455_v6 = vpop.f32.mrf.mxu3 }
 0xdc3   : > { %v11596_v58 = vpop.f32.mrf.mxu1  ;;  %v5456_v18 = vadd.f32 %v5455_v6, %v5367_v19  ;;  %v5369_v1 = vadd.f32 %v5368_v3, %v5280_v52  ;;  %v5105_v19 = vadd.f32 %v11197_v31, %v13021_v48  ;;  %v11618_v3 = vpop.xlane.xlu2 %5651 }
 0xdc4   : > { %13022 = vst [vmem:[#allocation22_spill] sm:$0xff] %v11618_v3 }
 0xdc5   : > { %v5541_v25 = vmax.f32 %v5456_v18, 0.0  ;;  %v5194_v42 = vadd.f32 %v11464_v49, %v5105_v19 }
 0xdc7   : > { %5410 = vmatmul.bf16.gmra.mxu2 %v13019_v5  ;;  %5812 = vrot.lane.b32.xlu2 %v5541_v25, %s12493_s15  ;;  %v5283_v46 = vadd.f32 %v11481_v38, %v5194_v42  ;;  %v11620_v25 = vpop.permute.xlu1 %5794  ;;  %v11622_v52 = vpop.permute.xlu0 %5802 }
 0xdc9   : > { %v11610_v28 = vpop.f32.mrf.mxu0 }
 0xdca   : > { %v5371_v60 = vpop.f32.mrf.mxu2  ;;  %v5457_v30 = vpop.f32.mrf.mxu3 }
 0xdcb   : > { %v11612_v6 = vpop.f32.mrf.mxu1  ;;  %v5458_v26 = vadd.f32 %v5457_v30, %v5369_v1  ;;  %v5372_v31 = vadd.f32 %v5371_v60, %v5283_v46  ;;  %v5107_v30 = vadd.f32 %v11209_v34, %v13023_v10  ;;  %v11634_v60 = vpop.xlane.xlu2 %5657  ;;  %v13025_v10 = vld [vmem:[#allocation147_spill] sm:$0xff] }
 0xdcc   : > { %13024 = vst [vmem:[#allocation14_spill] sm:$0xff] %v11634_v60  ;;  %v5132_v46 = vadd.f32 %v11327_v16, %v13025_v10  ;;  %v13028_v10 = vld [vmem:[#allocation100_spill] sm:$0xff] }
 0xdcd   : > { %v5544_v18 = vmax.f32 %v5458_v26, 0.0 }
 0xdcf   : > { %5499 = vmatmul.bf16.gmra.mxu3 %v10839_v45  ;;  %5816 = vrot.lane.b32.xlu0 %v5544_v18, %s12493_s15  ;;  %v5196_v45 = vadd.f32 %v11479_v62, %v5107_v30  ;;  %v11636_v42 = vpop.permute.xlu1 %5806  ;;  %v11638_v18 = vpop.permute.xlu0 %5818  ;;  %v13026_v62 = vld [vmem:[#allocation133_spill] sm:$0xff] }
 0xdd0   : > { %v5110_v30 = vadd.f32 %v11221_v44, %v13026_v62 }
 0xdd1   : > { %v11626_v49 = vpop.f32.mrf.mxu0  ;;  %v5285_v26 = vadd.f32 %v11496_v24, %v5196_v45 }
 0xdd2   : > { %v5373_v48 = vpop.f32.mrf.mxu2  ;;  %v5460_v5 = vpop.f32.mrf.mxu3 }
 0xdd3   : > { %v11628_v1 = vpop.f32.mrf.mxu1  ;;  %v5461_v38 = vadd.f32 %v5460_v5, %v5372_v31  ;;  %v5374_v34 = vadd.f32 %v5373_v48, %v5285_v26  ;;  %v11650_v16 = vpop.xlane.xlu2 %5663 }
 0xdd4   : > { %13027 = vst [vmem:[#allocation31_spill] sm:$0xff] %v11650_v16 }
 0xdd5   : > { %v5547_v19 = vmax.f32 %v5461_v38, 0.0 }
 0xdd7   : > { %5415 = vmatmul.bf16.gmra.mxu2 %v10846_v55  ;;  %5820 = vrot.lane.b32.xlu2 %v5547_v19, %s12493_s15  ;;  %v5199_v19 = vadd.f32 %v11494_v20, %v5110_v30  ;;  %v11652_v48 = vpop.permute.xlu1 %5814  ;;  %v11654_v26 = vpop.permute.xlu0 %5830  ;;  %v13029_v20 = vld [vmem:[#allocation144_spill] sm:$0xff] }
 0xdd8   : > { %v5112_v62 = vadd.f32 %v11233_v35, %v13029_v20 }
 0xdd9   : > { %v5220_v24 = vpop.f32.mrf.mxu0  ;;  %v5288_v51 = vadd.f32 %v11513_v39, %v5199_v19 }
 0xdda   : > { %v5376_v31 = vpop.f32.mrf.mxu2  ;;  %v5462_v5 = vpop.f32.mrf.mxu3  ;;  %v5221_v45 = vadd.f32 %v5220_v24, %v5132_v46 }
 0xddb   : > { %v11644_v38 = vpop.f32.mrf.mxu1  ;;  %v5463_v55 = vadd.f32 %v5462_v5, %v5374_v34  ;;  %v5377_v44 = vadd.f32 %v5376_v31, %v5288_v51  ;;  %v5135_v34 = vadd.f32 %v11339_v61, %v13028_v10  ;;  %v13030_v51 = vld [vmem:[#allocation76_spill] sm:$0xff] }
 0xddd   : > { %v5550_v60 = vmax.f32 %v5463_v55, 0.0  ;;  %v5201_v55 = vadd.f32 %v11511_v53, %v5112_v62 }
 0xddf   : > { %5504 = vmatmul.bf16.gmra.mxu3 %v10854_v4  ;;  %5824 = vrot.lane.b32.xlu1 %v5550_v60, %s12493_s15  ;;  %v5290_v16 = vadd.f32 %v11530_v0, %v5201_v55  ;;  %v11666_v61 = vpop.permute.xlu1 %5826  ;;  %v11668_v31 = vpop.permute.xlu0 %5850 }
 0xde0   : > { %13031 = vst [vmem:[#allocation15_spill] sm:$0xff] %v11668_v31  ;;  %v13039_v31 = vld [vmem:[#allocation148_spill] sm:$0xff] }
 0xde1   : > { %v5223_v39 = vpop.f32.mrf.mxu0 }
 0xde2   : > { %v5378_v46 = vpop.f32.mrf.mxu2  ;;  %v5465_v5 = vpop.f32.mrf.mxu3  ;;  %v5224_v24 = vadd.f32 %v5223_v39, %v5135_v34 }
 0xde3   : > { %v5309_v30 = vpop.f32.mrf.mxu1  ;;  %v5466_v4 = vadd.f32 %v5465_v5, %v5377_v44  ;;  %v5379_v35 = vadd.f32 %v5378_v46, %v5290_v16  ;;  %v11670_v44 = vpop.xlane.xlu2 %5669 }
 0xde4   : > { %v11660_v60 = vadd.f32 %v5309_v30, %v5221_v45  ;;  %13032 = vst [vmem:[#allocation54_spill] sm:$0xff] %v11670_v44  ;;  %v13033_v45 = vld [vmem:[#allocation142_spill] sm:$0xff] }
 0xde5   : > { %v5553_v19 = vmax.f32 %v5466_v4, 0.0  ;;  %v5115_v34 = vadd.f32 %v11245_v32, %v13033_v45 }
 0xde7   : > { %5420 = vmatmul.bf16.gmra.mxu2 %v13030_v51  ;;  %5828 = vrot.lane.b32.xlu0 %v5553_v19, %s12493_s15  ;;  %v5204_v0 = vadd.f32 %v11528_v17, %v5115_v34  ;;  %v11680_v16 = vpop.permute.xlu1 %5838  ;;  %v11682_v46 = vpop.permute.xlu0 %5870 }
 0xde8   : > { %13034 = vst [vmem:[#allocation25_spill] sm:$0xff] %v11682_v46 }
 0xde9   : > { %v5293_v30 = vadd.f32 %v11547_v7, %v5204_v0 }
 0xdea   : > { %v5381_v10 = vpop.f32.mrf.mxu2  ;;  %v5467_v20 = vpop.f32.mrf.mxu3 }
 0xdeb   : > { %v5312_v53 = vpop.f32.mrf.mxu1  ;;  %v5468_v5 = vadd.f32 %v5467_v20, %v5379_v35  ;;  %v5382_v4 = vadd.f32 %v5381_v10, %v5293_v30  ;;  %v5779_v19 = vpop.permute.xlu2 %5778 }
 0xdec   : > { %v11674_v62 = vadd.f32 %v5312_v53, %v5224_v24 }
 0xded   : > { %v5556_v39 = vmax.f32 %v5468_v5, 0.0 }
 0xdef   : > { %5509 = vmatmul.bf16.gmra.mxu3 %v12918_v50  ;;  %5832 = vrot.lane.b32.xlu2 %v5556_v39, %s12493_s15  ;;  %v11685_v17 = vpop.permute.xlu0 %5882  ;;  %v11687_v50 = vpop.permute.xlu1 %5842 }
 0xdf0   : > { %13035 = vst [vmem:[#allocation103_spill] sm:$0xff] %v11685_v17  ;;  %v5120_v17 = vadd.f32 %v11269_v11, %v13039_v31 }
 0xdf2   : > { %v5383_v55 = vpop.f32.mrf.mxu2  ;;  %v5470_v32 = vpop.f32.mrf.mxu3  ;;  %v5209_v12 = vadd.f32 %v11562_v36, %v5120_v17 }
 0xdf3   : > { %v5471_v51 = vadd.f32 %v5470_v32, %v5382_v4  ;;  %v5787_v20 = vpop.permute.xlu2 %5786 }
 0xdf5   : > { %v5559_v24 = vmax.f32 %v5471_v51, 0.0 }
 0xdf7   : > { %5836 = vrot.lane.b32.xlu1 %v5559_v24, %s12493_s15  ;;  %v11689_v45 = vpop.permute.xlu0 %5890  ;;  %v11693_v10 = vpop.permute.xlu1 %5858 }
 0xdf8   : > { %13036 = vst [vmem:[#allocation21_spill] sm:$0xff] %v11689_v45 }
 0xdfa   : > { %v5386_v35 = vpop.f32.mrf.mxu2  ;;  %v5472_v7 = vpop.f32.mrf.mxu3 }
 0xdfb   : > { %v11691_v5 = vpop.permute.xlu2 %5798 }
 0xdff   : > { %v5781_v0 = vpop.permute.xlu0 %5780  ;;  %v11697_v32 = vpop.permute.xlu1 %5862 }
 0xe00   : > { %v5906_v51 = vsel %vm675_vm5, %v5779_v19, %v5781_v0 }
 0xe02   : > { %v5388_v34 = vpop.f32.mrf.mxu2  ;;  %v5475_v53 = vpop.f32.mrf.mxu3 }
 0xe03   : > { %v11695_v4 = vpop.permute.xlu2 %5810 }
 0xe07   : > { %v5785_v29 = vpop.permute.xlu0 %5784  ;;  %v11704_v2 = vpop.permute.xlu1 %5874 }
 0xe08   : > { %13037 = vst [vmem:[#allocation112_spill] sm:$0xff] %v11704_v2  ;;  %v5907_v23 = vsel %vm675_vm5, %v11604_v33, %v5785_v29 }
 0xe0a   : > { %v5391_v39 = vpop.f32.mrf.mxu2  ;;  %v5477_v30 = vpop.f32.mrf.mxu3 }
 0xe0b   : > { %v11702_v3 = vpop.permute.xlu2 %5822 }
 0xe0f   : > { %v5789_v45 = vpop.permute.xlu1 %5788 }
 0xe10   : > { %v5908_v15 = vsel %vm675_vm5, %v5787_v20, %v5789_v45 }
 0xe11   : > { %5970 = vadd.xlane.f32.xlu0 %v5906_v51  ;;  %v5295_v51 = vadd.f32 %v11564_v47, %v5206_v56  ;;  %v5298_v56 = vadd.f32 %v11580_v41, %v5209_v12 }
 0xe12   : > { %v11700_v24 = vpop.f32.mrf.mxu2  ;;  %v5480_v44 = vpop.f32.mrf.mxu3 }
 0xe13   : > { %v11713_v0 = vpop.permute.xlu2 %5834  ;;  %v5384_v46 = vadd.f32 %v5383_v55, %v5295_v51  ;;  %v5387_v31 = vadd.f32 %v5386_v35, %v5298_v56 }
 0xe15   : > { %v5473_v2 = vadd.f32 %v5472_v7, %v5384_v46  ;;  %v5476_v46 = vadd.f32 %v5475_v53, %v5387_v31 }
 0xe17   : > { %v5562_v47 = vmax.f32 %v5473_v2, 0.0  ;;  %v5565_v51 = vmax.f32 %v5476_v46, 0.0  ;;  %v13044_v46 = vld [vmem:[#allocation82_spill] sm:$0xff] }
 0xe18   : > { %5972 = vadd.xlane.f32.xlu2 %v5907_v23  ;;  %v13040_v23 = vld [vmem:[#allocation141_spill] sm:$0xff] }
 0xe19   : > { %v5125_v8 = vadd.f32 %v11293_v27, %v13040_v23 }
 0xe1a   : > { %v5396_v22 = vpop.f32.mrf.mxu2  ;;  %v11711_v19 = vpop.f32.mrf.mxu3 }
 0xe1b   : > { %v11722_v33 = vpop.permute.xlu2 %5846  ;;  %v5214_v11 = vadd.f32 %v11594_v40, %v5125_v8 }
 0xe1d   : > { %v5303_v36 = vadd.f32 %v11612_v6, %v5214_v11 }
 0xe1f   : > { %v5392_v17 = vadd.f32 %v5391_v39, %v5303_v36  ;;  %v13043_v36 = vld [vmem:[#allocation150_spill] sm:$0xff] }
 0xe21   : > { %5974 = vadd.xlane.f32.xlu1 %v5908_v15  ;;  %v5481_v7 = vadd.f32 %v5480_v44, %v5392_v17  ;;  %v5801_v11 = vpop.permute.xlu1 %5800  ;;  %v5127_v17 = vadd.f32 %v13044_v46, %v13043_v36 }
 0xe22   : > { %v5398_v43 = vpop.f32.mrf.mxu2  ;;  %v5485_v29 = vpop.f32.mrf.mxu3 }
 0xe23   : > { %v5399_v55 = vadd.f32 %v5398_v43, %v11660_v60  ;;  %v11729_v45 = vpop.permute.xlu2 %5854  ;;  %v13041_v60 = vld [vmem:[#allocation145_spill] sm:$0xff]  ;;  %v5571_v6 = vmax.f32 %v5481_v7, 0.0 }
 0xe24   : > { %v5122_v40 = vadd.f32 %v11281_v63, %v13041_v60 }
 0xe25   : > { %5840 = vrot.lane.b32.xlu0 %v5562_v47, %s12493_s15 }
 0xe26   : > { %v5211_v35 = vadd.f32 %v11578_v14, %v5122_v40  ;;  %v5314_v40 = vpop.f32.mrf.mxu1 }
 0xe28   : > { %v5300_v53 = vadd.f32 %v11596_v58, %v5211_v35  ;;  %v5797_v58 = vpop.permute.xlu0 %5796  ;;  %v13045_v35 = vld [vmem:[#allocation23_spill] sm:$0xff] }
 0xe29   : > { %v5910_v56 = vsel %vm675_vm5, %v11620_v25, %v5797_v58 }
 0xe2a   : > { %v5401_v27 = vpop.f32.mrf.mxu2  ;;  %v5487_v20 = vpop.f32.mrf.mxu3  ;;  %v5389_v44 = vadd.f32 %v5388_v34, %v5300_v53 }
 0xe2b   : > { %v5402_v41 = vadd.f32 %v5401_v27, %v11674_v62  ;;  %v11732_v2 = vadd.f32 %v5487_v20, %v5399_v55  ;;  %v11740_v15 = vpop.permute.xlu2 %5866  ;;  %v5216_v27 = vadd.f32 %v11610_v28, %v5127_v17 }
 0xe2c   : > { %v5478_v62 = vadd.f32 %v5477_v30, %v5389_v44  ;;  %v13042_v30 = vld [vmem:[#allocation151_spill] sm:$0xff] }
 0xe2d   : > { %5844 = vrot.lane.b32.xlu0 %v5565_v51, %s12493_s15  ;;  %v5130_v47 = vadd.f32 %v11316_v37, %v13042_v30  ;;  %v5305_v20 = vadd.f32 %v11628_v1, %v5216_v27  ;;  %v7413_v51 = vmov 128.0  }
 0xe2e   : > { %v5568_v23 = vmax.f32 %v5478_v62, 0.0  ;;  %7302 = vrcp.f32 %v7413_v51 }
 0xe2f   : > { %v5219_v55 = vadd.f32 %v11626_v49, %v5130_v47  ;;  %v5394_v37 = vadd.f32 %v11700_v24, %v5305_v20 }
 0xe30   : > { %5852 = vrot.lane.b32.xlu2 %v5571_v6, %s12493_s15  ;;  %v13046_v6 = vld [vmem:[#allocation83_spill] sm:$0xff] }
 0xe31   : > { %v5308_v31 = vadd.f32 %v11644_v38, %v5219_v55  ;;  %v5483_v38 = vadd.f32 %v11711_v19, %v5394_v37  ;;  %v5809_v60 = vpop.permute.xlu0 %5808  ;;  %v5137_v28 = vadd.f32 %v13046_v6, %v13045_v35  ;;  %v5317_v55 = vpop.f32.mrf.mxu1  ;;  %v13049_v35 = vld [vmem:[#allocation51_spill] sm:$0xff] }
 0xe32   : > { %v5490_v39 = vpop.f32.mrf.mxu3  ;;  %v5403_v53 = vpop.f32.mrf.mxu2 }
 0xe33   : > { %v11742_v12 = vadd.f32 %v5490_v39, %v5402_v41  ;;  %v11745_v63 = vpop.permute.xlu2 %5878  ;;  %v5397_v7 = vadd.f32 %v5396_v22, %v5308_v31  ;;  %v5225_v22 = vpop.f32.mrf.mxu0 }
 0xe34   : > { %v5226_v1 = vadd.f32 %v5225_v22, %v5137_v28 }
 0xe35   : > { %v5486_v25 = vadd.f32 %v5485_v29, %v5397_v7  ;;  %v5574_v29 = vmax.f32 %v5483_v38, 0.0 }
 0xe36   : > { %v5315_v39 = vadd.f32 %v5314_v40, %v5226_v1 }
 0xe37   : > { %v5577_v49 = vmax.f32 %v5486_v25, 0.0 }
 0xe3a   : > { %5848 = vrot.lane.b32.xlu1 %v5568_v23, %s12493_s15  ;;  %v5492_v24 = vpop.f32.mrf.mxu3  ;;  %v5404_v23 = vadd.f32 %v5403_v53, %v5315_v39  ;;  %v5406_v36 = vpop.f32.mrf.mxu2 }
 0xe3b   : > { %v11747_v8 = vpop.permute.xlu2 %5886  ;;  %v5228_v58 = vpop.f32.mrf.mxu0 }
 0xe3c   : > { %v5493_v47 = vadd.f32 %v5492_v24, %v5404_v23  ;;  %v5913_v23 = vsel %vm675_vm5, %v11636_v42, %v5809_v60  ;;  %v13052_v42 = vld [vmem:[#allocation88_spill] sm:$0xff] }
 0xe3e   : > { %v5586_v7 = vmax.f32 %v5493_v47, 0.0 }
 0xe41   : > { %v5817_v19 = vpop.permute.xlu0 %5816 }
 0xe43   : > { %v11749_v14 = vpop.permute.xlu2 %5894  ;;  %v5230_v47 = vpop.f32.mrf.mxu0 }
 0xe4b   : > { %v5793_v43 = vpop.permute.xlu2 %5792 }
 0xe4c   : > { %v5909_v34 = vsel %vm675_vm5, %v11606_v9, %v5793_v43  ;;  %v5911_v9 = vsel %vm675_vm5, %v11691_v5, %v5801_v11  ;;  %v7303_v5 = vpop.eup %7302 }
 0xe4d   : > { %v5676_v44 = vmul.f32 128.0, %v7303_v5  ;;  %vm5680_vm0 = vweird.f32 %v7303_v5 }
 0xe4f   : > { %v5677_v43 = vsub.f32 1.0, %v5676_v44 }
 0xe51   : > { %v5678_v31 = vmul.f32 %v7303_v5, %v5677_v43  ;;  %v11782_v22 = vpop.permute.xlu1 %5824  ;;  %v13050_v43 = vld [vmem:[#allocation33_spill] sm:$0xff] }
 0xe53   : > { %v5805_v41 = vpop.permute.xlu2 %5804  ;;  %v5679_v20 = vadd.f32 %v7303_v5, %v5678_v31 }
 0xe55   : > { %v11778_v37 = vsel %vm5680_vm0, %v7303_v5, %v5679_v20 }
 0xe56   : > { %v5682_v6 = vmul.f32 %v11778_v37, %v13049_v35  ;;  %v5683_v5 = vmul.f32 %v11778_v37, %v11503_v59  ;;  %v5912_v59 = vsel %vm675_vm5, %v11622_v52, %v5805_v41 }
 0xe57   : > { %5976 = vadd.xlane.f32.xlu0 %v5909_v34  ;;  %v13047_v34 = vld [vmem:[#allocation105_spill] sm:$0xff] }
 0xe59   : > { %5978 = vadd.xlane.f32.xlu2 %v5910_v56  ;;  %v13048_v56 = vld [vmem:[#allocation44_spill] sm:$0xff]  ;;  %v11775_v27 = vpop.permute.xlu0 %5828 }
 0xe5a   : > { %v5140_v30 = vadd.f32 %v13048_v56, %v13047_v34 }
 0xe5b   : > { %v11771_v62 = vpop.permute.xlu2 %5812 }
 0xe5c   : > { %v5229_v11 = vadd.f32 %v5228_v58, %v5140_v30  ;;  %v5684_v58 = vmul.f32 %v11778_v37, %v13050_v43  ;;  %v5915_v30 = vsel %vm675_vm5, %v11652_v48, %v5817_v19  ;;  %v5580_v48 = vmax.f32 %v11732_v2, 0.0 }
 0xe5e   : > { %v5318_v46 = vadd.f32 %v5317_v55, %v5229_v11  ;;  %v13051_v55 = vld [vmem:[#allocation36_spill] sm:$0xff]  ;;  %v5319_v11 = vpop.f32.mrf.mxu1 }
 0xe5f   : > { %v5142_v60 = vadd.f32 %v13052_v42, %v13051_v55 }
 0xe60   : > { %v5407_v25 = vadd.f32 %v5406_v36, %v5318_v46  ;;  %v5408_v36 = vpop.f32.mrf.mxu2 }
 0xe61   : > { %v5231_v31 = vadd.f32 %v5230_v47, %v5142_v60 }
 0xe63   : > { %v5821_v17 = vpop.permute.xlu2 %5820  ;;  %v5320_v46 = vadd.f32 %v5319_v11, %v5231_v31 }
 0xe64   : > { %5980 = vadd.xlane.f32.xlu1 %v5911_v9  ;;  %v5495_v9 = vpop.f32.mrf.mxu3  ;;  %v5916_v52 = vsel %vm675_vm5, %v11638_v18, %v5821_v17 }
 0xe65   : > { %v5496_v51 = vadd.f32 %v5495_v9, %v5407_v25  ;;  %v5409_v9 = vadd.f32 %v5408_v36, %v5320_v46  ;;  %v5233_v25 = vpop.f32.mrf.mxu0 }
 0xe68   : > { %v5411_v41 = vpop.f32.mrf.mxu2 }
 0xe69   : > { %v11793_v1 = vpop.permute.xlu1 %5836 }
 0xe6b   : > { %5860 = vrot.lane.b32.xlu0 %v5577_v49, %s12493_s15  ;;  %v5589_v49 = vmax.f32 %v5496_v51, 0.0  ;;  %v11780_v38 = vpop.permute.xlu2 %5832  ;;  %v5322_v51 = vpop.f32.mrf.mxu1 }
 0xe71   : > { %5856 = vrot.lane.b32.xlu2 %v5574_v29, %s12493_s15 }
 0xe73   : > { %v5324_v35 = vpop.f32.mrf.mxu1 }
 0xe7d   : > { %5872 = vrot.lane.b32.xlu1 %v5586_v7, %s12493_s15  ;;  %v5497_v7 = vpop.f32.mrf.mxu3 }
 0xe7e   : > { %v5498_v20 = vadd.f32 %v5497_v7, %v5409_v9  ;;  %v13057_v9 = vld [vmem:[#allocation45_spill] sm:$0xff] }
 0xe84   : > { %v5971_v40 = vpop.xlane.xlu0 %5970 }
 0xe85   : > { %v6034_v28 = vmul.f32 %v5971_v40, %v11778_v37  ;;  %5876 = vrot.lane.b32.xlu1 %v5589_v49, %s12493_s15  ;;  %v5592_v49 = vmax.f32 %v5498_v20, 0.0  ;;  %v5500_v19 = vpop.f32.mrf.mxu3  ;;  %v5235_v40 = vpop.f32.mrf.mxu0 }
 0xe87   : > { %v11789_v29 = vsel %vm6066_vm2, %v5682_v6, %v6034_v28  ;;  %v5583_v6 = vmax.f32 %v11742_v12, 0.0 }
 0xe8b   : > { %v5973_v53 = vpop.xlane.xlu2 %5972 }
 0xe8c   : > { %v6035_v44 = vmul.f32 %v5973_v53, %v11778_v37  ;;  %v5413_v53 = vpop.f32.mrf.mxu2 }
 0xe8d   : > { %v5502_v17 = vpop.f32.mrf.mxu3 }
 0xe8e   : > { %v11797_v24 = vsel %vm6066_vm2, %v5683_v5, %v6035_v44  ;;  %v13053_v5 = vld [vmem:[#allocation109_spill] sm:$0xff]  ;;  %v13054_v44 = vld [vmem:[#allocation87_spill] sm:$0xff] }
 0xe8f   : > { %v5145_v18 = vadd.f32 %v13054_v44, %v13053_v5  ;;  %v13059_v5 = vld [vmem:[#allocation42_spill] sm:$0xff] }
 0xe90   : > { %v5686_v44 = vmul.f32 %v11778_v37, %v13059_v5  ;;  %v13065_v5 = vld [vmem:[#allocation72_spill] sm:$0xff] }
 0xe93   : > { %v11826_v60 = vpop.permute.xlu2 %5852 }
 0xe94   : > { %v5975_v39 = vpop.xlane.xlu1 %5974  ;;  %v5416_v12 = vpop.f32.mrf.mxu2 }
 0xe95   : > { %v6036_v34 = vmul.f32 %v5975_v39, %v11778_v37  ;;  %5984 = vadd.xlane.f32.xlu0 %v5913_v23  ;;  %v5234_v39 = vadd.f32 %v5233_v25, %v5145_v18  ;;  %v5238_v23 = vpop.f32.mrf.mxu0  ;;  %v5505_v11 = vpop.f32.mrf.mxu3  ;;  %v13058_v25 = vld [vmem:[#allocation91_spill] sm:$0xff] }
 0xe96   : > { %v5152_v20 = vadd.f32 %v13058_v25, %v13057_v9  ;;  %v5914_v25 = vsel %vm675_vm5, %v11695_v4, %v11771_v62 }
 0xe97   : > { %v11805_v56 = vsel %vm6066_vm2, %v5684_v58, %v6036_v34  ;;  %v11819_v28 = vpop.permute.xlu0 %5840  ;;  %v5323_v2 = vadd.f32 %v5322_v51, %v5234_v39  ;;  %v5327_v58 = vpop.f32.mrf.mxu1  ;;  %v13055_v34 = vld [vmem:[#allocation58_spill] sm:$0xff] }
 0xe99   : > { %v5412_v43 = vadd.f32 %v5411_v41, %v5323_v2  ;;  %v5685_v41 = vmul.f32 %v11778_v37, %v11520_v57 }
 0xe9a   : > { %5982 = vadd.xlane.f32.xlu2 %v5912_v59  ;;  %v13056_v59 = vld [vmem:[#allocation92_spill] sm:$0xff] }
 0xe9b   : > { %v5501_v47 = vadd.f32 %v5500_v19, %v5412_v43 }
 0xe9c   : > { %v5418_v18 = vpop.f32.mrf.mxu2 }
 0xe9d   : > { %5988 = vadd.xlane.f32.xlu0 %v5915_v30  ;;  %v5150_v30 = vadd.f32 %v13056_v59, %v13055_v34  ;;  %v5595_v36 = vmax.f32 %v5501_v47, 0.0  ;;  %v5240_v7 = vpop.f32.mrf.mxu0 }
 0xe9e   : > { %v5241_v19 = vadd.f32 %v5240_v7, %v5152_v20  ;;  %v13061_v7 = vld [vmem:[#allocation47_spill] sm:$0xff] }
 0xe9f   : > { %v5845_v55 = vpop.permute.xlu0 %5844  ;;  %v5239_v42 = vadd.f32 %v5238_v23, %v5150_v30 }
 0xea1   : > { %v5328_v31 = vadd.f32 %v5327_v58, %v5239_v42  ;;  %v5507_v58 = vpop.f32.mrf.mxu3  ;;  %v5687_v42 = vmul.f32 %v11778_v37, %v11537_v54 }
 0xea3   : > { %v5417_v46 = vadd.f32 %v5416_v12, %v5328_v31  ;;  %v5917_v31 = vsel %vm675_vm5, %v11702_v3, %v11782_v22  ;;  %v5918_v3 = vsel %vm675_vm5, %v11666_v61, %v11775_v27 }
 0xea5   : > { %v5506_v51 = vadd.f32 %v5505_v11, %v5417_v46  ;;  %v13060_v46 = vld [vmem:[#allocation37_spill] sm:$0xff] }
 0xea6   : > { %v5147_v9 = vadd.f32 %v13061_v7, %v13060_v46 }
 0xea7   : > { %v5601_v43 = vmax.f32 %v5506_v51, 0.0 }
 0xea8   : > { %v5236_v54 = vadd.f32 %v5235_v40, %v5147_v9  ;;  %v5921_v40 = vsel %vm675_vm5, %v11680_v16, %v11819_v28 }
 0xeaa   : > { %v5325_v20 = vadd.f32 %v5324_v35, %v5236_v54  ;;  %v13063_v35 = vld [vmem:[#allocation48_spill] sm:$0xff] }
 0xeac   : > { %v11840_v34 = vpop.permute.xlu1 %5848  ;;  %v5414_v51 = vadd.f32 %v5413_v53, %v5325_v20  ;;  %v5689_v53 = vmul.f32 %v11778_v37, %v13063_v35 }
 0xeaf   : > { %5990 = vadd.xlane.f32.xlu1 %v5916_v52 }
 0xeb1   : > { %5880 = vrot.lane.b32.xlu0 %v5592_v49, %s12493_s15  ;;  %v5329_v49 = vpop.f32.mrf.mxu1 }
 0xeb2   : > { %5864 = vrot.lane.b32.xlu2 %v5580_v48, %s12493_s15  ;;  %v5330_v23 = vadd.f32 %v5329_v49, %v5241_v19  ;;  %v13062_v49 = vld [vmem:[#allocation107_spill] sm:$0xff]  ;;  %v5243_v19 = vpop.f32.mrf.mxu0 }
 0xeb3   : > { %v5609_v4 = vmax.f32 %v13062_v49, 0.0 }
 0xeb4   : > { %v5419_v59 = vadd.f32 %v5418_v18, %v5330_v23  ;;  %v5421_v18 = vpop.f32.mrf.mxu2  ;;  %v5510_v23 = vpop.f32.mrf.mxu3 }
 0xeb6   : > { %v5508_v30 = vadd.f32 %v5507_v58, %v5419_v59 }
 0xeb8   : > { %v5604_v47 = vmax.f32 %v5508_v30, 0.0 }
 0xeb9   : > { %v5332_v16 = vpop.f32.mrf.mxu1 }
 0xeba   : > { %5868 = vrot.lane.b32.xlu2 %v5583_v6, %s12493_s15 }
 0xebc   : > { %v5423_v7 = vpop.f32.mrf.mxu2 }
 0xec8   : > { %5884 = vrot.lane.b32.xlu1 %v5595_v36, %s12493_s15 }
 0xeca   : > { %v5977_v52 = vpop.xlane.xlu0 %5976 }
 0xecb   : > { %v6037_v48 = vmul.f32 %v5977_v52, %v11778_v37  ;;  %v5503_v52 = vadd.f32 %v5502_v17, %v5414_v51  ;;  %v13064_v17 = vld [vmem:[#allocation96_spill] sm:$0xff] }
 0xecc   : > { %v5979_v6 = vpop.xlane.xlu2 %5978 }
 0xecd   : > { %v6038_v39 = vmul.f32 %v5979_v6, %v11778_v37  ;;  %v11838_v2 = vsel %vm6066_vm2, %v5685_v41, %v6037_v48  ;;  %v5598_v22 = vmax.f32 %v5503_v52, 0.0  ;;  %v5919_v41 = vsel %vm675_vm5, %v11654_v26, %v11780_v38 }
 0xece   : > { %v5606_v48 = vmax.f32 %v13064_v17, 0.0  ;;  %v5922_v38 = vsel %vm675_vm5, %v11687_v50, %v5845_v55  ;;  %v5691_v55 = vmul.f32 %v11778_v37, %v11473_v21  ;;  %v5920_v21 = vsel %vm675_vm5, %v11713_v0, %v11793_v1 }
 0xecf   : > { %v11843_v57 = vsel %vm6066_vm2, %v5686_v44, %v6038_v39  ;;  %v5688_v44 = vmul.f32 %v11778_v37, %v13065_v5 }
 0xed0   : > { %5892 = vrot.lane.b32.xlu1 %v5601_v43, %s12493_s15 }
 0xed4   : > { %v5857_v61 = vpop.permute.xlu2 %5856 }
 0xed7   : > { %v5981_v12 = vpop.xlane.xlu1 %5980 }
 0xed8   : > { %v6039_v11 = vmul.f32 %v5981_v12, %v11778_v37  ;;  %5896 = vrot.lane.b32.xlu1 %v5604_v47, %s12493_s15  ;;  %v5245_v47 = vpop.f32.mrf.mxu0  ;;  %v13066_v12 = vld [vmem:[#allocation11_spill] sm:$0xff] }
 0xeda   : > { %v11854_v36 = vsel %vm6066_vm2, %v5687_v42, %v6039_v11  ;;  %v13067_v42 = vld [vmem:[#allocation17_spill] sm:$0xff] }
 0xedb   : > { %5992 = vadd.xlane.f32.xlu0 %v5917_v31  ;;  %v5157_v11 = vadd.f32 %v13067_v42, %v13066_v12  ;;  %v5334_v31 = vpop.f32.mrf.mxu1  ;;  %v13075_v42 = vld [vmem:[#allocation67_spill] sm:$0xff] }
 0xedd   : > { %v11870_v62 = vpop.permute.xlu0 %5860  ;;  %v5246_v46 = vadd.f32 %v5245_v47, %v5157_v11 }
 0xedf   : > { %v5335_v9 = vadd.f32 %v5334_v31, %v5246_v46 }
 0xee1   : > { %v5424_v20 = vadd.f32 %v5423_v7, %v5335_v9 }
 0xee3   : > { %5986 = vadd.xlane.f32.xlu2 %v5914_v25  ;;  %v5512_v25 = vpop.f32.mrf.mxu3 }
 0xee4   : > { %v5513_v51 = vadd.f32 %v5512_v25, %v5424_v20  ;;  %v13076_v25 = vld [vmem:[#allocation13_spill] sm:$0xff] }
 0xee6   : > { %v5610_v52 = vmax.f32 %v5513_v51, 0.0 }
 0xeeb   : > { %5994 = vadd.xlane.f32.xlu2 %v5918_v3 }
 0xeef   : > { %5888 = vrot.lane.b32.xlu0 %v5598_v22, %s12493_s15  ;;  %v5873_v43 = vpop.permute.xlu1 %5872  ;;  %v5692_v22 = vmul.f32 %v11778_v37, %v11475_v13  ;;  %v5925_v13 = vsel %vm675_vm5, %v11729_v45, %v5857_v61  ;;  %v13070_v45 = vld [vmem:[#allocation112_spill] sm:$0xff] }
 0xef3   : > { %5996 = vadd.xlane.f32.xlu2 %v5919_v41 }
 0xef7   : > { %5902 = vrot.lane.b32.xlu0 %v5609_v4, %s12493_s15  ;;  %v5877_v54 = vpop.permute.xlu1 %5876  ;;  %v13068_v4 = vld [vmem:[#allocation121_spill] sm:$0xff] }
 0xef8   : > { %v5930_v61 = vsel %vm675_vm5, %v13070_v45, %v5877_v54  ;;  %v5698_v54 = vmul.f32 %v11778_v37, %v13076_v25 }
 0xf02   : > { %6000 = vadd.xlane.f32.xlu1 %v5921_v40  ;;  %v13069_v40 = vld [vmem:[#allocation102_spill] sm:$0xff] }
 0xf08   : > { %v5985_v27 = vpop.xlane.xlu0 %5984 }
 0xf09   : > { %v6041_v26 = vmul.f32 %v5985_v27, %v11778_v37  ;;  %v5155_v27 = vadd.f32 %v13069_v40, %v13068_v4 }
 0xf0a   : > { %6002 = vadd.xlane.f32.xlu1 %v5922_v38 }
 0xf0b   : > { %5898 = vrot.lane.b32.xlu2 %v5606_v48, %s12493_s15  ;;  %v11883_v6 = vsel %vm6066_vm2, %v5689_v53, %v6041_v26  ;;  %v5244_v35 = vadd.f32 %v5243_v19, %v5155_v27  ;;  %v5923_v48 = vsel %vm675_vm5, %v11722_v33, %v11840_v34  ;;  %v5926_v33 = vsel %vm675_vm5, %v11693_v10, %v11870_v62  ;;  %v13073_v62 = vld [vmem:[#allocation21_spill] sm:$0xff] }
 0xf0c   : > { %v13078_v27 = vld [vmem:[#allocation61_spill] sm:$0xff] }
 0xf0d   : > { %v5983_v28 = vpop.xlane.xlu2 %5982  ;;  %v5333_v53 = vadd.f32 %v5332_v16, %v5244_v35  ;;  %v5695_v35 = vmul.f32 %v11778_v37, %v13078_v27 }
 0xf0e   : > { %v6040_v39 = vmul.f32 %v5983_v28, %v11778_v37 }
 0xf0f   : > { %v5422_v17 = vadd.f32 %v5421_v18, %v5333_v53 }
 0xf10   : > { %v5989_v58 = vpop.xlane.xlu0 %5988  ;;  %v11889_v50 = vsel %vm6066_vm2, %v5688_v44, %v6040_v39  ;;  %v13071_v44 = vld [vmem:[#allocation103_spill] sm:$0xff] }
 0xf11   : > { %v6043_v59 = vmul.f32 %v5989_v58, %v11778_v37  ;;  %v5511_v0 = vadd.f32 %v5510_v23, %v5422_v17  ;;  %v13074_v58 = vld [vmem:[#allocation25_spill] sm:$0xff] }
 0xf13   : > { %v11895_v30 = vsel %vm6066_vm2, %v5691_v55, %v6043_v59  ;;  %v5607_v1 = vmax.f32 %v5511_v0, 0.0  ;;  %v5929_v55 = vsel %vm675_vm5, %v13074_v58, %v5873_v43  ;;  %v13079_v0 = vld [vmem:[#allocation71_spill] sm:$0xff] }
 0xf15   : > { %v5865_v38 = vpop.permute.xlu2 %5864 }
 0xf16   : > { %v5927_v19 = vsel %vm675_vm5, %v11697_v32, %v5865_v38 }
 0xf1d   : > { %v5869_v28 = vpop.permute.xlu2 %5868 }
 0xf1e   : > { %v5928_v5 = vsel %vm675_vm5, %v11740_v15, %v5869_v28  ;;  %v13072_v15 = vld [vmem:[#allocation15_spill] sm:$0xff] }
 0xf1f   : > { %v5924_v39 = vsel %vm675_vm5, %v13072_v15, %v11826_v60  ;;  %v5697_v60 = vmul.f32 %v11778_v37, %v13075_v42  ;;  %v6176_v42 = vld [vmem:[%s12183_s11 + $0x68] sm:$0xff] }
 0xf21   : > { %5998 = vadd.xlane.f32.xlu0 %v5920_v21 }
 0xf22   : > { %v5991_v3 = vpop.xlane.xlu1 %5990 }
 0xf23   : > { %v6044_v41 = vmul.f32 %v5991_v3, %v11778_v37  ;;  %5904 = vrot.lane.b32.xlu1 %v5610_v52, %s12493_s15  ;;  %v5881_v10 = vpop.permute.xlu0 %5880  ;;  %v13077_v3 = vld [vmem:[#allocation10_spill] sm:$0xff] }
 0xf24   : > { %v5931_v59 = vsel %vm675_vm5, %v11745_v63, %v5881_v10 }
 0xf25   : > { %v11907_v49 = vsel %vm6066_vm2, %v5692_v22, %v6044_v41 }
 0xf34   : > { %6004 = vadd.xlane.f32.xlu2 %v5923_v48 }
 0xf35   : > { %5900 = vrot.lane.b32.xlu0 %v5607_v1, %s12493_s15  ;;  %v5694_v1 = vmul.f32 %v11778_v37, %v13079_v0  ;;  %s7348_s15 = sshra.s32 %s6257_s21, 4  ;;  %s7349_s15 = int_to_ptr.hbm [resolvable:$true] %s7348_s15 }
 0xf36   : > { %s7350_s9 = scalar_lea.hbm %s7349_s15, 2  ;;  %p7355_p3 = scmp.lt.s32.totalorder %s7349_s15, %s12185_s13 }
 0xf37   : > { %p7351_p0 = scmp.ne.s32.totalorder %s7349_s15, %s7350_s9  ;;  %p7356_p4 = scmp.lt.s32.totalorder %s7354_s17, %s7350_s9 }
 0xf39   : > { %p7352_p1 = pnand %p7351_p0, %p7523_p5  ;;  %p7357_p7 = por %p7356_p4, %p7355_p3 }
 0xf3a   : > { %v5885_v26 = vpop.permute.xlu1 %5884 }
 0xf3b   : > { %v5932_v18 = vsel %vm675_vm5, %v13071_v44, %v5885_v26  ;;  %v13080_v26 = vld [vmem:[#allocation24_spill] sm:$0xff]  ;;  %v13082_v44 = vld [vmem:[#allocation35_spill] sm:$0xff]  ;;  %p7353_p2 = pneg %p7352_p1 }
 0xf3c   : > { %6008 = vadd.xlane.f32.xlu2 %v5925_v13  ;;  %v5693_v38 = vmul.f32 %v11778_v37, %v13080_v26  ;;  %v13091_v26 = vld [vmem:[#allocation31_spill] sm:$0xff] }
 0xf3d   : > { %p7358_p8 = pnand %p7357_p7, %p7353_p2 }
 0xf42   : > { %v5893_v16 = vpop.permute.xlu1 %5892 }
 0xf43   : > { %v5934_v23 = vsel %vm675_vm5, %v13073_v62, %v5893_v16 }
 0xf44   : > { %6012 = vadd.xlane.f32.xlu2 %v5927_v19 }
 0xf4a   : > { %v5897_v34 = vpop.permute.xlu1 %5896 }
 0xf4b   : > { %v5935_v32 = vsel %vm675_vm5, %v11749_v14, %v5897_v34 }
 0xf4c   : > { %6014 = vadd.xlane.f32.xlu2 %v5928_v5 }
 0xf4d   : > { %6010 = vadd.xlane.f32.xlu1 %v5926_v33  ;;  %v13081_v33 = vld [vmem:[#allocation85_spill] sm:$0xff] }
 0xf4e   : > { %v5993_v14 = vpop.xlane.xlu0 %5992  ;;  %v5690_v34 = vmul.f32 %v11778_v37, %v13081_v33 }
 0xf4f   : > { %v6045_v48 = vmul.f32 %v5993_v14, %v11778_v37  ;;  %v13085_v14 = vld [vmem:[#allocation22_spill] sm:$0xff] }
 0xf51   : > { %v6078_v16 = vsel %vm6066_vm2, %v5693_v38, %v6045_v48  ;;  %v5708_v38 = vmul.f32 %v11778_v37, %v13091_v26 }
 0xf54   : > { %6018 = vadd.xlane.f32.xlu2 %v5930_v61 }
 0xf55   : > { %6028 = vadd.xlane.f32.xlu1 %v5935_v32 }
 0xf56   : > { %v5987_v43 = vpop.xlane.xlu2 %5986 }
 0xf57   : > { %v6042_v28 = vmul.f32 %v5987_v43, %v11778_v37 }
 0xf59   : > { %v6075_v45 = vsel %vm6066_vm2, %v5690_v34, %v6042_v28  ;;  %v6173_v28 = vld [vmem:[%s12183_s11 + $0x50] sm:$0xff]  ;;  %v6171_v34 = vld [vmem:[%s12183_s11 + $0x40] sm:$0xff] }
 0xf5c   : > { %6022 = vadd.xlane.f32.xlu2 %v5932_v18  ;;  %v5699_v18 = vmul.f32 %v11778_v37, %v13082_v44 }
 0xf5e   : > { %v5995_v9 = vpop.xlane.xlu2 %5994 }
 0xf5f   : > { %6006 = vadd.xlane.f32.xlu0 %v5924_v39  ;;  %v6046_v53 = vmul.f32 %v5995_v9, %v11778_v37  ;;  %v13087_v9 = vld [vmem:[#allocation77_spill] sm:$0xff] }
 0xf61   : > { %v5889_v47 = vpop.permute.xlu0 %5888  ;;  %v6079_v19 = vsel %vm6066_vm2, %v5694_v1, %v6046_v53 }
 0xf62   : > { %v5933_v31 = vsel %vm675_vm5, %v11747_v8, %v5889_v47  ;;  %v5696_v8 = vmul.f32 %v11778_v37, %v13077_v3 }
 0xf64   : > { %6026 = vadd.xlane.f32.xlu2 %v5934_v23 }
 0xf66   : > { %v5997_v21 = vpop.xlane.xlu2 %5996 }
 0xf67   : > { %6016 = vadd.xlane.f32.xlu0 %v5929_v55  ;;  %v6047_v22 = vmul.f32 %v5997_v21, %v11778_v37  ;;  %v13088_v21 = vld [vmem:[#allocation14_spill] sm:$0xff] }
 0xf69   : > { %v5903_v20 = vpop.permute.xlu0 %5902  ;;  %v6080_v13 = vsel %vm6066_vm2, %v5695_v35, %v6047_v22  ;;  %v6174_v35 = vld [vmem:[%s12183_s11 + $0x58] sm:$0xff] }
 0xf6e   : > { %v5899_v5 = vpop.permute.xlu2 %5898 }
 0xf6f   : > { %6020 = vadd.xlane.f32.xlu0 %v5931_v59  ;;  %v5702_v59 = vmul.f32 %v11778_v37, %v13085_v14 }
 0xf75   : > { %v6001_v12 = vpop.xlane.xlu1 %6000 }
 0xf76   : > { %v6049_v11 = vmul.f32 %v6001_v12, %v11778_v37 }
 0xf77   : > { %6024 = vadd.xlane.f32.xlu0 %v5933_v31 }
 0xf78   : > { %v6082_v46 = vsel %vm6066_vm2, %v5697_v60, %v6049_v11  ;;  %v13086_v11 = vld [vmem:[#allocation57_spill] sm:$0xff] }
 0xf79   : > { %7197 = vmatpush.lsf.msrb.mxu0 %v6082_v46  ;;  %v5703_v31 = vmul.f32 %v11778_v37, %v13086_v11  ;;  %v13095_v11 = vld [vmem:[#allocation27_spill] sm:$0xff] }
 0xf7d   : > { %v6003_v7 = vpop.xlane.xlu1 %6002 }
 0xf7e   : > { %v6050_v63 = vmul.f32 %v6003_v7, %v11778_v37 }
 0xf80   : > { %v6083_v51 = vsel %vm6066_vm2, %v5698_v54, %v6050_v63  ;;  %v5704_v63 = vmul.f32 %v11778_v37, %v13087_v9  ;;  %v6188_v9 = vld [vmem:[%s12183_s11 + $0xc8] sm:$0xff] }
 0xf8f   : > { %6131 = vxpose.xlu1.b32.start [1/16] (narrow) %v6083_v51, 8 }
 0xf94   : > { %v5999_v52 = vpop.xlane.xlu0 %5998 }
 0xf95   : > { %v6048_v41 = vmul.f32 %v5999_v52, %v11778_v37  ;;  %v5905_v4 = vpop.permute.xlu1 %5904  ;;  %v5705_v52 = vmul.f32 %v11778_v37, %v13088_v21  ;;  %v6185_v21 = vld [vmem:[%s12183_s11 + $0xb0] sm:$0xff] }
 0xf96   : > { %v5937_v40 = vsel %vm675_vm5, %v5903_v20, %v5905_v4  ;;  %v6175_v20 = vld [vmem:[%s12183_s11 + $0x60] sm:$0xff] }
 0xf97   : > { %6032 = vadd.xlane.f32.xlu2 %v5937_v40  ;;  %v6081_v17 = vsel %vm6066_vm2, %v5696_v8, %v6048_v41  ;;  %v13089_v41 = vld [vmem:[#allocation19_spill] sm:$0xff] }
 0xf98   : > { %7198 = vmatpush.lsf.msrb.mxu0 %v6081_v17  ;;  %v5706_v4 = vmul.f32 %v11778_v37, %v13089_v41  ;;  %v13090_v17 = vld [vmem:[#allocation56_spill] sm:$0xff]  ;;  %v6180_v41 = vld [vmem:[%s12183_s11 + $0x88] sm:$0xff] }
 0xf99   : > { %v5707_v0 = vmul.f32 %v11778_v37, %v13090_v17 }
 0xf9a   : > { %7199 = vmatpush.lsf.msrb.mxu0 %v6080_v13 }
 0xf9c   : > { %7200 = vmatpush.lsf.msrb.mxu0 %v6079_v19 }
 0xf9e   : > { %7201 = vmatpush.lsf.msrb.mxu0 %v6078_v16 }
 0xfa0   : > { %7202 = vmatpush.lsf.msrb.mxu0 %v11907_v49 }
 0xfa2   : > { %7203 = vmatpush.lsf.msrb.mxu0 %v11895_v30 }
 0xfa4   : > { %7204 = vmatpush.lsf.msrb.mxu0 %v6075_v45  ;;  %v13092_v45 = vld [vmem:[#allocation65_spill] sm:$0xff] }
 0xfa6   : > { %7205 = vmatpush.lsf.msrb.mxu0 %v11883_v6  ;;  %v6178_v6 = vld [vmem:[%s12183_s11 + $0x78] sm:$0xff] }
 0xfa7   : > { %v5901_v61 = vpop.permute.xlu0 %5900  ;;  %v6005_v32 = vpop.xlane.xlu2 %6004 }
 0xfa8   : > { %v6051_v15 = vmul.f32 %v6005_v32, %v11778_v37  ;;  %7206 = vmatpush.lsf.msrb.mxu0 %v11889_v50  ;;  %v5936_v49 = vsel %vm675_vm5, %v5899_v5, %v5901_v61  ;;  %v13083_v50 = vld [vmem:[#allocation66_spill] sm:$0xff]  ;;  %v5709_v61 = vmul.f32 %v11778_v37, %v13092_v45  ;;  %v6170_v32 = vld [vmem:[%s12183_s11 + $0x38] sm:$0xff] }
 0xfa9   : > { %6030 = vadd.xlane.f32.xlu0 %v5936_v49  ;;  %v5700_v39 = vmul.f32 %v11778_v37, %v13083_v50  ;;  %v6172_v5 = vld [vmem:[%s12183_s11 + $0x48] sm:$0xff]  ;;  %v13093_v50 = vld [vmem:[#allocation12_spill] sm:$0xff] }
 0xfaa   : > { %7207 = vmatpush.lsf.msrb.mxu0 %v11854_v36  ;;  %v6084_v30 = vsel %vm6066_vm2, %v5699_v18, %v6051_v15  ;;  %v6169_v15 = vld [vmem:[%s12183_s11 + $0x30] sm:$0xff]  ;;  %v6168_v49 = vld [vmem:[%s12183_s11 + $0x28] sm:$0xff] }
 0xfab   : > { %6132 = vxpose.xlu1.b32.cont [2/16] (narrow) %v6084_v30, 8  ;;  %v6167_v30 = vld [vmem:[%s12183_s11 + $0x20] sm:$0xff] }
 0xfac   : > { %7208 = vmatpush.lsf.msrb.mxu0 %v11843_v57 }
 0xfae   : > { %7209 = vmatpush.lsf.msrb.mxu0 %v11838_v2 }
 0xfaf   : > { %v6009_v10 = vpop.xlane.xlu2 %6008 }
 0xfb0   : > { %7210 = vmatpush.lsf.msrb.mxu0 %v11805_v56  ;;  %v13084_v56 = vld [vmem:[#allocation52_spill] sm:$0xff] }
 0xfb1   : > { %v5701_v62 = vmul.f32 %v11778_v37, %v13084_v56 }
 0xfb2   : > { %7211 = vmatpush.lsf.msrb.mxu0 %v11797_v24  ;;  %v6053_v24 = vmul.f32 %v6009_v10, %v11778_v37 }
 0xfb4   : > { %7212 = vmatpush.lsf.msrb.mxu0 %v11789_v29  ;;  %v6177_v29 = vld [vmem:[%s12183_s11 + $0x70] sm:$0xff]  ;;  %v6086_v23 = vsel %vm6066_vm2, %v5701_v62, %v6053_v24  ;;  %v6163_v24 = vld [vmem:[%s12183_s11] sm:$0xff]  ;;  %v6194_v62 = vld [vmem:[%s12183_s11 + $0xf8] sm:$0xff] }
 0xfb5   : > { %7213 = vllmr.1.mxu0 }
 0xfb6   : > { %6199 = vmatpush.msra.mxu0 %v6178_v6 }
 0xfb7   : > { %v6013_v47 = vpop.xlane.xlu2 %6012 }
 0xfb8   : > { %6200 = vmatpush.msra.mxu0 %v6177_v29  ;;  %v6055_v60 = vmul.f32 %v6013_v47, %v11778_v37  ;;  %v6164_v29 = vld [vmem:[%s12183_s11 + $0x8] sm:$0xff] }
 0xfb9   : > { %v6192_v47 = vld [vmem:[%s12183_s11 + $0xe8] sm:$0xff] }
 0xfba   : > { %6201 = vmatpush.msra.mxu0 %v6176_v42  ;;  %v6088_v46 = vsel %vm6066_vm2, %v5703_v31, %v6055_v60  ;;  %v6190_v60 = vld [vmem:[%s12183_s11 + $0xd8] sm:$0xff]  ;;  %v5712_v31 = vmul.f32 %v11778_v37, %v13095_v11 }
 0xfbc   : > { %6202 = vmatpush.msra.mxu0 %v6175_v20  ;;  %v13096_v20 = vld [vmem:[#allocation34_spill] sm:$0xff] }
 0xfbe   : > { %6203 = vmatpush.msra.mxu0 %v6174_v35  ;;  %v7301_v35 = vld [vmem:[%s12184_s12] ss:$0 sm:$0xff] }
 0xfbf   : > { %v6015_v43 = vpop.xlane.xlu2 %6014 }
 0xfc0   : > { %v6011_v58 = vpop.xlane.xlu1 %6010  ;;  %v6056_v7 = vmul.f32 %v6015_v43, %v11778_v37  ;;  %6204 = vmatpush.msra.mxu0 %v6173_v28 }
 0xfc1   : > { %v6054_v55 = vmul.f32 %v6011_v58, %v11778_v37 }
 0xfc2   : > { %v6089_v25 = vsel %vm6066_vm2, %v5704_v63, %v6056_v7  ;;  %6205 = vmatpush.msra.mxu0 %v6172_v5  ;;  %v6187_v63 = vld [vmem:[%s12183_s11 + $0xc0] sm:$0xff] }
 0xfc3   : > { %v6087_v12 = vsel %vm6066_vm2, %v5702_v59, %v6054_v55  ;;  %v6193_v55 = vld [vmem:[%s12183_s11 + $0xf0] sm:$0xff] }
 0xfc4   : > { %6206 = vmatpush.msra.mxu0 %v6171_v34 }
 0xfc6   : > { %6207 = vmatpush.msra.mxu0 %v6170_v32 }
 0xfc7   : > { %v6019_v8 = vpop.xlane.xlu2 %6018 }
 0xfc8   : > { %v6058_v22 = vmul.f32 %v6019_v8, %v11778_v37  ;;  %6208 = vmatpush.msra.mxu0 %v6169_v15  ;;  %v6029_v10 = vpop.xlane.xlu1 %6028  ;;  %v6183_v8 = vld [vmem:[%s12183_s11 + $0xa0] sm:$0xff] }
 0xfc9   : > { %v6063_v56 = vmul.f32 %v6029_v10, %v11778_v37 }
 0xfca   : > { %v6091_v40 = vsel %vm6066_vm2, %v5706_v4, %v6058_v22  ;;  %6209 = vmatpush.msra.mxu0 %v6168_v49  ;;  %v6181_v22 = vld [vmem:[%s12183_s11 + $0x90] sm:$0xff]  ;;  %v6179_v4 = vld [vmem:[%s12183_s11 + $0x80] sm:$0xff] }
 0xfcc   : > { %6210 = vmatpush.msra.mxu0 %v6167_v30 }
 0xfcf   : > { %v6023_v48 = vpop.xlane.xlu2 %6022 }
 0xfd0   : > { %v6060_v13 = vmul.f32 %v6023_v48, %v11778_v37 }
 0xfd2   : > { %v6007_v36 = vpop.xlane.xlu0 %6006  ;;  %v6093_v19 = vsel %vm6066_vm2, %v5708_v38, %v6060_v13 }
 0xfd3   : > { %v6052_v57 = vmul.f32 %v6007_v36, %v11778_v37  ;;  %v6166_v36 = vld [vmem:[%s12183_s11 + $0x18] sm:$0xff] }
 0xfd4   : > { %6211 = vmatpush.msra.mxu0 %v6166_v36 }
 0xfd5   : > { %v6085_v2 = vsel %vm6066_vm2, %v5700_v39, %v6052_v57  ;;  %v5710_v39 = vmul.f32 %v11778_v37, %v13093_v50  ;;  %v6165_v57 = vld [vmem:[%s12183_s11 + $0x10] sm:$0xff] }
 0xfd6   : > { %6133 = vxpose.xlu1.b32.cont [3/16] (narrow) %v6085_v2, 8  ;;  %6212 = vmatpush.msra.mxu0 %v6165_v57 }
 0xfd7   : > { %v6027_v18 = vpop.xlane.xlu2 %6026 }
 0xfd8   : > { %v6062_v6 = vmul.f32 %v6027_v18, %v11778_v37  ;;  %6213 = vmatpush.msra.mxu0 %v6164_v29 }
 0xfda   : > { %v6017_v54 = vpop.xlane.xlu0 %6016  ;;  %v6095_v2 = vsel %vm6066_vm2, %v5710_v39, %v6062_v6  ;;  %6214 = vmatpush.msra.mxu0 %v6163_v24 }
 0xfdb   : > { %v6057_v51 = vmul.f32 %v6017_v54, %v11778_v37  ;;  %7214 = vmatmul.lmr.bf16.vlgmr.msra.gmra.1.mxu0  ;;  %v6186_v54 = vld [vmem:[%s12183_s11 + $0xb8] sm:$0xff] }
 0xfdc   : > { %6219 = vmatpush.msra.mxu0 %v6194_v62 }
 0xfdd   : > { %v6090_v3 = vsel %vm6066_vm2, %v5705_v52, %v6057_v51  ;;  %v5713_v51 = vmul.f32 %v11778_v37, %v13096_v20 }
 0xfde   : > { %6134 = vxpose.xlu1.b32.cont [4/16] (narrow) %v6086_v23, 8  ;;  %v13094_v23 = vld [vmem:[#allocation54_spill] sm:$0xff]  ;;  %6220 = vmatpush.msra.mxu0 %v6193_v55 }
 0xfdf   : > { %v5711_v58 = vmul.f32 %v11778_v37, %v13094_v23 }
 0xfe0   : > { %6221 = vmatpush.msra.mxu0 %v6192_v47 }
 0xfe1   : > { %v6096_v14 = vsel %vm6066_vm2, %v5711_v58, %v6063_v56 }
 0xfe2   : > { %v6021_v27 = vpop.xlane.xlu0 %6020 }
 0xfe3   : > { %v6059_v53 = vmul.f32 %v6021_v27, %v11778_v37 }
 0xfe5   : > { %v6092_v1 = vsel %vm6066_vm2, %v5707_v0, %v6059_v53 }
 0xfe6   : > { %6135 = vxpose.xlu1.b32.cont [5/16] (narrow) %v6087_v12, 8  ;;  %v6191_v12 = vld [vmem:[%s12183_s11 + $0xe0] sm:$0xff] }
 0xfe7   : > { %6222 = vmatpush.msra.mxu0 %v6191_v12 }
 0xfe9   : > { %6223 = vmatpush.msra.mxu0 %v6190_v60 }
 0xfea   : > { %v6025_v16 = vpop.xlane.xlu0 %6024 }
 0xfeb   : > { %v6061_v33 = vmul.f32 %v6025_v16, %v11778_v37 }
 0xfed   : > { %v6094_v44 = vsel %vm6066_vm2, %v5709_v61, %v6061_v33 }
 0xfee   : > { %6136 = vxpose.xlu1.b32.cont [6/16] (narrow) %v6088_v46, 8  ;;  %v6189_v46 = vld [vmem:[%s12183_s11 + $0xd0] sm:$0xff] }
 0xfef   : > { %6224 = vmatpush.msra.mxu0 %v6189_v46 }
 0xff1   : > { %6225 = vmatpush.msra.mxu0 %v6188_v9 }
 0xff3   : > { %6226 = vmatpush.msra.mxu0 %v6187_v63 }
 0xff5   : > { %6227 = vmatpush.msra.mxu0 %v6186_v54 }
 0xff6   : > { %6137 = vxpose.xlu1.b32.cont [7/16] (narrow) %v6089_v25, 8 }
 0xff7   : > { %6228 = vmatpush.msra.mxu0 %v6185_v21 }
 0xffe   : > { %6138 = vxpose.xlu1.b32.cont [8/16] (narrow) %v6090_v3, 8  ;;  %v6184_v3 = vld [vmem:[%s12183_s11 + $0xa8] sm:$0xff] }
 0xfff   : > { %6229 = vmatpush.msra.mxu0 %v6184_v3 }
0x1001   : > { %6230 = vmatpush.msra.mxu0 %v6183_v8 }
0x1006   : > { %6139 = vxpose.xlu1.b32.cont [9/16] (narrow) %v6091_v40, 8 }
0x100a   : > { %v6033_v7 = vpop.xlane.xlu2 %6032 }
0x100b   : > { %v6065_v25 = vmul.f32 %v6033_v7, %v11778_v37 }
0x100d   : > { %v6098_v52 = vsel %vm6066_vm2, %v5713_v51, %v6065_v25 }
0x100e   : > { %6140 = vxpose.xlu1.b32.cont [10/16] (narrow) %v6092_v1, 8 }
0x1016   : > { %6141 = vxpose.xlu1.b32.cont [11/16] (narrow) %v6093_v19, 8 }
0x101c   : > { %v6031_v59 = vpop.xlane.xlu0 %6030 }
0x101d   : > { %v6064_v42 = vmul.f32 %v6031_v59, %v11778_v37  ;;  %v6182_v37 = vld [vmem:[%s12183_s11 + $0x98] sm:$0xff] }
0x101e   : > { %6142 = vxpose.xlu1.b32.cont [12/16] (narrow) %v6094_v44, 8  ;;  %6231 = vmatpush.msra.mxu0 %v6182_v37 }
0x101f   : > { %v6097_v43 = vsel %vm6066_vm2, %v5712_v31, %v6064_v42 }
0x1020   : > { %6232 = vmatpush.msra.mxu0 %v6181_v22 }
0x1022   : > { %6233 = vmatpush.msra.mxu0 %v6180_v41 }
0x1024   : > { %6234 = vmatpush.msra.mxu0 %v6179_v4 }
0x1026   : > { %6143 = vxpose.xlu1.b32.cont [13/16] (narrow) %v6095_v2, 8 }
0x102e   : > { %6144 = vxpose.xlu1.b32.cont [14/16] (narrow) %v6096_v14, 8 }
0x1036   : > { %6145 = vxpose.xlu1.b32.cont [15/16] (narrow) %v6097_v43, 8 }
0x103e   : > { %6146 = vxpose.xlu1.b32.end [16/16] (narrow) %v6098_v52, 8 }
0x1058   : > { %v6216_v27 = vpop.f32.mrf.mxu0 }
0x1059   : > { %v6217_v53 = vadd.f32 %v7301_v35, %v6216_v27 }
0x106a   : > { %v6147_v40 = vpop.trf.xlu1 }
0x106b   : > { %6235 = vmatmul.f32.vlgmr.msra.gmra.mxu0 %v6147_v40 }
0x10e8   : > { %v6236_v17 = vpop.f32.mrf.mxu0 }
0x10e9   : > { %v6237_v0 = vadd.f32 %v6236_v17, %v6217_v53 }
0x10eb   : > { %6240 = vst.msk [vmem:[%s449_s24] sm:$0x3] %vm6239_vm4, %v6237_v0 }
0x10ec   : > { %7361 = shalt.err (!%p7358_p8)
}
0x10ed   : > { %7219 = dma.vmem_to_hbm [thread:$0]  (%p7523_p5), %s6255_s20, 32, %s6257_s21, %s6242_s30  }
0x10ee PF: > { %p7231_p9 = scmp.ge.s32.totalorder %s7400_s28, 2  ;;  %s6268_s1 = sand.u32 1, %s7388_s25  }
0x10ef   : > { %s6269_s2 = scalar_lea.sflag [#allocation5], %s6268_s1 }
0x10f0   : > { %p7226_p10 = pnand %p7231_p9, %p7527_p6 }
0x10f2   : > { %p7227_p11 = pneg %p7226_p10 }
0x10f4   : > { %7383 = dma.done.wait (%p7227_p11), %s6269_s2, 32  }
0x10f5   : > { %7385 = vsyncadd (%p7227_p11), %s6269_s2, 4294967264  ;;  %s13097_s23 = sld [smem:[#allocation9_spill]]  ;;  %p24_p12 = scmp.ge.s32.totalorder %s7510_s14, 4  }
0x10f6   : > { %s13098_s25 = smov %s7392_s26  ;;  %s13099_s26 = smov %s7396_s27 }
0x10f7   : > { %s13101_s28 = smov %s7510_s14  ;;  %26 = sbr.rel (!%p24_p12) target bundleno = 11 (0xb), region = 113 }
0x10fb   : > { %s13100_s27 = smov %s13097_s23 }
0x10fc   :  { %6275 = vsyncpa [#allocation4], 1 }
0x10fd   :  { %6277 = vsyncpa [#allocation4 + $0x1], 1 }
0x10fe   :  { %6278 = vsyncpa [#allocation5], 1 }
0x10ff   :  { %6280 = vsyncpa [#allocation5 + $0x1], 1 }

</bundles_post_ra>
